<compile_context>
chip_gen: v7x
topology: tpu7x:2x2x1
jax: 0.10.0
libtpu: 0.0.40
codegen_flags: <defaults>
</compile_context>

<pallas_src>
import functools

import jax
import jax.numpy as jnp
import numpy as np
from jax import lax
from jax.experimental import pallas as pl
from jax.experimental.pallas import tpu as pltpu

BN_EPS = 1e-5


def _round_up(x, m):
    return (x + m - 1) // m * m


def _conv_stats_kernel(x_ref, xh_ref, w_ref, y_ref, stats_ref, *, tn, offsets,
                       halo, vol, hpwp, wpad, n_b, dim_d, dim_h, dim_w):
    """conv0 (3x3x3, 8->4) + masked per-tile BN partial stats for one lane tile."""
    t = pl.program_id(0)

    # Main tile plus the small halo block of the next tile -> (8, tn + HB);
    # cast once to bf16 for the MXU (f32 accumulation in the dot).
    xcat = jnp.concatenate([x_ref[...], xh_ref[...]], axis=1).astype(jnp.bfloat16)
    wts = w_ref[...]                                      # (27, 8, 8) bf16

    # Scratch-free conv: 27 accumulating (8,8)@(8,tn) MXU dots on statically
    # shifted slices of the VMEM-resident tile (no im2col column build).
    acc = None
    for o, delta in enumerate(offsets):
        part = jnp.dot(wts[o], xcat[:, delta:delta + tn],
                       preferred_element_type=jnp.float32)
        acc = part if acc is None else acc + part
    y = acc[0:4, :]                                       # (4, tn) f32 conv output

    # Interior-voxel mask generated in-kernel from the flat lane index
    # (no mask stream from HBM).  f32 div/mod; exact for indices < ~2^23.
    lane = lax.broadcasted_iota(jnp.int32, (1, tn), 1)
    u = (lane + (t * tn + halo)).astype(jnp.float32)      # flat buffer coordinate
    kb = jnp.floor((u + 0.5) / vol)                       # padded-batch index
    v = u - kb * vol
    kd = jnp.floor((v + 0.5) / hpwp)
    r = v - kd * hpwp
    kh = jnp.floor((r + 0.5) / wpad)
    kw = r - kh * wpad
    valid = ((kb >= 1) & (kb <= n_b) & (kd >= 1) & (kd <= dim_d)
             & (kh >= 1) & (kh <= dim_h) & (kw >= 1) & (kw <= dim_w))
    m = jnp.where(valid, 1.0, 0.0)                        # (1, tn) f32

    # Masked per-tile BN partial statistics (sum / sum-of-squares per channel),
    # taken from the f32 accumulator before the bf16 downcast.
    ym = y * m
    stats_ref[...] = jnp.concatenate(
        [jnp.sum(ym, axis=1, keepdims=True),
         jnp.sum(ym * y, axis=1, keepdims=True)], axis=0).reshape(1, 8, 1)

    y_ref[...] = y.astype(y_ref.dtype)                    # bf16 intermediate


def _bn_relu_prob_kernel(coef_ref, y_ref, o_ref):
    """Fused BN affine + ReLU + 1x1x1 prob conv on one (large) lane tile."""
    y = y_ref[...].astype(jnp.float32)                    # (4, tn2)
    a = coef_ref[:, 0:1]                                  # (4, 1) BN scale
    b = coef_ref[:, 1:2]                                  # (4, 1) BN shift
    w_prob = coef_ref[:, 2:3]                             # (4, 1) prob weights
    z = jnp.maximum(y * a + b, 0.0)
    o_ref[...] = jnp.sum(z * w_prob, axis=0, keepdims=True) + coef_ref[0:1, 3:4]


def cost_reg_net_3dmlp(x, params):
    """x: (B, 8, D, H, W) float32 -> (B, 1, D, H, W) float32."""
    B, C, D, H, W = x.shape
    assert C == 8
    Dp, Hp, Wp = D + 2, H + 2, W + 2
    vol = Dp * Hp * Wp                      # one zero-padded volume
    halo = Hp * Wp + Wp + 1                 # flat reach of the first 3x3x3 tap
    N = B * D * H * W                       # number of valid (interior) voxels

    # Lane tiling: the halo block HB covers the 2*halo reach of a 3x3x3 window;
    # the main tile TN is a multiple of HB (so the halo stream is addressable
    # with block indices) of roughly 2K lanes.
    HB = _round_up(2 * halo, 128)
    TN = HB * max(1, -(-2048 // HB))
    # TODO(synk): for very large H*W (HB of order 1e5+ lanes) switch to a
    # per-depth-plane 2-D tiling so the per-step VMEM footprint stays bounded.

    Q = (B + 1) * vol - halo                # highest output lane we must produce
    T = pl.cdiv(Q, TN)
    Mt = T * TN
    # Zero pad-batches in front (flat halo) and behind (tail) keep every DMA
    # in bounds; a single jnp.pad builds the whole flat buffer.
    b_hi = max(1, -(-(Mt + HB - (B + 1) * vol) // vol))
    Lin = (1 + B + b_hi) * vol

    # ---- layout glue (one transpose + one pad): channels -> sublanes,
    # flattened zero-padded (pad-batch, B, Dp, Hp, Wp) -> lanes.
    x_t = jnp.transpose(x.astype(jnp.float32), (1, 0, 2, 3, 4))      # (8,B,D,H,W)
    xbuf = jnp.pad(x_t, ((0, 0), (1, b_hi), (1, 1), (1, 1), (1, 1))
                   ).reshape(8, Lin)                                  # (8, Lin)

    # conv0 weights per tap: (27, 8, 8) bf16, rows 0..3 = real out channels,
    # tap order (kd, kh, kw) matching `offsets` below.
    w_taps = jnp.transpose(params['conv0_w'], (2, 3, 4, 0, 1)).reshape(27, 4, 8)
    w_taps = jnp.pad(w_taps, ((0, 0), (0, 4), (0, 0))).astype(jnp.bfloat16)

    offsets = tuple(kd * Hp * Wp + kh * Wp + kw
                    for kd in range(3) for kh in range(3) for kw in range(3))

    # ---- pass 1: conv0 (bf16 MXU) + masked per-tile BN partial stats --------
    conv_kernel = functools.partial(
        _conv_stats_kernel, tn=TN, offsets=offsets, halo=halo, vol=float(vol),
        hpwp=float(Hp * Wp), wpad=float(Wp), n_b=B, dim_d=D, dim_h=H, dim_w=W)
    y, stats = pl.pallas_call(
        conv_kernel,
        out_shape=(jax.ShapeDtypeStruct((4, Mt), jnp.bfloat16),
                   jax.ShapeDtypeStruct((T, 8, 1), jnp.float32)),
        grid=(T,),
        in_specs=[
            pl.BlockSpec((8, TN), lambda t: (0, t)),                     # main tile
            pl.BlockSpec((8, HB), lambda t: (0, (t + 1) * (TN // HB))),  # halo only
            pl.BlockSpec((27, 8, 8), lambda t: (0, 0, 0)),               # weights
        ],
        out_specs=(
            pl.BlockSpec((4, TN), lambda t: (0, t)),                     # conv out
            pl.BlockSpec((1, 8, 1), lambda t: (t, 0, 0)),                # stats
        ),
        # TODO(synk): if the input DMA shows up exposed on real sizes, sweep
        # pipeline_mode=pl.Buffered(3) on the main input stream.
        compiler_params=pltpu.CompilerParams(
            dimension_semantics=("parallel",),
            vmem_limit_bytes=32 * 1024 * 1024),
    )(xbuf, xbuf, w_taps)

    # ---- tiny cross-tile reduction + coefficient folding (plain JAX) --------
    s_tot = jnp.sum(stats[:, 0:4, 0], axis=0)                    # (4,)
    sq_tot = jnp.sum(stats[:, 4:8, 0], axis=0)                   # (4,)
    mean = s_tot / N
    var = jnp.maximum(sq_tot / N - mean * mean, 0.0)             # clamp >= 0
    inv = lax.rsqrt(var + BN_EPS)
    a = params['bn_gamma'].astype(jnp.float32) * inv
    b = params['bn_beta'].astype(jnp.float32) - mean * a
    w_prob = params['prob_w'].reshape(4).astype(jnp.float32)
    bias4 = jnp.concatenate([params['prob_b'].reshape(1).astype(jnp.float32),
                             jnp.zeros(3, jnp.float32)])
    coef = jnp.stack([a, b, w_prob, bias4], axis=1)              # (4, 4)

    # ---- pass 2: BN affine + ReLU + 1x1x1 prob conv (big lane tiles) --------
    k2 = max(1, min(T, 16384 // TN))
    while T % k2:
        k2 -= 1
    TN2 = k2 * TN
    out_flat = pl.pallas_call(
        _bn_relu_prob_kernel,
        out_shape=jax.ShapeDtypeStruct((1, Mt), jnp.float32),
        grid=(T // k2,),
        in_specs=[pl.BlockSpec((4, 4), lambda t: (0, 0)),        # folded coeffs
                  pl.BlockSpec((4, TN2), lambda t: (0, t))],     # bf16 conv out
        out_specs=pl.BlockSpec((1, TN2), lambda t: (0, t)),
        compiler_params=pltpu.CompilerParams(
            dimension_semantics=("parallel",),
            vmem_limit_bytes=32 * 1024 * 1024),
    )(coef, y)

    # Extract the real voxels (output lane q <-> padded-flat position q + halo)
    # and restore NCDHW.
    start = vol - halo
    out = out_flat[:, start:start + B * vol].reshape(1, B, Dp, Hp, Wp)
    out = out[:, :, 1:D + 1, 1:H + 1, 1:W + 1]
    return jnp.transpose(out, (1, 0, 2, 3, 4))


def init_params(key):
    k1, k2, k3, k4, k5 = jax.random.split(key, 5)
    return {
        'conv0_w': 0.1 * jax.random.normal(k1, (4, 8, 3, 3, 3), jnp.float32),
        'bn_gamma': 1.0 + 0.1 * jax.random.normal(k2, (4,), jnp.float32),
        'bn_beta': 0.1 * jax.random.normal(k3, (4,), jnp.float32),
        'prob_w': 0.1 * jax.random.normal(k4, (1, 4, 1, 1, 1), jnp.float32),
        'prob_b': 0.1 * jax.random.normal(k5, (1,), jnp.float32),
    }


def reference(x, params):
    """Pure-JAX (XLA, f32) reference of the PyTorch forward."""
    y = lax.conv_general_dilated(
        x, params['conv0_w'], window_strides=(1, 1, 1),
        padding=[(1, 1), (1, 1), (1, 1)],
        dimension_numbers=('NCDHW', 'OIDHW', 'NCDHW'))
    mean = jnp.mean(y, axis=(0, 2, 3, 4), keepdims=True)
    var = jnp.mean((y - mean) ** 2, axis=(0, 2, 3, 4), keepdims=True)
    g = params['bn_gamma'].reshape(1, 4, 1, 1, 1)
    b = params['bn_beta'].reshape(1, 4, 1, 1, 1)
    z = jnp.maximum((y - mean) / jnp.sqrt(var + BN_EPS) * g + b, 0.0)
    out = jnp.einsum('bcdhw,oc->bodhw', z, params['prob_w'].reshape(1, 4))
    return out + params['prob_b'].reshape(1, 1, 1, 1, 1)


if __name__ == "__main__":
    key = jax.random.PRNGKey(0)
    pkey, xkey = jax.random.split(key)
    params = init_params(pkey)
    # (B, C=8, D, H, W)
    x = jax.random.normal(xkey, (2, 8, 8, 16, 16), jnp.float32)

    out = jax.jit(cost_reg_net_3dmlp)(x, params)
    out = jax.block_until_ready(out)

    assert out.shape == (2, 1, 8, 16, 16)
    ref = reference(x, params)
    # Kernel computes the conv with bf16 MXU operands and carries a bf16
    # intermediate (per perf review); reference is pure f32, hence 5e-3.
    np.testing.assert_allclose(np.asarray(out), np.asarray(ref),
                               rtol=5e-3, atol=5e-3)
    print("KERNEL_OK")
</pallas_src>

<mosaic_0001>
module attributes {stable_mosaic.version = 11 : i64} {
  func.func @_conv_stats_kernel(%arg0: i32, %arg1: memref<8x2304xf32, #tpu.memory_space<vmem>>, %arg2: memref<8x768xf32, #tpu.memory_space<vmem>>, %arg3: memref<27x8x8xbf16, #tpu.memory_space<vmem>>, %arg4: memref<4x2304xbf16, #tpu.memory_space<vmem>>, %arg5: memref<1x8x1xf32, #tpu.memory_space<vmem>>) attributes {dimension_semantics = [#tpu.dimension_semantics<parallel>], iteration_bounds = array<i64: 5>, scalar_prefetch = 0 : i64, scratch_operands = 0 : i64, tpu.core_type = #tpu.core_type<tc>, window_params = [{transform_indices = @transform_0, window_bounds = array<i64: 8, 2304>}, {transform_indices = @transform_1, window_bounds = array<i64: 8, 768>}, {pipeline_mode = #tpu.pipeline_mode<synchronous>, transform_indices = @transform_2, window_bounds = array<i64: 27, 8, 8>}, {transform_indices = @transform_3, window_bounds = array<i64: 4, 2304>}, {transform_indices = @transform_4, window_bounds = array<i64: 1, 8, 1>}]} {
    %c0 = arith.constant 0 : index
    %c0_0 = arith.constant 0 : index
    %0 = vector.load %arg1[%c0, %c0_0] : memref<8x2304xf32, #tpu.memory_space<vmem>>, vector<8x2304xf32>
    %c0_1 = arith.constant 0 : index
    %c0_2 = arith.constant 0 : index
    %1 = vector.load %arg2[%c0_1, %c0_2] : memref<8x768xf32, #tpu.memory_space<vmem>>, vector<8x768xf32>
    %2 = tpu.concatenate %0, %1 in 1 : vector<8x2304xf32>, vector<8x768xf32> -> vector<8x3072xf32>
    %3 = arith.truncf %2 : vector<8x3072xf32> to vector<8x3072xbf16>
    %c0_3 = arith.constant 0 : index
    %c0_4 = arith.constant 0 : index
    %c0_5 = arith.constant 0 : index
    %4 = vector.load %arg3[%c0_3, %c0_4, %c0_5] : memref<27x8x8xbf16, #tpu.memory_space<vmem>>, vector<27x8x8xbf16>
    %5 = vector.extract_strided_slice %4 {offsets = [0, 0, 0], sizes = [1, 8, 8], strides = [1, 1, 1]} : vector<27x8x8xbf16> to vector<1x8x8xbf16>
    %6 = vector.shape_cast %5 : vector<1x8x8xbf16> to vector<8x8xbf16>
    %7 = vector.extract_strided_slice %3 {offsets = [0, 0], sizes = [8, 2304], strides = [1, 1]} : vector<8x3072xbf16> to vector<8x2304xbf16>
    %cst = arith.constant dense<0.000000e+00> : vector<8x2304xf32>
    %8 = tpu.matmul %6, %7, %cst {dimension_numbers = #tpu.dot_dimension_numbers<[1], [0], [0], [1], [0, 0, 1, 1], [], []>} : vector<8x8xbf16>, vector<8x2304xbf16>, vector<8x2304xf32> -> vector<8x2304xf32>
    %9 = vector.extract_strided_slice %4 {offsets = [1, 0, 0], sizes = [1, 8, 8], strides = [1, 1, 1]} : vector<27x8x8xbf16> to vector<1x8x8xbf16>
    %10 = vector.shape_cast %9 : vector<1x8x8xbf16> to vector<8x8xbf16>
    %11 = vector.extract_strided_slice %3 {offsets = [0, 1], sizes = [8, 2304], strides = [1, 1]} : vector<8x3072xbf16> to vector<8x2304xbf16>
    %cst_6 = arith.constant dense<0.000000e+00> : vector<8x2304xf32>
    %12 = tpu.matmul %10, %11, %cst_6 {dimension_numbers = #tpu.dot_dimension_numbers<[1], [0], [0], [1], [0, 0, 1, 1], [], []>} : vector<8x8xbf16>, vector<8x2304xbf16>, vector<8x2304xf32> -> vector<8x2304xf32>
    %13 = arith.addf %8, %12 : vector<8x2304xf32>
    %14 = vector.extract_strided_slice %4 {offsets = [2, 0, 0], sizes = [1, 8, 8], strides = [1, 1, 1]} : vector<27x8x8xbf16> to vector<1x8x8xbf16>
    %15 = vector.shape_cast %14 : vector<1x8x8xbf16> to vector<8x8xbf16>
    %16 = vector.extract_strided_slice %3 {offsets = [0, 2], sizes = [8, 2304], strides = [1, 1]} : vector<8x3072xbf16> to vector<8x2304xbf16>
    %cst_7 = arith.constant dense<0.000000e+00> : vector<8x2304xf32>
    %17 = tpu.matmul %15, %16, %cst_7 {dimension_numbers = #tpu.dot_dimension_numbers<[1], [0], [0], [1], [0, 0, 1, 1], [], []>} : vector<8x8xbf16>, vector<8x2304xbf16>, vector<8x2304xf32> -> vector<8x2304xf32>
    %18 = arith.addf %13, %17 : vector<8x2304xf32>
    %19 = vector.extract_strided_slice %4 {offsets = [3, 0, 0], sizes = [1, 8, 8], strides = [1, 1, 1]} : vector<27x8x8xbf16> to vector<1x8x8xbf16>
    %20 = vector.shape_cast %19 : vector<1x8x8xbf16> to vector<8x8xbf16>
    %21 = vector.extract_strided_slice %3 {offsets = [0, 18], sizes = [8, 2304], strides = [1, 1]} : vector<8x3072xbf16> to vector<8x2304xbf16>
    %cst_8 = arith.constant dense<0.000000e+00> : vector<8x2304xf32>
    %22 = tpu.matmul %20, %21, %cst_8 {dimension_numbers = #tpu.dot_dimension_numbers<[1], [0], [0], [1], [0, 0, 1, 1], [], []>} : vector<8x8xbf16>, vector<8x2304xbf16>, vector<8x2304xf32> -> vector<8x2304xf32>
    %23 = arith.addf %18, %22 : vector<8x2304xf32>
    %24 = vector.extract_strided_slice %4 {offsets = [4, 0, 0], sizes = [1, 8, 8], strides = [1, 1, 1]} : vector<27x8x8xbf16> to vector<1x8x8xbf16>
    %25 = vector.shape_cast %24 : vector<1x8x8xbf16> to vector<8x8xbf16>
    %26 = vector.extract_strided_slice %3 {offsets = [0, 19], sizes = [8, 2304], strides = [1, 1]} : vector<8x3072xbf16> to vector<8x2304xbf16>
    %cst_9 = arith.constant dense<0.000000e+00> : vector<8x2304xf32>
    %27 = tpu.matmul %25, %26, %cst_9 {dimension_numbers = #tpu.dot_dimension_numbers<[1], [0], [0], [1], [0, 0, 1, 1], [], []>} : vector<8x8xbf16>, vector<8x2304xbf16>, vector<8x2304xf32> -> vector<8x2304xf32>
    %28 = arith.addf %23, %27 : vector<8x2304xf32>
    %29 = vector.extract_strided_slice %4 {offsets = [5, 0, 0], sizes = [1, 8, 8], strides = [1, 1, 1]} : vector<27x8x8xbf16> to vector<1x8x8xbf16>
    %30 = vector.shape_cast %29 : vector<1x8x8xbf16> to vector<8x8xbf16>
    %31 = vector.extract_strided_slice %3 {offsets = [0, 20], sizes = [8, 2304], strides = [1, 1]} : vector<8x3072xbf16> to vector<8x2304xbf16>
    %cst_10 = arith.constant dense<0.000000e+00> : vector<8x2304xf32>
    %32 = tpu.matmul %30, %31, %cst_10 {dimension_numbers = #tpu.dot_dimension_numbers<[1], [0], [0], [1], [0, 0, 1, 1], [], []>} : vector<8x8xbf16>, vector<8x2304xbf16>, vector<8x2304xf32> -> vector<8x2304xf32>
    %33 = arith.addf %28, %32 : vector<8x2304xf32>
    %34 = vector.extract_strided_slice %4 {offsets = [6, 0, 0], sizes = [1, 8, 8], strides = [1, 1, 1]} : vector<27x8x8xbf16> to vector<1x8x8xbf16>
    %35 = vector.shape_cast %34 : vector<1x8x8xbf16> to vector<8x8xbf16>
    %36 = vector.extract_strided_slice %3 {offsets = [0, 36], sizes = [8, 2304], strides = [1, 1]} : vector<8x3072xbf16> to vector<8x2304xbf16>
    %cst_11 = arith.constant dense<0.000000e+00> : vector<8x2304xf32>
    %37 = tpu.matmul %35, %36, %cst_11 {dimension_numbers = #tpu.dot_dimension_numbers<[1], [0], [0], [1], [0, 0, 1, 1], [], []>} : vector<8x8xbf16>, vector<8x2304xbf16>, vector<8x2304xf32> -> vector<8x2304xf32>
    %38 = arith.addf %33, %37 : vector<8x2304xf32>
    %39 = vector.extract_strided_slice %4 {offsets = [7, 0, 0], sizes = [1, 8, 8], strides = [1, 1, 1]} : vector<27x8x8xbf16> to vector<1x8x8xbf16>
    %40 = vector.shape_cast %39 : vector<1x8x8xbf16> to vector<8x8xbf16>
    %41 = vector.extract_strided_slice %3 {offsets = [0, 37], sizes = [8, 2304], strides = [1, 1]} : vector<8x3072xbf16> to vector<8x2304xbf16>
    %cst_12 = arith.constant dense<0.000000e+00> : vector<8x2304xf32>
    %42 = tpu.matmul %40, %41, %cst_12 {dimension_numbers = #tpu.dot_dimension_numbers<[1], [0], [0], [1], [0, 0, 1, 1], [], []>} : vector<8x8xbf16>, vector<8x2304xbf16>, vector<8x2304xf32> -> vector<8x2304xf32>
    %43 = arith.addf %38, %42 : vector<8x2304xf32>
    %44 = vector.extract_strided_slice %4 {offsets = [8, 0, 0], sizes = [1, 8, 8], strides = [1, 1, 1]} : vector<27x8x8xbf16> to vector<1x8x8xbf16>
    %45 = vector.shape_cast %44 : vector<1x8x8xbf16> to vector<8x8xbf16>
    %46 = vector.extract_strided_slice %3 {offsets = [0, 38], sizes = [8, 2304], strides = [1, 1]} : vector<8x3072xbf16> to vector<8x2304xbf16>
    %cst_13 = arith.constant dense<0.000000e+00> : vector<8x2304xf32>
    %47 = tpu.matmul %45, %46, %cst_13 {dimension_numbers = #tpu.dot_dimension_numbers<[1], [0], [0], [1], [0, 0, 1, 1], [], []>} : vector<8x8xbf16>, vector<8x2304xbf16>, vector<8x2304xf32> -> vector<8x2304xf32>
    %48 = arith.addf %43, %47 : vector<8x2304xf32>
    %49 = vector.extract_strided_slice %4 {offsets = [9, 0, 0], sizes = [1, 8, 8], strides = [1, 1, 1]} : vector<27x8x8xbf16> to vector<1x8x8xbf16>
    %50 = vector.shape_cast %49 : vector<1x8x8xbf16> to vector<8x8xbf16>
    %51 = vector.extract_strided_slice %3 {offsets = [0, 324], sizes = [8, 2304], strides = [1, 1]} : vector<8x3072xbf16> to vector<8x2304xbf16>
    %cst_14 = arith.constant dense<0.000000e+00> : vector<8x2304xf32>
    %52 = tpu.matmul %50, %51, %cst_14 {dimension_numbers = #tpu.dot_dimension_numbers<[1], [0], [0], [1], [0, 0, 1, 1], [], []>} : vector<8x8xbf16>, vector<8x2304xbf16>, vector<8x2304xf32> -> vector<8x2304xf32>
    %53 = arith.addf %48, %52 : vector<8x2304xf32>
    %54 = vector.extract_strided_slice %4 {offsets = [10, 0, 0], sizes = [1, 8, 8], strides = [1, 1, 1]} : vector<27x8x8xbf16> to vector<1x8x8xbf16>
    %55 = vector.shape_cast %54 : vector<1x8x8xbf16> to vector<8x8xbf16>
    %56 = vector.extract_strided_slice %3 {offsets = [0, 325], sizes = [8, 2304], strides = [1, 1]} : vector<8x3072xbf16> to vector<8x2304xbf16>
    %cst_15 = arith.constant dense<0.000000e+00> : vector<8x2304xf32>
    %57 = tpu.matmul %55, %56, %cst_15 {dimension_numbers = #tpu.dot_dimension_numbers<[1], [0], [0], [1], [0, 0, 1, 1], [], []>} : vector<8x8xbf16>, vector<8x2304xbf16>, vector<8x2304xf32> -> vector<8x2304xf32>
    %58 = arith.addf %53, %57 : vector<8x2304xf32>
    %59 = vector.extract_strided_slice %4 {offsets = [11, 0, 0], sizes = [1, 8, 8], strides = [1, 1, 1]} : vector<27x8x8xbf16> to vector<1x8x8xbf16>
    %60 = vector.shape_cast %59 : vector<1x8x8xbf16> to vector<8x8xbf16>
    %61 = vector.extract_strided_slice %3 {offsets = [0, 326], sizes = [8, 2304], strides = [1, 1]} : vector<8x3072xbf16> to vector<8x2304xbf16>
    %cst_16 = arith.constant dense<0.000000e+00> : vector<8x2304xf32>
    %62 = tpu.matmul %60, %61, %cst_16 {dimension_numbers = #tpu.dot_dimension_numbers<[1], [0], [0], [1], [0, 0, 1, 1], [], []>} : vector<8x8xbf16>, vector<8x2304xbf16>, vector<8x2304xf32> -> vector<8x2304xf32>
    %63 = arith.addf %58, %62 : vector<8x2304xf32>
    %64 = vector.extract_strided_slice %4 {offsets = [12, 0, 0], sizes = [1, 8, 8], strides = [1, 1, 1]} : vector<27x8x8xbf16> to vector<1x8x8xbf16>
    %65 = vector.shape_cast %64 : vector<1x8x8xbf16> to vector<8x8xbf16>
    %66 = vector.extract_strided_slice %3 {offsets = [0, 342], sizes = [8, 2304], strides = [1, 1]} : vector<8x3072xbf16> to vector<8x2304xbf16>
    %cst_17 = arith.constant dense<0.000000e+00> : vector<8x2304xf32>
    %67 = tpu.matmul %65, %66, %cst_17 {dimension_numbers = #tpu.dot_dimension_numbers<[1], [0], [0], [1], [0, 0, 1, 1], [], []>} : vector<8x8xbf16>, vector<8x2304xbf16>, vector<8x2304xf32> -> vector<8x2304xf32>
    %68 = arith.addf %63, %67 : vector<8x2304xf32>
    %69 = vector.extract_strided_slice %4 {offsets = [13, 0, 0], sizes = [1, 8, 8], strides = [1, 1, 1]} : vector<27x8x8xbf16> to vector<1x8x8xbf16>
    %70 = vector.shape_cast %69 : vector<1x8x8xbf16> to vector<8x8xbf16>
    %71 = vector.extract_strided_slice %3 {offsets = [0, 343], sizes = [8, 2304], strides = [1, 1]} : vector<8x3072xbf16> to vector<8x2304xbf16>
    %cst_18 = arith.constant dense<0.000000e+00> : vector<8x2304xf32>
    %72 = tpu.matmul %70, %71, %cst_18 {dimension_numbers = #tpu.dot_dimension_numbers<[1], [0], [0], [1], [0, 0, 1, 1], [], []>} : vector<8x8xbf16>, vector<8x2304xbf16>, vector<8x2304xf32> -> vector<8x2304xf32>
    %73 = arith.addf %68, %72 : vector<8x2304xf32>
    %74 = vector.extract_strided_slice %4 {offsets = [14, 0, 0], sizes = [1, 8, 8], strides = [1, 1, 1]} : vector<27x8x8xbf16> to vector<1x8x8xbf16>
    %75 = vector.shape_cast %74 : vector<1x8x8xbf16> to vector<8x8xbf16>
    %76 = vector.extract_strided_slice %3 {offsets = [0, 344], sizes = [8, 2304], strides = [1, 1]} : vector<8x3072xbf16> to vector<8x2304xbf16>
    %cst_19 = arith.constant dense<0.000000e+00> : vector<8x2304xf32>
    %77 = tpu.matmul %75, %76, %cst_19 {dimension_numbers = #tpu.dot_dimension_numbers<[1], [0], [0], [1], [0, 0, 1, 1], [], []>} : vector<8x8xbf16>, vector<8x2304xbf16>, vector<8x2304xf32> -> vector<8x2304xf32>
    %78 = arith.addf %73, %77 : vector<8x2304xf32>
    %79 = vector.extract_strided_slice %4 {offsets = [15, 0, 0], sizes = [1, 8, 8], strides = [1, 1, 1]} : vector<27x8x8xbf16> to vector<1x8x8xbf16>
    %80 = vector.shape_cast %79 : vector<1x8x8xbf16> to vector<8x8xbf16>
    %81 = vector.extract_strided_slice %3 {offsets = [0, 360], sizes = [8, 2304], strides = [1, 1]} : vector<8x3072xbf16> to vector<8x2304xbf16>
    %cst_20 = arith.constant dense<0.000000e+00> : vector<8x2304xf32>
    %82 = tpu.matmul %80, %81, %cst_20 {dimension_numbers = #tpu.dot_dimension_numbers<[1], [0], [0], [1], [0, 0, 1, 1], [], []>} : vector<8x8xbf16>, vector<8x2304xbf16>, vector<8x2304xf32> -> vector<8x2304xf32>
    %83 = arith.addf %78, %82 : vector<8x2304xf32>
    %84 = vector.extract_strided_slice %4 {offsets = [16, 0, 0], sizes = [1, 8, 8], strides = [1, 1, 1]} : vector<27x8x8xbf16> to vector<1x8x8xbf16>
    %85 = vector.shape_cast %84 : vector<1x8x8xbf16> to vector<8x8xbf16>
    %86 = vector.extract_strided_slice %3 {offsets = [0, 361], sizes = [8, 2304], strides = [1, 1]} : vector<8x3072xbf16> to vector<8x2304xbf16>
    %cst_21 = arith.constant dense<0.000000e+00> : vector<8x2304xf32>
    %87 = tpu.matmul %85, %86, %cst_21 {dimension_numbers = #tpu.dot_dimension_numbers<[1], [0], [0], [1], [0, 0, 1, 1], [], []>} : vector<8x8xbf16>, vector<8x2304xbf16>, vector<8x2304xf32> -> vector<8x2304xf32>
    %88 = arith.addf %83, %87 : vector<8x2304xf32>
    %89 = vector.extract_strided_slice %4 {offsets = [17, 0, 0], sizes = [1, 8, 8], strides = [1, 1, 1]} : vector<27x8x8xbf16> to vector<1x8x8xbf16>
    %90 = vector.shape_cast %89 : vector<1x8x8xbf16> to vector<8x8xbf16>
    %91 = vector.extract_strided_slice %3 {offsets = [0, 362], sizes = [8, 2304], strides = [1, 1]} : vector<8x3072xbf16> to vector<8x2304xbf16>
    %cst_22 = arith.constant dense<0.000000e+00> : vector<8x2304xf32>
    %92 = tpu.matmul %90, %91, %cst_22 {dimension_numbers = #tpu.dot_dimension_numbers<[1], [0], [0], [1], [0, 0, 1, 1], [], []>} : vector<8x8xbf16>, vector<8x2304xbf16>, vector<8x2304xf32> -> vector<8x2304xf32>
    %93 = arith.addf %88, %92 : vector<8x2304xf32>
    %94 = vector.extract_strided_slice %4 {offsets = [18, 0, 0], sizes = [1, 8, 8], strides = [1, 1, 1]} : vector<27x8x8xbf16> to vector<1x8x8xbf16>
    %95 = vector.shape_cast %94 : vector<1x8x8xbf16> to vector<8x8xbf16>
    %96 = vector.extract_strided_slice %3 {offsets = [0, 648], sizes = [8, 2304], strides = [1, 1]} : vector<8x3072xbf16> to vector<8x2304xbf16>
    %cst_23 = arith.constant dense<0.000000e+00> : vector<8x2304xf32>
    %97 = tpu.matmul %95, %96, %cst_23 {dimension_numbers = #tpu.dot_dimension_numbers<[1], [0], [0], [1], [0, 0, 1, 1], [], []>} : vector<8x8xbf16>, vector<8x2304xbf16>, vector<8x2304xf32> -> vector<8x2304xf32>
    %98 = arith.addf %93, %97 : vector<8x2304xf32>
    %99 = vector.extract_strided_slice %4 {offsets = [19, 0, 0], sizes = [1, 8, 8], strides = [1, 1, 1]} : vector<27x8x8xbf16> to vector<1x8x8xbf16>
    %100 = vector.shape_cast %99 : vector<1x8x8xbf16> to vector<8x8xbf16>
    %101 = vector.extract_strided_slice %3 {offsets = [0, 649], sizes = [8, 2304], strides = [1, 1]} : vector<8x3072xbf16> to vector<8x2304xbf16>
    %cst_24 = arith.constant dense<0.000000e+00> : vector<8x2304xf32>
    %102 = tpu.matmul %100, %101, %cst_24 {dimension_numbers = #tpu.dot_dimension_numbers<[1], [0], [0], [1], [0, 0, 1, 1], [], []>} : vector<8x8xbf16>, vector<8x2304xbf16>, vector<8x2304xf32> -> vector<8x2304xf32>
    %103 = arith.addf %98, %102 : vector<8x2304xf32>
    %104 = vector.extract_strided_slice %4 {offsets = [20, 0, 0], sizes = [1, 8, 8], strides = [1, 1, 1]} : vector<27x8x8xbf16> to vector<1x8x8xbf16>
    %105 = vector.shape_cast %104 : vector<1x8x8xbf16> to vector<8x8xbf16>
    %106 = vector.extract_strided_slice %3 {offsets = [0, 650], sizes = [8, 2304], strides = [1, 1]} : vector<8x3072xbf16> to vector<8x2304xbf16>
    %cst_25 = arith.constant dense<0.000000e+00> : vector<8x2304xf32>
    %107 = tpu.matmul %105, %106, %cst_25 {dimension_numbers = #tpu.dot_dimension_numbers<[1], [0], [0], [1], [0, 0, 1, 1], [], []>} : vector<8x8xbf16>, vector<8x2304xbf16>, vector<8x2304xf32> -> vector<8x2304xf32>
    %108 = arith.addf %103, %107 : vector<8x2304xf32>
    %109 = vector.extract_strided_slice %4 {offsets = [21, 0, 0], sizes = [1, 8, 8], strides = [1, 1, 1]} : vector<27x8x8xbf16> to vector<1x8x8xbf16>
    %110 = vector.shape_cast %109 : vector<1x8x8xbf16> to vector<8x8xbf16>
    %111 = vector.extract_strided_slice %3 {offsets = [0, 666], sizes = [8, 2304], strides = [1, 1]} : vector<8x3072xbf16> to vector<8x2304xbf16>
    %cst_26 = arith.constant dense<0.000000e+00> : vector<8x2304xf32>
    %112 = tpu.matmul %110, %111, %cst_26 {dimension_numbers = #tpu.dot_dimension_numbers<[1], [0], [0], [1], [0, 0, 1, 1], [], []>} : vector<8x8xbf16>, vector<8x2304xbf16>, vector<8x2304xf32> -> vector<8x2304xf32>
    %113 = arith.addf %108, %112 : vector<8x2304xf32>
    %114 = vector.extract_strided_slice %4 {offsets = [22, 0, 0], sizes = [1, 8, 8], strides = [1, 1, 1]} : vector<27x8x8xbf16> to vector<1x8x8xbf16>
    %115 = vector.shape_cast %114 : vector<1x8x8xbf16> to vector<8x8xbf16>
    %116 = vector.extract_strided_slice %3 {offsets = [0, 667], sizes = [8, 2304], strides = [1, 1]} : vector<8x3072xbf16> to vector<8x2304xbf16>
    %cst_27 = arith.constant dense<0.000000e+00> : vector<8x2304xf32>
    %117 = tpu.matmul %115, %116, %cst_27 {dimension_numbers = #tpu.dot_dimension_numbers<[1], [0], [0], [1], [0, 0, 1, 1], [], []>} : vector<8x8xbf16>, vector<8x2304xbf16>, vector<8x2304xf32> -> vector<8x2304xf32>
    %118 = arith.addf %113, %117 : vector<8x2304xf32>
    %119 = vector.extract_strided_slice %4 {offsets = [23, 0, 0], sizes = [1, 8, 8], strides = [1, 1, 1]} : vector<27x8x8xbf16> to vector<1x8x8xbf16>
    %120 = vector.shape_cast %119 : vector<1x8x8xbf16> to vector<8x8xbf16>
    %121 = vector.extract_strided_slice %3 {offsets = [0, 668], sizes = [8, 2304], strides = [1, 1]} : vector<8x3072xbf16> to vector<8x2304xbf16>
    %cst_28 = arith.constant dense<0.000000e+00> : vector<8x2304xf32>
    %122 = tpu.matmul %120, %121, %cst_28 {dimension_numbers = #tpu.dot_dimension_numbers<[1], [0], [0], [1], [0, 0, 1, 1], [], []>} : vector<8x8xbf16>, vector<8x2304xbf16>, vector<8x2304xf32> -> vector<8x2304xf32>
    %123 = arith.addf %118, %122 : vector<8x2304xf32>
    %124 = vector.extract_strided_slice %4 {offsets = [24, 0, 0], sizes = [1, 8, 8], strides = [1, 1, 1]} : vector<27x8x8xbf16> to vector<1x8x8xbf16>
    %125 = vector.shape_cast %124 : vector<1x8x8xbf16> to vector<8x8xbf16>
    %126 = vector.extract_strided_slice %3 {offsets = [0, 684], sizes = [8, 2304], strides = [1, 1]} : vector<8x3072xbf16> to vector<8x2304xbf16>
    %cst_29 = arith.constant dense<0.000000e+00> : vector<8x2304xf32>
    %127 = tpu.matmul %125, %126, %cst_29 {dimension_numbers = #tpu.dot_dimension_numbers<[1], [0], [0], [1], [0, 0, 1, 1], [], []>} : vector<8x8xbf16>, vector<8x2304xbf16>, vector<8x2304xf32> -> vector<8x2304xf32>
    %128 = arith.addf %123, %127 : vector<8x2304xf32>
    %129 = vector.extract_strided_slice %4 {offsets = [25, 0, 0], sizes = [1, 8, 8], strides = [1, 1, 1]} : vector<27x8x8xbf16> to vector<1x8x8xbf16>
    %130 = vector.shape_cast %129 : vector<1x8x8xbf16> to vector<8x8xbf16>
    %131 = vector.extract_strided_slice %3 {offsets = [0, 685], sizes = [8, 2304], strides = [1, 1]} : vector<8x3072xbf16> to vector<8x2304xbf16>
    %cst_30 = arith.constant dense<0.000000e+00> : vector<8x2304xf32>
    %132 = tpu.matmul %130, %131, %cst_30 {dimension_numbers = #tpu.dot_dimension_numbers<[1], [0], [0], [1], [0, 0, 1, 1], [], []>} : vector<8x8xbf16>, vector<8x2304xbf16>, vector<8x2304xf32> -> vector<8x2304xf32>
    %133 = arith.addf %128, %132 : vector<8x2304xf32>
    %134 = vector.extract_strided_slice %4 {offsets = [26, 0, 0], sizes = [1, 8, 8], strides = [1, 1, 1]} : vector<27x8x8xbf16> to vector<1x8x8xbf16>
    %135 = vector.shape_cast %134 : vector<1x8x8xbf16> to vector<8x8xbf16>
    %136 = vector.extract_strided_slice %3 {offsets = [0, 686], sizes = [8, 2304], strides = [1, 1]} : vector<8x3072xbf16> to vector<8x2304xbf16>
    %cst_31 = arith.constant dense<0.000000e+00> : vector<8x2304xf32>
    %137 = tpu.matmul %135, %136, %cst_31 {dimension_numbers = #tpu.dot_dimension_numbers<[1], [0], [0], [1], [0, 0, 1, 1], [], []>} : vector<8x8xbf16>, vector<8x2304xbf16>, vector<8x2304xf32> -> vector<8x2304xf32>
    %138 = arith.addf %133, %137 : vector<8x2304xf32>
    %139 = vector.extract_strided_slice %138 {offsets = [0, 0], sizes = [4, 2304], strides = [1, 1]} : vector<8x2304xf32> to vector<4x2304xf32>
    %140 = tpu.iota {dimensions = array<i32: 1>} : vector<1x2304xi32>
    %c2304_i32 = arith.constant 2304 : i32
    %141 = arith.muli %arg0, %c2304_i32 : i32
    %c343_i32 = arith.constant 343 : i32
    %142 = arith.addi %141, %c343_i32 : i32
    %143 = vector.broadcast %142 : i32 to vector<1x2304xi32>
    %144 = arith.addi %140, %143 : vector<1x2304xi32>
    %145 = arith.sitofp %144 : vector<1x2304xi32> to vector<1x2304xf32>
    %cst_32 = arith.constant 5.000000e-01 : f32
    %146 = vector.broadcast %cst_32 : f32 to vector<1x2304xf32>
    %147 = arith.addf %145, %146 : vector<1x2304xf32>
    %cst_33 = arith.constant 3.240000e+03 : f32
    %148 = vector.broadcast %cst_33 : f32 to vector<1x2304xf32>
    %149 = arith.divf %147, %148 : vector<1x2304xf32>
    %150 = math.floor %149 : vector<1x2304xf32>
    %cst_34 = arith.constant 3.240000e+03 : f32
    %151 = vector.broadcast %cst_34 : f32 to vector<1x2304xf32>
    %152 = arith.mulf %150, %151 : vector<1x2304xf32>
    %153 = arith.subf %145, %152 : vector<1x2304xf32>
    %cst_35 = arith.constant 5.000000e-01 : f32
    %154 = vector.broadcast %cst_35 : f32 to vector<1x2304xf32>
    %155 = arith.addf %153, %154 : vector<1x2304xf32>
    %cst_36 = arith.constant 3.240000e+02 : f32
    %156 = vector.broadcast %cst_36 : f32 to vector<1x2304xf32>
    %157 = arith.divf %155, %156 : vector<1x2304xf32>
    %158 = math.floor %157 : vector<1x2304xf32>
    %cst_37 = arith.constant 3.240000e+02 : f32
    %159 = vector.broadcast %cst_37 : f32 to vector<1x2304xf32>
    %160 = arith.mulf %158, %159 : vector<1x2304xf32>
    %161 = arith.subf %153, %160 : vector<1x2304xf32>
    %cst_38 = arith.constant 5.000000e-01 : f32
    %162 = vector.broadcast %cst_38 : f32 to vector<1x2304xf32>
    %163 = arith.addf %161, %162 : vector<1x2304xf32>
    %cst_39 = arith.constant 1.800000e+01 : f32
    %164 = vector.broadcast %cst_39 : f32 to vector<1x2304xf32>
    %165 = arith.divf %163, %164 : vector<1x2304xf32>
    %166 = math.floor %165 : vector<1x2304xf32>
    %cst_40 = arith.constant 1.800000e+01 : f32
    %167 = vector.broadcast %cst_40 : f32 to vector<1x2304xf32>
    %168 = arith.mulf %166, %167 : vector<1x2304xf32>
    %169 = arith.subf %161, %168 : vector<1x2304xf32>
    %cst_41 = arith.constant 1.000000e+00 : f32
    %170 = vector.broadcast %cst_41 : f32 to vector<1x2304xf32>
    %171 = arith.cmpf oge, %150, %170 : vector<1x2304xf32>
    %cst_42 = arith.constant 2.000000e+00 : f32
    %172 = vector.broadcast %cst_42 : f32 to vector<1x2304xf32>
    %173 = arith.cmpf ole, %150, %172 : vector<1x2304xf32>
    %174 = arith.andi %171, %173 : vector<1x2304xi1>
    %cst_43 = arith.constant 1.000000e+00 : f32
    %175 = vector.broadcast %cst_43 : f32 to vector<1x2304xf32>
    %176 = arith.cmpf oge, %158, %175 : vector<1x2304xf32>
    %177 = arith.andi %174, %176 : vector<1x2304xi1>
    %cst_44 = arith.constant 8.000000e+00 : f32
    %178 = vector.broadcast %cst_44 : f32 to vector<1x2304xf32>
    %179 = arith.cmpf ole, %158, %178 : vector<1x2304xf32>
    %180 = arith.andi %177, %179 : vector<1x2304xi1>
    %cst_45 = arith.constant 1.000000e+00 : f32
    %181 = vector.broadcast %cst_45 : f32 to vector<1x2304xf32>
    %182 = arith.cmpf oge, %166, %181 : vector<1x2304xf32>
    %183 = arith.andi %180, %182 : vector<1x2304xi1>
    %cst_46 = arith.constant 1.600000e+01 : f32
    %184 = vector.broadcast %cst_46 : f32 to vector<1x2304xf32>
    %185 = arith.cmpf ole, %166, %184 : vector<1x2304xf32>
    %186 = arith.andi %183, %185 : vector<1x2304xi1>
    %cst_47 = arith.constant 1.000000e+00 : f32
    %187 = vector.broadcast %cst_47 : f32 to vector<1x2304xf32>
    %188 = arith.cmpf oge, %169, %187 : vector<1x2304xf32>
    %189 = arith.andi %186, %188 : vector<1x2304xi1>
    %cst_48 = arith.constant 1.600000e+01 : f32
    %190 = vector.broadcast %cst_48 : f32 to vector<1x2304xf32>
    %191 = arith.cmpf ole, %169, %190 : vector<1x2304xf32>
    %192 = arith.andi %189, %191 : vector<1x2304xi1>
    %cst_49 = arith.constant 1.000000e+00 : f32
    %cst_50 = arith.constant 0.000000e+00 : f32
    %193 = vector.broadcast %cst_49 : f32 to vector<1x2304xf32>
    %194 = vector.broadcast %cst_50 : f32 to vector<1x2304xf32>
    %195 = arith.select %192, %193, %194 : vector<1x2304xi1>, vector<1x2304xf32>
    %196 = vector.broadcast %195 : vector<1x2304xf32> to vector<4x2304xf32>
    %197 = arith.mulf %139, %196 : vector<4x2304xf32>
    %cst_51 = arith.constant dense<0.000000e+00> : vector<4xf32>
    %198 = vector.multi_reduction <add>, %197, %cst_51 [1] : vector<4x2304xf32> to vector<4xf32>
    %199 = vector.shape_cast %198 : vector<4xf32> to vector<4x1xf32>
    %200 = arith.mulf %197, %139 : vector<4x2304xf32>
    %cst_52 = arith.constant dense<0.000000e+00> : vector<4xf32>
    %201 = vector.multi_reduction <add>, %200, %cst_52 [1] : vector<4x2304xf32> to vector<4xf32>
    %202 = vector.shape_cast %201 : vector<4xf32> to vector<4x1xf32>
    %203 = tpu.concatenate %199, %202 in 0 : vector<4x1xf32>, vector<4x1xf32> -> vector<8x1xf32>
    %204 = vector.shape_cast %203 : vector<8x1xf32> to vector<1x8x1xf32>
    %c0_53 = arith.constant 0 : index
    %c0_54 = arith.constant 0 : index
    %c0_55 = arith.constant 0 : index
    %205 = vector.load %arg5[%c0_53, %c0_54, %c0_55] : memref<1x8x1xf32, #tpu.memory_space<vmem>>, vector<1x8x1xf32>
    tpu.vector_store %arg5[%c0_53, %c0_54, %c0_55], %204 {strides = array<i32>} : memref<1x8x1xf32, #tpu.memory_space<vmem>>, vector<1x8x1xf32>,
    %206 = arith.truncf %139 : vector<4x2304xf32> to vector<4x2304xbf16>
    %c0_56 = arith.constant 0 : index
    %c0_57 = arith.constant 0 : index
    %207 = vector.load %arg4[%c0_56, %c0_57] : memref<4x2304xbf16, #tpu.memory_space<vmem>>, vector<4x2304xbf16>
    tpu.vector_store %arg4[%c0_56, %c0_57], %206 {strides = array<i32>} : memref<4x2304xbf16, #tpu.memory_space<vmem>>, vector<4x2304xbf16>,
    return
  }
  func.func @transform_0(%arg0: i32) -> (i32, i32) {
    %c0_i32 = arith.constant 0 : i32
    %c0_i32_0 = arith.constant 0 : i32
    return %c0_i32, %arg0 : i32, i32
  }
  func.func @transform_1(%arg0: i32) -> (i32, i32) {
    %c1_i32 = arith.constant 1 : i32
    %0 = arith.addi %arg0, %c1_i32 : i32
    %c3_i32 = arith.constant 3 : i32
    %1 = arith.muli %0, %c3_i32 : i32
    %c0_i32 = arith.constant 0 : i32
    %c0_i32_0 = arith.constant 0 : i32
    return %c0_i32, %1 : i32, i32
  }
  func.func @transform_2(%arg0: i32) -> (i32, i32, i32) {
    %c0_i32 = arith.constant 0 : i32
    %c0_i32_0 = arith.constant 0 : i32
    %c0_i32_1 = arith.constant 0 : i32
    %c0_i32_2 = arith.constant 0 : i32
    return %c0_i32, %c0_i32_0, %c0_i32_1 : i32, i32, i32
  }
  func.func @transform_3(%arg0: i32) -> (i32, i32) {
    %c0_i32 = arith.constant 0 : i32
    %c0_i32_0 = arith.constant 0 : i32
    return %c0_i32, %arg0 : i32, i32
  }
  func.func @transform_4(%arg0: i32) -> (i32, i32, i32) {
    %c0_i32 = arith.constant 0 : i32
    %c0_i32_0 = arith.constant 0 : i32
    %c0_i32_1 = arith.constant 0 : i32
    return %arg0, %c0_i32, %c0_i32_0 : i32, i32, i32
  }
}

module attributes {stable_mosaic.version = 11 : i64} {
  func.func @_bn_relu_prob_kernel(%arg0: i32, %arg1: memref<4x4xf32, #tpu.memory_space<vmem>>, %arg2: memref<4x11520xbf16, #tpu.memory_space<vmem>>, %arg3: memref<1x11520xf32, #tpu.memory_space<vmem>>) attributes {dimension_semantics = [#tpu.dimension_semantics<parallel>], iteration_bounds = array<i64: 1>, scalar_prefetch = 0 : i64, scratch_operands = 0 : i64, tpu.core_type = #tpu.core_type<tc>, window_params = [{pipeline_mode = #tpu.pipeline_mode<synchronous>, transform_indices = @transform_0, window_bounds = array<i64: 4, 4>}, {transform_indices = @transform_1, window_bounds = array<i64: 4, 11520>}, {transform_indices = @transform_2, window_bounds = array<i64: 1, 11520>}]} {
    %c0 = arith.constant 0 : index
    %c0_0 = arith.constant 0 : index
    %0 = vector.load %arg2[%c0, %c0_0] : memref<4x11520xbf16, #tpu.memory_space<vmem>>, vector<4x11520xbf16>
    %1 = arith.extf %0 : vector<4x11520xbf16> to vector<4x11520xf32>
    %c0_1 = arith.constant 0 : index
    %c0_2 = arith.constant 0 : index
    %2 = vector.load %arg1[%c0_1, %c0_2] : memref<4x4xf32, #tpu.memory_space<vmem>>, vector<4x1xf32>
    %c0_3 = arith.constant 0 : index
    %c1 = arith.constant 1 : index
    %3 = vector.load %arg1[%c0_3, %c1] : memref<4x4xf32, #tpu.memory_space<vmem>>, vector<4x1xf32>
    %c0_4 = arith.constant 0 : index
    %c2 = arith.constant 2 : index
    %4 = vector.load %arg1[%c0_4, %c2] : memref<4x4xf32, #tpu.memory_space<vmem>>, vector<4x1xf32>
    %5 = vector.broadcast %2 : vector<4x1xf32> to vector<4x11520xf32>
    %6 = arith.mulf %1, %5 : vector<4x11520xf32>
    %7 = vector.broadcast %3 : vector<4x1xf32> to vector<4x11520xf32>
    %8 = arith.addf %6, %7 : vector<4x11520xf32>
    %cst = arith.constant 0.000000e+00 : f32
    %9 = vector.broadcast %cst : f32 to vector<4x11520xf32>
    %10 = arith.maximumf %8, %9 : vector<4x11520xf32>
    %11 = vector.broadcast %4 : vector<4x1xf32> to vector<4x11520xf32>
    %12 = arith.mulf %10, %11 : vector<4x11520xf32>
    %cst_5 = arith.constant dense<0.000000e+00> : vector<11520xf32>
    %13 = vector.multi_reduction <add>, %12, %cst_5 [0] : vector<4x11520xf32> to vector<11520xf32>
    %14 = vector.shape_cast %13 : vector<11520xf32> to vector<1x11520xf32>
    %c0_6 = arith.constant 0 : index
    %c3 = arith.constant 3 : index
    %15 = vector.load %arg1[%c0_6, %c3] : memref<4x4xf32, #tpu.memory_space<vmem>>, vector<1x1xf32>
    %16 = vector.broadcast %15 : vector<1x1xf32> to vector<1x11520xf32>
    %17 = arith.addf %14, %16 : vector<1x11520xf32>
    %c0_7 = arith.constant 0 : index
    %c0_8 = arith.constant 0 : index
    %18 = vector.load %arg3[%c0_7, %c0_8] : memref<1x11520xf32, #tpu.memory_space<vmem>>, vector<1x11520xf32>
    tpu.vector_store %arg3[%c0_7, %c0_8], %17 {strides = array<i32>} : memref<1x11520xf32, #tpu.memory_space<vmem>>, vector<1x11520xf32>,
    return
  }
  func.func @transform_0(%arg0: i32) -> (i32, i32) {
    %c0_i32 = arith.constant 0 : i32
    %c0_i32_0 = arith.constant 0 : i32
    %c0_i32_1 = arith.constant 0 : i32
    return %c0_i32, %c0_i32_0 : i32, i32
  }
  func.func @transform_1(%arg0: i32) -> (i32, i32) {
    %c0_i32 = arith.constant 0 : i32
    %c0_i32_0 = arith.constant 0 : i32
    return %c0_i32, %arg0 : i32, i32
  }
  func.func @transform_2(%arg0: i32) -> (i32, i32) {
    %c0_i32 = arith.constant 0 : i32
    %c0_i32_0 = arith.constant 0 : i32
    return %c0_i32, %arg0 : i32, i32
  }
}

</mosaic_0001>

<bundles_post_ra>
// kernel: cost_reg_net_3dmlp.3
= control target key start
LH: loop header
LB: loop body
LE: loop exit
PB: predicated region body
PF: predicated region fallthrough
CT: control target
= control target key end

     0   :  { %v1843_v0 = vmov 0   ;;  %v1844_v2 = vmov 2   ;;  %v1845_v4 = vmov 1   ;;  %v1846_v5 = vmov 3   ;;  %s3402_s0 = inlined_call_operand.vmem [shape: f32[4,4], index: 0, kind: input, shape index: {}]   ;;  %s3403_s1 = inlined_call_operand.vmem [shape: bf16[4,11520], index: 1, kind: input, shape index: {}]   ;;  %s3404_s2 = inlined_call_operand.vmem [shape: f32[1,11520], index: 2, kind: output, shape index: {}]  }
   0x1   :  { %1838 = vset.pattern.permute.xlu0 %v1843_v0  ;;  %v79_v1 = vld [vmem:[%s3402_s0] sm:$0xf]  ;;  %1840 = vset.pattern.permute.xlu1 %v1844_v2  ;;  %v1878_v7 = vld [vmem:[%s3403_s1 + $0x8] sm:$0xff]  ;;  %v1847_v8 = vmov 839922192   ;;  %v3405_v10 = vlaneseq  ;;  %v1883_v11 = vld [vmem:[%s3403_s1 + $0x10] sm:$0xff] }
   0x2   :  { %82 = vperm.xlu0 %1838, %v79_v1   ;;  %239 = vperm.xlu1 %1840, %v79_v1   ;;  %v1060_v3 = vld [vmem:[%s3402_s0] sm:$0x1]  ;;  %v85_v9 = vunpack.c.l.s4 %v1847_v8  ;;  %v1888_v12 = vld [vmem:[%s3403_s1 + $0x18] sm:$0xff]  ;;  %v1898_v14 = vld [vmem:[%s3403_s1 + $0x28] sm:$0xff]  ;;  %v36_v18 = vunpack.c.l.bf16 %v1878_v7  ;;  %v37_v19 = vunpack.c.h.bf16 %v1878_v7  ;;  %v38_v22 = vunpack.c.l.bf16 %v1883_v11 }
   0x3   :  { %v1873_v6 = vld [vmem:[%s3403_s1] sm:$0xff]  ;;  %v1903_v15 = vld [vmem:[%s3403_s1 + $0x30] sm:$0xff]  ;;  %v1912_v20 = vld [vmem:[%s3403_s1 + $0x38] sm:$0xff]  ;;  %v39_v23 = vunpack.c.h.bf16 %v1883_v11  ;;  %v1922_v25 = vshrl.u32 %v3405_v10, 7  ;;  %v40_v28 = vunpack.c.l.bf16 %v1888_v12  ;;  %v41_v29 = vunpack.c.h.bf16 %v1888_v12 }
   0x4   :  { %v1893_v13 = vld [vmem:[%s3403_s1 + $0x20] sm:$0xff]  ;;  %v34_v16 = vunpack.c.l.bf16 %v1873_v6  ;;  %v35_v17 = vunpack.c.h.bf16 %v1873_v6  ;;  %v86_v24 = vunpack.c.0.s8 %v85_v9  ;;  %v1927_v26 = vld [vmem:[%s3403_s1 + $0x48] sm:$0xff]  ;;  %v1932_v27 = vld [vmem:[%s3403_s1 + $0x50] sm:$0xff]  ;;  %v44_v34 = vunpack.c.l.bf16 %v1898_v14 }
   0x5   :  { %v1917_v21 = vld [vmem:[%s3403_s1 + $0x40] sm:$0xff]  ;;  %3435 = vst [vmem:[#allocation2_spill] sm:$0xff] %v1922_v25  ;;  %v42_v30 = vunpack.c.l.bf16 %v1893_v13  ;;  %v43_v31 = vunpack.c.h.bf16 %v1893_v13  ;;  %v1941_v32 = vld [vmem:[%s3403_s1 + $0x58] sm:$0xff]  ;;  %v45_v35 = vunpack.c.h.bf16 %v1898_v14  ;;  %v46_v36 = vunpack.c.l.bf16 %v1903_v15  ;;  %v1955_v38 = vld [vmem:[%s3403_s1 + $0x68] sm:$0xff] }
   0x6   :  { %1839 = vset.pattern.permute.xlu0 %v1845_v4  ;;  %1841 = vset.pattern.permute.xlu1 %v1846_v5  ;;  %v1946_v33 = vld [vmem:[%s3403_s1 + $0x60] sm:$0xff]  ;;  %v47_v37 = vunpack.c.h.bf16 %v1903_v15  ;;  %v1960_v39 = vld [vmem:[%s3403_s1 + $0x70] sm:$0xff]  ;;  %v48_v40 = vunpack.c.l.bf16 %v1912_v20  ;;  %v49_v41 = vunpack.c.h.bf16 %v1912_v20  ;;  %v50_v42 = vunpack.c.l.bf16 %v1917_v21  ;;  %v1969_v44 = vld [vmem:[%s3403_s1 + $0x78] sm:$0xff] }
   0x7   :  { %138 = vperm.xlu0 %1839, %v79_v1   ;;  %1063 = vperm.xlu1 %1841, %v1060_v3   ;;  %v51_v43 = vunpack.c.h.bf16 %v1917_v21  ;;  %v1974_v45 = vld [vmem:[%s3403_s1 + $0x80] sm:$0xff]  ;;  %v52_v46 = vunpack.c.l.bf16 %v1927_v26  ;;  %v53_v47 = vunpack.c.h.bf16 %v1927_v26  ;;  %v54_v48 = vunpack.c.l.bf16 %v1932_v27  ;;  %v1985_v50 = vld [vmem:[%s3403_s1 + $0x88] sm:$0xff]  ;;  %v1994_v55 = vld [vmem:[%s3403_s1 + $0x90] sm:$0xff] }
   0x8   :  { %v1980_v49 = vsub.s32 %v86_v24, %v1922_v25  ;;  %v55_v51 = vunpack.c.h.bf16 %v1932_v27  ;;  %v56_v52 = vunpack.c.l.bf16 %v1941_v32  ;;  %v57_v53 = vunpack.c.h.bf16 %v1941_v32  ;;  %v1999_v56 = vld [vmem:[%s3403_s1 + $0x98] sm:$0xff]  ;;  %v2008_v62 = vld [vmem:[%s3403_s1 + $0xa0] sm:$0xff]  ;;  %v2013_v63 = vld [vmem:[%s3403_s1 + $0xa8] sm:$0xff] }
   0x9   :  { %v58_v54 = vunpack.c.l.bf16 %v1946_v33  ;;  %v59_v57 = vunpack.c.h.bf16 %v1946_v33  ;;  %v60_v58 = vunpack.c.l.bf16 %v1955_v38  ;;  %v61_v59 = vunpack.c.h.bf16 %v1955_v38 }
   0xa   :  { %3436 = vst [vmem:[#allocation3_spill] sm:$0xff] %v1980_v49  ;;  %v62_v60 = vunpack.c.l.bf16 %v1960_v39  ;;  %v63_v0 = vunpack.c.h.bf16 %v1960_v39  ;;  %v64_v1 = vunpack.c.l.bf16 %v1969_v44  ;;  %v65_v2 = vunpack.c.h.bf16 %v1969_v44 }
   0xb   :  { %1842 = vset.pattern.permute.xlu0 %v1846_v5  ;;  %v66_v3 = vunpack.c.l.bf16 %v1974_v45  ;;  %v33_v5 = vld [vmem:[%s3403_s1 + $0xb0] sm:$0xf]  ;;  %v67_v8 = vunpack.c.h.bf16 %v1974_v45  ;;  %v68_v9 = vunpack.c.l.bf16 %v1985_v50  ;;  %v69_v12 = vunpack.c.h.bf16 %v1985_v50 }
   0xc   :  { %v70_v14 = vunpack.c.l.bf16 %v1994_v55  ;;  %v71_v15 = vunpack.c.h.bf16 %v1994_v55  ;;  %v72_v20 = vunpack.c.l.bf16 %v1999_v56  ;;  %v73_v21 = vunpack.c.h.bf16 %v1999_v56 }
   0xd   :  { %v74_v24 = vunpack.c.l.bf16 %v2008_v62  ;;  %v75_v26 = vunpack.c.h.bf16 %v2008_v62  ;;  %v76_v27 = vunpack.c.l.bf16 %v2013_v63  ;;  %v77_v32 = vunpack.c.h.bf16 %v2013_v63 }
   0xe   :  { %v78_v33 = vunpack.c.l.bf16 %v33_v5  ;;  %vm429_vm0 = vcmask 1043456  }
  0x81   :  { %v83_v61 = vpop.permute.xlu0 %82  ;;  %v240_v4 = vpop.permute.xlu1 %239 }
  0x82   :  { %v90_v13 = vrot.slane %v83_v61, %v1980_v49  ;;  %v2039_v44 = vrot.slane %v240_v4, %v1980_v49 }
  0x84   :  { %v92_v38 = vmul.f32 %v90_v13, %v34_v16  ;;  %v93_v39 = vmul.f32 %v90_v13, %v35_v17  ;;  %3437 = vst [vmem:[#allocation4_spill] sm:$0xff] %v2039_v44  ;;  %v94_v45 = vmul.f32 %v90_v13, %v36_v18  ;;  %v95_v50 = vmul.f32 %v90_v13, %v37_v19 }
  0x85   :  { %v96_v55 = vmul.f32 %v90_v13, %v38_v22  ;;  %v97_v56 = vmul.f32 %v90_v13, %v39_v23  ;;  %v98_v61 = vmul.f32 %v90_v13, %v40_v28  ;;  %v99_v16 = vmul.f32 %v90_v13, %v41_v29 }
  0x86   :  { %v100_v62 = vmul.f32 %v90_v13, %v42_v30  ;;  %v101_v6 = vmul.f32 %v90_v13, %v43_v31  ;;  %v102_v17 = vmul.f32 %v90_v13, %v44_v34  ;;  %v103_v63 = vmul.f32 %v90_v13, %v45_v35  ;;  %v139_v30 = vpop.permute.xlu0 %138 }
  0x87   :  { %v104_v4 = vmul.f32 %v90_v13, %v46_v36  ;;  %v105_v5 = vmul.f32 %v90_v13, %v47_v37  ;;  %v106_v10 = vmul.f32 %v90_v13, %v48_v40  ;;  %v107_v25 = vmul.f32 %v90_v13, %v49_v41 }
  0x88   :  { %v108_v18 = vmul.f32 %v90_v13, %v50_v42  ;;  %v109_v44 = vmul.f32 %v90_v13, %v51_v43  ;;  %v110_v7 = vmul.f32 %v90_v13, %v52_v46  ;;  %v111_v19 = vmul.f32 %v90_v13, %v53_v47 }
  0x89   :  { %v112_v49 = vmul.f32 %v90_v13, %v54_v48  ;;  %v113_v22 = vmul.f32 %v90_v13, %v55_v51  ;;  %v114_v11 = vmul.f32 %v90_v13, %v56_v52  ;;  %v115_v23 = vmul.f32 %v90_v13, %v57_v53 }
  0x8a   :  { %v116_v28 = vmul.f32 %v90_v13, %v58_v54  ;;  %v117_v29 = vmul.f32 %v90_v13, %v59_v57  ;;  %v118_v31 = vmul.f32 %v90_v13, %v60_v58  ;;  %v119_v34 = vmul.f32 %v90_v13, %v61_v59  ;;  %v3438_v54 = vld [vmem:[#allocation3_spill] sm:$0xff] }
  0x8b   :  { %v120_v35 = vmul.f32 %v90_v13, %v62_v60  ;;  %v121_v36 = vmul.f32 %v90_v13, %v63_v0  ;;  %v122_v37 = vmul.f32 %v90_v13, %v64_v1  ;;  %v123_v40 = vmul.f32 %v90_v13, %v65_v2 }
  0x8c   :  { %v124_v41 = vmul.f32 %v90_v13, %v66_v3  ;;  %v125_v42 = vmul.f32 %v90_v13, %v67_v8  ;;  %v126_v43 = vmul.f32 %v90_v13, %v68_v9  ;;  %v127_v46 = vmul.f32 %v90_v13, %v69_v12 }
  0x8d   :  { %v128_v47 = vmul.f32 %v90_v13, %v70_v14  ;;  %v129_v48 = vmul.f32 %v90_v13, %v71_v15  ;;  %v130_v51 = vmul.f32 %v90_v13, %v72_v20  ;;  %v131_v52 = vmul.f32 %v90_v13, %v73_v21 }
  0x8e   :  { %v132_v53 = vmul.f32 %v90_v13, %v74_v24  ;;  %v146_v57 = vrot.slane %v139_v30, %v3438_v54  ;;  %v133_v58 = vmul.f32 %v90_v13, %v75_v26  ;;  %v134_v59 = vmul.f32 %v90_v13, %v76_v27 }
  0x8f   :  { %v135_v60 = vmul.f32 %v90_v13, %v77_v32  ;;  %v136_v0 = vmul.f32 %v90_v13, %v78_v33 }
  0x90   :  { %v2050_v1 = vadd.f32 %v146_v57, %v92_v38  ;;  %v2052_v2 = vadd.f32 %v146_v57, %v93_v39  ;;  %v2054_v3 = vadd.f32 %v146_v57, %v94_v45  ;;  %v2056_v8 = vadd.f32 %v146_v57, %v95_v50 }
  0x91   :  { %v2058_v9 = vadd.f32 %v146_v57, %v96_v55  ;;  %v2060_v12 = vadd.f32 %v146_v57, %v97_v56  ;;  %v2062_v14 = vadd.f32 %v146_v57, %v98_v61  ;;  %v2064_v15 = vadd.f32 %v146_v57, %v99_v16 }
  0x92   :  { %v2066_v20 = vadd.f32 %v146_v57, %v100_v62  ;;  %v2068_v21 = vadd.f32 %v146_v57, %v101_v6  ;;  %v2070_v13 = vadd.f32 %v146_v57, %v102_v17  ;;  %v2072_v24 = vadd.f32 %v146_v57, %v103_v63 }
  0x93   :  { %v2074_v26 = vadd.f32 %v146_v57, %v104_v4  ;;  %v2076_v27 = vadd.f32 %v146_v57, %v105_v5  ;;  %v2078_v32 = vadd.f32 %v146_v57, %v106_v10  ;;  %v2080_v33 = vadd.f32 %v146_v57, %v107_v25 }
  0x94   :  { %v2082_v38 = vadd.f32 %v146_v57, %v108_v18  ;;  %v2084_v39 = vadd.f32 %v146_v57, %v109_v44  ;;  %v2086_v45 = vadd.f32 %v146_v57, %v110_v7  ;;  %v2088_v50 = vadd.f32 %v146_v57, %v111_v19 }
  0x95   :  { %v2090_v55 = vadd.f32 %v146_v57, %v112_v49  ;;  %v2092_v56 = vadd.f32 %v146_v57, %v113_v22  ;;  %v2094_v61 = vadd.f32 %v146_v57, %v114_v11  ;;  %v2096_v16 = vadd.f32 %v146_v57, %v115_v23 }
  0x96   :  { %v2098_v10 = vadd.f32 %v146_v57, %v116_v28  ;;  %v2100_v25 = vadd.f32 %v146_v57, %v117_v29  ;;  %v2102_v62 = vadd.f32 %v146_v57, %v118_v31  ;;  %v2104_v44 = vadd.f32 %v146_v57, %v119_v34 }
  0x97   :  { %v2106_v6 = vadd.f32 %v146_v57, %v120_v35  ;;  %v2108_v17 = vadd.f32 %v146_v57, %v121_v36  ;;  %v2110_v49 = vadd.f32 %v146_v57, %v122_v37  ;;  %v2112_v63 = vadd.f32 %v146_v57, %v123_v40 }
  0x98   :  { %v2114_v4 = vadd.f32 %v146_v57, %v124_v41  ;;  %v2116_v5 = vadd.f32 %v146_v57, %v125_v42  ;;  %v2118_v18 = vadd.f32 %v146_v57, %v126_v43  ;;  %v2120_v7 = vadd.f32 %v146_v57, %v127_v46 }
  0x99   :  { %v2122_v19 = vadd.f32 %v146_v57, %v128_v47  ;;  %v2124_v22 = vadd.f32 %v146_v57, %v129_v48  ;;  %v2126_v11 = vadd.f32 %v146_v57, %v130_v51  ;;  %v2128_v23 = vadd.f32 %v146_v57, %v131_v52 }
  0x9a   :  { %v2130_v28 = vadd.f32 %v146_v57, %v132_v53  ;;  %v2132_v29 = vadd.f32 %v146_v57, %v133_v58  ;;  %v2134_v30 = vadd.f32 %v146_v57, %v134_v59  ;;  %v2136_v31 = vadd.f32 %v146_v57, %v135_v60 }
  0x9b   :  { %v2138_v34 = vadd.f32 %v146_v57, %v136_v0  ;;  %v193_v35 = vmax.f32 %v2050_v1, 0.0  ;;  %v194_v36 = vmax.f32 %v2052_v2, 0.0  ;;  %v195_v37 = vmax.f32 %v2054_v3, 0.0 }
  0x9c   :  { %v196_v40 = vmax.f32 %v2056_v8, 0.0  ;;  %v197_v41 = vmax.f32 %v2058_v9, 0.0  ;;  %v198_v42 = vmax.f32 %v2060_v12, 0.0  ;;  %v199_v43 = vmax.f32 %v2062_v14, 0.0 }
  0x9d   :  { %v200_v46 = vmax.f32 %v2064_v15, 0.0  ;;  %v201_v47 = vmax.f32 %v2066_v20, 0.0  ;;  %v202_v48 = vmax.f32 %v2068_v21, 0.0  ;;  %v203_v51 = vmax.f32 %v2070_v13, 0.0 }
  0x9e   :  { %v204_v52 = vmax.f32 %v2072_v24, 0.0  ;;  %v205_v53 = vmax.f32 %v2074_v26, 0.0  ;;  %v206_v54 = vmax.f32 %v2076_v27, 0.0  ;;  %v207_v57 = vmax.f32 %v2078_v32, 0.0 }
  0x9f   :  { %v208_v58 = vmax.f32 %v2080_v33, 0.0  ;;  %v209_v59 = vmax.f32 %v2082_v38, 0.0  ;;  %v210_v60 = vmax.f32 %v2084_v39, 0.0  ;;  %v211_v0 = vmax.f32 %v2086_v45, 0.0 }
  0xa0   :  { %v212_v1 = vmax.f32 %v2088_v50, 0.0  ;;  %v213_v2 = vmax.f32 %v2090_v55, 0.0  ;;  %v214_v3 = vmax.f32 %v2092_v56, 0.0  ;;  %v215_v8 = vmax.f32 %v2094_v61, 0.0 }
  0xa1   :  { %v216_v9 = vmax.f32 %v2096_v16, 0.0  ;;  %v217_v12 = vmax.f32 %v2098_v10, 0.0  ;;  %v218_v14 = vmax.f32 %v2100_v25, 0.0  ;;  %v219_v15 = vmax.f32 %v2102_v62, 0.0  ;;  %v3439_v62 = vld [vmem:[#allocation4_spill] sm:$0xff] }
  0xa2   :  { %v220_v20 = vmax.f32 %v2104_v44, 0.0  ;;  %v221_v21 = vmax.f32 %v2106_v6, 0.0  ;;  %v222_v13 = vmax.f32 %v2108_v17, 0.0  ;;  %v223_v24 = vmax.f32 %v2110_v49, 0.0 }
  0xa3   :  { %v224_v26 = vmax.f32 %v2112_v63, 0.0  ;;  %v225_v27 = vmax.f32 %v2114_v4, 0.0  ;;  %v226_v32 = vmax.f32 %v2116_v5, 0.0  ;;  %v227_v33 = vmax.f32 %v2118_v18, 0.0 }
  0xa4   :  { %v228_v38 = vmax.f32 %v2120_v7, 0.0  ;;  %v229_v39 = vmax.f32 %v2122_v19, 0.0  ;;  %v230_v45 = vmax.f32 %v2124_v22, 0.0  ;;  %v231_v50 = vmax.f32 %v2126_v11, 0.0 }
  0xa5   :  { %v232_v55 = vmax.f32 %v2128_v23, 0.0  ;;  %v233_v56 = vmax.f32 %v2130_v28, 0.0  ;;  %v234_v61 = vmax.f32 %v2132_v29, 0.0  ;;  %v235_v16 = vmax.f32 %v2134_v30, 0.0 }
  0xa6   :  { %v236_v10 = vmax.f32 %v2136_v31, 0.0  ;;  %v237_v25 = vmax.f32 %v2138_v34, 0.0  ;;  %v2186_v44 = vmul.f32 %v3439_v62, %v193_v35  ;;  %v2189_v6 = vmul.f32 %v3439_v62, %v194_v36 }
  0xa7   :  { %v2192_v17 = vmul.f32 %v3439_v62, %v195_v37  ;;  %v2195_v49 = vmul.f32 %v3439_v62, %v196_v40  ;;  %v2198_v63 = vmul.f32 %v3439_v62, %v197_v41  ;;  %v2201_v4 = vmul.f32 %v3439_v62, %v198_v42 }
  0xa8   :  { %v2204_v5 = vmul.f32 %v3439_v62, %v199_v43  ;;  %v2207_v18 = vmul.f32 %v3439_v62, %v200_v46  ;;  %v2210_v7 = vmul.f32 %v3439_v62, %v201_v47  ;;  %v2213_v19 = vmul.f32 %v3439_v62, %v202_v48 }
  0xa9   :  { %v2216_v22 = vmul.f32 %v3439_v62, %v203_v51  ;;  %v2219_v11 = vmul.f32 %v3439_v62, %v204_v52  ;;  %v2222_v23 = vmul.f32 %v3439_v62, %v205_v53  ;;  %v2225_v28 = vmul.f32 %v3439_v62, %v206_v54 }
  0xaa   :  { %v2228_v29 = vmul.f32 %v3439_v62, %v207_v57  ;;  %v2231_v30 = vmul.f32 %v3439_v62, %v208_v58  ;;  %v2234_v31 = vmul.f32 %v3439_v62, %v209_v59  ;;  %v2237_v34 = vmul.f32 %v3439_v62, %v210_v60 }
  0xab   :  { %v2240_v35 = vmul.f32 %v3439_v62, %v211_v0  ;;  %v2243_v36 = vmul.f32 %v3439_v62, %v212_v1  ;;  %v2246_v37 = vmul.f32 %v3439_v62, %v213_v2  ;;  %v2249_v40 = vmul.f32 %v3439_v62, %v214_v3 }
  0xac   :  { %v2252_v41 = vmul.f32 %v3439_v62, %v215_v8  ;;  %v2255_v42 = vmul.f32 %v3439_v62, %v216_v9  ;;  %v2258_v43 = vmul.f32 %v3439_v62, %v217_v12  ;;  %v2261_v46 = vmul.f32 %v3439_v62, %v218_v14 }
  0xad   :  { %v2264_v47 = vmul.f32 %v3439_v62, %v219_v15  ;;  %v2267_v48 = vmul.f32 %v3439_v62, %v220_v20  ;;  %v2270_v51 = vmul.f32 %v3439_v62, %v221_v21  ;;  %v2273_v52 = vmul.f32 %v3439_v62, %v222_v13 }
  0xae   :  { %v2276_v53 = vmul.f32 %v3439_v62, %v223_v24  ;;  %v2279_v54 = vmul.f32 %v3439_v62, %v224_v26  ;;  %v2282_v57 = vmul.f32 %v3439_v62, %v225_v27  ;;  %v2285_v58 = vmul.f32 %v3439_v62, %v226_v32 }
  0xaf   :  { %v2288_v59 = vmul.f32 %v3439_v62, %v227_v33  ;;  %v2291_v60 = vmul.f32 %v3439_v62, %v228_v38  ;;  %v2294_v0 = vmul.f32 %v3439_v62, %v229_v39  ;;  %v2297_v1 = vmul.f32 %v3439_v62, %v230_v45 }
  0xb0   :  { %3440 = vst [vmem:[#allocation3_spill] sm:$0xff] %v2282_v57  ;;  %3441 = vst [vmem:[#allocation4_spill] sm:$0xff] %v2285_v58  ;;  %v2300_v2 = vmul.f32 %v3439_v62, %v231_v50  ;;  %v2303_v3 = vmul.f32 %v3439_v62, %v232_v55  ;;  %v2306_v8 = vmul.f32 %v3439_v62, %v233_v56  ;;  %v444_v55 = vsel %vm429_vm0, %v2189_v6, 0.0 }
  0xb1   :  { %3442 = vst [vmem:[#allocation5_spill] sm:$0xff] %v2288_v59  ;;  %3443 = vst [vmem:[#allocation6_spill] sm:$0xff] %v2291_v60  ;;  %v2309_v9 = vmul.f32 %v3439_v62, %v234_v61  ;;  %v2312_v12 = vmul.f32 %v3439_v62, %v235_v16  ;;  %v2315_v14 = vmul.f32 %v3439_v62, %v236_v10  ;;  %v445_v39 = vrot.slane %v444_v55, 4 }
  0xb2   :  { %3444 = vst [vmem:[#allocation7_spill] sm:$0xff] %v2294_v0  ;;  %3445 = vst [vmem:[#allocation8_spill] sm:$0xff] %v2297_v1  ;;  %v2318_v15 = vmul.f32 %v3439_v62, %v237_v25  ;;  %v339_v20 = vcombine.high %v2186_v44, %v2186_v44  ;;  %v340_v21 = vcombine.high %v2189_v6, %v2189_v6  ;;  %v430_v25 = vsel %vm429_vm0, %v2186_v44, 0.0 }
  0xb3   :  { %3446 = vst [vmem:[#allocation9_spill] sm:$0xff] %v2300_v2  ;;  %3447 = vst [vmem:[#allocation10_spill] sm:$0xff] %v2303_v3  ;;  %v341_v13 = vcombine.high %v2192_v17, %v2192_v17  ;;  %v342_v24 = vcombine.high %v2195_v49, %v2195_v49  ;;  %v431_v56 = vrot.slane %v430_v25, 4  ;;  %v458_v16 = vsel %vm429_vm0, %v2192_v17, 0.0 }
  0xb4   :  { %3448 = vst [vmem:[#allocation11_spill] sm:$0xff] %v2306_v8  ;;  %3449 = vst [vmem:[#allocation12_spill] sm:$0xff] %v2309_v9  ;;  %v437_v62 = vsel %vm429_vm0, %v339_v20, 0.0  ;;  %v451_v50 = vsel %vm429_vm0, %v340_v21, 0.0  ;;  %v472_v10 = vsel %vm429_vm0, %v2195_v49, 0.0  ;;  %v446_v32 = vadd.f32 %v445_v39, %v444_v55 }
  0xb5   :  { %3450 = vst [vmem:[#allocation13_spill] sm:$0xff] %v2312_v12  ;;  %3451 = vst [vmem:[#allocation14_spill] sm:$0xff] %v2315_v14  ;;  %v438_v45 = vrot.slane %v437_v62, 4  ;;  %v452_v61 = vrot.slane %v451_v50, 4  ;;  %v465_v38 = vsel %vm429_vm0, %v341_v13, 0.0  ;;  %v479_v44 = vsel %vm429_vm0, %v342_v24, 0.0 }
  0xb6   :  { %3452 = vst [vmem:[#allocation15_spill] sm:$0xff] %v2318_v15  ;;  %v432_v20 = vadd.f32 %v431_v56, %v430_v25  ;;  %v459_v27 = vrot.slane %v458_v16, 4  ;;  %v466_v21 = vrot.slane %v465_v38, 4  ;;  %v473_v26 = vrot.slane %v472_v10, 4 }
  0xb7   :  { %v439_v33 = vadd.f32 %v438_v45, %v437_v62  ;;  %v453_v6 = vadd.f32 %v452_v61, %v451_v50  ;;  %v480_v15 = vrot.slane %v479_v44, 4  ;;  %v447_v9 = vrot.slane %v446_v32, 2 }
  0xb8   :  { %v433_v14 = vrot.slane %v432_v20, 2  ;;  %v460_v17 = vadd.f32 %v459_v27, %v458_v16  ;;  %v467_v3 = vadd.f32 %v466_v21, %v465_v38  ;;  %v474_v13 = vadd.f32 %v473_v26, %v472_v10 }
  0xb9   :  { %v440_v12 = vrot.slane %v439_v33, 2  ;;  %v454_v8 = vrot.slane %v453_v6, 2  ;;  %v481_v2 = vadd.f32 %v480_v15, %v479_v44  ;;  %v448_v0 = vadd.f32 %v447_v9, %v446_v32 }
  0xba   :  { %v434_v1 = vadd.f32 %v433_v14, %v432_v20  ;;  %v461_v56 = vrot.slane %v460_v17, 2  ;;  %v468_v45 = vrot.slane %v467_v3, 2  ;;  %v475_v39 = vrot.slane %v474_v13, 2 }
  0xbb   :  { %v441_v49 = vadd.f32 %v440_v12, %v439_v33  ;;  %v455_v24 = vadd.f32 %v454_v8, %v453_v6  ;;  %v482_v50 = vrot.slane %v481_v2, 2  ;;  %v449_v25 = vrot.slane %v448_v0, 1 }
  0xbc   :  { %v435_v55 = vrot.slane %v434_v1, 1  ;;  %v462_v60 = vadd.f32 %v461_v56, %v460_v17  ;;  %v469_v59 = vadd.f32 %v468_v45, %v467_v3  ;;  %v476_v58 = vadd.f32 %v475_v39, %v474_v13 }
  0xbd   :  { %v442_v61 = vrot.slane %v441_v49, 1  ;;  %v456_v62 = vrot.slane %v455_v24, 1  ;;  %v483_v57 = vadd.f32 %v482_v50, %v481_v2  ;;  %v2426_v14 = vadd.f32 %v449_v25, %v448_v0 }
  0xbe   :  { %v2422_v27 = vadd.f32 %v435_v55, %v434_v1  ;;  %v463_v8 = vrot.slane %v462_v60, 1  ;;  %v470_v12 = vrot.slane %v469_v59, 1  ;;  %v477_v15 = vrot.slane %v476_v58, 1 }
  0xbf   :  { %v2424_v26 = vadd.f32 %v442_v61, %v441_v49  ;;  %v2428_v9 = vadd.f32 %v456_v62, %v455_v24  ;;  %v484_v32 = vrot.slane %v483_v57, 1  ;;  %v486_v33 = vsel %vm429_vm0, %v2198_v63, 0.0 }
  0xc0   :  { %v3453_v3 = vcombine.high %v2198_v63, %v2198_v63  ;;  %v500_v1 = vsel %vm429_vm0, %v2201_v4, 0.0  ;;  %v3454_v0 = vcombine.high %v2201_v4, %v2201_v4  ;;  %v2442_v16 = vadd.f32 %v463_v8, %v462_v60 }
  0xc1   :  { %v2444_v10 = vadd.f32 %v470_v12, %v469_v59  ;;  %v2446_v44 = vadd.f32 %v477_v15, %v476_v58  ;;  %v2448_v20 = vadd.f32 %v484_v32, %v483_v57  ;;  %v487_v6 = vrot.slane %v486_v33, 4 }
  0xc2   :  { %v493_v2 = vsel %vm429_vm0, %v3453_v3, 0.0  ;;  %v507_v38 = vsel %vm429_vm0, %v3454_v0, 0.0  ;;  %3455 = vst [vmem:[#allocation16_spill] sm:$0xff] %v2442_v16  ;;  %v501_v21 = vrot.slane %v500_v1, 4  ;;  %v514_v13 = vsel %vm429_vm0, %v2204_v5, 0.0 }
  0xc3   :  { %3456 = vst [vmem:[#allocation17_spill] sm:$0xff] %v2444_v10  ;;  %3457 = vst [vmem:[#allocation18_spill] sm:$0xff] %v2446_v44  ;;  %v494_v63 = vrot.slane %v493_v2, 4  ;;  %v508_v17 = vrot.slane %v507_v38, 4  ;;  %v3459_v4 = vcombine.high %v2204_v5, %v2204_v5  ;;  %v528_v59 = vsel %vm429_vm0, %v2207_v18, 0.0 }
  0xc4   :  { %3458 = vst [vmem:[#allocation19_spill] sm:$0xff] %v2448_v20  ;;  %v3460_v58 = vcombine.high %v2207_v18, %v2207_v18  ;;  %v488_v60 = vadd.f32 %v487_v6, %v486_v33  ;;  %v502_v56 = vadd.f32 %v501_v21, %v500_v1  ;;  %v515_v39 = vrot.slane %v514_v13, 4 }
  0xc5   :  { %v521_v49 = vsel %vm429_vm0, %v3459_v4, 0.0  ;;  %v495_v24 = vadd.f32 %v494_v63, %v493_v2  ;;  %v509_v45 = vadd.f32 %v508_v17, %v507_v38  ;;  %v529_v55 = vrot.slane %v528_v59, 4 }
  0xc6   :  { %v535_v57 = vsel %vm429_vm0, %v3460_v58, 0.0  ;;  %v522_v50 = vrot.slane %v521_v49, 4  ;;  %v489_v25 = vrot.slane %v488_v60, 2  ;;  %v503_v62 = vrot.slane %v502_v56, 2 }
  0xc7   :  { %v536_v61 = vrot.slane %v535_v57, 4  ;;  %v496_v5 = vrot.slane %v495_v24, 2  ;;  %v510_v8 = vrot.slane %v509_v45, 2  ;;  %v516_v12 = vadd.f32 %v515_v39, %v514_v13 }
  0xc8   :  { %v523_v15 = vadd.f32 %v522_v50, %v521_v49  ;;  %v530_v32 = vadd.f32 %v529_v55, %v528_v59  ;;  %v490_v0 = vadd.f32 %v489_v25, %v488_v60  ;;  %v504_v4 = vadd.f32 %v503_v62, %v502_v56 }
  0xc9   :  { %v537_v3 = vadd.f32 %v536_v61, %v535_v57  ;;  %v497_v18 = vadd.f32 %v496_v5, %v495_v24  ;;  %v511_v58 = vadd.f32 %v510_v8, %v509_v45  ;;  %v517_v33 = vrot.slane %v516_v12, 2 }
  0xca   :  { %v524_v2 = vrot.slane %v523_v15, 2  ;;  %v531_v1 = vrot.slane %v530_v32, 2  ;;  %v491_v6 = vrot.slane %v490_v0, 1  ;;  %v505_v21 = vrot.slane %v504_v4, 1 }
  0xcb   :  { %v538_v38 = vrot.slane %v537_v3, 2  ;;  %v498_v63 = vrot.slane %v497_v18, 1  ;;  %v512_v17 = vrot.slane %v511_v58, 1  ;;  %v518_v20 = vadd.f32 %v517_v33, %v516_v12 }
  0xcc   :  { %v525_v44 = vadd.f32 %v524_v2, %v523_v15  ;;  %v532_v10 = vadd.f32 %v531_v1, %v530_v32  ;;  %v2462_v13 = vadd.f32 %v491_v6, %v490_v0  ;;  %v2466_v59 = vadd.f32 %v505_v21, %v504_v4 }
  0xcd   :  { %v539_v16 = vadd.f32 %v538_v38, %v537_v3  ;;  %v2464_v49 = vadd.f32 %v498_v63, %v497_v18  ;;  %v2468_v57 = vadd.f32 %v512_v17, %v511_v58  ;;  %v519_v60 = vrot.slane %v518_v20, 1 }
  0xce   :  { %v526_v24 = vrot.slane %v525_v44, 1  ;;  %v533_v56 = vrot.slane %v532_v10, 1  ;;  %v542_v39 = vsel %vm429_vm0, %v2210_v7, 0.0  ;;  %v3461_v50 = vcombine.high %v2210_v7, %v2210_v7 }
  0xcf   :  { %v540_v45 = vrot.slane %v539_v16, 1  ;;  %v556_v61 = vsel %vm429_vm0, %v2213_v19, 0.0  ;;  %v3462_v25 = vcombine.high %v2213_v19, %v2213_v19  ;;  %v2482_v62 = vadd.f32 %v519_v60, %v518_v20 }
  0xd0   :  { %v549_v55 = vsel %vm429_vm0, %v3461_v50, 0.0  ;;  %v2484_v8 = vadd.f32 %v526_v24, %v525_v44  ;;  %v2486_v12 = vadd.f32 %v533_v56, %v532_v10  ;;  %v543_v32 = vrot.slane %v542_v39, 4 }
  0xd1   :  { %v563_v5 = vsel %vm429_vm0, %v3462_v25, 0.0  ;;  %3463 = vst [vmem:[#allocation20_spill] sm:$0xff] %v2482_v62  ;;  %v2488_v15 = vadd.f32 %v540_v45, %v539_v16  ;;  %v550_v7 = vrot.slane %v549_v55, 4  ;;  %v557_v3 = vrot.slane %v556_v61, 4 }
  0xd2   :  { %3464 = vst [vmem:[#allocation21_spill] sm:$0xff] %v2484_v8  ;;  %3465 = vst [vmem:[#allocation22_spill] sm:$0xff] %v2486_v12  ;;  %v564_v0 = vrot.slane %v563_v5, 4  ;;  %v570_v18 = vsel %vm429_vm0, %v2216_v22, 0.0  ;;  %v3467_v19 = vcombine.high %v2216_v22, %v2216_v22  ;;  %v584_v44 = vsel %vm429_vm0, %v2219_v11, 0.0 }
  0xd3   :  { %3466 = vst [vmem:[#allocation23_spill] sm:$0xff] %v2488_v15  ;;  %v3468_v10 = vcombine.high %v2219_v11, %v2219_v11  ;;  %v544_v20 = vadd.f32 %v543_v32, %v542_v39  ;;  %v551_v58 = vadd.f32 %v550_v7, %v549_v55  ;;  %v558_v33 = vadd.f32 %v557_v3, %v556_v61 }
  0xd4   :  { %v577_v4 = vsel %vm429_vm0, %v3467_v19, 0.0  ;;  %v565_v2 = vadd.f32 %v564_v0, %v563_v5  ;;  %v571_v1 = vrot.slane %v570_v18, 4  ;;  %v585_v6 = vrot.slane %v584_v44, 4 }
  0xd5   :  { %v591_v16 = vsel %vm429_vm0, %v3468_v10, 0.0  ;;  %v578_v38 = vrot.slane %v577_v4, 4  ;;  %v545_v21 = vrot.slane %v544_v20, 2  ;;  %v552_v22 = vrot.slane %v551_v58, 2 }
  0xd6   :  { %v592_v63 = vrot.slane %v591_v16, 4  ;;  %v559_v17 = vrot.slane %v558_v33, 2  ;;  %v566_v60 = vrot.slane %v565_v2, 2  ;;  %v572_v24 = vadd.f32 %v571_v1, %v570_v18 }
  0xd7   :  { %v579_v56 = vadd.f32 %v578_v38, %v577_v4  ;;  %v586_v45 = vadd.f32 %v585_v6, %v584_v44  ;;  %v546_v25 = vadd.f32 %v545_v21, %v544_v20  ;;  %v553_v11 = vadd.f32 %v552_v22, %v551_v58 }
  0xd8   :  { %v593_v50 = vadd.f32 %v592_v63, %v591_v16  ;;  %v560_v19 = vadd.f32 %v559_v17, %v558_v33  ;;  %v567_v10 = vadd.f32 %v566_v60, %v565_v2  ;;  %v573_v39 = vrot.slane %v572_v24, 2 }
  0xd9   :  { %v580_v55 = vrot.slane %v579_v56, 2  ;;  %v587_v61 = vrot.slane %v586_v45, 2  ;;  %v547_v32 = vrot.slane %v546_v25, 1  ;;  %v554_v7 = vrot.slane %v553_v11, 1 }
  0xda   :  { %v594_v5 = vrot.slane %v593_v50, 2  ;;  %v561_v3 = vrot.slane %v560_v19, 1  ;;  %v568_v0 = vrot.slane %v567_v10, 1  ;;  %v574_v15 = vadd.f32 %v573_v39, %v572_v24 }
  0xdb   :  { %v581_v12 = vadd.f32 %v580_v55, %v579_v56  ;;  %v588_v8 = vadd.f32 %v587_v61, %v586_v45  ;;  %v2502_v18 = vadd.f32 %v547_v32, %v546_v25  ;;  %v2504_v4 = vadd.f32 %v554_v7, %v553_v11 }
  0xdc   :  { %v595_v62 = vadd.f32 %v594_v5, %v593_v50  ;;  %v2506_v44 = vadd.f32 %v561_v3, %v560_v19  ;;  %v2508_v16 = vadd.f32 %v568_v0, %v567_v10  ;;  %v575_v20 = vrot.slane %v574_v15, 1 }
  0xdd   :  { %v582_v58 = vrot.slane %v581_v12, 1  ;;  %v589_v33 = vrot.slane %v588_v8, 1  ;;  %v598_v1 = vsel %vm429_vm0, %v2222_v23, 0.0  ;;  %v3469_v38 = vcombine.high %v2222_v23, %v2222_v23 }
  0xde   :  { %v596_v2 = vrot.slane %v595_v62, 1  ;;  %v612_v63 = vsel %vm429_vm0, %v2225_v28, 0.0  ;;  %v3470_v21 = vcombine.high %v2225_v28, %v2225_v28  ;;  %v2522_v17 = vadd.f32 %v575_v20, %v574_v15 }
  0xdf   :  { %v605_v6 = vsel %vm429_vm0, %v3469_v38, 0.0  ;;  %v2524_v60 = vadd.f32 %v582_v58, %v581_v12  ;;  %v2526_v24 = vadd.f32 %v589_v33, %v588_v8  ;;  %v599_v45 = vrot.slane %v598_v1, 4 }
  0xe0   :  { %v619_v22 = vsel %vm429_vm0, %v3470_v21, 0.0  ;;  %3471 = vst [vmem:[#allocation24_spill] sm:$0xff] %v2522_v17  ;;  %v2528_v56 = vadd.f32 %v596_v2, %v595_v62  ;;  %v606_v23 = vrot.slane %v605_v6, 4  ;;  %v613_v50 = vrot.slane %v612_v63, 4 }
  0xe1   :  { %3472 = vst [vmem:[#allocation25_spill] sm:$0xff] %v2524_v60  ;;  %3473 = vst [vmem:[#allocation26_spill] sm:$0xff] %v2526_v24  ;;  %v620_v25 = vrot.slane %v619_v22, 4  ;;  %v626_v11 = vsel %vm429_vm0, %v2228_v29, 0.0  ;;  %v3475_v28 = vcombine.high %v2228_v29, %v2228_v29  ;;  %v640_v12 = vsel %vm429_vm0, %v2231_v30, 0.0 }
  0xe2   :  { %3474 = vst [vmem:[#allocation27_spill] sm:$0xff] %v2528_v56  ;;  %v3476_v8 = vcombine.high %v2231_v30, %v2231_v30  ;;  %v600_v15 = vadd.f32 %v599_v45, %v598_v1  ;;  %v607_v10 = vadd.f32 %v606_v23, %v605_v6  ;;  %v614_v39 = vadd.f32 %v613_v50, %v612_v63 }
  0xe3   :  { %v633_v19 = vsel %vm429_vm0, %v3475_v28, 0.0  ;;  %v621_v55 = vadd.f32 %v620_v25, %v619_v22  ;;  %v627_v61 = vrot.slane %v626_v11, 4  ;;  %v641_v32 = vrot.slane %v640_v12, 4 }
  0xe4   :  { %v647_v62 = vsel %vm429_vm0, %v3476_v8, 0.0  ;;  %v634_v5 = vrot.slane %v633_v19, 4  ;;  %v601_v3 = vrot.slane %v600_v15, 2  ;;  %v608_v29 = vrot.slane %v607_v10, 2 }
  0xe5   :  { %v648_v7 = vrot.slane %v647_v62, 4  ;;  %v615_v0 = vrot.slane %v614_v39, 2  ;;  %v622_v20 = vrot.slane %v621_v55, 2  ;;  %v628_v58 = vadd.f32 %v627_v61, %v626_v11 }
  0xe6   :  { %v635_v33 = vadd.f32 %v634_v5, %v633_v19  ;;  %v642_v2 = vadd.f32 %v641_v32, %v640_v12  ;;  %v602_v21 = vadd.f32 %v601_v3, %v600_v15  ;;  %v609_v30 = vadd.f32 %v608_v29, %v607_v10 }
  0xe7   :  { %v649_v38 = vadd.f32 %v648_v7, %v647_v62  ;;  %v616_v28 = vadd.f32 %v615_v0, %v614_v39  ;;  %v623_v8 = vadd.f32 %v622_v20, %v621_v55  ;;  %v629_v1 = vrot.slane %v628_v58, 2 }
  0xe8   :  { %v636_v6 = vrot.slane %v635_v33, 2  ;;  %v643_v63 = vrot.slane %v642_v2, 2  ;;  %v603_v45 = vrot.slane %v602_v21, 1  ;;  %v610_v23 = vrot.slane %v609_v30, 1 }
  0xe9   :  { %v650_v22 = vrot.slane %v649_v38, 2  ;;  %v617_v50 = vrot.slane %v616_v28, 1  ;;  %v624_v25 = vrot.slane %v623_v8, 1  ;;  %v630_v56 = vadd.f32 %v629_v1, %v628_v58 }
  0xea   :  { %v637_v24 = vadd.f32 %v636_v6, %v635_v33  ;;  %v644_v60 = vadd.f32 %v643_v63, %v642_v2  ;;  %v2542_v11 = vadd.f32 %v603_v45, %v602_v21  ;;  %v2544_v19 = vadd.f32 %v610_v23, %v609_v30 }
  0xeb   :  { %v651_v17 = vadd.f32 %v650_v22, %v649_v38  ;;  %v2546_v12 = vadd.f32 %v617_v50, %v616_v28  ;;  %v2548_v62 = vadd.f32 %v624_v25, %v623_v8  ;;  %v631_v15 = vrot.slane %v630_v56, 1 }
  0xec   :  { %v638_v10 = vrot.slane %v637_v24, 1  ;;  %v645_v39 = vrot.slane %v644_v60, 1  ;;  %v654_v61 = vsel %vm429_vm0, %v2234_v31, 0.0  ;;  %v3477_v5 = vcombine.high %v2234_v31, %v2234_v31 }
  0xed   :  { %v652_v55 = vrot.slane %v651_v17, 1  ;;  %v668_v7 = vsel %vm429_vm0, %v2237_v34, 0.0  ;;  %v3478_v3 = vcombine.high %v2237_v34, %v2237_v34  ;;  %v2562_v0 = vadd.f32 %v631_v15, %v630_v56 }
  0xee   :  { %v661_v32 = vsel %vm429_vm0, %v3477_v5, 0.0  ;;  %v2564_v20 = vadd.f32 %v638_v10, %v637_v24  ;;  %v2566_v58 = vadd.f32 %v645_v39, %v644_v60  ;;  %v655_v2 = vrot.slane %v654_v61, 4 }
  0xef   :  { %v675_v29 = vsel %vm429_vm0, %v3478_v3, 0.0  ;;  %3479 = vst [vmem:[#allocation28_spill] sm:$0xff] %v2562_v0  ;;  %v2568_v33 = vadd.f32 %v652_v55, %v651_v17  ;;  %v662_v31 = vrot.slane %v661_v32, 4  ;;  %v669_v38 = vrot.slane %v668_v7, 4 }
  0xf0   :  { %3480 = vst [vmem:[#allocation29_spill] sm:$0xff] %v2564_v20  ;;  %3481 = vst [vmem:[#allocation30_spill] sm:$0xff] %v2566_v58  ;;  %v676_v21 = vrot.slane %v675_v29, 4  ;;  %v682_v30 = vsel %vm429_vm0, %v2240_v35, 0.0  ;;  %v3483_v34 = vcombine.high %v2240_v35, %v2240_v35  ;;  %v696_v24 = vsel %vm429_vm0, %v2243_v36, 0.0 }
  0xf1   :  { %3482 = vst [vmem:[#allocation31_spill] sm:$0xff] %v2568_v33  ;;  %v3484_v60 = vcombine.high %v2243_v36, %v2243_v36  ;;  %v656_v56 = vadd.f32 %v655_v2, %v654_v61  ;;  %v663_v8 = vadd.f32 %v662_v31, %v661_v32  ;;  %v670_v1 = vadd.f32 %v669_v38, %v668_v7 }
  0xf2   :  { %v689_v28 = vsel %vm429_vm0, %v3483_v34, 0.0  ;;  %v677_v6 = vadd.f32 %v676_v21, %v675_v29  ;;  %v683_v63 = vrot.slane %v682_v30, 4  ;;  %v697_v45 = vrot.slane %v696_v24, 4 }
  0xf3   :  { %v703_v17 = vsel %vm429_vm0, %v3484_v60, 0.0  ;;  %v690_v22 = vrot.slane %v689_v28, 4  ;;  %v657_v50 = vrot.slane %v656_v56, 2  ;;  %v664_v35 = vrot.slane %v663_v8, 2 }
  0xf4   :  { %v704_v23 = vrot.slane %v703_v17, 4  ;;  %v671_v25 = vrot.slane %v670_v1, 2  ;;  %v678_v15 = vrot.slane %v677_v6, 2  ;;  %v684_v10 = vadd.f32 %v683_v63, %v682_v30 }
  0xf5   :  { %v691_v39 = vadd.f32 %v690_v22, %v689_v28  ;;  %v698_v55 = vadd.f32 %v697_v45, %v696_v24  ;;  %v658_v3 = vadd.f32 %v657_v50, %v656_v56  ;;  %v665_v36 = vadd.f32 %v664_v35, %v663_v8 }
  0xf6   :  { %v705_v5 = vadd.f32 %v704_v23, %v703_v17  ;;  %v672_v34 = vadd.f32 %v671_v25, %v670_v1  ;;  %v679_v60 = vadd.f32 %v678_v15, %v677_v6  ;;  %v685_v61 = vrot.slane %v684_v10, 2 }
  0xf7   :  { %v692_v32 = vrot.slane %v691_v39, 2  ;;  %v699_v7 = vrot.slane %v698_v55, 2  ;;  %v659_v2 = vrot.slane %v658_v3, 1  ;;  %v666_v31 = vrot.slane %v665_v36, 1 }
  0xf8   :  { %v706_v29 = vrot.slane %v705_v5, 2  ;;  %v673_v38 = vrot.slane %v672_v34, 1  ;;  %v680_v21 = vrot.slane %v679_v60, 1  ;;  %v686_v33 = vadd.f32 %v685_v61, %v684_v10 }
  0xf9   :  { %v693_v58 = vadd.f32 %v692_v32, %v691_v39  ;;  %v700_v20 = vadd.f32 %v699_v7, %v698_v55  ;;  %v2582_v30 = vadd.f32 %v659_v2, %v658_v3  ;;  %v2584_v28 = vadd.f32 %v666_v31, %v665_v36 }
  0xfa   :  { %v707_v0 = vadd.f32 %v706_v29, %v705_v5  ;;  %v2586_v24 = vadd.f32 %v673_v38, %v672_v34  ;;  %v2588_v17 = vadd.f32 %v680_v21, %v679_v60  ;;  %v687_v56 = vrot.slane %v686_v33, 1 }
  0xfb   :  { %v694_v8 = vrot.slane %v693_v58, 1  ;;  %v701_v1 = vrot.slane %v700_v20, 1  ;;  %v710_v63 = vsel %vm429_vm0, %v2246_v37, 0.0  ;;  %v3485_v22 = vcombine.high %v2246_v37, %v2246_v37 }
  0xfc   :  { %v708_v6 = vrot.slane %v707_v0, 1  ;;  %v724_v23 = vsel %vm429_vm0, %v2249_v40, 0.0  ;;  %v3486_v50 = vcombine.high %v2249_v40, %v2249_v40  ;;  %v2602_v25 = vadd.f32 %v687_v56, %v686_v33 }
  0xfd   :  { %v717_v45 = vsel %vm429_vm0, %v3485_v22, 0.0  ;;  %v2604_v15 = vadd.f32 %v694_v8, %v693_v58  ;;  %v2606_v10 = vadd.f32 %v701_v1, %v700_v20  ;;  %v711_v55 = vrot.slane %v710_v63, 4 }
  0xfe   :  { %v731_v35 = vsel %vm429_vm0, %v3486_v50, 0.0  ;;  %3487 = vst [vmem:[#allocation32_spill] sm:$0xff] %v2602_v25  ;;  %v2608_v39 = vadd.f32 %v708_v6, %v707_v0  ;;  %v718_v37 = vrot.slane %v717_v45, 4  ;;  %v725_v5 = vrot.slane %v724_v23, 4 }
  0xff   :  { %3488 = vst [vmem:[#allocation33_spill] sm:$0xff] %v2604_v15  ;;  %3489 = vst [vmem:[#allocation34_spill] sm:$0xff] %v2606_v10  ;;  %v732_v3 = vrot.slane %v731_v35, 4  ;;  %v738_v36 = vsel %vm429_vm0, %v2252_v41, 0.0  ;;  %v3491_v40 = vcombine.high %v2252_v41, %v2252_v41  ;;  %v752_v58 = vsel %vm429_vm0, %v2255_v42, 0.0 }
 0x100   :  { %3490 = vst [vmem:[#allocation35_spill] sm:$0xff] %v2608_v39  ;;  %v3492_v20 = vcombine.high %v2255_v42, %v2255_v42  ;;  %v712_v33 = vadd.f32 %v711_v55, %v710_v63  ;;  %v719_v60 = vadd.f32 %v718_v37, %v717_v45  ;;  %v726_v61 = vadd.f32 %v725_v5, %v724_v23 }
 0x101   :  { %v745_v34 = vsel %vm429_vm0, %v3491_v40, 0.0  ;;  %v733_v32 = vadd.f32 %v732_v3, %v731_v35  ;;  %v739_v7 = vrot.slane %v738_v36, 4  ;;  %v753_v2 = vrot.slane %v752_v58, 4 }
 0x102   :  { %v759_v0 = vsel %vm429_vm0, %v3492_v20, 0.0  ;;  %v746_v29 = vrot.slane %v745_v34, 4  ;;  %v713_v38 = vrot.slane %v712_v33, 2  ;;  %v720_v41 = vrot.slane %v719_v60, 2 }
 0x103   :  { %v760_v31 = vrot.slane %v759_v0, 4  ;;  %v727_v21 = vrot.slane %v726_v61, 2  ;;  %v734_v56 = vrot.slane %v733_v32, 2  ;;  %v740_v8 = vadd.f32 %v739_v7, %v738_v36 }
 0x104   :  { %v747_v1 = vadd.f32 %v746_v29, %v745_v34  ;;  %v754_v6 = vadd.f32 %v753_v2, %v752_v58  ;;  %v714_v50 = vadd.f32 %v713_v38, %v712_v33  ;;  %v721_v42 = vadd.f32 %v720_v41, %v719_v60 }
 0x105   :  { %v761_v22 = vadd.f32 %v760_v31, %v759_v0  ;;  %v728_v40 = vadd.f32 %v727_v21, %v726_v61  ;;  %v735_v20 = vadd.f32 %v734_v56, %v733_v32  ;;  %v741_v63 = vrot.slane %v740_v8, 2 }
 0x106   :  { %v748_v45 = vrot.slane %v747_v1, 2  ;;  %v755_v23 = vrot.slane %v754_v6, 2  ;;  %v715_v55 = vrot.slane %v714_v50, 1  ;;  %v722_v37 = vrot.slane %v721_v42, 1 }
 0x107   :  { %v762_v35 = vrot.slane %v761_v22, 2  ;;  %v729_v5 = vrot.slane %v728_v40, 1  ;;  %v736_v3 = vrot.slane %v735_v20, 1  ;;  %v742_v39 = vadd.f32 %v741_v63, %v740_v8 }
 0x108   :  { %v749_v10 = vadd.f32 %v748_v45, %v747_v1  ;;  %v756_v15 = vadd.f32 %v755_v23, %v754_v6  ;;  %v2622_v36 = vadd.f32 %v715_v55, %v714_v50  ;;  %v2624_v34 = vadd.f32 %v722_v37, %v721_v42 }
 0x109   :  { %v763_v25 = vadd.f32 %v762_v35, %v761_v22  ;;  %v2626_v58 = vadd.f32 %v729_v5, %v728_v40  ;;  %v2628_v0 = vadd.f32 %v736_v3, %v735_v20  ;;  %v743_v33 = vrot.slane %v742_v39, 1 }
 0x10a   :  { %v750_v60 = vrot.slane %v749_v10, 1  ;;  %v757_v61 = vrot.slane %v756_v15, 1  ;;  %v766_v7 = vsel %vm429_vm0, %v2258_v43, 0.0  ;;  %v3493_v29 = vcombine.high %v2258_v43, %v2258_v43 }
 0x10b   :  { %v764_v32 = vrot.slane %v763_v25, 1  ;;  %v780_v31 = vsel %vm429_vm0, %v2261_v46, 0.0  ;;  %v3494_v38 = vcombine.high %v2261_v46, %v2261_v46  ;;  %v2642_v21 = vadd.f32 %v743_v33, %v742_v39 }
 0x10c   :  { %v773_v2 = vsel %vm429_vm0, %v3493_v29, 0.0  ;;  %v2644_v56 = vadd.f32 %v750_v60, %v749_v10  ;;  %v2646_v8 = vadd.f32 %v757_v61, %v756_v15  ;;  %v767_v6 = vrot.slane %v766_v7, 4 }
 0x10d   :  { %v787_v41 = vsel %vm429_vm0, %v3494_v38, 0.0  ;;  %3495 = vst [vmem:[#allocation36_spill] sm:$0xff] %v2642_v21  ;;  %v2648_v1 = vadd.f32 %v764_v32, %v763_v25  ;;  %v774_v43 = vrot.slane %v773_v2, 4  ;;  %v781_v22 = vrot.slane %v780_v31, 4 }
 0x10e   :  { %3496 = vst [vmem:[#allocation37_spill] sm:$0xff] %v2644_v56  ;;  %3497 = vst [vmem:[#allocation38_spill] sm:$0xff] %v2646_v8  ;;  %v788_v50 = vrot.slane %v787_v41, 4  ;;  %v794_v42 = vsel %vm429_vm0, %v2264_v47, 0.0  ;;  %v3499_v46 = vcombine.high %v2264_v47, %v2264_v47  ;;  %v808_v10 = vsel %vm429_vm0, %v2267_v48, 0.0 }
 0x10f   :  { %3498 = vst [vmem:[#allocation39_spill] sm:$0xff] %v2648_v1  ;;  %v3500_v15 = vcombine.high %v2267_v48, %v2267_v48  ;;  %v768_v39 = vadd.f32 %v767_v6, %v766_v7  ;;  %v775_v20 = vadd.f32 %v774_v43, %v773_v2  ;;  %v782_v63 = vadd.f32 %v781_v22, %v780_v31 }
 0x110   :  { %v801_v40 = vsel %vm429_vm0, %v3499_v46, 0.0  ;;  %v789_v45 = vadd.f32 %v788_v50, %v787_v41  ;;  %v795_v23 = vrot.slane %v794_v42, 4  ;;  %v809_v55 = vrot.slane %v808_v10, 4 }
 0x111   :  { %v815_v25 = vsel %vm429_vm0, %v3500_v15, 0.0  ;;  %v802_v35 = vrot.slane %v801_v40, 4  ;;  %v769_v5 = vrot.slane %v768_v39, 2  ;;  %v776_v47 = vrot.slane %v775_v20, 2 }
 0x112   :  { %v816_v37 = vrot.slane %v815_v25, 4  ;;  %v783_v3 = vrot.slane %v782_v63, 2  ;;  %v790_v33 = vrot.slane %v789_v45, 2  ;;  %v796_v60 = vadd.f32 %v795_v23, %v794_v42 }
 0x113   :  { %v803_v61 = vadd.f32 %v802_v35, %v801_v40  ;;  %v810_v32 = vadd.f32 %v809_v55, %v808_v10  ;;  %v770_v38 = vadd.f32 %v769_v5, %v768_v39  ;;  %v777_v48 = vadd.f32 %v776_v47, %v775_v20 }
 0x114   :  { %v817_v29 = vadd.f32 %v816_v37, %v815_v25  ;;  %v784_v46 = vadd.f32 %v783_v3, %v782_v63  ;;  %v791_v15 = vadd.f32 %v790_v33, %v789_v45  ;;  %v797_v7 = vrot.slane %v796_v60, 2 }
 0x115   :  { %v804_v2 = vrot.slane %v803_v61, 2  ;;  %v811_v31 = vrot.slane %v810_v32, 2  ;;  %v771_v6 = vrot.slane %v770_v38, 1  ;;  %v778_v43 = vrot.slane %v777_v48, 1 }
 0x116   :  { %v818_v41 = vrot.slane %v817_v29, 2  ;;  %v785_v22 = vrot.slane %v784_v46, 1  ;;  %v792_v50 = vrot.slane %v791_v15, 1  ;;  %v798_v1 = vadd.f32 %v797_v7, %v796_v60 }
 0x117   :  { %v805_v8 = vadd.f32 %v804_v2, %v803_v61  ;;  %v812_v56 = vadd.f32 %v811_v31, %v810_v32  ;;  %v2662_v42 = vadd.f32 %v771_v6, %v770_v38  ;;  %v2664_v40 = vadd.f32 %v778_v43, %v777_v48 }
 0x118   :  { %v819_v21 = vadd.f32 %v818_v41, %v817_v29  ;;  %v2666_v10 = vadd.f32 %v785_v22, %v784_v46  ;;  %v2668_v25 = vadd.f32 %v792_v50, %v791_v15  ;;  %v799_v39 = vrot.slane %v798_v1, 1 }
 0x119   :  { %v806_v20 = vrot.slane %v805_v8, 1  ;;  %v813_v63 = vrot.slane %v812_v56, 1  ;;  %v822_v23 = vsel %vm429_vm0, %v2270_v51, 0.0  ;;  %v3501_v35 = vcombine.high %v2270_v51, %v2270_v51 }
 0x11a   :  { %v820_v45 = vrot.slane %v819_v21, 1  ;;  %v836_v37 = vsel %vm429_vm0, %v2273_v52, 0.0  ;;  %v3502_v5 = vcombine.high %v2273_v52, %v2273_v52  ;;  %v2682_v3 = vadd.f32 %v799_v39, %v798_v1 }
 0x11b   :  { %v829_v55 = vsel %vm429_vm0, %v3501_v35, 0.0  ;;  %v2684_v33 = vadd.f32 %v806_v20, %v805_v8  ;;  %v2686_v60 = vadd.f32 %v813_v63, %v812_v56  ;;  %v823_v32 = vrot.slane %v822_v23, 4 }
 0x11c   :  { %v843_v47 = vsel %vm429_vm0, %v3502_v5, 0.0  ;;  %3503 = vst [vmem:[#allocation40_spill] sm:$0xff] %v2682_v3  ;;  %v2688_v61 = vadd.f32 %v820_v45, %v819_v21  ;;  %v830_v51 = vrot.slane %v829_v55, 4  ;;  %v837_v29 = vrot.slane %v836_v37, 4 }
 0x11d   :  { %3504 = vst [vmem:[#allocation41_spill] sm:$0xff] %v2684_v33  ;;  %3505 = vst [vmem:[#allocation42_spill] sm:$0xff] %v2686_v60  ;;  %v844_v38 = vrot.slane %v843_v47, 4  ;;  %v850_v48 = vsel %vm429_vm0, %v2276_v53, 0.0  ;;  %v3507_v52 = vcombine.high %v2276_v53, %v2276_v53  ;;  %v864_v8 = vsel %vm429_vm0, %v2279_v54, 0.0 }
 0x11e   :  { %3506 = vst [vmem:[#allocation43_spill] sm:$0xff] %v2688_v61  ;;  %v3508_v56 = vcombine.high %v2279_v54, %v2279_v54  ;;  %v824_v1 = vadd.f32 %v823_v32, %v822_v23  ;;  %v831_v15 = vadd.f32 %v830_v51, %v829_v55  ;;  %v838_v7 = vadd.f32 %v837_v29, %v836_v37 }
 0x11f   :  { %v857_v46 = vsel %vm429_vm0, %v3507_v52, 0.0  ;;  %v845_v2 = vadd.f32 %v844_v38, %v843_v47  ;;  %v851_v31 = vrot.slane %v850_v48, 4  ;;  %v865_v6 = vrot.slane %v864_v8, 4 }
 0x120   :  { %v871_v21 = vsel %vm429_vm0, %v3508_v56, 0.0  ;;  %v858_v41 = vrot.slane %v857_v46, 4  ;;  %v825_v22 = vrot.slane %v824_v1, 2  ;;  %v832_v53 = vrot.slane %v831_v15, 2 }
 0x121   :  { %v872_v43 = vrot.slane %v871_v21, 4  ;;  %v839_v50 = vrot.slane %v838_v7, 2  ;;  %v846_v39 = vrot.slane %v845_v2, 2  ;;  %v852_v20 = vadd.f32 %v851_v31, %v850_v48  ;;  %v3513_v31 = vld [vmem:[#allocation3_spill] sm:$0xff] }
 0x122   :  { %v859_v63 = vadd.f32 %v858_v41, %v857_v46  ;;  %v866_v45 = vadd.f32 %v865_v6, %v864_v8  ;;  %v826_v5 = vadd.f32 %v825_v22, %v824_v1  ;;  %v833_v54 = vadd.f32 %v832_v53, %v831_v15  ;;  %v3515_v22 = vld [vmem:[#allocation4_spill] sm:$0xff] }
 0x123   :  { %v873_v35 = vadd.f32 %v872_v43, %v871_v21  ;;  %v840_v52 = vadd.f32 %v839_v50, %v838_v7  ;;  %v847_v56 = vadd.f32 %v846_v39, %v845_v2  ;;  %v853_v23 = vrot.slane %v852_v20, 2 }
 0x124   :  { %v860_v55 = vrot.slane %v859_v63, 2  ;;  %v867_v37 = vrot.slane %v866_v45, 2  ;;  %v827_v32 = vrot.slane %v826_v5, 1  ;;  %v834_v51 = vrot.slane %v833_v54, 1 }
 0x125   :  { %v874_v47 = vrot.slane %v873_v35, 2  ;;  %v841_v29 = vrot.slane %v840_v52, 1  ;;  %v848_v38 = vrot.slane %v847_v56, 1  ;;  %v854_v61 = vadd.f32 %v853_v23, %v852_v20  ;;  %v3521_v23 = vld [vmem:[#allocation5_spill] sm:$0xff] }
 0x126   :  { %v861_v60 = vadd.f32 %v860_v55, %v859_v63  ;;  %v868_v33 = vadd.f32 %v867_v37, %v866_v45  ;;  %v2702_v48 = vadd.f32 %v827_v32, %v826_v5  ;;  %v2704_v46 = vadd.f32 %v834_v51, %v833_v54 }
 0x127   :  { %v875_v3 = vadd.f32 %v874_v47, %v873_v35  ;;  %v2706_v8 = vadd.f32 %v841_v29, %v840_v52  ;;  %v2708_v21 = vadd.f32 %v848_v38, %v847_v56  ;;  %v855_v1 = vrot.slane %v854_v61, 1 }
 0x128   :  { %3509 = vst [vmem:[#allocation44_spill] sm:$0xff] %v2702_v48  ;;  %3510 = vst [vmem:[#allocation45_spill] sm:$0xff] %v2704_v46  ;;  %v862_v15 = vrot.slane %v861_v60, 1  ;;  %v869_v7 = vrot.slane %v868_v33, 1  ;;  %v878_v41 = vsel %vm429_vm0, %v3513_v31, 0.0  ;;  %v3514_v6 = vcombine.high %v3513_v31, %v3513_v31 }
 0x129   :  { %3511 = vst [vmem:[#allocation46_spill] sm:$0xff] %v2706_v8  ;;  %3512 = vst [vmem:[#allocation47_spill] sm:$0xff] %v2708_v21  ;;  %v876_v2 = vrot.slane %v875_v3, 1  ;;  %v892_v53 = vsel %vm429_vm0, %v3515_v22, 0.0  ;;  %v3516_v50 = vcombine.high %v3515_v22, %v3515_v22  ;;  %v2722_v20 = vadd.f32 %v855_v1, %v854_v61  ;;  %v3523_v61 = vld [vmem:[#allocation6_spill] sm:$0xff] }
 0x12a   :  { %v885_v43 = vsel %vm429_vm0, %v3514_v6, 0.0  ;;  %v2724_v63 = vadd.f32 %v862_v15, %v861_v60  ;;  %v2726_v45 = vadd.f32 %v869_v7, %v868_v33  ;;  %v879_v5 = vrot.slane %v878_v41, 4 }
 0x12b   :  { %v899_v39 = vsel %vm429_vm0, %v3516_v50, 0.0  ;;  %3517 = vst [vmem:[#allocation3_spill] sm:$0xff] %v2722_v20  ;;  %v2728_v35 = vadd.f32 %v876_v2, %v875_v3  ;;  %v886_v54 = vrot.slane %v885_v43, 4  ;;  %v893_v52 = vrot.slane %v892_v53, 4 }
 0x12c   :  { %3518 = vst [vmem:[#allocation4_spill] sm:$0xff] %v2724_v63  ;;  %3519 = vst [vmem:[#allocation48_spill] sm:$0xff] %v2726_v45  ;;  %v900_v56 = vrot.slane %v899_v39, 4  ;;  %v906_v55 = vsel %vm429_vm0, %v3521_v23, 0.0  ;;  %v3522_v37 = vcombine.high %v3521_v23, %v3521_v23  ;;  %v920_v60 = vsel %vm429_vm0, %v3523_v61, 0.0 }
 0x12d   :  { %3520 = vst [vmem:[#allocation49_spill] sm:$0xff] %v2728_v35  ;;  %v3524_v33 = vcombine.high %v3523_v61, %v3523_v61  ;;  %v880_v32 = vadd.f32 %v879_v5, %v878_v41  ;;  %v887_v51 = vadd.f32 %v886_v54, %v885_v43  ;;  %v894_v29 = vadd.f32 %v893_v52, %v892_v53 }
 0x12e   :  { %v913_v47 = vsel %vm429_vm0, %v3522_v37, 0.0  ;;  %v901_v38 = vadd.f32 %v900_v56, %v899_v39  ;;  %v907_v1 = vrot.slane %v906_v55, 4  ;;  %v921_v7 = vrot.slane %v920_v60, 4 }
 0x12f   :  { %v927_v3 = vsel %vm429_vm0, %v3524_v33, 0.0  ;;  %v914_v15 = vrot.slane %v913_v47, 4  ;;  %v881_v31 = vrot.slane %v880_v32, 2  ;;  %v888_v6 = vrot.slane %v887_v51, 2 }
 0x130   :  { %v928_v2 = vrot.slane %v927_v3, 4  ;;  %v895_v22 = vrot.slane %v894_v29, 2  ;;  %v902_v50 = vrot.slane %v901_v38, 2  ;;  %v908_v23 = vadd.f32 %v907_v1, %v906_v55  ;;  %v3529_v1 = vld [vmem:[#allocation7_spill] sm:$0xff] }
 0x131   :  { %v915_v37 = vadd.f32 %v914_v15, %v913_v47  ;;  %v922_v35 = vadd.f32 %v921_v7, %v920_v60  ;;  %v882_v63 = vadd.f32 %v881_v31, %v880_v32  ;;  %v889_v61 = vadd.f32 %v888_v6, %v887_v51 }
 0x132   :  { %v929_v45 = vadd.f32 %v928_v2, %v927_v3  ;;  %v896_v20 = vadd.f32 %v895_v22, %v894_v29  ;;  %v903_v33 = vadd.f32 %v902_v50, %v901_v38  ;;  %v909_v41 = vrot.slane %v908_v23, 2 }
 0x133   :  { %v916_v43 = vrot.slane %v915_v37, 2  ;;  %v923_v53 = vrot.slane %v922_v35, 2  ;;  %v883_v5 = vrot.slane %v882_v63, 1  ;;  %v890_v54 = vrot.slane %v889_v61, 1 }
 0x134   :  { %v930_v39 = vrot.slane %v929_v45, 2  ;;  %v897_v52 = vrot.slane %v896_v20, 1  ;;  %v904_v56 = vrot.slane %v903_v33, 1  ;;  %v910_v21 = vadd.f32 %v909_v41, %v908_v23  ;;  %v3537_v41 = vld [vmem:[#allocation9_spill] sm:$0xff] }
 0x135   :  { %v917_v8 = vadd.f32 %v916_v43, %v915_v37  ;;  %v924_v46 = vadd.f32 %v923_v53, %v922_v35  ;;  %v2742_v55 = vadd.f32 %v883_v5, %v882_v63  ;;  %v2744_v47 = vadd.f32 %v890_v54, %v889_v61  ;;  %v3531_v63 = vld [vmem:[#allocation8_spill] sm:$0xff] }
 0x136   :  { %v931_v48 = vadd.f32 %v930_v39, %v929_v45  ;;  %v2746_v60 = vadd.f32 %v897_v52, %v896_v20  ;;  %v2748_v3 = vadd.f32 %v904_v56, %v903_v33  ;;  %v911_v32 = vrot.slane %v910_v21, 1 }
 0x137   :  { %3525 = vst [vmem:[#allocation5_spill] sm:$0xff] %v2742_v55  ;;  %3526 = vst [vmem:[#allocation6_spill] sm:$0xff] %v2744_v47  ;;  %v918_v51 = vrot.slane %v917_v8, 1  ;;  %v925_v29 = vrot.slane %v924_v46, 1  ;;  %v934_v15 = vsel %vm429_vm0, %v3529_v1, 0.0  ;;  %v3530_v7 = vcombine.high %v3529_v1, %v3529_v1 }
 0x138   :  { %3527 = vst [vmem:[#allocation50_spill] sm:$0xff] %v2746_v60  ;;  %3528 = vst [vmem:[#allocation51_spill] sm:$0xff] %v2748_v3  ;;  %v932_v38 = vrot.slane %v931_v48, 1  ;;  %v948_v35 = vsel %vm429_vm0, %v3531_v63, 0.0  ;;  %v3532_v20 = vcombine.high %v3531_v63, %v3531_v63  ;;  %v2762_v31 = vadd.f32 %v911_v32, %v910_v21  ;;  %v3539_v21 = vld [vmem:[#allocation10_spill] sm:$0xff] }
 0x139   :  { %v941_v45 = vsel %vm429_vm0, %v3530_v7, 0.0  ;;  %v2764_v6 = vadd.f32 %v918_v51, %v917_v8  ;;  %v2766_v22 = vadd.f32 %v925_v29, %v924_v46  ;;  %v935_v23 = vrot.slane %v934_v15, 4 }
 0x13a   :  { %v955_v2 = vsel %vm429_vm0, %v3532_v20, 0.0  ;;  %3533 = vst [vmem:[#allocation7_spill] sm:$0xff] %v2762_v31  ;;  %v2768_v50 = vadd.f32 %v932_v38, %v931_v48  ;;  %v942_v37 = vrot.slane %v941_v45, 4  ;;  %v949_v61 = vrot.slane %v948_v35, 4 }
 0x13b   :  { %3534 = vst [vmem:[#allocation8_spill] sm:$0xff] %v2764_v6  ;;  %3535 = vst [vmem:[#allocation52_spill] sm:$0xff] %v2766_v22  ;;  %v956_v33 = vrot.slane %v955_v2, 4  ;;  %v962_v43 = vsel %vm429_vm0, %v3537_v41, 0.0  ;;  %v3538_v53 = vcombine.high %v3537_v41, %v3537_v41  ;;  %v976_v8 = vsel %vm429_vm0, %v3539_v21, 0.0 }
 0x13c   :  { %3536 = vst [vmem:[#allocation53_spill] sm:$0xff] %v2768_v50  ;;  %v3540_v46 = vcombine.high %v3539_v21, %v3539_v21  ;;  %v936_v5 = vadd.f32 %v935_v23, %v934_v15  ;;  %v943_v54 = vadd.f32 %v942_v37, %v941_v45  ;;  %v950_v52 = vadd.f32 %v949_v61, %v948_v35 }
 0x13d   :  { %v969_v39 = vsel %vm429_vm0, %v3538_v53, 0.0  ;;  %v957_v56 = vadd.f32 %v956_v33, %v955_v2  ;;  %v963_v32 = vrot.slane %v962_v43, 4  ;;  %v977_v29 = vrot.slane %v976_v8, 4 }
 0x13e   :  { %v983_v48 = vsel %vm429_vm0, %v3540_v46, 0.0  ;;  %v970_v51 = vrot.slane %v969_v39, 4  ;;  %v937_v1 = vrot.slane %v936_v5, 2  ;;  %v944_v7 = vrot.slane %v943_v54, 2 }
 0x13f   :  { %v984_v38 = vrot.slane %v983_v48, 4  ;;  %v951_v63 = vrot.slane %v950_v52, 2  ;;  %v958_v20 = vrot.slane %v957_v56, 2  ;;  %v964_v41 = vadd.f32 %v963_v32, %v962_v43  ;;  %v3544_v32 = vld [vmem:[#allocation11_spill] sm:$0xff] }
 0x140   :  { %v971_v53 = vadd.f32 %v970_v51, %v969_v39  ;;  %v978_v50 = vadd.f32 %v977_v29, %v976_v8  ;;  %v938_v6 = vadd.f32 %v937_v1, %v936_v5  ;;  %v945_v21 = vadd.f32 %v944_v7, %v943_v54 }
 0x141   :  { %v985_v22 = vadd.f32 %v984_v38, %v983_v48  ;;  %v952_v31 = vadd.f32 %v951_v63, %v950_v52  ;;  %v959_v46 = vadd.f32 %v958_v20, %v957_v56  ;;  %v965_v15 = vrot.slane %v964_v41, 2 }
 0x142   :  { %v972_v45 = vrot.slane %v971_v53, 2  ;;  %v979_v35 = vrot.slane %v978_v50, 2  ;;  %v939_v23 = vrot.slane %v938_v6, 1  ;;  %v946_v37 = vrot.slane %v945_v21, 1 }
 0x143   :  { %v986_v2 = vrot.slane %v985_v22, 2  ;;  %v953_v61 = vrot.slane %v952_v31, 1  ;;  %v960_v33 = vrot.slane %v959_v46, 1  ;;  %v966_v3 = vadd.f32 %v965_v15, %v964_v41  ;;  %v3552_v15 = vld [vmem:[#allocation13_spill] sm:$0xff] }
 0x144   :  { %v973_v60 = vadd.f32 %v972_v45, %v971_v53  ;;  %v980_v47 = vadd.f32 %v979_v35, %v978_v50  ;;  %v2782_v43 = vadd.f32 %v939_v23, %v938_v6  ;;  %v2784_v39 = vadd.f32 %v946_v37, %v945_v21  ;;  %v3546_v6 = vld [vmem:[#allocation12_spill] sm:$0xff] }
 0x145   :  { %v987_v55 = vadd.f32 %v986_v2, %v985_v22  ;;  %v2786_v8 = vadd.f32 %v953_v61, %v952_v31  ;;  %v2788_v48 = vadd.f32 %v960_v33, %v959_v46  ;;  %v967_v5 = vrot.slane %v966_v3, 1 }
 0x146   :  { %3541 = vst [vmem:[#allocation9_spill] sm:$0xff] %v2784_v39  ;;  %v974_v54 = vrot.slane %v973_v60, 1  ;;  %v981_v52 = vrot.slane %v980_v47, 1  ;;  %v990_v51 = vsel %vm429_vm0, %v3544_v32, 0.0  ;;  %v3545_v29 = vcombine.high %v3544_v32, %v3544_v32 }
 0x147   :  { %3542 = vst [vmem:[#allocation10_spill] sm:$0xff] %v2786_v8  ;;  %3543 = vst [vmem:[#allocation54_spill] sm:$0xff] %v2788_v48  ;;  %v988_v56 = vrot.slane %v987_v55, 1  ;;  %v1004_v50 = vsel %vm429_vm0, %v3546_v6, 0.0  ;;  %v3547_v31 = vcombine.high %v3546_v6, %v3546_v6  ;;  %v2802_v1 = vadd.f32 %v967_v5, %v966_v3  ;;  %v3554_v3 = vld [vmem:[#allocation14_spill] sm:$0xff]  ;;  %v2822_v48 = vpop.permute.xlu1 %1063 }
 0x148   :  { %v997_v22 = vsel %vm429_vm0, %v3545_v29, 0.0  ;;  %v2804_v7 = vadd.f32 %v974_v54, %v973_v60  ;;  %v2806_v63 = vadd.f32 %v981_v52, %v980_v47  ;;  %v991_v41 = vrot.slane %v990_v51, 4 }
 0x149   :  { %v1011_v38 = vsel %vm429_vm0, %v3547_v31, 0.0  ;;  %3548 = vst [vmem:[#allocation11_spill] sm:$0xff] %v2802_v1  ;;  %v2808_v20 = vadd.f32 %v988_v56, %v987_v55  ;;  %v998_v53 = vrot.slane %v997_v22, 4  ;;  %v1005_v21 = vrot.slane %v1004_v50, 4 }
 0x14a   :  { %3549 = vst [vmem:[#allocation12_spill] sm:$0xff] %v2804_v7  ;;  %3550 = vst [vmem:[#allocation55_spill] sm:$0xff] %v2806_v63  ;;  %v1012_v46 = vrot.slane %v1011_v38, 4  ;;  %v1018_v45 = vsel %vm429_vm0, %v3552_v15, 0.0  ;;  %v3553_v35 = vcombine.high %v3552_v15, %v3552_v15  ;;  %v1032_v60 = vsel %vm429_vm0, %v3554_v3, 0.0 }
 0x14b   :  { %3551 = vst [vmem:[#allocation56_spill] sm:$0xff] %v2808_v20  ;;  %v3555_v47 = vcombine.high %v3554_v3, %v3554_v3  ;;  %v992_v23 = vadd.f32 %v991_v41, %v990_v51  ;;  %v999_v37 = vadd.f32 %v998_v53, %v997_v22  ;;  %v1006_v61 = vadd.f32 %v1005_v21, %v1004_v50 }
 0x14c   :  { %v1025_v2 = vsel %vm429_vm0, %v3553_v35, 0.0  ;;  %v1013_v33 = vadd.f32 %v1012_v46, %v1011_v38  ;;  %v1019_v5 = vrot.slane %v1018_v45, 4  ;;  %v1033_v52 = vrot.slane %v1032_v60, 4 }
 0x14d   :  { %v1039_v55 = vsel %vm429_vm0, %v3555_v47, 0.0  ;;  %v1026_v54 = vrot.slane %v1025_v2, 4  ;;  %v993_v32 = vrot.slane %v992_v23, 2  ;;  %v1000_v29 = vrot.slane %v999_v37, 2 }
 0x14e   :  { %v1040_v56 = vrot.slane %v1039_v55, 4  ;;  %v1007_v6 = vrot.slane %v1006_v61, 2  ;;  %v1014_v31 = vrot.slane %v1013_v33, 2  ;;  %v1020_v15 = vadd.f32 %v1019_v5, %v1018_v45 }
 0x14f   :  { %v1027_v35 = vadd.f32 %v1026_v54, %v1025_v2  ;;  %v1034_v20 = vadd.f32 %v1033_v52, %v1032_v60  ;;  %v994_v7 = vadd.f32 %v993_v32, %v992_v23  ;;  %v1001_v3 = vadd.f32 %v1000_v29, %v999_v37  ;;  %v3556_v52 = vld [vmem:[#allocation15_spill] sm:$0xff] }
 0x150   :  { %v1041_v63 = vadd.f32 %v1040_v56, %v1039_v55  ;;  %v1008_v1 = vadd.f32 %v1007_v6, %v1006_v61  ;;  %v1015_v47 = vadd.f32 %v1014_v31, %v1013_v33  ;;  %v1021_v51 = vrot.slane %v1020_v15, 2 }
 0x151   :  { %v1028_v22 = vrot.slane %v1027_v35, 2  ;;  %v1035_v50 = vrot.slane %v1034_v20, 2  ;;  %v995_v41 = vrot.slane %v994_v7, 1  ;;  %v1002_v53 = vrot.slane %v1001_v3, 1 }
 0x152   :  { %v1042_v38 = vrot.slane %v1041_v63, 2  ;;  %v1009_v21 = vrot.slane %v1008_v1, 1  ;;  %v1016_v46 = vrot.slane %v1015_v47, 1  ;;  %v1022_v8 = vadd.f32 %v1021_v51, %v1020_v15  ;;  %v3560_v51 = vld [vmem:[#allocation18_spill] sm:$0xff] }
 0x153   :  { %v1029_v39 = vadd.f32 %v1028_v22, %v1027_v35  ;;  %v1036_v45 = vadd.f32 %v1035_v50, %v1034_v20  ;;  %v2824_v60 = vadd.f32 %v995_v41, %v994_v7  ;;  %v2826_v55 = vadd.f32 %v1002_v53, %v1001_v3  ;;  %v3561_v50 = vld [vmem:[#allocation19_spill] sm:$0xff] }
 0x154   :  { %v1043_v2 = vadd.f32 %v1042_v38, %v1041_v63  ;;  %v2828_v23 = vadd.f32 %v1009_v21, %v1008_v1  ;;  %v2830_v37 = vadd.f32 %v1016_v46, %v1015_v47  ;;  %v1023_v61 = vrot.slane %v1022_v8, 1 }
 0x155   :  { %v1030_v33 = vrot.slane %v1029_v39, 1  ;;  %v1037_v5 = vrot.slane %v1036_v45, 1  ;;  %v1046_v56 = vsel %vm429_vm0, %v3556_v52, 0.0  ;;  %v3557_v32 = vcombine.high %v3556_v52, %v3556_v52 }
 0x156   :  { %v1044_v54 = vrot.slane %v1043_v2, 1  ;;  %v2840_v7 = vadd.f32 %v2822_v48, %v2422_v27  ;;  %v2844_v1 = vadd.f32 %v2822_v48, %v2424_v26  ;;  %v2846_v20 = vadd.f32 %v1023_v61, %v1022_v8  ;;  %v3558_v26 = vld [vmem:[#allocation16_spill] sm:$0xff]  ;;  %v3563_v61 = vld [vmem:[#allocation21_spill] sm:$0xff] }
 0x157   :  { %v1053_v63 = vsel %vm429_vm0, %v3557_v32, 0.0  ;;  %v2848_v29 = vadd.f32 %v1030_v33, %v1029_v39  ;;  %v2850_v6 = vadd.f32 %v1037_v5, %v1036_v45  ;;  %v1047_v15 = vrot.slane %v1046_v56, 4  ;;  %v3559_v39 = vld [vmem:[#allocation17_spill] sm:$0xff]  ;;  %v3562_v45 = vld [vmem:[#allocation20_spill] sm:$0xff] }
 0x158   :  { %v2852_v31 = vadd.f32 %v1044_v54, %v1043_v2  ;;  %v1054_v35 = vrot.slane %v1053_v63, 4  ;;  %v2856_v3 = vadd.f32 %v2822_v48, %v2426_v14  ;;  %v2860_v27 = vadd.f32 %v2822_v48, %v2428_v9 }
 0x159   :  { %v2864_v8 = vadd.f32 %v2822_v48, %v3558_v26  ;;  %v2868_v47 = vadd.f32 %v2822_v48, %v3559_v39  ;;  %v2872_v22 = vadd.f32 %v2822_v48, %v3560_v51  ;;  %v2876_v14 = vadd.f32 %v2822_v48, %v3561_v50  ;;  %v3566_v26 = vld [vmem:[#allocation24_spill] sm:$0xff] }
 0x15a   :  { %v1048_v38 = vadd.f32 %v1047_v15, %v1046_v56  ;;  %v1055_v41 = vadd.f32 %v1054_v35, %v1053_v63  ;;  %v2880_v9 = vadd.f32 %v2822_v48, %v2462_v13  ;;  %v2884_v53 = vadd.f32 %v2822_v48, %v2464_v49  ;;  %v3564_v49 = vld [vmem:[#allocation22_spill] sm:$0xff] }
 0x15b   :  { %v2888_v21 = vadd.f32 %v2822_v48, %v2466_v59  ;;  %v2892_v46 = vadd.f32 %v2822_v48, %v2468_v57  ;;  %v2896_v2 = vadd.f32 %v2822_v48, %v3562_v45  ;;  %v2900_v13 = vadd.f32 %v2822_v48, %v3563_v61  ;;  %v3565_v59 = vld [vmem:[#allocation23_spill] sm:$0xff] }
 0x15c   :  { %v1049_v33 = vrot.slane %v1048_v38, 2  ;;  %v1056_v5 = vrot.slane %v1055_v41, 2  ;;  %v2904_v54 = vadd.f32 %v2822_v48, %v3564_v49  ;;  %v2908_v52 = vadd.f32 %v2822_v48, %v3565_v59  ;;  %v3571_v49 = vld [vmem:[#allocation28_spill] sm:$0xff] }
 0x15d   :  { %v2912_v57 = vadd.f32 %v2822_v48, %v2502_v18  ;;  %v2916_v56 = vadd.f32 %v2822_v48, %v2504_v4  ;;  %v2920_v32 = vadd.f32 %v2822_v48, %v2506_v44  ;;  %v2924_v63 = vadd.f32 %v2822_v48, %v2508_v16  ;;  %v3567_v18 = vld [vmem:[#allocation25_spill] sm:$0xff]  ;;  %v3568_v4 = vld [vmem:[#allocation26_spill] sm:$0xff]  ;;  %v3569_v44 = vld [vmem:[#allocation27_spill] sm:$0xff] }
 0x15e   :  { %v1050_v15 = vadd.f32 %v1049_v33, %v1048_v38  ;;  %v1057_v35 = vadd.f32 %v1056_v5, %v1055_v41  ;;  %v2928_v39 = vadd.f32 %v2822_v48, %v3566_v26  ;;  %v2932_v51 = vadd.f32 %v2822_v48, %v3567_v18 }
 0x15f   :  { %v2936_v50 = vadd.f32 %v2822_v48, %v3568_v4  ;;  %v2940_v45 = vadd.f32 %v2822_v48, %v3569_v44  ;;  %v2944_v16 = vadd.f32 %v2822_v48, %v2542_v11  ;;  %v2948_v38 = vadd.f32 %v2822_v48, %v2544_v19  ;;  %v3572_v11 = vld [vmem:[#allocation29_spill] sm:$0xff]  ;;  %v3573_v19 = vld [vmem:[#allocation30_spill] sm:$0xff]  ;;  %v3574_v4 = vld [vmem:[#allocation31_spill] sm:$0xff] }
 0x160   :  { %v1051_v41 = vrot.slane %v1050_v15, 1  ;;  %v1058_v61 = vrot.slane %v1057_v35, 1  ;;  %v2952_v33 = vadd.f32 %v2822_v48, %v2546_v12  ;;  %v2956_v5 = vadd.f32 %v2822_v48, %v2548_v62 }
 0x161   :  { %v2960_v59 = vadd.f32 %v2822_v48, %v3571_v49  ;;  %v2964_v26 = vadd.f32 %v2822_v48, %v3572_v11  ;;  %v2968_v18 = vadd.f32 %v2822_v48, %v3573_v19  ;;  %v2972_v12 = vadd.f32 %v2822_v48, %v3574_v4  ;;  %v3575_v4 = vld [vmem:[#allocation32_spill] sm:$0xff] }
 0x162   :  { %3570 = vst [vmem:[#allocation13_spill] sm:$0xff] %v2952_v33  ;;  %v1052_v44 = vadd.f32 %v1051_v41, %v1050_v15  ;;  %v1059_v33 = vadd.f32 %v1058_v61, %v1057_v35  ;;  %v2976_v62 = vadd.f32 %v2822_v48, %v2582_v30  ;;  %v2980_v49 = vadd.f32 %v2822_v48, %v2584_v28  ;;  %v3576_v35 = vld [vmem:[#allocation33_spill] sm:$0xff]  ;;  %v3577_v41 = vld [vmem:[#allocation34_spill] sm:$0xff]  ;;  %v3579_v61 = vld [vmem:[#allocation35_spill] sm:$0xff] }
 0x163   :  { %v2984_v11 = vadd.f32 %v2822_v48, %v2586_v24  ;;  %v2988_v19 = vadd.f32 %v2822_v48, %v2588_v17  ;;  %v2992_v15 = vadd.f32 %v2822_v48, %v3575_v4  ;;  %v2996_v30 = vadd.f32 %v2822_v48, %v3576_v35 }
 0x164   :  { %v3000_v28 = vadd.f32 %v2822_v48, %v3577_v41  ;;  %v3004_v24 = vadd.f32 %v2822_v48, %v3579_v61  ;;  %v3008_v17 = vadd.f32 %v2822_v48, %v2622_v36  ;;  %v3012_v4 = vadd.f32 %v2822_v48, %v2624_v34 }
 0x165   :  { %v3016_v35 = vadd.f32 %v2822_v48, %v2626_v58  ;;  %v3020_v41 = vadd.f32 %v2822_v48, %v2628_v0  ;;  %v3040_v0 = vadd.f32 %v2822_v48, %v2662_v42 }
 0x166   :  { %3578 = vst [vmem:[#allocation14_spill] sm:$0xff] %v3000_v28  ;;  %3580 = vst [vmem:[#allocation15_spill] sm:$0xff] %v3004_v24  ;;  %v3583_v28 = vld [vmem:[#allocation36_spill] sm:$0xff]  ;;  %v3584_v24 = vld [vmem:[#allocation37_spill] sm:$0xff] }
 0x167   :  { %3581 = vst [vmem:[#allocation16_spill] sm:$0xff] %v3008_v17  ;;  %3582 = vst [vmem:[#allocation17_spill] sm:$0xff] %v3012_v4  ;;  %v3024_v61 = vadd.f32 %v2822_v48, %v3583_v28  ;;  %v3028_v36 = vadd.f32 %v2822_v48, %v3584_v24  ;;  %v3585_v17 = vld [vmem:[#allocation38_spill] sm:$0xff]  ;;  %v3587_v4 = vld [vmem:[#allocation39_spill] sm:$0xff]  ;;  %v3044_v28 = vadd.f32 %v2822_v48, %v2664_v40 }
 0x168   :  { %v3032_v34 = vadd.f32 %v2822_v48, %v3585_v17  ;;  %v3036_v58 = vadd.f32 %v2822_v48, %v3587_v4  ;;  %3589 = vst [vmem:[#allocation20_spill] sm:$0xff] %v3040_v0  ;;  %v3048_v24 = vadd.f32 %v2822_v48, %v2666_v10  ;;  %v3052_v17 = vadd.f32 %v2822_v48, %v2668_v25  ;;  %v3597_v0 = vld [vmem:[#allocation42_spill] sm:$0xff] }
 0x169   :  { %3590 = vst [vmem:[#allocation21_spill] sm:$0xff] %v3044_v28  ;;  %v3064_v40 = vadd.f32 %v2822_v48, %v3597_v0  ;;  %v3599_v28 = vld [vmem:[#allocation43_spill] sm:$0xff] }
 0x16a   :  { %3586 = vst [vmem:[#allocation18_spill] sm:$0xff] %v3032_v34  ;;  %3588 = vst [vmem:[#allocation19_spill] sm:$0xff] %v3036_v58  ;;  %v3593_v34 = vld [vmem:[#allocation40_spill] sm:$0xff]  ;;  %v3595_v58 = vld [vmem:[#allocation41_spill] sm:$0xff]  ;;  %v3068_v10 = vadd.f32 %v2822_v48, %v3599_v28 }
 0x16b   :  { %3591 = vst [vmem:[#allocation22_spill] sm:$0xff] %v3048_v24  ;;  %3592 = vst [vmem:[#allocation23_spill] sm:$0xff] %v3052_v17  ;;  %v3056_v4 = vadd.f32 %v2822_v48, %v3593_v34  ;;  %v3060_v42 = vadd.f32 %v2822_v48, %v3595_v58  ;;  %v3601_v24 = vld [vmem:[#allocation44_spill] sm:$0xff]  ;;  %v3603_v17 = vld [vmem:[#allocation45_spill] sm:$0xff] }
 0x16c   :  { %3598 = vst [vmem:[#allocation26_spill] sm:$0xff] %v3064_v40  ;;  %3600 = vst [vmem:[#allocation27_spill] sm:$0xff] %v3068_v10  ;;  %v3072_v25 = vadd.f32 %v2822_v48, %v3601_v24  ;;  %v3076_v34 = vadd.f32 %v2822_v48, %v3603_v17  ;;  %v3609_v40 = vld [vmem:[#allocation3_spill] sm:$0xff]  ;;  %v3611_v10 = vld [vmem:[#allocation4_spill] sm:$0xff] }
 0x16d   :  { %3594 = vst [vmem:[#allocation24_spill] sm:$0xff] %v3056_v4  ;;  %3596 = vst [vmem:[#allocation25_spill] sm:$0xff] %v3060_v42  ;;  %v3605_v4 = vld [vmem:[#allocation46_spill] sm:$0xff]  ;;  %v3607_v42 = vld [vmem:[#allocation47_spill] sm:$0xff]  ;;  %v3088_v28 = vadd.f32 %v2822_v48, %v3609_v40  ;;  %v3092_v24 = vadd.f32 %v2822_v48, %v3611_v10 }
 0x16e   :  { %3602 = vst [vmem:[#allocation28_spill] sm:$0xff] %v3072_v25  ;;  %3604 = vst [vmem:[#allocation29_spill] sm:$0xff] %v3076_v34  ;;  %v3080_v58 = vadd.f32 %v2822_v48, %v3605_v4  ;;  %v3084_v0 = vadd.f32 %v2822_v48, %v3607_v42  ;;  %v3613_v25 = vld [vmem:[#allocation48_spill] sm:$0xff]  ;;  %v3615_v34 = vld [vmem:[#allocation49_spill] sm:$0xff] }
 0x16f   :  { %3610 = vst [vmem:[#allocation32_spill] sm:$0xff] %v3088_v28  ;;  %3612 = vst [vmem:[#allocation33_spill] sm:$0xff] %v3092_v24  ;;  %v3096_v17 = vadd.f32 %v2822_v48, %v3613_v25  ;;  %v3100_v4 = vadd.f32 %v2822_v48, %v3615_v34  ;;  %v3621_v28 = vld [vmem:[#allocation50_spill] sm:$0xff]  ;;  %v3623_v24 = vld [vmem:[#allocation51_spill] sm:$0xff] }
 0x170   :  { %3606 = vst [vmem:[#allocation30_spill] sm:$0xff] %v3080_v58  ;;  %3608 = vst [vmem:[#allocation31_spill] sm:$0xff] %v3084_v0  ;;  %v3617_v58 = vld [vmem:[#allocation5_spill] sm:$0xff]  ;;  %v3619_v0 = vld [vmem:[#allocation6_spill] sm:$0xff]  ;;  %v3112_v10 = vadd.f32 %v2822_v48, %v3621_v28  ;;  %v3116_v25 = vadd.f32 %v2822_v48, %v3623_v24  ;;  %v3136_v24 = vadd.f32 %v2822_v48, %v2782_v43 }
 0x171   :  { %3614 = vst [vmem:[#allocation34_spill] sm:$0xff] %v3096_v17  ;;  %3616 = vst [vmem:[#allocation35_spill] sm:$0xff] %v3100_v4  ;;  %v3104_v42 = vadd.f32 %v2822_v48, %v3617_v58  ;;  %v3108_v40 = vadd.f32 %v2822_v48, %v3619_v0  ;;  %v3624_v17 = vld [vmem:[#allocation7_spill] sm:$0xff]  ;;  %v3626_v4 = vld [vmem:[#allocation8_spill] sm:$0xff] }
 0x172   :  { %3622 = vst [vmem:[#allocation38_spill] sm:$0xff] %v3112_v10  ;;  %v3120_v34 = vadd.f32 %v2822_v48, %v3624_v17  ;;  %v3124_v58 = vadd.f32 %v2822_v48, %v3626_v4  ;;  %3632 = vst [vmem:[#allocation43_spill] sm:$0xff] %v3136_v24  ;;  %v3633_v10 = vld [vmem:[#allocation9_spill] sm:$0xff]  ;;  %v3639_v24 = vld [vmem:[#allocation55_spill] sm:$0xff] }
 0x173   :  { %3618 = vst [vmem:[#allocation36_spill] sm:$0xff] %v3104_v42  ;;  %3620 = vst [vmem:[#allocation37_spill] sm:$0xff] %v3108_v40  ;;  %v3628_v42 = vld [vmem:[#allocation52_spill] sm:$0xff]  ;;  %v3630_v40 = vld [vmem:[#allocation53_spill] sm:$0xff]  ;;  %v3140_v17 = vadd.f32 %v2822_v48, %v3633_v10  ;;  %v3160_v10 = vadd.f32 %v2822_v48, %v3639_v24  ;;  %v3180_v24 = vadd.f32 %v2822_v48, %v2830_v37 }
 0x174   :  { %3625 = vst [vmem:[#allocation39_spill] sm:$0xff] %v3120_v34  ;;  %3627 = vst [vmem:[#allocation40_spill] sm:$0xff] %v3124_v58  ;;  %v3128_v0 = vadd.f32 %v2822_v48, %v3628_v42  ;;  %v3132_v28 = vadd.f32 %v2822_v48, %v3630_v40  ;;  %v3635_v34 = vld [vmem:[#allocation10_spill] sm:$0xff]  ;;  %v3202_v37 = vadd.f32 %v2822_v48, %v1059_v33  ;;  %v1848_v33 = vmov 1966171168  }
 0x175   :  { %3634 = vst [vmem:[#allocation44_spill] sm:$0xff] %v3140_v17  ;;  %v3144_v4 = vadd.f32 %v2822_v48, %v3635_v34  ;;  %v3636_v58 = vld [vmem:[#allocation54_spill] sm:$0xff]  ;;  %v3640_v17 = vld [vmem:[#allocation56_spill] sm:$0xff] }
 0x176   :  { %3629 = vst [vmem:[#allocation41_spill] sm:$0xff] %v3128_v0  ;;  %3631 = vst [vmem:[#allocation42_spill] sm:$0xff] %v3132_v28  ;;  %v3148_v42 = vadd.f32 %v2822_v48, %v3636_v58  ;;  %v3637_v0 = vld [vmem:[#allocation11_spill] sm:$0xff]  ;;  %v3638_v28 = vld [vmem:[#allocation12_spill] sm:$0xff]  ;;  %v3164_v34 = vadd.f32 %v2822_v48, %v3640_v17  ;;  %v3168_v58 = vadd.f32 %v2822_v48, %v2824_v60 }
 0x177   :  { %v3152_v40 = vadd.f32 %v2822_v48, %v3637_v0  ;;  %v3156_v43 = vadd.f32 %v2822_v48, %v3638_v28  ;;  %v3172_v0 = vadd.f32 %v2822_v48, %v2826_v55  ;;  %v3176_v28 = vadd.f32 %v2822_v48, %v2828_v23 }
 0x178   :  { %v3184_v17 = vadd.f32 %v2822_v48, %v2846_v20  ;;  %v3188_v60 = vadd.f32 %v2822_v48, %v2848_v29  ;;  %v3192_v55 = vadd.f32 %v2822_v48, %v2850_v6  ;;  %v3196_v23 = vadd.f32 %v2822_v48, %v2852_v31 }
 0x179   :  { %3641 = vst [vmem:[#allocation45_spill] sm:$0xff] %v3176_v28  ;;  %v3199_v28 = vadd.f32 %v2822_v48, %v1052_v44  ;;  %v1246_v20 = vcombine.low %v2840_v7, %v2844_v1  ;;  %v1247_v29 = vcombine.low %v2856_v3, %v2860_v27  ;;  %v1248_v6 = vcombine.low %v2864_v8, %v2868_v47 }
 0x17a   :  { %3642 = vst [vmem:[#allocation46_spill] sm:$0xff] %v3192_v55  ;;  %v1249_v55 = vcombine.low %v2872_v22, %v2876_v14  ;;  %v1295_v31 = vcombine.low %v2880_v9, %v2884_v53  ;;  %v1296_v44 = vcombine.low %v2888_v21, %v2892_v46  ;;  %v1297_v48 = vcombine.low %v2896_v2, %v2900_v13  ;;  %v3643_v14 = vld [vmem:[#allocation13_spill] sm:$0xff] }
 0x17b   :  { %v1251_v7 = vunpack.c.l.s4 %v1848_v33  ;;  %v1298_v1 = vcombine.low %v2904_v54, %v2908_v52  ;;  %v1344_v3 = vcombine.low %v2912_v57, %v2916_v56  ;;  %v1345_v27 = vcombine.low %v2920_v32, %v2924_v63  ;;  %v3644_v52 = vld [vmem:[#allocation15_spill] sm:$0xff]  ;;  %v3645_v57 = vld [vmem:[#allocation14_spill] sm:$0xff]  ;;  %v3646_v32 = vld [vmem:[#allocation17_spill] sm:$0xff] }
 0x17c   :  { %v1346_v8 = vcombine.low %v2928_v39, %v2932_v51  ;;  %v1347_v47 = vcombine.low %v2936_v50, %v2940_v45  ;;  %v1393_v22 = vcombine.low %v2944_v16, %v2948_v38  ;;  %v1394_v9 = vcombine.low %v3643_v14, %v2956_v5  ;;  %v3647_v63 = vld [vmem:[#allocation16_spill] sm:$0xff]  ;;  %v3648_v51 = vld [vmem:[#allocation2_spill] sm:$0xff]  ;;  %v3649_v38 = vld [vmem:[#allocation19_spill] sm:$0xff] }
 0x17d   :  { %v1252_v53 = vunpack.c.0.s8 %v1251_v7  ;;  %v1395_v21 = vcombine.low %v2960_v59, %v2964_v26  ;;  %v1396_v46 = vcombine.low %v2968_v18, %v2972_v12  ;;  %v1442_v2 = vcombine.low %v2976_v62, %v2980_v49  ;;  %v3650_v5 = vld [vmem:[#allocation18_spill] sm:$0xff]  ;;  %v3651_v26 = vld [vmem:[#allocation21_spill] sm:$0xff]  ;;  %v3652_v18 = vld [vmem:[#allocation20_spill] sm:$0xff] }
 0x17e   :  { %v1443_v13 = vcombine.low %v2984_v11, %v2988_v19  ;;  %v1444_v54 = vcombine.low %v2992_v15, %v2996_v30  ;;  %v1445_v56 = vcombine.low %v3645_v57, %v3644_v52  ;;  %v1491_v39 = vcombine.low %v3647_v63, %v3646_v32  ;;  %v3653_v62 = vld [vmem:[#allocation23_spill] sm:$0xff]  ;;  %v3654_v49 = vld [vmem:[#allocation22_spill] sm:$0xff]  ;;  %v3655_v19 = vld [vmem:[#allocation25_spill] sm:$0xff] }
 0x17f   :  { %v3247_v50 = vsub.s32 %v1252_v53, %v3648_v51  ;;  %v1492_v45 = vcombine.low %v3016_v35, %v3020_v41  ;;  %v1493_v16 = vcombine.low %v3024_v61, %v3028_v36  ;;  %v1494_v59 = vcombine.low %v3650_v5, %v3649_v38  ;;  %v3656_v15 = vld [vmem:[#allocation24_spill] sm:$0xff]  ;;  %v3657_v33 = vld [vmem:[#allocation27_spill] sm:$0xff]  ;;  %v3658_v7 = vld [vmem:[#allocation26_spill] sm:$0xff] }
 0x180   :  { %v1540_v12 = vcombine.low %v3652_v18, %v3651_v26  ;;  %v1541_v11 = vcombine.low %v3654_v49, %v3653_v62  ;;  %v1542_v30 = vcombine.low %v3656_v15, %v3655_v19  ;;  %v1543_v14 = vcombine.low %v3658_v7, %v3657_v33 }
 0x181   :  { %v1256_v35 = vrot.slane %v1246_v20, %v3247_v50  ;;  %v1263_v41 = vrot.slane %v1247_v29, %v3247_v50  ;;  %v1270_v61 = vrot.slane %v1248_v6, %v3247_v50  ;;  %v1277_v36 = vrot.slane %v1249_v55, %v3247_v50 }
 0x182   :  { %v1305_v53 = vrot.slane %v1295_v31, %v3247_v50  ;;  %v1312_v52 = vrot.slane %v1296_v44, %v3247_v50  ;;  %v1319_v57 = vrot.slane %v1297_v48, %v3247_v50  ;;  %v1326_v32 = vrot.slane %v1298_v1, %v3247_v50 }
 0x183   :  { %v1278_v63 = vcombine.low %v1256_v35, %v1263_v41  ;;  %v1279_v51 = vcombine.low %v1270_v61, %v1277_v36  ;;  %v1354_v38 = vrot.slane %v1344_v3, %v3247_v50  ;;  %v1361_v20 = vrot.slane %v1345_v27, %v3247_v50 }
 0x184   :  { %v1327_v5 = vcombine.low %v1305_v53, %v1312_v52  ;;  %v1328_v29 = vcombine.low %v1319_v57, %v1326_v32  ;;  %v1368_v6 = vrot.slane %v1346_v8, %v3247_v50  ;;  %v1375_v55 = vrot.slane %v1347_v47, %v3247_v50 }
 0x185   :  { %v1286_v31 = vrot.slane %v1278_v63, %v3247_v50  ;;  %v1293_v44 = vrot.slane %v1279_v51, %v3247_v50  ;;  %v1376_v26 = vcombine.low %v1354_v38, %v1361_v20  ;;  %v1403_v48 = vrot.slane %v1393_v22, %v3247_v50 }
 0x186   :  { %v1335_v1 = vrot.slane %v1327_v5, %v3247_v50  ;;  %v1342_v18 = vrot.slane %v1328_v29, %v3247_v50  ;;  %v1377_v3 = vcombine.low %v1368_v6, %v1375_v55  ;;  %v1410_v27 = vrot.slane %v1394_v9, %v3247_v50  ;;  %v3659_v5 = vld [vmem:[#allocation29_spill] sm:$0xff]  ;;  %v3661_v6 = vld [vmem:[#allocation31_spill] sm:$0xff]  ;;  %v3662_v55 = vld [vmem:[#allocation30_spill] sm:$0xff] }
 0x187   :  { %v1294_v62 = vcombine.low %v1286_v31, %v1293_v44  ;;  %v1384_v49 = vrot.slane %v1376_v26, %v3247_v50  ;;  %v1417_v8 = vrot.slane %v1395_v21, %v3247_v50  ;;  %v1424_v47 = vrot.slane %v1396_v46, %v3247_v50  ;;  %v3663_v44 = vld [vmem:[#allocation33_spill] sm:$0xff]  ;;  %v3664_v26 = vld [vmem:[#allocation32_spill] sm:$0xff] }
 0x188   :  { %v1343_v19 = vcombine.low %v1335_v1, %v1342_v18  ;;  %v1391_v15 = vrot.slane %v1377_v3, %v3247_v50  ;;  %v1425_v33 = vcombine.low %v1403_v48, %v1410_v27  ;;  %v1452_v22 = vrot.slane %v1442_v2, %v3247_v50  ;;  %v3665_v18 = vld [vmem:[#allocation35_spill] sm:$0xff]  ;;  %v3666_v3 = vld [vmem:[#allocation34_spill] sm:$0xff] }
 0x189   :  { %v1426_v7 = vcombine.low %v1417_v8, %v1424_v47  ;;  %v1459_v35 = vrot.slane %v1443_v13, %v3247_v50  ;;  %v1466_v41 = vrot.slane %v1444_v54, %v3247_v50  ;;  %v1473_v9 = vrot.slane %v1445_v56, %v3247_v50  ;;  %1812 = vst [vmem:[%s3404_s2] sm:$0xff] %v1294_v62  ;;  %v3667_v47 = vld [vmem:[#allocation37_spill] sm:$0xff] }
 0x18a   :  { %v1392_v21 = vcombine.low %v1384_v49, %v1391_v15  ;;  %v1433_v46 = vrot.slane %v1425_v33, %v3247_v50  ;;  %v1501_v61 = vrot.slane %v1491_v39, %v3247_v50  ;;  %v1508_v36 = vrot.slane %v1492_v45, %v3247_v50  ;;  %1813 = vst [vmem:[%s3404_s2 + $0x8] sm:$0xff] %v1343_v19  ;;  %v3668_v19 = vld [vmem:[#allocation36_spill] sm:$0xff] }
 0x18b   :  { %v1440_v2 = vrot.slane %v1426_v7, %v3247_v50  ;;  %v1474_v13 = vcombine.low %v1452_v22, %v1459_v35  ;;  %v1475_v54 = vcombine.low %v1466_v41, %v1473_v9  ;;  %v1515_v56 = vrot.slane %v1493_v16, %v3247_v50  ;;  %v3669_v35 = vld [vmem:[#allocation38_spill] sm:$0xff] }
 0x18c   :  { %v1522_v53 = vrot.slane %v1494_v59, %v3247_v50  ;;  %v1523_v52 = vcombine.low %v1501_v61, %v1508_v36  ;;  %v1550_v57 = vrot.slane %v1540_v12, %v3247_v50  ;;  %v1557_v32 = vrot.slane %v1541_v11, %v3247_v50  ;;  %1814 = vst [vmem:[%s3404_s2 + $0x10] sm:$0xff] %v1392_v21  ;;  %v3660_v11 = vld [vmem:[#allocation28_spill] sm:$0xff]  ;;  %v3672_v36 = vld [vmem:[#allocation42_spill] sm:$0xff] }
 0x18d   :  { %v1441_v39 = vcombine.low %v1433_v46, %v1440_v2  ;;  %v1482_v45 = vrot.slane %v1474_v13, %v3247_v50  ;;  %v1489_v63 = vrot.slane %v1475_v54, %v3247_v50  ;;  %v1564_v51 = vrot.slane %v1542_v30, %v3247_v50  ;;  %v3670_v21 = vld [vmem:[#allocation40_spill] sm:$0xff]  ;;  %v3671_v46 = vld [vmem:[#allocation39_spill] sm:$0xff]  ;;  %v3673_v2 = vld [vmem:[#allocation41_spill] sm:$0xff] }
 0x18e   :  { %v1524_v38 = vcombine.low %v1515_v56, %v1522_v53  ;;  %v1531_v16 = vrot.slane %v1523_v52, %v3247_v50  ;;  %v1571_v59 = vrot.slane %v1543_v14, %v3247_v50  ;;  %v1572_v20 = vcombine.low %v1550_v57, %v1557_v32  ;;  %v3674_v57 = vld [vmem:[#allocation44_spill] sm:$0xff]  ;;  %v3675_v32 = vld [vmem:[#allocation43_spill] sm:$0xff] }
 0x18f   :  { %v1490_v12 = vcombine.low %v1482_v45, %v1489_v63  ;;  %v1589_v29 = vcombine.low %v3660_v11, %v3659_v5  ;;  %v1590_v31 = vcombine.low %v3662_v55, %v3661_v6  ;;  %v1591_v48 = vcombine.low %v3664_v26, %v3663_v44  ;;  %1815 = vst [vmem:[%s3404_s2 + $0x18] sm:$0xff] %v1441_v39  ;;  %v3676_v6 = vld [vmem:[#allocation45_spill] sm:$0xff]  ;;  %v3677_v26 = vld [vmem:[#allocation46_spill] sm:$0xff] }
 0x190   :  { %v1538_v30 = vrot.slane %v1524_v38, %v3247_v50  ;;  %v1573_v1 = vcombine.low %v1564_v51, %v1571_v59  ;;  %v1580_v14 = vrot.slane %v1572_v20, %v3247_v50  ;;  %v1592_v27 = vcombine.low %v3666_v3, %v3665_v18 }
 0x191   :  { %v1599_v62 = vrot.slane %v1589_v29, %v3247_v50  ;;  %v1606_v49 = vrot.slane %v1590_v31, %v3247_v50  ;;  %v1613_v8 = vrot.slane %v1591_v48, %v3247_v50  ;;  %v1638_v15 = vcombine.low %v3668_v19, %v3667_v47  ;;  %1816 = vst [vmem:[%s3404_s2 + $0x20] sm:$0xff] %v1490_v12 }
 0x192   :  { %v1539_v33 = vcombine.low %v1531_v16, %v1538_v30  ;;  %v1587_v22 = vrot.slane %v1573_v1, %v3247_v50  ;;  %v1620_v7 = vrot.slane %v1592_v27, %v3247_v50  ;;  %v1639_v41 = vcombine.low %v3669_v35, %v3116_v25 }
 0x193   :  { %v1621_v9 = vcombine.low %v1599_v62, %v1606_v49  ;;  %v1640_v61 = vcombine.low %v3671_v46, %v3670_v21  ;;  %v1641_v13 = vcombine.low %v3673_v2, %v3672_v36  ;;  %v1648_v54 = vrot.slane %v1638_v15, %v3247_v50 }
 0x194   :  { %v1588_v56 = vcombine.low %v1580_v14, %v1587_v22  ;;  %v1622_v53 = vcombine.low %v1613_v8, %v1620_v7  ;;  %v1655_v52 = vrot.slane %v1639_v41, %v3247_v50  ;;  %v1687_v39 = vcombine.low %v3675_v32, %v3674_v57  ;;  %1817 = vst [vmem:[%s3404_s2 + $0x28] sm:$0xff] %v1539_v33 }
 0x195   :  { %v1629_v25 = vrot.slane %v1621_v9, %v3247_v50  ;;  %v1662_v45 = vrot.slane %v1640_v61, %v3247_v50  ;;  %v1669_v63 = vrot.slane %v1641_v13, %v3247_v50  ;;  %v1688_v51 = vcombine.low %v3144_v4, %v3148_v42 }
 0x196   :  { %v1636_v38 = vrot.slane %v1622_v53, %v3247_v50  ;;  %v1670_v16 = vcombine.low %v1648_v54, %v1655_v52  ;;  %v1689_v59 = vcombine.low %v3152_v40, %v3156_v43  ;;  %v1690_v20 = vcombine.low %v3160_v10, %v3164_v34  ;;  %1818 = vst [vmem:[%s3404_s2 + $0x30] sm:$0xff] %v1588_v56 }
 0x197   :  { %v1671_v12 = vcombine.low %v1662_v45, %v1669_v63  ;;  %v1697_v5 = vrot.slane %v1687_v39, %v3247_v50  ;;  %v1704_v11 = vrot.slane %v1688_v51, %v3247_v50  ;;  %v1736_v4 = vcombine.low %v3168_v58, %v3172_v0 }
 0x198   :  { %v1637_v42 = vcombine.low %v1629_v25, %v1636_v38  ;;  %v1678_v29 = vrot.slane %v1670_v16, %v3247_v50  ;;  %v1711_v40 = vrot.slane %v1689_v59, %v3247_v50  ;;  %v1718_v43 = vrot.slane %v1690_v20, %v3247_v50 }
 0x199   :  { %v1685_v10 = vrot.slane %v1671_v12, %v3247_v50  ;;  %v1719_v34 = vcombine.low %v1697_v5, %v1704_v11  ;;  %v1737_v55 = vcombine.low %v3676_v6, %v3180_v24  ;;  %v1738_v31 = vcombine.low %v3184_v17, %v3188_v60 }
 0x19a   :  { %v1720_v44 = vcombine.low %v1711_v40, %v1718_v43  ;;  %v1739_v58 = vcombine.low %v3677_v26, %v3196_v23  ;;  %v1746_v0 = vrot.slane %v1736_v4, %v3247_v50  ;;  %v1785_v48 = vcombine.low %v3199_v28, %v3202_v37  ;;  %1819 = vst [vmem:[%s3404_s2 + $0x38] sm:$0xff] %v1637_v42 }
 0x19b   :  { %v1686_v30 = vcombine.low %v1678_v29, %v1685_v10  ;;  %v1727_v1 = vrot.slane %v1719_v34, %v3247_v50  ;;  %v1753_v24 = vrot.slane %v1737_v55, %v3247_v50  ;;  %v1760_v17 = vrot.slane %v1738_v31, %v3247_v50 }
 0x19c   :  { %v1734_v60 = vrot.slane %v1720_v44, %v3247_v50  ;;  %v1767_v23 = vrot.slane %v1739_v58, %v3247_v50  ;;  %v1792_v14 = vrot.slane %v1785_v48, %v3247_v50  ;;  %v3678_v28 = vlaneseq }
 0x19d   :  { %v1768_v18 = vcombine.low %v1746_v0, %v1753_v24  ;;  %1820 = vst [vmem:[%s3404_s2 + $0x40] sm:$0xff] %v1686_v30 }
 0x19e   :  { %vm1825_vm1 = vcmp.lt.s32.totalorder %v3678_v28, 256  ;;  %v1735_v37 = vcombine.low %v1727_v1, %v1734_v60  ;;  %v1769_v3 = vcombine.low %v1760_v17, %v1767_v23  ;;  %v1799_v27 = vrot.slane %v1792_v14, %v3247_v50 }
 0x19f   :  { %v1776_v62 = vrot.slane %v1768_v18, %v3247_v50 }
 0x1a0   :  { %v1783_v49 = vrot.slane %v1769_v3, %v3247_v50  ;;  %1821 = vst [vmem:[%s3404_s2 + $0x48] sm:$0xff] %v1735_v37  ;;  %1827 = vst.msk [vmem:[%s3404_s2 + $0x58] sm:$0x3] %vm1825_vm1, %v1799_v27 }
 0x1a2   :  { %v1784_v8 = vcombine.low %v1776_v62, %v1783_v49 }
 0x1a4   :  { %1822 = vst [vmem:[%s3404_s2 + $0x50] sm:$0xff] %v1784_v8 }

// kernel: cost_reg_net_3dmlp.2
= control target key start
LH: loop header
LB: loop body
LE: loop exit
PB: predicated region body
PF: predicated region fallthrough
CT: control target
= control target key end

     0   :  { %s16298_s15 = smov 0   ;;  %s21519_s0 = inlined_call_operand.vmem [shape: f32[8,12960], index: 0, kind: input, shape index: {}, may-alias: {0,1}]   ;;  %s21520_s1 = inlined_call_operand.vmem [shape: f32[8,12960], index: 1, kind: input, shape index: {}, may-alias: {0,1}]   ;;  %s21521_s2 = inlined_call_operand.vmem [shape: bf16[27,8,8], index: 2, kind: input, shape index: {}]   ;;  %s21522_s3 = inlined_call_operand.vmem [shape: bf16[4,11520], index: 3, kind: output, shape index: {0}]   ;;  %s21523_s4 = inlined_call_operand.vmem [shape: f32[5,8,1], index: 4, kind: output, shape index: {1}]  }
   0x1 LB: > { %s16304_s16 = sadd.s32 4294967295, %s16242_s15   ;;  %p14764_p0 = scmp.ge.s32.totalorder %s16242_s15, 1  ;;  %s16242_s15 = sphi %s16298_s15, %s15_s15  }
   0x2   : > { %p193_p1 = scmp.lt.s32.totalorder %s16242_s15, 6 }
   0x4   : > { %p194_p2 = pnand %p14764_p0, %p193_p1 }
   0x6   : > { %197 = sbr.rel (%p194_p2) target bundleno = 1514 (0x5ea), region = 32 }
   0xd   : > { %s16309_s17 = smul.u32 18, %s16304_s16  ;;  %s248_s18 = sadd.s32 1, %s16304_s16  ;;  %v21525_v14 = vmov 0   ;;  %vm1312_vm0 = vcmask 1031168   ;;  %vm21536_vm1 = vcmask 1043456   ;;  %vm401_vm2 = vcmask 1039360  }
   0xe   : > { %s14766_s19 = smul.u32 18, %s248_s18  ;;  %s16244_s25 = smov 126   ;;  %1666 = vmatprep.mubr.bf16.mxu0 %v21525_v14  ;;  %511 = vmatprep.mubr.bf16.mxu1 %v21525_v14  ;;  %v16522_v50 = vld [vmem:[%s21521_s2 + $0x8] sm:$0xf]  ;;  %vm420_vm3 = vcmask 64512   ;;  %vm1813_vm4 = vcmask 900096  }
   0xf   : > { %p239_p3 = scmp.lt.s32.totalorder %s16309_s17, 101  ;;  %s16245_s27 = smov 127   ;;  %v16533_v52 = vld [vmem:[%s21521_s2 + $0x4] sm:$0xf]  ;;  %vm2314_vm5 = vcmask 891904   ;;  %vm2815_vm6 = vcmask 883712  }
  0x10   : > { %p251_p4 = scmp.lt.s32.totalorder %s14766_s19, 101  ;;  %s16247_s5 = smov 110   ;;  %vm3316_vm7 = vcmask 752640   ;;  %vm3817_vm8 = vcmask 744448   ;;  %vm4318_vm9 = vcmask 736256   ;;  %vm4821_vm10 = vcmask 490496  }
  0x11   : > { %s240_s20 = scalar_select %p239_p3, %s16309_s17, 101  ;;  %vm5322_vm11 = vcmask 482304   ;;  %vm5823_vm12 = vcmask 474112   ;;  %vm6324_vm13 = vcmask 343040   ;;  %vm6825_vm14 = vcmask 334848  }
  0x12   : > { %s21927_s19 = smov (!%p251_p4, %s14766_s19), 101  ;;  %s16248_s6 = smov 109   ;;  %vm7326_vm15 = vcmask 326656  }
  0x13   : > { %s14765_s21 = sshll.u32 %s240_s20, 3  ;;  %s14767_s26 = sshll.u32 %s21927_s19, 3 }
  0x14   : > { %s16317_s24 = scalar_lea.vmem %s21519_s0, %s14765_s21  ;;  %s16352_s30 = scalar_lea.vmem %s21520_s1, %s14767_s26 }
  0x15   : > { %v283_v0 = vld [vmem:[%s16317_s24 + $0x70] sm:$0xff]  ;;  %v281_v1 = vld [vmem:[%s16317_s24 + $0x60] sm:$0xff]  ;;  %v282_v2 = vld [vmem:[%s16317_s24 + $0x68] sm:$0xff]  ;;  %s16249_s7 = smov 108   ;;  %s16250_s12 = smov 92  }
  0x16   : > { %v16322_v3 = vpack.c.bf16 %v283_v0, %v283_v0  ;;  %v16324_v4 = vpack.c.bf16 %v281_v1, %v281_v1  ;;  %v269_v5 = vld [vmem:[%s16317_s24] sm:$0xff]  ;;  %v16331_v6 = vpack.c.bf16 %v282_v2, %v282_v2  ;;  %v270_v8 = vld [vmem:[%s16317_s24 + $0x8] sm:$0xff]  ;;  %v271_v9 = vld [vmem:[%s16317_s24 + $0x10] sm:$0xff]  ;;  %s16251_s18 = smov 91   ;;  %s16252_s23 = smov 90  }
  0x17   : > { %v16333_v7 = vpack.c.bf16 %v269_v5, %v269_v5  ;;  %v16341_v10 = vpack.c.bf16 %v270_v8, %v270_v8  ;;  %v16343_v11 = vpack.c.bf16 %v271_v9, %v271_v9  ;;  %v285_v12 = vld [vmem:[%s16317_s24 + $0x80] sm:$0xff]  ;;  %v286_v13 = vld [vmem:[%s16317_s24 + $0x88] sm:$0xff]  ;;  %v272_v18 = vld [vmem:[%s16317_s24 + $0x18] sm:$0xff]  ;;  %s16253_s26 = smov 60   ;;  %s16254_s29 = smov 59  }
  0x18   : > { %1302 = vrot.lane.b32.xlu1 %v16322_v3, %s16244_s25  ;;  %1298 = vrot.lane.b32.xlu0 %v16324_v4, %s16244_s25  ;;  %v16358_v15 = vpack.c.bf16 %v285_v12, %v285_v12  ;;  %v16360_v16 = vpack.c.bf16 %v286_v13, %v286_v13  ;;  %v287_v17 = vld [vmem:[%s16352_s30] sm:$0xff]  ;;  %v16370_v20 = vpack.c.bf16 %v272_v18, %v272_v18  ;;  %v274_v23 = vld [vmem:[%s16317_s24 + $0x28] sm:$0xff]  ;;  %s16255_s11 = smov 58   ;;  %s16256_s19 = smov 42  }
  0x19   : > { %v16368_v19 = vpack.c.bf16 %v287_v17, %v287_v17  ;;  %v273_v21 = vld [vmem:[%s16317_s24 + $0x20] sm:$0xff]  ;;  %v275_v24 = vld [vmem:[%s16317_s24 + $0x30] sm:$0xff]  ;;  %v16389_v25 = vpack.c.bf16 %v274_v23, %v274_v23  ;;  %v276_v27 = vld [vmem:[%s16317_s24 + $0x38] sm:$0xff]  ;;  %s16260_s10 = smov 23   ;;  %s16261_s13 = smov 22  }
  0x1a   : > { %21542 = vst [vmem:[#allocation2_spill] sm:$0xff] %v16360_v16  ;;  %v16377_v22 = vpack.c.bf16 %v273_v21, %v273_v21  ;;  %v16391_v26 = vpack.c.bf16 %v275_v24, %v275_v24  ;;  %v16402_v28 = vpack.c.bf16 %v276_v27, %v276_v27  ;;  %v277_v29 = vld [vmem:[%s16317_s24 + $0x40] sm:$0xff]  ;;  %v278_v31 = vld [vmem:[%s16317_s24 + $0x48] sm:$0xff]  ;;  %v279_v32 = vld [vmem:[%s16317_s24 + $0x50] sm:$0xff]  ;;  %s16267_s8 = smov 100   ;;  %s16269_s14 = smov 83  }
  0x1b   : > { %v16409_v30 = vpack.c.bf16 %v277_v29, %v277_v29  ;;  %v16417_v33 = vpack.c.bf16 %v278_v31, %v278_v31  ;;  %v16419_v34 = vpack.c.bf16 %v279_v32, %v279_v32  ;;  %v280_v35 = vld [vmem:[%s16317_s24 + $0x58] sm:$0xff]  ;;  %v16585_v21 = vld [vmem:[%s21521_s2 + $0xc] sm:$0xf]  ;;  %s16270_s20 = smov 82   ;;  %s13823_s28 = smul.u32 2304, %s16304_s16 }
  0x1c   : > { %1300 = vrot.lane.b32.xlu0 %v16331_v6, %s16244_s25  ;;  %363 = vrot.lane.b32.xlu1 %v16333_v7, %s16245_s27  ;;  %v16434_v36 = vpack.c.bf16 %v280_v35, %v280_v35  ;;  %v284_v37 = vld [vmem:[%s16317_s24 + $0x78] sm:$0xff]  ;;  %s16257_s24 = smov 41   ;;  %p259_p5 = scmp.lt.s32.totalorder %s16309_s17, 89 }
  0x1d   : > { %v16457_v38 = vpack.c.bf16 %v284_v37, %v284_v37  ;;  %p264_p6 = scmp.lt.s32.totalorder %s16304_s16, 4 }
  0x1e   : > { %s21929_s17 = smov (!%p259_p5, %s16309_s17), 89 }
  0x1f   : > { %s21931_s16 = smov (!%p264_p6, %s16304_s16), 4 }
  0x20   : > { %365 = vrot.lane.b32.xlu0 %v16341_v10, %s16245_s27  ;;  %367 = vrot.lane.b32.xlu1 %v16343_v11, %s16245_s27 }
  0x24   : > { %1306 = vrot.lane.b32.xlu0 %v16358_v15, %s16244_s25  ;;  %1308 = vrot.lane.b32.xlu1 %v16360_v16, %s16244_s25 }
  0x28   : > { %1310 = vrot.lane.b32.xlu0 %v16368_v19, %s16244_s25  ;;  %369 = vrot.lane.b32.xlu1 %v16370_v20, %s16245_s27 }
  0x2c   : > { %371 = vrot.lane.b32.xlu0 %v16377_v22, %s16245_s27  ;;  %1775 = vrot.lane.b32.xlu1 %v16333_v7, %s16247_s5 }
  0x30   : > { %1777 = vrot.lane.b32.xlu0 %v16341_v10, %s16247_s5  ;;  %1779 = vrot.lane.b32.xlu1 %v16343_v11, %s16247_s5 }
  0x34   : > { %373 = vrot.lane.b32.xlu0 %v16389_v25, %s16245_s27  ;;  %375 = vrot.lane.b32.xlu1 %v16391_v26, %s16245_s27 }
  0x38   : > { %1783 = vrot.lane.b32.xlu0 %v16377_v22, %s16247_s5  ;;  %1785 = vrot.lane.b32.xlu1 %v16389_v25, %s16247_s5 }
  0x3c   : > { %1787 = vrot.lane.b32.xlu0 %v16391_v26, %s16247_s5  ;;  %377 = vrot.lane.b32.xlu1 %v16402_v28, %s16245_s27 }
  0x40   : > { %379 = vrot.lane.b32.xlu0 %v16409_v30, %s16245_s27  ;;  %1791 = vrot.lane.b32.xlu1 %v16409_v30, %s16247_s5 }
  0x44   : > { %1793 = vrot.lane.b32.xlu0 %v16417_v33, %s16247_s5  ;;  %1795 = vrot.lane.b32.xlu1 %v16419_v34, %s16247_s5 }
  0x48   : > { %381 = vrot.lane.b32.xlu0 %v16417_v33, %s16245_s27  ;;  %383 = vrot.lane.b32.xlu1 %v16419_v34, %s16245_s27 }
  0x4c   : > { %1799 = vrot.lane.b32.xlu0 %v16324_v4, %s16247_s5  ;;  %1801 = vrot.lane.b32.xlu1 %v16331_v6, %s16247_s5 }
  0x50   : > { %1803 = vrot.lane.b32.xlu0 %v16322_v3, %s16247_s5  ;;  %385 = vrot.lane.b32.xlu1 %v16434_v36, %s16245_s27 }
  0x54   : > { %387 = vrot.lane.b32.xlu0 %v16324_v4, %s16245_s27  ;;  %1807 = vrot.lane.b32.xlu1 %v16358_v15, %s16247_s5 }
  0x58   : > { %1809 = vrot.lane.b32.xlu0 %v16360_v16, %s16247_s5  ;;  %1811 = vrot.lane.b32.xlu1 %v16368_v19, %s16247_s5 }
  0x5c   : > { %389 = vrot.lane.b32.xlu0 %v16331_v6, %s16245_s27  ;;  %391 = vrot.lane.b32.xlu1 %v16322_v3, %s16245_s27 }
  0x60   : > { %2276 = vrot.lane.b32.xlu0 %v16333_v7, %s16248_s6  ;;  %2278 = vrot.lane.b32.xlu1 %v16341_v10, %s16248_s6 }
  0x64   : > { %2280 = vrot.lane.b32.xlu0 %v16343_v11, %s16248_s6  ;;  %393 = vrot.lane.b32.xlu1 %v16457_v38, %s16245_s27 }
  0x68   : > { %395 = vrot.lane.b32.xlu0 %v16358_v15, %s16245_s27  ;;  %2284 = vrot.lane.b32.xlu1 %v16377_v22, %s16248_s6 }
  0x6c   : > { %2286 = vrot.lane.b32.xlu0 %v16389_v25, %s16248_s6  ;;  %2288 = vrot.lane.b32.xlu1 %v16391_v26, %s16248_s6 }
  0x70   : > { %397 = vrot.lane.b32.xlu0 %v16360_v16, %s16245_s27  ;;  %399 = vrot.lane.b32.xlu1 %v16368_v19, %s16245_s27 }
  0x74   : > { %2292 = vrot.lane.b32.xlu0 %v16409_v30, %s16248_s6  ;;  %2294 = vrot.lane.b32.xlu1 %v16417_v33, %s16248_s6 }
  0x78   : > { %2296 = vrot.lane.b32.xlu0 %v16419_v34, %s16248_s6  ;;  %2300 = vrot.lane.b32.xlu1 %v16324_v4, %s16248_s6 }
  0x7c   : > { %2302 = vrot.lane.b32.xlu0 %v16331_v6, %s16248_s6  ;;  %2304 = vrot.lane.b32.xlu1 %v16322_v3, %s16248_s6 }
  0x80   : > { %2308 = vrot.lane.b32.xlu0 %v16358_v15, %s16248_s6  ;;  %2310 = vrot.lane.b32.xlu1 %v16360_v16, %s16248_s6 }
  0x84   : > { %2312 = vrot.lane.b32.xlu0 %v16368_v19, %s16248_s6  ;;  %2777 = vrot.lane.b32.xlu1 %v16333_v7, %s16249_s7 }
  0x88   : > { %2779 = vrot.lane.b32.xlu0 %v16341_v10, %s16249_s7  ;;  %2781 = vrot.lane.b32.xlu1 %v16343_v11, %s16249_s7 }
  0x8a   : > { %v16499_v39 = vpop.permute.xlu1 %1302  ;;  %v16501_v40 = vpop.permute.xlu0 %1298 }
  0x8c   : > { %2785 = vrot.lane.b32.xlu0 %v16377_v22, %s16249_s7  ;;  %2787 = vrot.lane.b32.xlu1 %v16389_v25, %s16249_s7 }
  0x8e   : > { %v1301_v41 = vpop.permute.xlu0 %1300  ;;  %v364_v42 = vpop.permute.xlu1 %363 }
  0x8f   : > { %v1326_v43 = vsel %vm1312_vm0, %v1301_v41, %v16499_v39  ;;  %v1325_v44 = vsel %vm1312_vm0, %v16501_v40, %v1301_v41 }
  0x90   : > { %14818 = vmatprep.subr.msk.bf16.mxu0 %vm21536_vm1, %v1326_v43  ;;  %2789 = vrot.lane.b32.xlu0 %v16391_v26, %s16249_s7  ;;  %v1371_v45 = vsel %vm21536_vm1, %v1325_v44, 0 }
  0x91   : > { %2793 = vrot.lane.b32.xlu1 %v16409_v30, %s16249_s7  ;;  %1635 = vmatpush1.bf16.msra.mxu0 %v1371_v45 }
  0x92   : > { %v366_v46 = vpop.permute.xlu0 %365  ;;  %v368_v47 = vpop.permute.xlu1 %367 }
  0x93   : > { %v403_v48 = vsel %vm401_vm2, %v366_v46, %v368_v47  ;;  %v402_v49 = vsel %vm401_vm2, %v364_v42, %v366_v46 }
  0x94   : > { %2795 = vrot.lane.b32.xlu0 %v16417_v33, %s16249_s7  ;;  %14770 = vmatprep.subr.msk.bf16.mxu1 %vm21536_vm1, %v403_v48  ;;  %v426_v51 = vsel %vm21536_vm1, %v402_v49, 0 }
  0x95   : > { %2797 = vrot.lane.b32.xlu1 %v16419_v34, %s16249_s7  ;;  %480 = vmatpush1.bf16.msra.mxu1 %v426_v51 }
  0x96   : > { %v16535_v53 = vpop.permute.xlu0 %1306  ;;  %v1309_v54 = vpop.permute.xlu1 %1308  ;;  %14819 = vmatmul.mubr.msk.bf16.vlgmr.msra.gmra.mrb[0].mxu0 %vm420_vm3, %v16522_v50 }
  0x97   : > { %1748 = vmatprep.mubr.bf16.mxu0 %v21525_v14  ;;  %v1329_v55 = vsel %vm1312_vm0, %v16535_v53, %v1309_v54 }
  0x98   : > { %2801 = vrot.lane.b32.xlu0 %v16324_v4, %s16249_s7  ;;  %14771 = vmatmul.mubr.msk.bf16.vlgmr.msra.gmra.mrb[0].mxu1 %vm420_vm3, %v16533_v52  ;;  %v1383_v59 = vsel %vm21536_vm1, %v1329_v55, 0 }
  0x99   : > { %2803 = vrot.lane.b32.xlu1 %v16331_v6, %s16249_s7  ;;  %552 = vmatprep.mubr.bf16.mxu1 %v21525_v14 }
  0x9a   : > { %v1311_v56 = vpop.permute.xlu0 %1310  ;;  %v370_v57 = vpop.permute.xlu1 %369 }
  0x9b   : > { %v1330_v58 = vsel %vm1312_vm0, %v1309_v54, %v1311_v56  ;;  %v404_v60 = vsel %vm401_vm2, %v368_v47, %v370_v57 }
  0x9c   : > { %2805 = vrot.lane.b32.xlu0 %v16322_v3, %s16249_s7  ;;  %14822 = vmatprep.subr.msk.bf16.mxu0 %vm21536_vm1, %v1330_v58  ;;  %v432_v0 = vsel %vm21536_vm1, %v404_v60, 0 }
  0x9d   : > { %2809 = vrot.lane.b32.xlu1 %v16358_v15, %s16249_s7  ;;  %1717 = vmatpush1.bf16.msra.mxu0 %v1383_v59 }
  0x9e   : > { %v372_v61 = vpop.permute.xlu0 %371  ;;  %v1776_v62 = vpop.permute.xlu1 %1775 }
  0x9f   : > { %v405_v63 = vsel %vm401_vm2, %v370_v57, %v372_v61 }
  0xa0   : > { %2811 = vrot.lane.b32.xlu0 %v16360_v16, %s16249_s7  ;;  %14772 = vmatprep.subr.msk.bf16.mxu1 %vm21536_vm1, %v405_v63 }
  0xa1   : > { %2813 = vrot.lane.b32.xlu1 %v16368_v19, %s16249_s7  ;;  %521 = vmatpush1.bf16.msra.mxu1 %v432_v0 }
  0xa2   : > { %v1778_v1 = vpop.permute.xlu0 %1777  ;;  %v16564_v2 = vpop.permute.xlu1 %1779  ;;  %14823 = vmatmul.mubr.msk.bf16.vlgmr.msra.gmra.mrb[4].mxu0 %vm420_vm3, %v16522_v50 }
  0xa3   : > { %v1814_v5 = vsel %vm1813_vm4, %v1776_v62, %v1778_v1  ;;  %v1815_v8 = vsel %vm1813_vm4, %v1778_v1, %v16564_v2  ;;  %1921 = vmatprep.mubr.bf16.mxu0 %v21525_v14 }
  0xa4   : > { %3278 = vrot.lane.b32.xlu0 %v16333_v7, %s16250_s12  ;;  %14824 = vmatprep.subr.msk.bf16.mxu0 %vm21536_vm1, %v1815_v8  ;;  %v1836_v9 = vsel %vm21536_vm1, %v1814_v5, 0 }
  0xa5   : > { %3280 = vrot.lane.b32.xlu1 %v16341_v10, %s16250_s12  ;;  %1890 = vmatpush1.bf16.msra.mxu0 %v1836_v9 }
  0xa6   : > { %v374_v12 = vpop.permute.xlu0 %373  ;;  %v376_v13 = vpop.permute.xlu1 %375  ;;  %14773 = vmatmul.mubr.msk.bf16.vlgmr.msra.gmra.mrb[4].mxu1 %vm420_vm3, %v16533_v52 }
  0xa7   : > { %v406_v17 = vsel %vm401_vm2, %v372_v61, %v374_v12  ;;  %v407_v18 = vsel %vm401_vm2, %v374_v12, %v376_v13  ;;  %593 = vmatprep.mubr.bf16.mxu1 %v21525_v14 }
  0xa8   : > { %3282 = vrot.lane.b32.xlu0 %v16343_v11, %s16250_s12  ;;  %14774 = vmatprep.subr.msk.bf16.mxu1 %vm21536_vm1, %v407_v18  ;;  %v438_v23 = vsel %vm21536_vm1, %v406_v17, 0 }
  0xa9   : > { %3286 = vrot.lane.b32.xlu1 %v16377_v22, %s16250_s12  ;;  %562 = vmatpush1.bf16.msra.mxu1 %v438_v23 }
  0xaa   : > { %v16594_v24 = vpop.permute.xlu0 %1783  ;;  %v1786_v27 = vpop.permute.xlu1 %1785  ;;  %14825 = vmatmul.mubr.msk.bf16.vlgmr.msra.gmra.mrb[8].mxu0 %vm420_vm3, %v16585_v21 }
  0xab   : > { %2003 = vmatprep.mubr.bf16.mxu0 %v21525_v14  ;;  %v1818_v29 = vsel %vm1813_vm4, %v16594_v24, %v1786_v27 }
  0xac   : > { %3288 = vrot.lane.b32.xlu0 %v16389_v25, %s16250_s12  ;;  %v1848_v37 = vsel %vm21536_vm1, %v1818_v29, 0 }
  0xad   : > { %3290 = vrot.lane.b32.xlu1 %v16391_v26, %s16250_s12 }
  0xae   : > { %v16605_v31 = vpop.permute.xlu0 %1787  ;;  %v378_v32 = vpop.permute.xlu1 %377  ;;  %14775 = vmatmul.mubr.msk.bf16.vlgmr.msra.gmra.mrb[8].mxu1 %vm420_vm3, %v16533_v52 }
  0xaf   : > { %v1819_v35 = vsel %vm1813_vm4, %v1786_v27, %v16605_v31  ;;  %634 = vmatprep.mubr.bf16.mxu1 %v21525_v14  ;;  %v408_v41 = vsel %vm401_vm2, %v376_v13, %v378_v32 }
  0xb0   : > { %1274 = vrot.lane.b32.xlu0 %v16333_v7, %s16244_s25  ;;  %14828 = vmatprep.subr.msk.bf16.mxu0 %vm21536_vm1, %v1819_v35  ;;  %v444_v45 = vsel %vm21536_vm1, %v408_v41, 0 }
  0xb1   : > { %1276 = vrot.lane.b32.xlu1 %v16341_v10, %s16244_s25  ;;  %1972 = vmatpush1.bf16.msra.mxu0 %v1848_v37 }
  0xb2   : > { %v380_v42 = vpop.permute.xlu0 %379  ;;  %v16619_v43 = vpop.permute.xlu1 %1791 }
  0xb3   : > { %v409_v44 = vsel %vm401_vm2, %v378_v32, %v380_v42 }
  0xb4   : > { %1278 = vrot.lane.b32.xlu0 %v16343_v11, %s16244_s25  ;;  %14776 = vmatprep.subr.msk.bf16.mxu1 %vm21536_vm1, %v409_v44 }
  0xb5   : > { %3294 = vrot.lane.b32.xlu1 %v16409_v30, %s16250_s12  ;;  %603 = vmatpush1.bf16.msra.mxu1 %v444_v45 }
  0xb6   : > { %v1794_v46 = vpop.permute.xlu0 %1793  ;;  %v16628_v47 = vpop.permute.xlu1 %1795  ;;  %14829 = vmatmul.mubr.msk.bf16.vlgmr.msra.gmra.mrb[12].mxu0 %vm420_vm3, %v16585_v21 }
  0xb7   : > { %v1822_v48 = vsel %vm1813_vm4, %v16619_v43, %v1794_v46  ;;  %v1823_v49 = vsel %vm1813_vm4, %v1794_v46, %v16628_v47  ;;  %2085 = vmatprep.mubr.bf16.mxu0 %v21525_v14 }
  0xb8   : > { %3296 = vrot.lane.b32.xlu0 %v16417_v33, %s16250_s12  ;;  %14832 = vmatprep.subr.msk.bf16.mxu0 %vm21536_vm1, %v1823_v49  ;;  %v1860_v51 = vsel %vm21536_vm1, %v1822_v48, 0 }
  0xb9   : > { %3298 = vrot.lane.b32.xlu1 %v16419_v34, %s16250_s12  ;;  %2054 = vmatpush1.bf16.msra.mxu0 %v1860_v51 }
  0xba   : > { %v382_v54 = vpop.permute.xlu0 %381  ;;  %v384_v55 = vpop.permute.xlu1 %383  ;;  %14777 = vmatmul.mubr.msk.bf16.vlgmr.msra.gmra.mrb[12].mxu1 %vm420_vm3, %v16533_v52 }
  0xbb   : > { %v410_v56 = vsel %vm401_vm2, %v380_v42, %v382_v54  ;;  %v411_v57 = vsel %vm401_vm2, %v382_v54, %v384_v55  ;;  %675 = vmatprep.mubr.bf16.mxu1 %v21525_v14 }
  0xbc   : > { %1280 = vrot.lane.b32.xlu0 %v16370_v20, %s16244_s25  ;;  %14778 = vmatprep.subr.msk.bf16.mxu1 %vm21536_vm1, %v411_v57  ;;  %v450_v58 = vsel %vm21536_vm1, %v410_v56, 0 }
  0xbd   : > { %1282 = vrot.lane.b32.xlu1 %v16377_v22, %s16244_s25  ;;  %644 = vmatpush1.bf16.msra.mxu1 %v450_v58  ;;  %v16739_v58 = vld [vmem:[%s21521_s2 + $0x10] sm:$0xf] }
  0xbe   : > { %v16654_v59 = vpop.permute.xlu0 %1799  ;;  %v1802_v60 = vpop.permute.xlu1 %1801  ;;  %14833 = vmatmul.mubr.msk.bf16.vlgmr.msra.gmra.mrb[16].mxu0 %vm420_vm3, %v16585_v21 }
  0xbf   : > { %2167 = vmatprep.mubr.bf16.mxu0 %v21525_v14  ;;  %v1826_v61 = vsel %vm1813_vm4, %v16654_v59, %v1802_v60 }
  0xc0   : > { %3302 = vrot.lane.b32.xlu0 %v16324_v4, %s16250_s12  ;;  %v1872_v1 = vsel %vm21536_vm1, %v1826_v61, 0 }
  0xc1   : > { %3304 = vrot.lane.b32.xlu1 %v16331_v6, %s16250_s12 }
  0xc2   : > { %v16665_v62 = vpop.permute.xlu0 %1803  ;;  %v386_v63 = vpop.permute.xlu1 %385  ;;  %14779 = vmatmul.mubr.msk.bf16.vlgmr.msra.gmra.mrb[16].mxu1 %vm420_vm3, %v16533_v52 }
  0xc3   : > { %v1827_v0 = vsel %vm1813_vm4, %v1802_v60, %v16665_v62  ;;  %716 = vmatprep.mubr.bf16.mxu1 %v21525_v14  ;;  %v412_v5 = vsel %vm401_vm2, %v384_v55, %v386_v63 }
  0xc4   : > { %3306 = vrot.lane.b32.xlu0 %v16322_v3, %s16250_s12  ;;  %14836 = vmatprep.subr.msk.bf16.mxu0 %vm21536_vm1, %v1827_v0  ;;  %v456_v13 = vsel %vm21536_vm1, %v412_v5, 0 }
  0xc5   : > { %1284 = vrot.lane.b32.xlu1 %v16389_v25, %s16244_s25  ;;  %2136 = vmatpush1.bf16.msra.mxu0 %v1872_v1 }
  0xc6   : > { %v388_v8 = vpop.permute.xlu0 %387  ;;  %v16679_v9 = vpop.permute.xlu1 %1807 }
  0xc7   : > { %v413_v12 = vsel %vm401_vm2, %v386_v63, %v388_v8 }
  0xc8   : > { %1286 = vrot.lane.b32.xlu0 %v16391_v26, %s16244_s25  ;;  %14780 = vmatprep.subr.msk.bf16.mxu1 %vm21536_vm1, %v413_v12 }
  0xc9   : > { %3310 = vrot.lane.b32.xlu1 %v16358_v15, %s16250_s12  ;;  %685 = vmatpush1.bf16.msra.mxu1 %v456_v13 }
  0xca   : > { %v1810_v17 = vpop.permute.xlu0 %1809  ;;  %v1812_v18 = vpop.permute.xlu1 %1811  ;;  %14837 = vmatmul.mubr.msk.bf16.vlgmr.msra.gmra.mrb[0].mxu0 %vm420_vm3, %v16585_v21 }
  0xcb   : > { %v1830_v23 = vsel %vm1813_vm4, %v16679_v9, %v1810_v17  ;;  %v1831_v27 = vsel %vm1813_vm4, %v1810_v17, %v1812_v18  ;;  %2249 = vmatprep.mubr.bf16.mxu0 %v21525_v14 }
  0xcc   : > { %3312 = vrot.lane.b32.xlu0 %v16360_v16, %s16250_s12  ;;  %14840 = vmatprep.subr.msk.bf16.mxu0 %vm21536_vm1, %v1831_v27  ;;  %v1884_v29 = vsel %vm21536_vm1, %v1830_v23, 0 }
  0xcd   : > { %3314 = vrot.lane.b32.xlu1 %v16368_v19, %s16250_s12  ;;  %2218 = vmatpush1.bf16.msra.mxu0 %v1884_v29  ;;  %v852_v29 = vsel %vm21536_vm1, %v16333_v7, 0 }
  0xce   : > { %v390_v32 = vpop.permute.xlu0 %389  ;;  %v392_v35 = vpop.permute.xlu1 %391  ;;  %14781 = vmatmul.mubr.msk.bf16.vlgmr.msra.gmra.mrb[20].mxu1 %vm420_vm3, %v16533_v52 }
  0xcf   : > { %v414_v37 = vsel %vm401_vm2, %v388_v8, %v390_v32  ;;  %v415_v41 = vsel %vm401_vm2, %v390_v32, %v392_v35  ;;  %757 = vmatprep.mubr.bf16.mxu1 %v21525_v14 }
  0xd0   : > { %1288 = vrot.lane.b32.xlu0 %v16402_v28, %s16244_s25  ;;  %14782 = vmatprep.subr.msk.bf16.mxu1 %vm21536_vm1, %v415_v41  ;;  %v462_v42 = vsel %vm21536_vm1, %v414_v37, 0 }
  0xd1   : > { %1290 = vrot.lane.b32.xlu1 %v16409_v30, %s16244_s25  ;;  %726 = vmatpush1.bf16.msra.mxu1 %v462_v42  ;;  %v16808_v42 = vld [vmem:[%s21521_s2] sm:$0xf] }
  0xd2   : > { %v2277_v44 = vpop.permute.xlu0 %2276  ;;  %v2279_v45 = vpop.permute.xlu1 %2278  ;;  %14841 = vmatmul.mubr.msk.bf16.vlgmr.msra.gmra.mrb[4].mxu0 %vm420_vm3, %v16585_v21 }
  0xd3   : > { %2422 = vmatprep.mubr.bf16.mxu0 %v21525_v14  ;;  %v2315_v46 = vsel %vm2314_vm5, %v2277_v44, %v2279_v45 }
  0xd4   : > { %3779 = vrot.lane.b32.xlu0 %v16333_v7, %s16251_s18  ;;  %v2337_v51 = vsel %vm21536_vm1, %v2315_v46, 0 }
  0xd5   : > { %3781 = vrot.lane.b32.xlu1 %v16341_v10, %s16251_s18 }
  0xd6   : > { %v16719_v48 = vpop.permute.xlu0 %2280  ;;  %v394_v49 = vpop.permute.xlu1 %393  ;;  %14783 = vmatmul.mubr.msk.bf16.vlgmr.msra.gmra.mrb[24].mxu1 %vm420_vm3, %v16533_v52 }
  0xd7   : > { %v2316_v21 = vsel %vm2314_vm5, %v2279_v45, %v16719_v48  ;;  %798 = vmatprep.mubr.bf16.mxu1 %v21525_v14  ;;  %v416_v54 = vsel %vm401_vm2, %v392_v35, %v394_v49 }
  0xd8   : > { %3783 = vrot.lane.b32.xlu0 %v16343_v11, %s16251_s18  ;;  %14842 = vmatprep.subr.msk.bf16.mxu0 %vm21536_vm1, %v2316_v21  ;;  %v468_v60 = vsel %vm21536_vm1, %v416_v54, 0 }
  0xd9   : > { %1292 = vrot.lane.b32.xlu1 %v16417_v33, %s16244_s25  ;;  %2391 = vmatpush1.bf16.msra.mxu0 %v2337_v51  ;;  %v858_v51 = vsel %vm21536_vm1, %v16343_v11, 0 }
  0xda   : > { %v396_v55 = vpop.permute.xlu0 %395  ;;  %v16733_v56 = vpop.permute.xlu1 %2284 }
  0xdb   : > { %v417_v57 = vsel %vm401_vm2, %v394_v49, %v396_v55 }
  0xdc   : > { %1294 = vrot.lane.b32.xlu0 %v16419_v34, %s16244_s25  ;;  %14784 = vmatprep.subr.msk.bf16.mxu1 %vm21536_vm1, %v417_v57 }
  0xdd   : > { %767 = vmatpush1.bf16.msra.mxu1 %v468_v60  ;;  %3787 = vrot.lane.b32.xlu1 %v16377_v22, %s16251_s18 }
  0xde   : > { %v2287_v61 = vpop.permute.xlu0 %2286  ;;  %v16747_v63 = vpop.permute.xlu1 %2288  ;;  %14843 = vmatmul.mubr.msk.bf16.vlgmr.msra.gmra.mrb[8].mxu0 %vm420_vm3, %v16739_v58 }
  0xdf   : > { %v2319_v0 = vsel %vm2314_vm5, %v16733_v56, %v2287_v61  ;;  %v2320_v1 = vsel %vm2314_vm5, %v2287_v61, %v16747_v63  ;;  %2504 = vmatprep.mubr.bf16.mxu0 %v21525_v14 }
  0xe0   : > { %3789 = vrot.lane.b32.xlu0 %v16389_v25, %s16251_s18  ;;  %14785 = vmatmul.mubr.msk.bf16.vlgmr.msra.gmra.mrb[28].mxu1 %vm420_vm3, %v16533_v52  ;;  %v2349_v5 = vsel %vm21536_vm1, %v2319_v0, 0 }
  0xe1   : > { %14846 = vmatprep.subr.msk.bf16.mxu0 %vm21536_vm1, %v2320_v1  ;;  %3791 = vrot.lane.b32.xlu1 %v16391_v26, %s16251_s18 }
  0xe2   : > { %2473 = vmatpush1.bf16.msra.mxu0 %v2349_v5  ;;  %v398_v8 = vpop.permute.xlu0 %397  ;;  %v400_v12 = vpop.permute.xlu1 %399  ;;  %839 = vmatprep.mubr.bf16.mxu1 %v21525_v14  ;;  %v864_v5 = vsel %vm21536_vm1, %v16377_v22, 0 }
  0xe3   : > { %v418_v13 = vsel %vm401_vm2, %v396_v55, %v398_v8  ;;  %v419_v17 = vsel %vm401_vm2, %v398_v8, %v400_v12  ;;  %vm8328_vm2 = vcmask 187392  }
  0xe4   : > { %1296 = vrot.lane.b32.xlu0 %v16434_v36, %s16244_s25  ;;  %14786 = vmatprep.subr.msk.bf16.mxu1 %vm21536_vm1, %v419_v17  ;;  %v474_v18 = vsel %vm21536_vm1, %v418_v13, 0 }
  0xe5   : > { %808 = vmatpush1.bf16.msra.mxu1 %v474_v18  ;;  %3795 = vrot.lane.b32.xlu1 %v16409_v30, %s16251_s18 }
  0xe6   : > { %v16773_v23 = vpop.permute.xlu0 %2292  ;;  %v2295_v27 = vpop.permute.xlu1 %2294  ;;  %14847 = vmatmul.mubr.msk.bf16.vlgmr.msra.gmra.mrb[12].mxu0 %vm420_vm3, %v16739_v58  ;;  %14788 = vmatprep.subr.msk.bf16.mxu1 %vm21536_vm1, %v16341_v10 }
  0xe7   : > { %2586 = vmatprep.mubr.bf16.mxu0 %v21525_v14  ;;  %v2323_v32 = vsel %vm2314_vm5, %v16773_v23, %v2295_v27 }
  0xe8   : > { %3797 = vrot.lane.b32.xlu0 %v16417_v33, %s16251_s18  ;;  %14787 = vmatmul.mubr.msk.bf16.vlgmr.msra.gmra.mrb[32].mxu1 %vm420_vm3, %v16533_v52  ;;  %v2361_v52 = vsel %vm21536_vm1, %v2323_v32, 0 }
  0xe9   : > { %3799 = vrot.lane.b32.xlu1 %v16419_v34, %s16251_s18  ;;  %906 = vmatpush1.bf16.msra.mxu1 %v852_v29  ;;  %v870_v29 = vsel %vm21536_vm1, %v16391_v26, 0 }
  0xea   : > { %v16790_v35 = vpop.permute.xlu0 %2296  ;;  %v16792_v37 = vpop.permute.xlu1 %2300  ;;  %937 = vmatprep.mubr.bf16.mxu1 %v21525_v14  ;;  %14790 = vmatprep.subr.msk.bf16.mxu1 %vm21536_vm1, %v16370_v20 }
  0xeb   : > { %v2324_v41 = vsel %vm2314_vm5, %v2295_v27, %v16790_v35 }
  0xec   : > { %1304 = vrot.lane.b32.xlu0 %v16457_v38, %s16244_s25  ;;  %14850 = vmatprep.subr.msk.bf16.mxu0 %vm21536_vm1, %v2324_v41 }
  0xed   : > { %2555 = vmatpush1.bf16.msra.mxu0 %v2361_v52  ;;  %3803 = vrot.lane.b32.xlu1 %v16324_v4, %s16251_s18 }
  0xee   : > { %v2303_v44 = vpop.permute.xlu0 %2302  ;;  %v16810_v45 = vpop.permute.xlu1 %2304 }
  0xef   : > { %v2327_v46 = vsel %vm2314_vm5, %v16792_v37, %v2303_v44  ;;  %v2328_v49 = vsel %vm2314_vm5, %v2303_v44, %v16810_v45 }
  0xf0   : > { %3805 = vrot.lane.b32.xlu0 %v16331_v6, %s16251_s18  ;;  %14789 = vmatmul.mubr.msk.bf16.vlgmr.msra.gmra.mrb[0].mxu1 %vm420_vm3, %v16808_v42  ;;  %v2373_v21 = vsel %vm21536_vm1, %v2327_v46, 0  ;;  %v16900_v46 = vld [vmem:[%s21521_s2 + $0x14] sm:$0xf] }
  0xf1   : > { %14851 = vmatmul.mubr.msk.bf16.vlgmr.msra.gmra.mrb[16].mxu0 %vm420_vm3, %v16739_v58  ;;  %14854 = vmatprep.subr.msk.bf16.mxu0 %vm21536_vm1, %v2328_v49  ;;  %v876_v49 = vsel %vm21536_vm1, %v16409_v30, 0 }
  0xf2   : > { %2637 = vmatpush1.bf16.msra.mxu0 %v2373_v21  ;;  %v16826_v54 = vpop.permute.xlu0 %2308  ;;  %v2311_v55 = vpop.permute.xlu1 %2310  ;;  %3807 = vrot.lane.b32.xlu1 %v16322_v3, %s16251_s18 }
  0xf3   : > { %947 = vmatpush1.bf16.msra.mxu1 %v858_v51  ;;  %978 = vmatprep.mubr.bf16.mxu1 %v21525_v14  ;;  %v2331_v57 = vsel %vm2314_vm5, %v16826_v54, %v2311_v55 }
  0xf4   : > { %1781 = vrot.lane.b32.xlu0 %v16370_v20, %s16247_s5  ;;  %2668 = vmatprep.mubr.bf16.mxu0 %v21525_v14  ;;  %v2385_v1 = vsel %vm21536_vm1, %v2331_v57, 0 }
  0xf5   : > { %14792 = vmatprep.subr.msk.bf16.mxu1 %vm21536_vm1, %v16389_v25 }
  0xf6   : > { %v2313_v60 = vpop.permute.xlu0 %2312  ;;  %v2778_v61 = vpop.permute.xlu1 %2777  ;;  %3811 = vrot.lane.b32.xlu1 %v16358_v15, %s16251_s18 }
  0xf7   : > { %v2332_v0 = vsel %vm2314_vm5, %v2311_v55, %v2313_v60 }
  0xf8   : > { %3813 = vrot.lane.b32.xlu0 %v16360_v16, %s16251_s18  ;;  %14791 = vmatmul.mubr.msk.bf16.vlgmr.msra.gmra.mrb[4].mxu1 %vm420_vm3, %v16808_v42 }
  0xf9   : > { %14855 = vmatmul.mubr.msk.bf16.vlgmr.msra.gmra.mrb[0].mxu0 %vm420_vm3, %v16739_v58  ;;  %14858 = vmatprep.subr.msk.bf16.mxu0 %vm21536_vm1, %v2332_v0 }
  0xfa   : > { %2719 = vmatpush1.bf16.msra.mxu0 %v2385_v1  ;;  %v2780_v8 = vpop.permute.xlu0 %2779  ;;  %v16851_v12 = vpop.permute.xlu1 %2781  ;;  %3815 = vrot.lane.b32.xlu1 %v16368_v19, %s16251_s18  ;;  %v882_v1 = vsel %vm21536_vm1, %v16419_v34, 0 }
  0xfb   : > { %988 = vmatpush1.bf16.msra.mxu1 %v864_v5  ;;  %1019 = vmatprep.mubr.bf16.mxu1 %v21525_v14  ;;  %v2817_v13 = vsel %vm2815_vm6, %v2780_v8, %v16851_v12  ;;  %v2816_v17 = vsel %vm2815_vm6, %v2778_v61, %v2780_v8 }
  0xfc   : > { %1789 = vrot.lane.b32.xlu0 %v16402_v28, %s16247_s5  ;;  %2750 = vmatprep.mubr.bf16.mxu0 %v21525_v14  ;;  %v2838_v32 = vsel %vm21536_vm1, %v2816_v17, 0 }
  0xfd   : > { %14860 = vmatprep.subr.msk.bf16.mxu0 %vm21536_vm1, %v2817_v13  ;;  %14794 = vmatprep.subr.msk.bf16.mxu1 %vm21536_vm1, %v16402_v28 }
  0xfe   : > { %v16865_v18 = vpop.permute.xlu0 %2785  ;;  %v2788_v27 = vpop.permute.xlu1 %2787  ;;  %4280 = vrot.lane.b32.xlu1 %v16333_v7, %s16252_s23 }
  0xff   : > { %v2820_v52 = vsel %vm2815_vm6, %v16865_v18, %v2788_v27 }
 0x100   : > { %4282 = vrot.lane.b32.xlu0 %v16341_v10, %s16252_s23  ;;  %14793 = vmatmul.mubr.msk.bf16.vlgmr.msra.gmra.mrb[8].mxu1 %vm420_vm3, %v16808_v42  ;;  %v2850_v51 = vsel %vm21536_vm1, %v2820_v52, 0 }
 0x101   : > { %14859 = vmatmul.mubr.msk.bf16.vlgmr.msra.gmra.mrb[4].mxu0 %vm420_vm3, %v16739_v58  ;;  %1029 = vmatpush1.bf16.msra.mxu1 %v870_v29 }
 0x102   : > { %2892 = vmatpush1.bf16.msra.mxu0 %v2838_v32  ;;  %v16878_v41 = vpop.permute.xlu0 %2789  ;;  %4284 = vrot.lane.b32.xlu1 %v16343_v11, %s16252_s23 }
 0x103   : > { %v16882_v7 = vpop.permute.xlu1 %2793  ;;  %1060 = vmatprep.mubr.bf16.mxu1 %v21525_v14  ;;  %2923 = vmatprep.mubr.bf16.mxu0 %v21525_v14  ;;  %v2821_v10 = vsel %vm2815_vm6, %v2788_v27, %v16878_v41 }
 0x104   : > { %1797 = vrot.lane.b32.xlu0 %v16434_v36, %s16247_s5  ;;  %14864 = vmatprep.subr.msk.bf16.mxu0 %vm21536_vm1, %v2821_v10  ;;  %v888_v10 = vsel %vm21536_vm1, %v16324_v4, 0 }
 0x105   : > { %14796 = vmatprep.subr.msk.bf16.mxu1 %vm21536_vm1, %v16417_v33 }
 0x106   : > { %v2796_v44 = vpop.permute.xlu0 %2795  ;;  %4288 = vrot.lane.b32.xlu1 %v16377_v22, %s16252_s23 }
 0x107   : > { %v16904_v21 = vpop.permute.xlu1 %2797  ;;  %v2824_v61 = vsel %vm2815_vm6, %v16882_v7, %v2796_v44 }
 0x108   : > { %4290 = vrot.lane.b32.xlu0 %v16389_v25, %s16252_s23  ;;  %14795 = vmatmul.mubr.msk.bf16.vlgmr.msra.gmra.mrb[12].mxu1 %vm420_vm3, %v16808_v42  ;;  %v2825_v55 = vsel %vm2815_vm6, %v2796_v44, %v16904_v21  ;;  %v2862_v13 = vsel %vm21536_vm1, %v2824_v61, 0 }
 0x109   : > { %14861 = vmatmul.mubr.msk.bf16.vlgmr.msra.gmra.mrb[8].mxu0 %vm420_vm3, %v16900_v46  ;;  %1070 = vmatpush1.bf16.msra.mxu1 %v876_v49 }
 0x10a   : > { %2974 = vmatpush1.bf16.msra.mxu0 %v2850_v51  ;;  %v16915_v57 = vpop.permute.xlu0 %2801  ;;  %4292 = vrot.lane.b32.xlu1 %v16391_v26, %s16252_s23 }
 0x10b   : > { %v2804_v60 = vpop.permute.xlu1 %2803  ;;  %1101 = vmatprep.mubr.bf16.mxu1 %v21525_v14  ;;  %3005 = vmatprep.mubr.bf16.mxu0 %v21525_v14 }
 0x10c   : > { %1805 = vrot.lane.b32.xlu0 %v16457_v38, %s16247_s5  ;;  %14868 = vmatprep.subr.msk.bf16.mxu0 %vm21536_vm1, %v2825_v55  ;;  %v2828_v29 = vsel %vm2815_vm6, %v16915_v57, %v2804_v60  ;;  %s16258_s5 = smov 40  }
 0x10d   : > { %14798 = vmatprep.subr.msk.bf16.mxu1 %vm21536_vm1, %v16434_v36  ;;  %v2874_v49 = vsel %vm21536_vm1, %v2828_v29, 0 }
 0x10e   : > { %v16928_v0 = vpop.permute.xlu0 %2805  ;;  %4296 = vrot.lane.b32.xlu1 %v16409_v30, %s16252_s23 }
 0x10f   : > { %v16934_v5 = vpop.permute.xlu1 %2809  ;;  %v2829_v8 = vsel %vm2815_vm6, %v2804_v60, %v16928_v0 }
 0x110   : > { %4298 = vrot.lane.b32.xlu0 %v16417_v33, %s16252_s23  ;;  %14797 = vmatmul.mubr.msk.bf16.vlgmr.msra.gmra.mrb[16].mxu1 %vm420_vm3, %v16808_v42 }
 0x111   : > { %14865 = vmatmul.mubr.msk.bf16.vlgmr.msra.gmra.mrb[12].mxu0 %vm420_vm3, %v16900_v46  ;;  %1111 = vmatpush1.bf16.msra.mxu1 %v882_v1  ;;  %v894_v1 = vsel %vm21536_vm1, %v16322_v3, 0 }
 0x112   : > { %3056 = vmatpush1.bf16.msra.mxu0 %v2862_v13  ;;  %v2812_v17 = vpop.permute.xlu0 %2811  ;;  %4300 = vrot.lane.b32.xlu1 %v16419_v34, %s16252_s23 }
 0x113   : > { %v2814_v27 = vpop.permute.xlu1 %2813  ;;  %14872 = vmatprep.subr.msk.bf16.mxu0 %vm21536_vm1, %v2829_v8  ;;  %1142 = vmatprep.mubr.bf16.mxu1 %v21525_v14  ;;  %v2832_v60 = vsel %vm2815_vm6, %v16934_v5, %v2812_v17 }
 0x114   : > { %2282 = vrot.lane.b32.xlu0 %v16370_v20, %s16248_s6  ;;  %3087 = vmatprep.mubr.bf16.mxu0 %v21525_v14  ;;  %v2833_v44 = vsel %vm2815_vm6, %v2812_v17, %v2814_v27  ;;  %v2886_v17 = vsel %vm21536_vm1, %v2832_v60, 0 }
 0x115   : > { %14800 = vmatprep.subr.msk.bf16.mxu1 %vm21536_vm1, %v16331_v6 }
 0x116   : > { %v3279_v32 = vpop.permute.xlu0 %3278  ;;  %4304 = vrot.lane.b32.xlu1 %v16324_v4, %s16252_s23 }
 0x117   : > { %v3281_v52 = vpop.permute.xlu1 %3280 }
 0x118   : > { %4306 = vrot.lane.b32.xlu0 %v16331_v6, %s16252_s23  ;;  %14799 = vmatmul.mubr.msk.bf16.vlgmr.msra.gmra.mrb[20].mxu1 %vm420_vm3, %v16808_v42 }
 0x119   : > { %14869 = vmatmul.mubr.msk.bf16.vlgmr.msra.gmra.mrb[16].mxu0 %vm420_vm3, %v16900_v46  ;;  %1152 = vmatpush1.bf16.msra.mxu1 %v888_v10  ;;  %v3317_v10 = vsel %vm3316_vm7, %v3279_v32, %v3281_v52 }
 0x11a   : > { %3138 = vmatpush1.bf16.msra.mxu0 %v2874_v49  ;;  %v16968_v51 = vpop.permute.xlu0 %3282  ;;  %4308 = vrot.lane.b32.xlu1 %v16322_v3, %s16252_s23  ;;  %v900_v49 = vsel %vm21536_vm1, %v16358_v15, 0 }
 0x11b   : > { %v16972_v55 = vpop.permute.xlu1 %3286  ;;  %14876 = vmatprep.subr.msk.bf16.mxu0 %vm21536_vm1, %v2833_v44  ;;  %1183 = vmatprep.mubr.bf16.mxu1 %v21525_v14  ;;  %v3318_v13 = vsel %vm3316_vm7, %v3281_v52, %v16968_v51  ;;  %v3339_v52 = vsel %vm21536_vm1, %v3317_v10, 0 }
 0x11c   : > { %21543 = vst [vmem:[#allocation3_spill] sm:$0xff] %v16972_v55  ;;  %2290 = vrot.lane.b32.xlu0 %v16402_v28, %s16248_s6  ;;  %3169 = vmatprep.mubr.bf16.mxu0 %v21525_v14 }
 0x11d   : > { %14802 = vmatprep.subr.msk.bf16.mxu1 %vm21536_vm1, %v16457_v38 }
 0x11e   : > { %v3289_v61 = vpop.permute.xlu0 %3288  ;;  %4312 = vrot.lane.b32.xlu1 %v16358_v15, %s16252_s23 }
 0x11f   : > { %v16987_v8 = vpop.permute.xlu1 %3290  ;;  %v3321_v10 = vsel %vm3316_vm7, %v16972_v55, %v3289_v61 }
 0x120   : > { %21544 = vst [vmem:[#allocation4_spill] sm:$0xff] %v16987_v8  ;;  %4314 = vrot.lane.b32.xlu0 %v16360_v16, %s16252_s23  ;;  %14801 = vmatmul.mubr.msk.bf16.vlgmr.msra.gmra.mrb[24].mxu1 %vm420_vm3, %v16808_v42 }
 0x121   : > { %14873 = vmatmul.mubr.msk.bf16.vlgmr.msra.gmra.mrb[0].mxu0 %vm420_vm3, %v16900_v46  ;;  %1193 = vmatpush1.bf16.msra.mxu1 %v894_v1  ;;  %v3322_v1 = vsel %vm3316_vm7, %v3289_v61, %v16987_v8 }
 0x122   : > { %3220 = vmatpush1.bf16.msra.mxu0 %v2886_v17  ;;  %v1275_v27 = vpop.permute.xlu0 %1274  ;;  %4316 = vrot.lane.b32.xlu1 %v16368_v19, %s16252_s23 }
 0x123   : > { %14878 = vmatprep.subr.msk.bf16.mxu0 %vm21536_vm1, %v3318_v13  ;;  %v1277_v29 = vpop.permute.xlu1 %1276  ;;  %1224 = vmatprep.mubr.bf16.mxu1 %v21525_v14 }
 0x124   : > { %2298 = vrot.lane.b32.xlu0 %v16434_v36, %s16248_s6  ;;  %3251 = vmatprep.mubr.bf16.mxu0 %v21525_v14  ;;  %v1313_v8 = vsel %vm1312_vm0, %v1275_v27, %v1277_v29 }
 0x125   : > { %14804 = vmatprep.subr.msk.bf16.mxu1 %vm21536_vm1, %v16360_v16  ;;  %v1335_v27 = vsel %vm21536_vm1, %v1313_v8, 0  ;;  %v21548_v8 = vmov 0  }
 0x126   : > { %v1279_v44 = vpop.permute.xlu0 %1278  ;;  %4783 = vrot.lane.b32.xlu1 %v16343_v11, %s16253_s26 }
 0x127   : > { %v17012_v60 = vpop.permute.xlu1 %3294  ;;  %v1314_v32 = vsel %vm1312_vm0, %v1277_v29, %v1279_v44  ;;  %v3351_v29 = vsel %vm21536_vm1, %v3321_v10, 0 }
 0x128   : > { %21545 = vst [vmem:[#allocation5_spill] sm:$0xff] %v17012_v60  ;;  %4785 = vrot.lane.b32.xlu0 %v16370_v20, %s16253_s26  ;;  %14803 = vmatmul.mubr.msk.bf16.vlgmr.msra.gmra.mrb[28].mxu1 %vm420_vm3, %v16808_v42 }
 0x129   : > { %14877 = vmatmul.mubr.msk.bf16.vlgmr.msra.gmra.mrb[4].mxu0 %vm420_vm3, %v16900_v46  ;;  %1234 = vmatpush1.bf16.msra.mxu1 %v900_v49 }
 0x12a   : > { %3393 = vmatpush1.bf16.msra.mxu0 %v3339_v52  ;;  %v3297_v13 = vpop.permute.xlu0 %3296  ;;  %4787 = vrot.lane.b32.xlu1 %v16377_v22, %s16253_s26 }
 0x12b   : > { %14882 = vmatprep.subr.msk.bf16.mxu0 %vm21536_vm1, %v3322_v1  ;;  %v17027_v17 = vpop.permute.xlu1 %3298  ;;  %14806 = vmatprep.subr.msk.bf16.mxu1 %vm21536_vm1, %v1314_v32  ;;  %v17042_v1 = vld [vmem:[%s21521_s2 + $0x18] sm:$0xf] }
 0x12c   : > { %21546 = vst [vmem:[#allocation6_spill] sm:$0xff] %v17027_v17  ;;  %2306 = vrot.lane.b32.xlu0 %v16457_v38, %s16248_s6  ;;  %1265 = vmatprep.mubr.bf16.mxu1 %v21525_v14  ;;  %v3326_v61 = vsel %vm3316_vm7, %v3297_v13, %v17027_v17 }
 0x12d   : > { %3424 = vmatprep.mubr.bf16.mxu0 %v21525_v14 }
 0x12e   : > { %v1281_v49 = vpop.permute.xlu0 %1280  ;;  %4791 = vrot.lane.b32.xlu1 %v16391_v26, %s16253_s26 }
 0x12f   : > { %v1283_v32 = vpop.permute.xlu1 %1282  ;;  %v1315_v10 = vsel %vm1312_vm0, %v1279_v44, %v1281_v49 }
 0x130   : > { %4793 = vrot.lane.b32.xlu0 %v16402_v28, %s16253_s26  ;;  %14805 = vmatmul.mubr.msk.bf16.vlgmr.msra.gmra.mrb[32].mxu1 %vm420_vm3, %v16808_v42  ;;  %v1316_v52 = vsel %vm1312_vm0, %v1281_v49, %v1283_v32 }
 0x131   : > { %1389 = vmatpush1.bf16.msra.mxu1 %v1335_v27  ;;  %14879 = vmatmul.mubr.msk.bf16.vlgmr.msra.gmra.mrb[8].mxu0 %vm420_vm3, %v17042_v1  ;;  %v3325_v27 = vsel %vm3316_vm7, %v17012_v60, %v3297_v13 }
 0x132   : > { %3475 = vmatpush1.bf16.msra.mxu0 %v3351_v29  ;;  %v17055_v14 = vpop.permute.xlu0 %3302  ;;  %4795 = vrot.lane.b32.xlu1 %v16409_v30, %s16253_s26  ;;  %v3363_v13 = vsel %vm21536_vm1, %v3325_v27, 0 }
 0x133   : > { %21547 = vst [vmem:[#allocation7_spill] sm:$0xff] %v17055_v14  ;;  %v3305_v42 = vpop.permute.xlu1 %3304  ;;  %14886 = vmatprep.subr.msk.bf16.mxu0 %vm21536_vm1, %v3326_v61  ;;  %1420 = vmatprep.mubr.bf16.mxu1 %v21548_v8 }
 0x134   : > { %2783 = vrot.lane.b32.xlu0 %v16370_v20, %s16249_s7  ;;  %14808 = vmatprep.subr.msk.bf16.mxu1 %vm21536_vm1, %v1316_v52  ;;  %v1341_v52 = vsel %vm21536_vm1, %v1315_v10, 0 }
 0x135   : > { %3506 = vmatprep.mubr.bf16.mxu0 %v21548_v8 }
 0x136   : > { %v17068_v29 = vpop.permute.xlu0 %3306  ;;  %4799 = vrot.lane.b32.xlu1 %v16419_v34, %s16253_s26 }
 0x137   : > { %21549 = vst [vmem:[#allocation8_spill] sm:$0xff] %v17068_v29  ;;  %v1285_v61 = vpop.permute.xlu1 %1284  ;;  %v3330_v44 = vsel %vm3316_vm7, %v3305_v42, %v17068_v29 }
 0x138   : > { %4801 = vrot.lane.b32.xlu0 %v16434_v36, %s16253_s26  ;;  %14807 = vmatmul.mubr.msk.bf16.vlgmr.msra.gmra.mrb[0].mxu1 %vm420_vm3, %v16522_v50  ;;  %v1317_v27 = vsel %vm1312_vm0, %v1283_v32, %v1285_v61 }
 0x139   : > { %1430 = vmatpush1.bf16.msra.mxu1 %v1341_v52  ;;  %14883 = vmatmul.mubr.msk.bf16.vlgmr.msra.gmra.mrb[12].mxu0 %vm420_vm3, %v17042_v1  ;;  %v3329_v52 = vsel %vm3316_vm7, %v17055_v14, %v3305_v42 }
 0x13a   : > { %3557 = vmatpush1.bf16.msra.mxu0 %v3363_v13  ;;  %v1287_v49 = vpop.permute.xlu0 %1286  ;;  %4803 = vrot.lane.b32.xlu1 %v16324_v4, %s16253_s26  ;;  %v3375_v42 = vsel %vm21536_vm1, %v3329_v52, 0 }
 0x13b   : > { %v17084_v17 = vpop.permute.xlu1 %3310  ;;  %14890 = vmatprep.subr.msk.bf16.mxu0 %vm21536_vm1, %v3330_v44  ;;  %1461 = vmatprep.mubr.bf16.mxu1 %v21548_v8  ;;  %v1318_v10 = vsel %vm1312_vm0, %v1285_v61, %v1287_v49  ;;  %v288_v61 = vld [vmem:[%s16352_s30 + $0x8] sm:$0xff] }
 0x13c   : > { %2791 = vrot.lane.b32.xlu0 %v16402_v28, %s16249_s7  ;;  %14810 = vmatprep.subr.msk.bf16.mxu1 %vm21536_vm1, %v1318_v10  ;;  %v1347_v10 = vsel %vm21536_vm1, %v1317_v27, 0  ;;  %v289_v27 = vld [vmem:[%s16352_s30 + $0x10] sm:$0xff]  ;;  %v17117_v52 = vpack.c.bf16 %v288_v61, %v288_v61 }
 0x13d   : > { %3588 = vmatprep.mubr.bf16.mxu0 %v21548_v8  ;;  %v17125_v16 = vpack.c.bf16 %v289_v27, %v289_v27 }
 0x13e   : > { %v3313_v13 = vpop.permute.xlu0 %3312  ;;  %4807 = vrot.lane.b32.xlu1 %v16322_v3, %s16253_s26 }
 0x13f   : > { %v3315_v44 = vpop.permute.xlu1 %3314 }
 0x140   : > { %4809 = vrot.lane.b32.xlu0 %v16457_v38, %s16253_s26  ;;  %14809 = vmatmul.mubr.msk.bf16.vlgmr.msra.gmra.mrb[4].mxu1 %vm420_vm3, %v16522_v50  ;;  %v3334_v32 = vsel %vm3316_vm7, %v3313_v13, %v3315_v44 }
 0x141   : > { %1471 = vmatpush1.bf16.msra.mxu1 %v1347_v10  ;;  %14887 = vmatmul.mubr.msk.bf16.vlgmr.msra.gmra.mrb[16].mxu0 %vm420_vm3, %v17042_v1 }
 0x142   : > { %3639 = vmatpush1.bf16.msra.mxu0 %v3375_v42  ;;  %v1289_v29 = vpop.permute.xlu0 %1288  ;;  %4811 = vrot.lane.b32.xlu1 %v16358_v15, %s16253_s26  ;;  %v3333_v42 = vsel %vm3316_vm7, %v17084_v17, %v3313_v13 }
 0x143   : > { %v1291_v14 = vpop.permute.xlu1 %1290  ;;  %1502 = vmatprep.mubr.bf16.mxu1 %v21548_v8  ;;  %3670 = vmatprep.mubr.bf16.mxu0 %v21548_v8  ;;  %v1319_v10 = vsel %vm1312_vm0, %v1287_v49, %v1289_v29  ;;  %v3387_v49 = vsel %vm21536_vm1, %v3333_v42, 0 }
 0x144   : > { %2799 = vrot.lane.b32.xlu0 %v16434_v36, %s16249_s7  ;;  %v1320_v44 = vsel %vm1312_vm0, %v1289_v29, %v1291_v14  ;;  %14894 = vmatprep.subr.msk.bf16.mxu0 %vm21536_vm1, %v3334_v32  ;;  %v1353_v29 = vsel %vm21536_vm1, %v1319_v10, 0 }
 0x145   : > { %14812 = vmatprep.subr.msk.bf16.mxu1 %vm21536_vm1, %v1320_v44 }
 0x146   : > { %v3780_v60 = vpop.permute.xlu0 %3779  ;;  %4815 = vrot.lane.b32.xlu1 %v16368_v19, %s16253_s26 }
 0x147   : > { %v3782_v55 = vpop.permute.xlu1 %3781 }
 0x148   : > { %4817 = vrot.lane.b32.xlu0 %v17117_v52, %s16253_s26  ;;  %14811 = vmatmul.mubr.msk.bf16.vlgmr.msra.gmra.mrb[8].mxu1 %vm420_vm3, %v16522_v50  ;;  %v3818_v27 = vsel %vm3817_vm8, %v3780_v60, %v3782_v55 }
 0x149   : > { %1512 = vmatpush1.bf16.msra.mxu1 %v1353_v29  ;;  %14891 = vmatmul.mubr.msk.bf16.vlgmr.msra.gmra.mrb[0].mxu0 %vm420_vm3, %v17042_v1  ;;  %v3840_v29 = vsel %vm21536_vm1, %v3818_v27, 0  ;;  %v17178_v27 = vld [vmem:[%s21521_s2 + $0x1c] sm:$0xf] }
 0x14a   : > { %3721 = vmatpush1.bf16.msra.mxu0 %v3387_v49  ;;  %v17135_v13 = vpop.permute.xlu0 %3783  ;;  %4819 = vrot.lane.b32.xlu1 %v17125_v16, %s16253_s26 }
 0x14b   : > { %v1293_v32 = vpop.permute.xlu1 %1292  ;;  %1543 = vmatprep.mubr.bf16.mxu1 %v21548_v8  ;;  %3752 = vmatprep.mubr.bf16.mxu0 %v21548_v8  ;;  %v3819_v61 = vsel %vm3817_vm8, %v3782_v55, %v17135_v13 }
 0x14c   : > { %2807 = vrot.lane.b32.xlu0 %v16457_v38, %s16249_s7  ;;  %14896 = vmatprep.subr.msk.bf16.mxu0 %vm21536_vm1, %v3819_v61  ;;  %v1321_v44 = vsel %vm1312_vm0, %v1291_v14, %v1293_v32  ;;  %s16259_s7 = smov 24  }
 0x14d   : > { %v1359_v14 = vsel %vm21536_vm1, %v1321_v44, 0 }
 0x14e   : > { %v1295_v10 = vpop.permute.xlu0 %1294  ;;  %5284 = vrot.lane.b32.xlu1 %v16343_v11, %s16254_s29 }
 0x14f   : > { %v1322_v42 = vsel %vm1312_vm0, %v1293_v32, %v1295_v10  ;;  %v17152_v49 = vpop.permute.xlu1 %3787 }
 0x150   : > { %5286 = vrot.lane.b32.xlu0 %v16370_v20, %s16254_s29  ;;  %14813 = vmatmul.mubr.msk.bf16.vlgmr.msra.gmra.mrb[12].mxu1 %vm420_vm3, %v16522_v50 }
 0x151   : > { %14814 = vmatprep.subr.msk.bf16.mxu1 %vm21536_vm1, %v1322_v42  ;;  %14895 = vmatmul.mubr.msk.bf16.vlgmr.msra.gmra.mrb[4].mxu0 %vm420_vm3, %v17042_v1 }
 0x152   : > { %1553 = vmatpush1.bf16.msra.mxu1 %v1359_v14  ;;  %3894 = vmatpush1.bf16.msra.mxu0 %v3840_v29  ;;  %v3790_v55 = vpop.permute.xlu0 %3789 }
 0x153   : > { %5288 = vrot.lane.b32.xlu1 %v16377_v22, %s16254_s29  ;;  %v17164_v60 = vpop.permute.xlu1 %3791  ;;  %1584 = vmatprep.mubr.bf16.mxu1 %v21548_v8  ;;  %v3822_v50 = vsel %vm3817_vm8, %v17152_v49, %v3790_v55 }
 0x154   : > { %3284 = vrot.lane.b32.xlu0 %v16370_v20, %s16250_s12  ;;  %3925 = vmatprep.mubr.bf16.mxu0 %v21548_v8  ;;  %v3823_v32 = vsel %vm3817_vm8, %v3790_v55, %v17164_v60  ;;  %v3852_v29 = vsel %vm21536_vm1, %v3822_v50, 0  ;;  %v16231_v55 = vld [vmem:[%s21521_s2 + $0x8] sm:$0xf] }
 0x155   : > { %14900 = vmatprep.subr.msk.bf16.mxu0 %vm21536_vm1, %v3823_v32 }
 0x156   : > { %v1297_v61 = vpop.permute.xlu0 %1296 }
 0x157   : > { %v1323_v44 = vsel %vm1312_vm0, %v1295_v10, %v1297_v61  ;;  %5292 = vrot.lane.b32.xlu1 %v16391_v26, %s16254_s29  ;;  %v1324_v42 = vsel %vm1312_vm0, %v1297_v61, %v16501_v40  ;;  %v17186_v14 = vpop.permute.xlu1 %3795 }
 0x158   : > { %21550 = vst [vmem:[#allocation9_spill] sm:$0xff] %v17186_v14  ;;  %5294 = vrot.lane.b32.xlu0 %v16402_v28, %s16254_s29  ;;  %14815 = vmatmul.mubr.msk.bf16.vlgmr.msra.gmra.mrb[16].mxu1 %vm420_vm3, %v16231_v55  ;;  %v1365_v10 = vsel %vm21536_vm1, %v1323_v44, 0 }
 0x159   : > { %14816 = vmatprep.subr.msk.bf16.mxu1 %vm21536_vm1, %v1324_v42  ;;  %14897 = vmatmul.mubr.msk.bf16.vlgmr.msra.gmra.mrb[8].mxu0 %vm420_vm3, %v17178_v27 }
 0x15a   : > { %1594 = vmatpush1.bf16.msra.mxu1 %v1365_v10  ;;  %3976 = vmatpush1.bf16.msra.mxu0 %v3852_v29  ;;  %v3798_v40 = vpop.permute.xlu0 %3797 }
 0x15b   : > { %5296 = vrot.lane.b32.xlu1 %v16409_v30, %s16254_s29  ;;  %v17200_v50 = vpop.permute.xlu1 %3799  ;;  %1625 = vmatprep.mubr.bf16.mxu1 %v21548_v8  ;;  %v3826_v32 = vsel %vm3817_vm8, %v17186_v14, %v3798_v40 }
 0x15c   : > { %3292 = vrot.lane.b32.xlu0 %v16402_v28, %s16250_s12  ;;  %4007 = vmatprep.mubr.bf16.mxu0 %v21548_v8  ;;  %v3827_v61 = vsel %vm3817_vm8, %v3798_v40, %v17200_v50  ;;  %v3864_v10 = vsel %vm21536_vm1, %v3826_v32, 0 }
 0x15d   : > { %14904 = vmatprep.subr.msk.bf16.mxu0 %vm21536_vm1, %v3827_v61 }
 0x15e   : > { %v1305_v44 = vpop.permute.xlu0 %1304 }
 0x15f   : > { %v1327_v42 = vsel %vm1312_vm0, %v16499_v39, %v1305_v44  ;;  %5300 = vrot.lane.b32.xlu1 %v16419_v34, %s16254_s29  ;;  %v1328_v29 = vsel %vm1312_vm0, %v1305_v44, %v16535_v53  ;;  %v17218_v14 = vpop.permute.xlu1 %3803  ;;  %vm7827_vm0 = vcmask 195584  }
 0x160   : > { %5302 = vrot.lane.b32.xlu0 %v16434_v36, %s16254_s29  ;;  %14817 = vmatmul.mubr.msk.bf16.vlgmr.msra.gmra.mrb[20].mxu1 %vm420_vm3, %v16231_v55  ;;  %v1377_v40 = vsel %vm21536_vm1, %v1327_v42, 0 }
 0x161   : > { %14820 = vmatprep.subr.msk.bf16.mxu1 %vm21536_vm1, %v1328_v29  ;;  %14901 = vmatmul.mubr.msk.bf16.vlgmr.msra.gmra.mrb[12].mxu0 %vm420_vm3, %v17178_v27 }
 0x162   : > { %1676 = vmatpush1.bf16.msra.mxu1 %v1377_v40  ;;  %4058 = vmatpush1.bf16.msra.mxu0 %v3864_v10  ;;  %v3806_v39 = vpop.permute.xlu0 %3805 }
 0x163   : > { %5304 = vrot.lane.b32.xlu1 %v16324_v4, %s16254_s29  ;;  %1707 = vmatprep.mubr.bf16.mxu1 %v21548_v8  ;;  %v3830_v53 = vsel %vm3817_vm8, %v17218_v14, %v3806_v39 }
 0x164   : > { %3300 = vrot.lane.b32.xlu0 %v16434_v36, %s16250_s12  ;;  %v17234_v32 = vpop.permute.xlu1 %3807  ;;  %4089 = vmatprep.mubr.bf16.mxu0 %v21548_v8  ;;  %v3876_v10 = vsel %vm21536_vm1, %v3830_v53, 0 }
 0x165   : > { %v3831_v61 = vsel %vm3817_vm8, %v3806_v39, %v17234_v32 }
 0x166   : > { %v1782_v44 = vpop.permute.xlu0 %1781  ;;  %14908 = vmatprep.subr.msk.bf16.mxu0 %vm21536_vm1, %v3831_v61 }
 0x167   : > { %v1816_v42 = vsel %vm1813_vm4, %v16564_v2, %v1782_v44  ;;  %5308 = vrot.lane.b32.xlu1 %v16322_v3, %s16254_s29  ;;  %v1817_v29 = vsel %vm1813_vm4, %v1782_v44, %v16594_v24 }
 0x168   : > { %5310 = vrot.lane.b32.xlu0 %v16457_v38, %s16254_s29  ;;  %14821 = vmatmul.mubr.msk.bf16.vlgmr.msra.gmra.mrb[28].mxu1 %vm420_vm3, %v16231_v55  ;;  %v1842_v40 = vsel %vm21536_vm1, %v1816_v42, 0  ;;  %v17251_v39 = vpop.permute.xlu1 %3811 }
 0x169   : > { %14826 = vmatprep.subr.msk.bf16.mxu1 %vm21536_vm1, %v1817_v29  ;;  %14905 = vmatmul.mubr.msk.bf16.vlgmr.msra.gmra.mrb[16].mxu0 %vm420_vm3, %v17178_v27 }
 0x16a   : > { %1931 = vmatpush1.bf16.msra.mxu1 %v1842_v40  ;;  %4140 = vmatpush1.bf16.msra.mxu0 %v3876_v10  ;;  %v3814_v2 = vpop.permute.xlu0 %3813  ;;  %v17278_v10 = vld [vmem:[%s21521_s2 + $0xc] sm:$0xf] }
 0x16b   : > { %5312 = vrot.lane.b32.xlu1 %v16358_v15, %s16254_s29  ;;  %1962 = vmatprep.mubr.bf16.mxu1 %v21548_v8  ;;  %v3834_v24 = vsel %vm3817_vm8, %v17251_v39, %v3814_v2 }
 0x16c   : > { %3308 = vrot.lane.b32.xlu0 %v16457_v38, %s16250_s12  ;;  %v3816_v55 = vpop.permute.xlu1 %3815  ;;  %4171 = vmatprep.mubr.bf16.mxu0 %v21548_v8  ;;  %v3888_v29 = vsel %vm21536_vm1, %v3834_v24, 0 }
 0x16d   : > { %v3835_v53 = vsel %vm3817_vm8, %v3814_v2, %v3816_v55 }
 0x16e   : > { %v1790_v61 = vpop.permute.xlu0 %1789  ;;  %14912 = vmatprep.subr.msk.bf16.mxu0 %vm21536_vm1, %v3835_v53 }
 0x16f   : > { %v1820_v44 = vsel %vm1813_vm4, %v16605_v31, %v1790_v61  ;;  %5316 = vrot.lane.b32.xlu1 %v16368_v19, %s16254_s29  ;;  %v1821_v42 = vsel %vm1813_vm4, %v1790_v61, %v16619_v43 }
 0x170   : > { %5318 = vrot.lane.b32.xlu0 %v17117_v52, %s16254_s29  ;;  %14827 = vmatmul.mubr.msk.bf16.vlgmr.msra.gmra.mrb[4].mxu1 %vm420_vm3, %v17278_v10  ;;  %v1854_v31 = vsel %vm21536_vm1, %v1820_v44, 0  ;;  %v4281_v40 = vpop.permute.xlu1 %4280 }
 0x171   : > { %14830 = vmatprep.subr.msk.bf16.mxu1 %vm21536_vm1, %v1821_v42  ;;  %14909 = vmatmul.mubr.msk.bf16.vlgmr.msra.gmra.mrb[0].mxu0 %vm420_vm3, %v17178_v27 }
 0x172   : > { %2013 = vmatpush1.bf16.msra.mxu1 %v1854_v31  ;;  %4222 = vmatpush1.bf16.msra.mxu0 %v3888_v29  ;;  %v4283_v43 = vpop.permute.xlu0 %4282 }
 0x173   : > { %5320 = vrot.lane.b32.xlu1 %v17125_v16, %s16254_s29  ;;  %2044 = vmatprep.mubr.bf16.mxu1 %v21548_v8  ;;  %v4319_v2 = vsel %vm4318_vm9, %v4281_v40, %v4283_v43 }
 0x174   : > { %3785 = vrot.lane.b32.xlu0 %v16370_v20, %s16251_s18  ;;  %v17292_v24 = vpop.permute.xlu1 %4284  ;;  %4253 = vmatprep.mubr.bf16.mxu0 %v21548_v8  ;;  %v4341_v61 = vsel %vm21536_vm1, %v4319_v2, 0 }
 0x175   : > { %v4320_v55 = vsel %vm4318_vm9, %v4283_v43, %v17292_v24 }
 0x176   : > { %v1798_v53 = vpop.permute.xlu0 %1797  ;;  %14914 = vmatprep.subr.msk.bf16.mxu0 %vm21536_vm1, %v4320_v55  ;;  %v17330_v55 = vld [vmem:[%s21521_s2 + $0x20] sm:$0xf] }
 0x177   : > { %v1824_v44 = vsel %vm1813_vm4, %v16628_v47, %v1798_v53  ;;  %5785 = vrot.lane.b32.xlu1 %v16343_v11, %s16255_s11  ;;  %v1825_v42 = vsel %vm1813_vm4, %v1798_v53, %v16654_v59 }
 0x178   : > { %5787 = vrot.lane.b32.xlu0 %v16370_v20, %s16255_s11  ;;  %14831 = vmatmul.mubr.msk.bf16.vlgmr.msra.gmra.mrb[12].mxu1 %vm420_vm3, %v17278_v10  ;;  %v1866_v29 = vsel %vm21536_vm1, %v1824_v44, 0  ;;  %v17310_v31 = vpop.permute.xlu1 %4288 }
 0x179   : > { %14834 = vmatprep.subr.msk.bf16.mxu1 %vm21536_vm1, %v1825_v42  ;;  %14913 = vmatmul.mubr.msk.bf16.vlgmr.msra.gmra.mrb[4].mxu0 %vm420_vm3, %v17178_v27 }
 0x17a   : > { %2095 = vmatpush1.bf16.msra.mxu1 %v1866_v29  ;;  %4395 = vmatpush1.bf16.msra.mxu0 %v4341_v61  ;;  %v4291_v47 = vpop.permute.xlu0 %4290 }
 0x17b   : > { %5789 = vrot.lane.b32.xlu1 %v16377_v22, %s16255_s11  ;;  %2126 = vmatprep.mubr.bf16.mxu1 %v21548_v8  ;;  %v4323_v59 = vsel %vm4318_vm9, %v17310_v31, %v4291_v47 }
 0x17c   : > { %3793 = vrot.lane.b32.xlu0 %v16402_v28, %s16251_s18  ;;  %v17322_v40 = vpop.permute.xlu1 %4292  ;;  %4426 = vmatprep.mubr.bf16.mxu0 %v21548_v8  ;;  %v4353_v44 = vsel %vm21536_vm1, %v4323_v59, 0 }
 0x17d   : > { %v4324_v43 = vsel %vm4318_vm9, %v4291_v47, %v17322_v40 }
 0x17e   : > { %v1806_v2 = vpop.permute.xlu0 %1805  ;;  %14918 = vmatprep.subr.msk.bf16.mxu0 %vm21536_vm1, %v4324_v43 }
 0x17f   : > { %v1828_v53 = vsel %vm1813_vm4, %v16665_v62, %v1806_v2  ;;  %5793 = vrot.lane.b32.xlu1 %v16391_v26, %s16255_s11  ;;  %v1829_v61 = vsel %vm1813_vm4, %v1806_v2, %v16679_v9  ;;  %vm8829_vm4 = vcmask 179200  }
 0x180   : > { %5795 = vrot.lane.b32.xlu0 %v16402_v28, %s16255_s11  ;;  %14835 = vmatmul.mubr.msk.bf16.vlgmr.msra.gmra.mrb[20].mxu1 %vm420_vm3, %v17278_v10  ;;  %v1878_v42 = vsel %vm21536_vm1, %v1828_v53, 0  ;;  %v17345_v29 = vpop.permute.xlu1 %4296 }
 0x181   : > { %14838 = vmatprep.subr.msk.bf16.mxu1 %vm21536_vm1, %v1829_v61  ;;  %14915 = vmatmul.mubr.msk.bf16.vlgmr.msra.gmra.mrb[8].mxu0 %vm420_vm3, %v17330_v55 }
 0x182   : > { %2177 = vmatpush1.bf16.msra.mxu1 %v1878_v42  ;;  %4477 = vmatpush1.bf16.msra.mxu0 %v4353_v44  ;;  %v4299_v62 = vpop.permute.xlu0 %4298 }
 0x183   : > { %5797 = vrot.lane.b32.xlu1 %v16409_v30, %s16255_s11  ;;  %2208 = vmatprep.mubr.bf16.mxu1 %v21548_v8  ;;  %v4327_v9 = vsel %vm4318_vm9, %v17345_v29, %v4299_v62 }
 0x184   : > { %3801 = vrot.lane.b32.xlu0 %v16434_v36, %s16251_s18  ;;  %v17357_v47 = vpop.permute.xlu1 %4300  ;;  %4508 = vmatprep.mubr.bf16.mxu0 %v21548_v8  ;;  %v4365_v61 = vsel %vm21536_vm1, %v4327_v9, 0 }
 0x185   : > { %v4328_v59 = vsel %vm4318_vm9, %v4299_v62, %v17357_v47 }
 0x186   : > { %v2283_v43 = vpop.permute.xlu0 %2282  ;;  %14922 = vmatprep.subr.msk.bf16.mxu0 %vm21536_vm1, %v4328_v59 }
 0x187   : > { %v2317_v2 = vsel %vm2314_vm5, %v16719_v48, %v2283_v43  ;;  %5801 = vrot.lane.b32.xlu1 %v16419_v34, %s16255_s11  ;;  %v2318_v53 = vsel %vm2314_vm5, %v2283_v43, %v16733_v56 }
 0x188   : > { %5803 = vrot.lane.b32.xlu0 %v16434_v36, %s16255_s11  ;;  %14839 = vmatmul.mubr.msk.bf16.vlgmr.msra.gmra.mrb[28].mxu1 %vm420_vm3, %v17278_v10  ;;  %v2343_v44 = vsel %vm21536_vm1, %v2317_v2, 0  ;;  %v17375_v42 = vpop.permute.xlu1 %4304 }
 0x189   : > { %14844 = vmatprep.subr.msk.bf16.mxu1 %vm21536_vm1, %v2318_v53  ;;  %14919 = vmatmul.mubr.msk.bf16.vlgmr.msra.gmra.mrb[12].mxu0 %vm420_vm3, %v17330_v55 }
 0x18a   : > { %2432 = vmatpush1.bf16.msra.mxu1 %v2343_v44  ;;  %4559 = vmatpush1.bf16.msra.mxu0 %v4365_v61  ;;  %v4307_v48 = vpop.permute.xlu0 %4306 }
 0x18b   : > { %5805 = vrot.lane.b32.xlu1 %v16324_v4, %s16255_s11  ;;  %2463 = vmatprep.mubr.bf16.mxu1 %v21548_v8  ;;  %v4331_v56 = vsel %vm4318_vm9, %v17375_v42, %v4307_v48 }
 0x18c   : > { %3809 = vrot.lane.b32.xlu0 %v16457_v38, %s16251_s18  ;;  %v17387_v10 = vpop.permute.xlu1 %4308  ;;  %4590 = vmatprep.mubr.bf16.mxu0 %v21548_v8  ;;  %v4377_v2 = vsel %vm21536_vm1, %v4331_v56, 0 }
 0x18d   : > { %v4332_v62 = vsel %vm4318_vm9, %v4307_v48, %v17387_v10 }
 0x18e   : > { %v2291_v9 = vpop.permute.xlu0 %2290  ;;  %14926 = vmatprep.subr.msk.bf16.mxu0 %vm21536_vm1, %v4332_v62 }
 0x18f   : > { %v2321_v59 = vsel %vm2314_vm5, %v16747_v63, %v2291_v9  ;;  %5809 = vrot.lane.b32.xlu1 %v16322_v3, %s16255_s11  ;;  %v2322_v43 = vsel %vm2314_vm5, %v2291_v9, %v16773_v23 }
 0x190   : > { %5811 = vrot.lane.b32.xlu0 %v16457_v38, %s16255_s11  ;;  %14845 = vmatmul.mubr.msk.bf16.vlgmr.msra.gmra.mrb[4].mxu1 %vm420_vm3, %v16739_v58  ;;  %v2355_v53 = vsel %vm21536_vm1, %v2321_v59, 0  ;;  %v17405_v61 = vpop.permute.xlu1 %4312  ;;  %v16233_v59 = vld [vmem:[%s21521_s2 + $0x10] sm:$0xf] }
 0x191   : > { %14848 = vmatprep.subr.msk.bf16.mxu1 %vm21536_vm1, %v2322_v43  ;;  %14923 = vmatmul.mubr.msk.bf16.vlgmr.msra.gmra.mrb[16].mxu0 %vm420_vm3, %v17330_v55 }
 0x192   : > { %2514 = vmatpush1.bf16.msra.mxu1 %v2355_v53  ;;  %4641 = vmatpush1.bf16.msra.mxu0 %v4377_v2  ;;  %v4315_v63 = vpop.permute.xlu0 %4314 }
 0x193   : > { %5813 = vrot.lane.b32.xlu1 %v16358_v15, %s16255_s11  ;;  %2545 = vmatprep.mubr.bf16.mxu1 %v21548_v8  ;;  %v4335_v58 = vsel %vm4318_vm9, %v17405_v61, %v4315_v63 }
 0x194   : > { %4286 = vrot.lane.b32.xlu0 %v16370_v20, %s16252_s23  ;;  %v4317_v23 = vpop.permute.xlu1 %4316  ;;  %4672 = vmatprep.mubr.bf16.mxu0 %v21548_v8  ;;  %v4389_v9 = vsel %vm21536_vm1, %v4335_v58, 0 }
 0x195   : > { %v4336_v44 = vsel %vm4318_vm9, %v4315_v63, %v4317_v23 }
 0x196   : > { %v2299_v48 = vpop.permute.xlu0 %2298  ;;  %14930 = vmatprep.subr.msk.bf16.mxu0 %vm21536_vm1, %v4336_v44 }
 0x197   : > { %v2325_v56 = vsel %vm2314_vm5, %v16790_v35, %v2299_v48  ;;  %5817 = vrot.lane.b32.xlu1 %v16368_v19, %s16255_s11  ;;  %v2326_v62 = vsel %vm2314_vm5, %v2299_v48, %v16792_v37 }
 0x198   : > { %5819 = vrot.lane.b32.xlu0 %v17117_v52, %s16255_s11  ;;  %14849 = vmatmul.mubr.msk.bf16.vlgmr.msra.gmra.mrb[12].mxu1 %vm420_vm3, %v16233_v59  ;;  %v2367_v43 = vsel %vm21536_vm1, %v2325_v56, 0  ;;  %v4784_v35 = vpop.permute.xlu1 %4783 }
 0x199   : > { %14852 = vmatprep.subr.msk.bf16.mxu1 %vm21536_vm1, %v2326_v62  ;;  %14927 = vmatmul.mubr.msk.bf16.vlgmr.msra.gmra.mrb[0].mxu0 %vm420_vm3, %v17330_v55 }
 0x19a   : > { %2596 = vmatpush1.bf16.msra.mxu1 %v2367_v43  ;;  %4723 = vmatpush1.bf16.msra.mxu0 %v4389_v9  ;;  %v4786_v37 = vpop.permute.xlu0 %4785 }
 0x19b   : > { %5821 = vrot.lane.b32.xlu1 %v17125_v16, %s16255_s11  ;;  %2627 = vmatprep.mubr.bf16.mxu1 %v21548_v8  ;;  %v4822_v2 = vsel %vm4821_vm10, %v4784_v35, %v4786_v37 }
 0x19c   : > { %4294 = vrot.lane.b32.xlu0 %v16402_v28, %s16252_s23  ;;  %v17443_v53 = vpop.permute.xlu1 %4787  ;;  %4754 = vmatprep.mubr.bf16.mxu0 %v21548_v8  ;;  %v4844_v23 = vsel %vm21536_vm1, %v4822_v2, 0 }
 0x19d   : > { %v4823_v63 = vsel %vm4821_vm10, %v4786_v37, %v17443_v53  ;;  %v17480_v37 = vld [vmem:[%s21521_s2 + $0x24] sm:$0xf] }
 0x19e   : > { %v2307_v58 = vpop.permute.xlu0 %2306  ;;  %14932 = vmatprep.subr.msk.bf16.mxu0 %vm21536_vm1, %v4823_v63 }
 0x19f   : > { %v2329_v44 = vsel %vm2314_vm5, %v16810_v45, %v2307_v58  ;;  %6286 = vrot.lane.b32.xlu1 %v16343_v11, %s16256_s19  ;;  %v2330_v48 = vsel %vm2314_vm5, %v2307_v58, %v16826_v54  ;;  %vm9333_vm5 = vcmask 982016  }
 0x1a0   : > { %6288 = vrot.lane.b32.xlu0 %v16370_v20, %s16256_s19  ;;  %14853 = vmatmul.mubr.msk.bf16.vlgmr.msra.gmra.mrb[20].mxu1 %vm420_vm3, %v16233_v59  ;;  %v2379_v56 = vsel %vm21536_vm1, %v2329_v44, 0  ;;  %v17460_v62 = vpop.permute.xlu1 %4791 }
 0x1a1   : > { %14856 = vmatprep.subr.msk.bf16.mxu1 %vm21536_vm1, %v2330_v48  ;;  %14931 = vmatmul.mubr.msk.bf16.vlgmr.msra.gmra.mrb[4].mxu0 %vm420_vm3, %v17330_v55 }
 0x1a2   : > { %2678 = vmatpush1.bf16.msra.mxu1 %v2379_v56  ;;  %4898 = vmatpush1.bf16.msra.mxu0 %v4844_v23  ;;  %v4794_v45 = vpop.permute.xlu0 %4793 }
 0x1a3   : > { %6290 = vrot.lane.b32.xlu1 %v16377_v22, %s16256_s19  ;;  %2709 = vmatprep.mubr.bf16.mxu1 %v21548_v8  ;;  %v4826_v54 = vsel %vm4821_vm10, %v17460_v62, %v4794_v45 }
 0x1a4   : > { %4302 = vrot.lane.b32.xlu0 %v16434_v36, %s16252_s23  ;;  %v17472_v9 = vpop.permute.xlu1 %4795  ;;  %4929 = vmatprep.mubr.bf16.mxu0 %v21548_v8  ;;  %v4856_v58 = vsel %vm21536_vm1, %v4826_v54, 0 }
 0x1a5   : > { %v4827_v43 = vsel %vm4821_vm10, %v4794_v45, %v17472_v9 }
 0x1a6   : > { %v2784_v35 = vpop.permute.xlu0 %2783  ;;  %14936 = vmatprep.subr.msk.bf16.mxu0 %vm21536_vm1, %v4827_v43 }
 0x1a7   : > { %v2818_v2 = vsel %vm2815_vm6, %v16851_v12, %v2784_v35  ;;  %6294 = vrot.lane.b32.xlu1 %v16391_v26, %s16256_s19  ;;  %v2819_v63 = vsel %vm2815_vm6, %v2784_v35, %v16865_v18 }
 0x1a8   : > { %6296 = vrot.lane.b32.xlu0 %v16402_v28, %s16256_s19  ;;  %14857 = vmatmul.mubr.msk.bf16.vlgmr.msra.gmra.mrb[28].mxu1 %vm420_vm3, %v16233_v59  ;;  %v2844_v23 = vsel %vm21536_vm1, %v2818_v2, 0  ;;  %v17494_v44 = vpop.permute.xlu1 %4799 }
 0x1a9   : > { %14862 = vmatprep.subr.msk.bf16.mxu1 %vm21536_vm1, %v2819_v63  ;;  %14933 = vmatmul.mubr.msk.bf16.vlgmr.msra.gmra.mrb[8].mxu0 %vm420_vm3, %v17480_v37 }
 0x1aa   : > { %2933 = vmatpush1.bf16.msra.mxu1 %v2844_v23  ;;  %4980 = vmatpush1.bf16.msra.mxu0 %v4856_v58  ;;  %v4802_v12 = vpop.permute.xlu0 %4801 }
 0x1ab   : > { %6298 = vrot.lane.b32.xlu1 %v16409_v30, %s16256_s19  ;;  %2964 = vmatprep.mubr.bf16.mxu1 %v21548_v8  ;;  %v4830_v18 = vsel %vm4821_vm10, %v17494_v44, %v4802_v12 }
 0x1ac   : > { %4310 = vrot.lane.b32.xlu0 %v16457_v38, %s16252_s23  ;;  %v17506_v59 = vpop.permute.xlu1 %4803  ;;  %5011 = vmatprep.mubr.bf16.mxu0 %v21548_v8  ;;  %v4868_v43 = vsel %vm21536_vm1, %v4830_v18, 0 }
 0x1ad   : > { %v4831_v48 = vsel %vm4821_vm10, %v4802_v12, %v17506_v59 }
 0x1ae   : > { %v2792_v56 = vpop.permute.xlu0 %2791  ;;  %14940 = vmatprep.subr.msk.bf16.mxu0 %vm21536_vm1, %v4831_v48 }
 0x1af   : > { %v2822_v45 = vsel %vm2815_vm6, %v16878_v41, %v2792_v56  ;;  %6302 = vrot.lane.b32.xlu1 %v16419_v34, %s16256_s19  ;;  %v2823_v54 = vsel %vm2815_vm6, %v2792_v56, %v16882_v7 }
 0x1b0   : > { %6304 = vrot.lane.b32.xlu0 %v16434_v36, %s16256_s19  ;;  %14863 = vmatmul.mubr.msk.bf16.vlgmr.msra.gmra.mrb[4].mxu1 %vm420_vm3, %v16900_v46  ;;  %v2856_v35 = vsel %vm21536_vm1, %v2822_v45, 0  ;;  %v17524_v2 = vpop.permute.xlu1 %4807 }
 0x1b1   : > { %14866 = vmatprep.subr.msk.bf16.mxu1 %vm21536_vm1, %v2823_v54  ;;  %14937 = vmatmul.mubr.msk.bf16.vlgmr.msra.gmra.mrb[12].mxu0 %vm420_vm3, %v17480_v37 }
 0x1b2   : > { %3015 = vmatpush1.bf16.msra.mxu1 %v2856_v35  ;;  %5062 = vmatpush1.bf16.msra.mxu0 %v4868_v43  ;;  %v4810_v41 = vpop.permute.xlu0 %4809 }
 0x1b3   : > { %6306 = vrot.lane.b32.xlu1 %v16324_v4, %s16256_s19  ;;  %3046 = vmatprep.mubr.bf16.mxu1 %v21548_v8  ;;  %v4834_v7 = vsel %vm4821_vm10, %v17524_v2, %v4810_v41 }
 0x1b4   : > { %4789 = vrot.lane.b32.xlu0 %v16389_v25, %s16253_s26  ;;  %v17536_v63 = vpop.permute.xlu1 %4811  ;;  %5093 = vmatprep.mubr.bf16.mxu0 %v21548_v8  ;;  %v4880_v48 = vsel %vm21536_vm1, %v4834_v7, 0 }
 0x1b5   : > { %v4835_v58 = vsel %vm4821_vm10, %v4810_v41, %v17536_v63 }
 0x1b6   : > { %v2800_v23 = vpop.permute.xlu0 %2799  ;;  %14944 = vmatprep.subr.msk.bf16.mxu0 %vm21536_vm1, %v4835_v58  ;;  %v16234_v58 = vld [vmem:[%s21521_s2 + $0x14] sm:$0xf] }
 0x1b7   : > { %v2826_v12 = vsel %vm2815_vm6, %v16904_v21, %v2800_v23  ;;  %6310 = vrot.lane.b32.xlu1 %v16322_v3, %s16256_s19  ;;  %v2827_v18 = vsel %vm2815_vm6, %v2800_v23, %v16915_v57 }
 0x1b8   : > { %6312 = vrot.lane.b32.xlu0 %v16457_v38, %s16256_s19  ;;  %14867 = vmatmul.mubr.msk.bf16.vlgmr.msra.gmra.mrb[12].mxu1 %vm420_vm3, %v16900_v46  ;;  %v2868_v56 = vsel %vm21536_vm1, %v2826_v12, 0  ;;  %v17554_v45 = vpop.permute.xlu1 %4815 }
 0x1b9   : > { %14870 = vmatprep.subr.msk.bf16.mxu1 %vm21536_vm1, %v2827_v18  ;;  %14941 = vmatmul.mubr.msk.bf16.vlgmr.msra.gmra.mrb[16].mxu0 %vm420_vm3, %v17480_v37 }
 0x1ba   : > { %3097 = vmatpush1.bf16.msra.mxu1 %v2868_v56  ;;  %5144 = vmatpush1.bf16.msra.mxu0 %v4880_v48  ;;  %v4818_v21 = vpop.permute.xlu0 %4817 }
 0x1bb   : > { %6314 = vrot.lane.b32.xlu1 %v16358_v15, %s16256_s19  ;;  %3128 = vmatprep.mubr.bf16.mxu1 %v21548_v8  ;;  %v4838_v46 = vsel %vm4821_vm10, %v17554_v45, %v4818_v21 }
 0x1bc   : > { %4797 = vrot.lane.b32.xlu0 %v16417_v33, %s16253_s26  ;;  %v4820_v57 = vpop.permute.xlu1 %4819  ;;  %5175 = vmatprep.mubr.bf16.mxu0 %v21548_v8  ;;  %v4892_v7 = vsel %vm21536_vm1, %v4838_v46, 0 }
 0x1bd   : > { %v4839_v54 = vsel %vm4821_vm10, %v4818_v21, %v4820_v57  ;;  %v21551_v57 = vld [vmem:[#allocation3_spill] sm:$0xff] }
 0x1be   : > { %v2808_v43 = vpop.permute.xlu0 %2807  ;;  %14948 = vmatprep.subr.msk.bf16.mxu0 %vm21536_vm1, %v4839_v54 }
 0x1bf   : > { %v2830_v35 = vsel %vm2815_vm6, %v16928_v0, %v2808_v43  ;;  %6318 = vrot.lane.b32.xlu1 %v16368_v19, %s16256_s19  ;;  %v2831_v41 = vsel %vm2815_vm6, %v2808_v43, %v16934_v5  ;;  %vm9834_vm6 = vcmask 973824  }
 0x1c0   : > { %6320 = vrot.lane.b32.xlu0 %v17117_v52, %s16256_s19  ;;  %14871 = vmatmul.mubr.msk.bf16.vlgmr.msra.gmra.mrb[20].mxu1 %vm420_vm3, %v16234_v58  ;;  %v2880_v23 = vsel %vm21536_vm1, %v2830_v35, 0  ;;  %v5285_v0 = vpop.permute.xlu1 %5284 }
 0x1c1   : > { %14874 = vmatprep.subr.msk.bf16.mxu1 %vm21536_vm1, %v2831_v41  ;;  %14945 = vmatmul.mubr.msk.bf16.vlgmr.msra.gmra.mrb[0].mxu0 %vm420_vm3, %v17480_v37 }
 0x1c2   : > { %3179 = vmatpush1.bf16.msra.mxu1 %v2880_v23  ;;  %5226 = vmatpush1.bf16.msra.mxu0 %v4892_v7  ;;  %v5287_v5 = vpop.permute.xlu0 %5286  ;;  %v21552_v7 = vld [vmem:[#allocation2_spill] sm:$0xff] }
 0x1c3   : > { %6322 = vrot.lane.b32.xlu1 %v17125_v16, %s16256_s19  ;;  %3210 = vmatprep.mubr.bf16.mxu1 %v21548_v8  ;;  %v5323_v12 = vsel %vm5322_vm11, %v5285_v0, %v5287_v5  ;;  %v17627_v0 = vld [vmem:[%s21521_s2 + $0x28] sm:$0xf] }
 0x1c4   : > { %4805 = vrot.lane.b32.xlu0 %v16331_v6, %s16253_s26  ;;  %5257 = vmatprep.mubr.bf16.mxu0 %v21548_v8  ;;  %v5345_v21 = vsel %vm21536_vm1, %v5323_v12, 0  ;;  %v21553_v12 = vld [vmem:[#allocation4_spill] sm:$0xff] }
 0x1c5   : > { %v17593_v18 = vpop.permute.xlu1 %5288 }
 0x1c6   : > { %v3285_v48 = vpop.permute.xlu0 %3284  ;;  %v5324_v56 = vsel %vm5322_vm11, %v5287_v5, %v17593_v18 }
 0x1c7   : > { %v3319_v46 = vsel %vm3316_vm7, %v16968_v51, %v3285_v48  ;;  %6787 = vrot.lane.b32.xlu1 %v16343_v11, %s16257_s24  ;;  %v3320_v54 = vsel %vm3316_vm7, %v3285_v48, %v21551_v57  ;;  %14950 = vmatprep.subr.msk.bf16.mxu0 %vm21536_vm1, %v5324_v56  ;;  %v21554_v56 = vld [vmem:[#allocation5_spill] sm:$0xff] }
 0x1c8   : > { %6789 = vrot.lane.b32.xlu0 %v16370_v20, %s16257_s24  ;;  %14875 = vmatmul.mubr.msk.bf16.vlgmr.msra.gmra.mrb[28].mxu1 %vm420_vm3, %v16234_v58  ;;  %v3345_v43 = vsel %vm21536_vm1, %v3319_v46, 0 }
 0x1c9   : > { %14880 = vmatprep.subr.msk.bf16.mxu1 %vm21536_vm1, %v3320_v54  ;;  %14949 = vmatmul.mubr.msk.bf16.vlgmr.msra.gmra.mrb[4].mxu0 %vm420_vm3, %v17480_v37  ;;  %v17612_v51 = vpop.permute.xlu1 %5292 }
 0x1ca   : > { %3434 = vmatpush1.bf16.msra.mxu1 %v3345_v43  ;;  %5399 = vmatpush1.bf16.msra.mxu0 %v5345_v21  ;;  %v5295_v35 = vpop.permute.xlu0 %5294 }
 0x1cb   : > { %6791 = vrot.lane.b32.xlu1 %v16377_v22, %s16257_s24  ;;  %3465 = vmatprep.mubr.bf16.mxu1 %v21548_v8  ;;  %v5327_v41 = vsel %vm5322_vm11, %v17612_v51, %v5295_v35 }
 0x1cc   : > { %4813 = vrot.lane.b32.xlu0 %v21552_v7, %s16253_s26  ;;  %5430 = vmatprep.mubr.bf16.mxu0 %v21548_v8  ;;  %v5357_v46 = vsel %vm21536_vm1, %v5327_v41, 0  ;;  %s16265_s26 = smov 102  }
 0x1cd   : > { %v17622_v58 = vpop.permute.xlu1 %5296 }
 0x1ce   : > { %v3293_v23 = vpop.permute.xlu0 %3292  ;;  %v5328_v5 = vsel %vm5322_vm11, %v5295_v35, %v17622_v58 }
 0x1cf   : > { %v3323_v48 = vsel %vm3316_vm7, %v21553_v12, %v3293_v23  ;;  %6795 = vrot.lane.b32.xlu1 %v16391_v26, %s16257_s24  ;;  %v3324_v21 = vsel %vm3316_vm7, %v3293_v23, %v21554_v56  ;;  %14954 = vmatprep.subr.msk.bf16.mxu0 %vm21536_vm1, %v5328_v5  ;;  %v21555_v12 = vld [vmem:[#allocation6_spill] sm:$0xff]  ;;  %v21556_v56 = vld [vmem:[#allocation7_spill] sm:$0xff] }
 0x1d0   : > { %6797 = vrot.lane.b32.xlu0 %v16402_v28, %s16257_s24  ;;  %14881 = vmatmul.mubr.msk.bf16.vlgmr.msra.gmra.mrb[4].mxu1 %vm420_vm3, %v17042_v1  ;;  %v3357_v57 = vsel %vm21536_vm1, %v3323_v48, 0 }
 0x1d1   : > { %14884 = vmatprep.subr.msk.bf16.mxu1 %vm21536_vm1, %v3324_v21  ;;  %14951 = vmatmul.mubr.msk.bf16.vlgmr.msra.gmra.mrb[8].mxu0 %vm420_vm3, %v17627_v0  ;;  %v17647_v54 = vpop.permute.xlu1 %5300 }
 0x1d2   : > { %3516 = vmatpush1.bf16.msra.mxu1 %v3357_v57  ;;  %5481 = vmatpush1.bf16.msra.mxu0 %v5357_v46  ;;  %v5303_v43 = vpop.permute.xlu0 %5302 }
 0x1d3   : > { %6799 = vrot.lane.b32.xlu1 %v16409_v30, %s16257_s24  ;;  %3547 = vmatprep.mubr.bf16.mxu1 %v21548_v8  ;;  %v5331_v35 = vsel %vm5322_vm11, %v17647_v54, %v5303_v43 }
 0x1d4   : > { %5290 = vrot.lane.b32.xlu0 %v16389_v25, %s16254_s29  ;;  %5512 = vmatprep.mubr.bf16.mxu0 %v21548_v8  ;;  %v5369_v46 = vsel %vm21536_vm1, %v5331_v35, 0 }
 0x1d5   : > { %v17657_v41 = vpop.permute.xlu1 %5304 }
 0x1d6   : > { %v3301_v23 = vpop.permute.xlu0 %3300  ;;  %v5332_v5 = vsel %vm5322_vm11, %v5303_v43, %v17657_v41 }
 0x1d7   : > { %v3327_v48 = vsel %vm3316_vm7, %v21555_v12, %v3301_v23  ;;  %6803 = vrot.lane.b32.xlu1 %v16419_v34, %s16257_s24  ;;  %v3328_v21 = vsel %vm3316_vm7, %v3301_v23, %v21556_v56  ;;  %14958 = vmatprep.subr.msk.bf16.mxu0 %vm21536_vm1, %v5332_v5  ;;  %v21557_v56 = vld [vmem:[#allocation8_spill] sm:$0xff] }
 0x1d8   : > { %6805 = vrot.lane.b32.xlu0 %v16434_v36, %s16257_s24  ;;  %14885 = vmatmul.mubr.msk.bf16.vlgmr.msra.gmra.mrb[12].mxu1 %vm420_vm3, %v17042_v1  ;;  %v3369_v57 = vsel %vm21536_vm1, %v3327_v48, 0 }
 0x1d9   : > { %14888 = vmatprep.subr.msk.bf16.mxu1 %vm21536_vm1, %v3328_v21  ;;  %14955 = vmatmul.mubr.msk.bf16.vlgmr.msra.gmra.mrb[12].mxu0 %vm420_vm3, %v17627_v0  ;;  %v17677_v43 = vpop.permute.xlu1 %5308 }
 0x1da   : > { %3598 = vmatpush1.bf16.msra.mxu1 %v3369_v57  ;;  %5563 = vmatpush1.bf16.msra.mxu0 %v5369_v46  ;;  %v5311_v23 = vpop.permute.xlu0 %5310 }
 0x1db   : > { %6807 = vrot.lane.b32.xlu1 %v16324_v4, %s16257_s24  ;;  %3629 = vmatprep.mubr.bf16.mxu1 %v21548_v8  ;;  %v5335_v35 = vsel %vm5322_vm11, %v17677_v43, %v5311_v23 }
 0x1dc   : > { %5298 = vrot.lane.b32.xlu0 %v16417_v33, %s16254_s29  ;;  %5594 = vmatprep.mubr.bf16.mxu0 %v21548_v8  ;;  %v5381_v57 = vsel %vm21536_vm1, %v5335_v35, 0 }
 0x1dd   : > { %v17687_v5 = vpop.permute.xlu1 %5312 }
 0x1de   : > { %v3309_v12 = vpop.permute.xlu0 %3308  ;;  %v5336_v48 = vsel %vm5322_vm11, %v5311_v23, %v17687_v5 }
 0x1df   : > { %v3331_v21 = vsel %vm3316_vm7, %v21557_v56, %v3309_v12  ;;  %6811 = vrot.lane.b32.xlu1 %v16322_v3, %s16257_s24  ;;  %v3332_v46 = vsel %vm3316_vm7, %v3309_v12, %v17084_v17  ;;  %14962 = vmatprep.subr.msk.bf16.mxu0 %vm21536_vm1, %v5336_v48  ;;  %vm10335_vm7 = vcmask 965632  }
 0x1e0   : > { %6813 = vrot.lane.b32.xlu0 %v16457_v38, %s16257_s24  ;;  %14889 = vmatmul.mubr.msk.bf16.vlgmr.msra.gmra.mrb[20].mxu1 %vm420_vm3, %v17042_v1  ;;  %v3381_v23 = vsel %vm21536_vm1, %v3331_v21, 0 }
 0x1e1   : > { %14892 = vmatprep.subr.msk.bf16.mxu1 %vm21536_vm1, %v3332_v46  ;;  %14959 = vmatmul.mubr.msk.bf16.vlgmr.msra.gmra.mrb[16].mxu0 %vm420_vm3, %v17627_v0  ;;  %v17707_v56 = vpop.permute.xlu1 %5316 }
 0x1e2   : > { %3680 = vmatpush1.bf16.msra.mxu1 %v3381_v23  ;;  %5645 = vmatpush1.bf16.msra.mxu0 %v5381_v57  ;;  %v5319_v17 = vpop.permute.xlu0 %5318  ;;  %v16235_v23 = vld [vmem:[%s21521_s2 + $0x18] sm:$0xf] }
 0x1e3   : > { %6815 = vrot.lane.b32.xlu1 %v16358_v15, %s16257_s24  ;;  %3711 = vmatprep.mubr.bf16.mxu1 %v21548_v8  ;;  %v5339_v1 = vsel %vm5322_vm11, %v17707_v56, %v5319_v17 }
 0x1e4   : > { %5306 = vrot.lane.b32.xlu0 %v16331_v6, %s16254_s29  ;;  %5676 = vmatprep.mubr.bf16.mxu0 %v21548_v8  ;;  %v5393_v57 = vsel %vm21536_vm1, %v5339_v1, 0 }
 0x1e5   : > { %v5321_v35 = vpop.permute.xlu1 %5320 }
 0x1e6   : > { %v3786_v12 = vpop.permute.xlu0 %3785  ;;  %v5340_v48 = vsel %vm5322_vm11, %v5319_v17, %v5321_v35 }
 0x1e7   : > { %v3820_v21 = vsel %vm3817_vm8, %v17135_v13, %v3786_v12  ;;  %6819 = vrot.lane.b32.xlu1 %v16368_v19, %s16257_s24  ;;  %v3821_v46 = vsel %vm3817_vm8, %v3786_v12, %v17152_v49  ;;  %14966 = vmatprep.subr.msk.bf16.mxu0 %vm21536_vm1, %v5340_v48 }
 0x1e8   : > { %6821 = vrot.lane.b32.xlu0 %v17117_v52, %s16257_s24  ;;  %14893 = vmatmul.mubr.msk.bf16.vlgmr.msra.gmra.mrb[28].mxu1 %vm420_vm3, %v16235_v23  ;;  %v3846_v13 = vsel %vm21536_vm1, %v3820_v21, 0 }
 0x1e9   : > { %14898 = vmatprep.subr.msk.bf16.mxu1 %vm21536_vm1, %v3821_v46  ;;  %14963 = vmatmul.mubr.msk.bf16.vlgmr.msra.gmra.mrb[0].mxu0 %vm420_vm3, %v17627_v0  ;;  %v5786_v49 = vpop.permute.xlu1 %5785 }
 0x1ea   : > { %3935 = vmatpush1.bf16.msra.mxu1 %v3846_v13  ;;  %5727 = vmatpush1.bf16.msra.mxu0 %v5393_v57  ;;  %v5788_v17 = vpop.permute.xlu0 %5787  ;;  %v21558_v57 = vld [vmem:[#allocation9_spill] sm:$0xff] }
 0x1eb   : > { %6823 = vrot.lane.b32.xlu1 %v17125_v16, %s16257_s24  ;;  %3966 = vmatprep.mubr.bf16.mxu1 %v21548_v8  ;;  %v5824_v1 = vsel %vm5823_vm12, %v5786_v49, %v5788_v17 }
 0x1ec   : > { %5314 = vrot.lane.b32.xlu0 %v21552_v7, %s16254_s29  ;;  %5758 = vmatprep.mubr.bf16.mxu0 %v21548_v8  ;;  %v5846_v21 = vsel %vm21536_vm1, %v5824_v1, 0  ;;  %s16266_s29 = smov 101  }
 0x1ed   : > { %v17743_v35 = vpop.permute.xlu1 %5789 }
 0x1ee   : > { %v3794_v12 = vpop.permute.xlu0 %3793  ;;  %v5825_v48 = vsel %vm5823_vm12, %v5788_v17, %v17743_v35 }
 0x1ef   : > { %v3824_v46 = vsel %vm3817_vm8, %v17164_v60, %v3794_v12  ;;  %7288 = vrot.lane.b32.xlu1 %v16343_v11, %s16258_s5  ;;  %v3825_v23 = vsel %vm3817_vm8, %v3794_v12, %v21558_v57  ;;  %14968 = vmatprep.subr.msk.bf16.mxu0 %vm21536_vm1, %v5825_v48 }
 0x1f0   : > { %7290 = vrot.lane.b32.xlu0 %v16370_v20, %s16258_s5  ;;  %14899 = vmatmul.mubr.msk.bf16.vlgmr.msra.gmra.mrb[4].mxu1 %vm420_vm3, %v17178_v27  ;;  %v3858_v13 = vsel %vm21536_vm1, %v3824_v46, 0 }
 0x1f1   : > { %14902 = vmatprep.subr.msk.bf16.mxu1 %vm21536_vm1, %v3825_v23  ;;  %14967 = vmatmul.mubr.msk.bf16.vlgmr.msra.gmra.mrb[4].mxu0 %vm420_vm3, %v17627_v0  ;;  %v17763_v60 = vpop.permute.xlu1 %5793  ;;  %v17782_v23 = vld [vmem:[%s21521_s2 + $0x2c] sm:$0xf] }
 0x1f2   : > { %4017 = vmatpush1.bf16.msra.mxu1 %v3858_v13  ;;  %5900 = vmatpush1.bf16.msra.mxu0 %v5846_v21  ;;  %v5796_v49 = vpop.permute.xlu0 %5795 }
 0x1f3   : > { %v17765_v17 = vpop.f32.mrb[24].mxu1  ;;  %7292 = vrot.lane.b32.xlu1 %v16377_v22, %s16258_s5  ;;  %4048 = vmatprep.mubr.bf16.mxu1 %v21548_v8  ;;  %v5828_v1 = vsel %vm5823_vm12, %v17763_v60, %v5796_v49 }
 0x1f4   : > { %21559 = vst [vmem:[#allocation3_spill] sm:$0xff] %v17765_v17  ;;  %5791 = vrot.lane.b32.xlu0 %v16389_v25, %s16255_s11  ;;  %v17774_v12 = vpop.f32.mrb[25].mxu1  ;;  %5931 = vmatprep.mubr.bf16.mxu0 %v21548_v8 }
 0x1f5   : > { %21560 = vst [vmem:[#allocation2_spill] sm:$0xff] %v17774_v12  ;;  %v1189_v48 = vpop.f32.mrb[26].mxu1  ;;  %v17777_v21 = vpop.permute.xlu1 %5797 }
 0x1f6   : > { %v3802_v46 = vpop.permute.xlu0 %3801  ;;  %v1190_v57 = vpop.f32.mrb[27].mxu1  ;;  %v5829_v13 = vsel %vm5823_vm12, %v5796_v49, %v17777_v21 }
 0x1f7   : > { %v3828_v17 = vsel %vm3817_vm8, %v17200_v50, %v3802_v46  ;;  %7296 = vrot.lane.b32.xlu1 %v16391_v26, %s16258_s5  ;;  %v3829_v48 = vsel %vm3817_vm8, %v3802_v46, %v17218_v14  ;;  %14972 = vmatprep.subr.msk.bf16.mxu0 %vm21536_vm1, %v5829_v13  ;;  %v5858_v57 = vsel %vm21536_vm1, %v5828_v1, 0 }
 0x1f8   : > { %7298 = vrot.lane.b32.xlu0 %v16402_v28, %s16258_s5  ;;  %14903 = vmatmul.mubr.msk.bf16.vlgmr.msra.gmra.mrb[12].mxu1 %vm420_vm3, %v17178_v27  ;;  %v3870_v49 = vsel %vm21536_vm1, %v3828_v17, 0 }
 0x1f9   : > { %14906 = vmatprep.subr.msk.bf16.mxu1 %vm21536_vm1, %v3829_v48  ;;  %14969 = vmatmul.mubr.msk.bf16.vlgmr.msra.gmra.mrb[8].mxu0 %vm420_vm3, %v17782_v23  ;;  %v17802_v50 = vpop.permute.xlu1 %5801 }
 0x1fa   : > { %4099 = vmatpush1.bf16.msra.mxu1 %v3870_v49  ;;  %5982 = vmatpush1.bf16.msra.mxu0 %v5858_v57  ;;  %v5804_v14 = vpop.permute.xlu0 %5803 }
 0x1fb   : > { %7300 = vrot.lane.b32.xlu1 %v16409_v30, %s16258_s5  ;;  %4130 = vmatprep.mubr.bf16.mxu1 %v21548_v8  ;;  %v5832_v1 = vsel %vm5823_vm12, %v17802_v50, %v5804_v14 }
 0x1fc   : > { %5799 = vrot.lane.b32.xlu0 %v16417_v33, %s16255_s11  ;;  %6013 = vmatprep.mubr.bf16.mxu0 %v21548_v8  ;;  %v5870_v49 = vsel %vm21536_vm1, %v5832_v1, 0 }
 0x1fd   : > { %v17812_v17 = vpop.permute.xlu1 %5805 }
 0x1fe   : > { %v3810_v46 = vpop.permute.xlu0 %3809  ;;  %v5833_v13 = vsel %vm5823_vm12, %v5804_v14, %v17812_v17 }
 0x1ff   : > { %v3832_v48 = vsel %vm3817_vm8, %v17234_v32, %v3810_v46  ;;  %7304 = vrot.lane.b32.xlu1 %v16419_v34, %s16258_s5  ;;  %v3833_v57 = vsel %vm3817_vm8, %v3810_v46, %v17251_v39  ;;  %14976 = vmatprep.subr.msk.bf16.mxu0 %vm21536_vm1, %v5833_v13  ;;  %vm10836_vm8 = vcmask 834560  }
 0x200   : > { %7306 = vrot.lane.b32.xlu0 %v16434_v36, %s16258_s5  ;;  %14907 = vmatmul.mubr.msk.bf16.vlgmr.msra.gmra.mrb[20].mxu1 %vm420_vm3, %v17178_v27  ;;  %v3882_v14 = vsel %vm21536_vm1, %v3832_v48, 0 }
 0x201   : > { %14910 = vmatprep.subr.msk.bf16.mxu1 %vm21536_vm1, %v3833_v57  ;;  %14973 = vmatmul.mubr.msk.bf16.vlgmr.msra.gmra.mrb[12].mxu0 %vm420_vm3, %v17782_v23  ;;  %v17832_v32 = vpop.permute.xlu1 %5809 }
 0x202   : > { %21561 = vst [vmem:[#allocation4_spill] sm:$0xff] %v17832_v32  ;;  %4181 = vmatpush1.bf16.msra.mxu1 %v3882_v14  ;;  %6064 = vmatpush1.bf16.msra.mxu0 %v5870_v49  ;;  %v5812_v39 = vpop.permute.xlu0 %5811 }
 0x203   : > { %v17834_v46 = vpop.f32.mrb[32].mxu1  ;;  %7308 = vrot.lane.b32.xlu1 %v16324_v4, %s16258_s5  ;;  %4212 = vmatprep.mubr.bf16.mxu1 %v21548_v8  ;;  %v5836_v1 = vsel %vm5823_vm12, %v17832_v32, %v5812_v39 }
 0x204   : > { %21562 = vst [vmem:[#allocation5_spill] sm:$0xff] %v17834_v46  ;;  %5807 = vrot.lane.b32.xlu0 %v16331_v6, %s16255_s11  ;;  %v17843_v13 = vpop.f32.mrb[33].mxu1  ;;  %6095 = vmatprep.mubr.bf16.mxu0 %v21548_v8 }
 0x205   : > { %21563 = vst [vmem:[#allocation6_spill] sm:$0xff] %v17843_v13  ;;  %v1271_v48 = vpop.f32.mrb[34].mxu1  ;;  %v17846_v57 = vpop.permute.xlu1 %5813 }
 0x206   : > { %v4287_v49 = vpop.permute.xlu0 %4286  ;;  %v1272_v14 = vpop.f32.mrb[35].mxu1  ;;  %v5837_v46 = vsel %vm5823_vm12, %v5812_v39, %v17846_v57  ;;  %v5882_v48 = vsel %vm21536_vm1, %v5836_v1, 0 }
 0x207   : > { %v4321_v12 = vsel %vm4318_vm9, %v17292_v24, %v4287_v49  ;;  %7312 = vrot.lane.b32.xlu1 %v16322_v3, %s16258_s5  ;;  %v4322_v32 = vsel %vm4318_vm9, %v4287_v49, %v17310_v31  ;;  %14980 = vmatprep.subr.msk.bf16.mxu0 %vm21536_vm1, %v5837_v46 }
 0x208   : > { %7314 = vrot.lane.b32.xlu0 %v16457_v38, %s16258_s5  ;;  %14911 = vmatmul.mubr.msk.bf16.vlgmr.msra.gmra.mrb[28].mxu1 %vm420_vm3, %v17178_v27  ;;  %v4347_v39 = vsel %vm21536_vm1, %v4321_v12, 0 }
 0x209   : > { %14916 = vmatprep.subr.msk.bf16.mxu1 %vm21536_vm1, %v4322_v32  ;;  %14977 = vmatmul.mubr.msk.bf16.vlgmr.msra.gmra.mrb[16].mxu0 %vm420_vm3, %v17782_v23  ;;  %v17866_v24 = vpop.permute.xlu1 %5817 }
 0x20a   : > { %4436 = vmatpush1.bf16.msra.mxu1 %v4347_v39  ;;  %6146 = vmatpush1.bf16.msra.mxu0 %v5882_v48  ;;  %v5820_v31 = vpop.permute.xlu0 %5819 }
 0x20b   : > { %v17868_v46 = vpop.f32.mrb[0].mxu1  ;;  %7316 = vrot.lane.b32.xlu1 %v16358_v15, %s16258_s5  ;;  %4467 = vmatprep.mubr.bf16.mxu1 %v21548_v8  ;;  %v5840_v27 = vsel %vm5823_vm12, %v17866_v24, %v5820_v31 }
 0x20c   : > { %5815 = vrot.lane.b32.xlu0 %v21552_v7, %s16255_s11  ;;  %v17877_v12 = vpop.f32.mrb[1].mxu1  ;;  %6177 = vmatprep.mubr.bf16.mxu0 %v21548_v8  ;;  %s16268_s11 = smov 84  }
 0x20d   : > { %21564 = vst [vmem:[#allocation7_spill] sm:$0xff] %v17877_v12  ;;  %v1426_v32 = vpop.f32.mrb[2].mxu1  ;;  %v5822_v1 = vpop.permute.xlu1 %5821  ;;  %v5894_v12 = vsel %vm21536_vm1, %v5840_v27, 0 }
 0x20e   : > { %v4295_v49 = vpop.permute.xlu0 %4294  ;;  %v5841_v14 = vsel %vm5823_vm12, %v5820_v31, %v5822_v1  ;;  %v1427_v48 = vpop.f32.mrb[3].mxu1 }
 0x20f   : > { %v4325_v39 = vsel %vm4318_vm9, %v17322_v40, %v4295_v49  ;;  %7320 = vrot.lane.b32.xlu1 %v16368_v19, %s16258_s5  ;;  %v4326_v13 = vsel %vm4318_vm9, %v4295_v49, %v17345_v29  ;;  %14984 = vmatprep.subr.msk.bf16.mxu0 %vm21536_vm1, %v5841_v14 }
 0x210   : > { %7322 = vrot.lane.b32.xlu0 %v17117_v52, %s16258_s5  ;;  %14917 = vmatmul.mubr.msk.bf16.vlgmr.msra.gmra.mrb[4].mxu1 %vm420_vm3, %v17330_v55  ;;  %v4359_v31 = vsel %vm21536_vm1, %v4325_v39, 0 }
 0x211   : > { %14920 = vmatprep.subr.msk.bf16.mxu1 %vm21536_vm1, %v4326_v13  ;;  %14981 = vmatmul.mubr.msk.bf16.vlgmr.msra.gmra.mrb[0].mxu0 %vm420_vm3, %v17782_v23  ;;  %v6287_v40 = vpop.permute.xlu1 %6286 }
 0x212   : > { %4518 = vmatpush1.bf16.msra.mxu1 %v4359_v31  ;;  %6228 = vmatpush1.bf16.msra.mxu0 %v5894_v12  ;;  %v6289_v29 = vpop.permute.xlu0 %6288 }
 0x213   : > { %7324 = vrot.lane.b32.xlu1 %v17125_v16, %s16258_s5  ;;  %4549 = vmatprep.mubr.bf16.mxu1 %v21548_v8  ;;  %v6325_v27 = vsel %vm6324_vm13, %v6287_v40, %v6289_v29 }
 0x214   : > { %6292 = vrot.lane.b32.xlu0 %v16389_v25, %s16256_s19  ;;  %6259 = vmatprep.mubr.bf16.mxu0 %v21548_v8  ;;  %v6347_v12 = vsel %vm21536_vm1, %v6325_v27, 0 }
 0x215   : > { %v17904_v13 = vpop.permute.xlu1 %6290 }
 0x216   : > { %v4303_v32 = vpop.permute.xlu0 %4302  ;;  %v6326_v1 = vsel %vm6324_vm13, %v6289_v29, %v17904_v13 }
 0x217   : > { %v4329_v49 = vsel %vm4318_vm9, %v17357_v47, %v4303_v32  ;;  %7789 = vrot.lane.b32.xlu1 %v16343_v11, %s16259_s7  ;;  %v4330_v14 = vsel %vm4318_vm9, %v4303_v32, %v17375_v42  ;;  %14986 = vmatprep.subr.msk.bf16.mxu0 %vm21536_vm1, %v6326_v1 }
 0x218   : > { %7791 = vrot.lane.b32.xlu0 %v16370_v20, %s16259_s7  ;;  %14921 = vmatmul.mubr.msk.bf16.vlgmr.msra.gmra.mrb[12].mxu1 %vm420_vm3, %v17330_v55  ;;  %v4371_v48 = vsel %vm21536_vm1, %v4329_v49, 0 }
 0x219   : > { %14924 = vmatprep.subr.msk.bf16.mxu1 %vm21536_vm1, %v4330_v14  ;;  %14985 = vmatmul.mubr.msk.bf16.vlgmr.msra.gmra.mrb[4].mxu0 %vm420_vm3, %v17782_v23  ;;  %v17924_v47 = vpop.permute.xlu1 %6294 }
 0x21a   : > { %4600 = vmatpush1.bf16.msra.mxu1 %v4371_v48  ;;  %6401 = vmatpush1.bf16.msra.mxu0 %v6347_v12  ;;  %v6297_v42 = vpop.permute.xlu0 %6296  ;;  %v17943_v12 = vld [vmem:[%s21521_s2 + $0x30] sm:$0xf] }
 0x21b   : > { %v17926_v39 = vpop.f32.mrb[8].mxu1  ;;  %7793 = vrot.lane.b32.xlu1 %v16377_v22, %s16259_s7  ;;  %4631 = vmatprep.mubr.bf16.mxu1 %v21548_v8  ;;  %v6329_v31 = vsel %vm6324_vm13, %v17924_v47, %v6297_v42 }
 0x21c   : > { %21565 = vst [vmem:[#allocation8_spill] sm:$0xff] %v17926_v39  ;;  %6300 = vrot.lane.b32.xlu0 %v16417_v33, %s16256_s19  ;;  %v17935_v40 = vpop.f32.mrb[9].mxu1  ;;  %6432 = vmatprep.mubr.bf16.mxu0 %v21548_v8 }
 0x21d   : > { %21566 = vst [vmem:[#allocation9_spill] sm:$0xff] %v17935_v40  ;;  %v1508_v29 = vpop.f32.mrb[10].mxu1  ;;  %v17938_v27 = vpop.permute.xlu1 %6298 }
 0x21e   : > { %v4311_v32 = vpop.permute.xlu0 %4310  ;;  %v1509_v1 = vpop.f32.mrb[11].mxu1  ;;  %v6330_v49 = vsel %vm6324_vm13, %v6297_v42, %v17938_v27  ;;  %v6359_v29 = vsel %vm21536_vm1, %v6329_v31, 0 }
 0x21f   : > { %v4333_v14 = vsel %vm4318_vm9, %v17387_v10, %v4311_v32  ;;  %7797 = vrot.lane.b32.xlu1 %v16391_v26, %s16259_s7  ;;  %v4334_v48 = vsel %vm4318_vm9, %v4311_v32, %v17405_v61  ;;  %14990 = vmatprep.subr.msk.bf16.mxu0 %vm21536_vm1, %v6330_v49  ;;  %vm11337_vm9 = vcmask 826368  }
 0x220   : > { %7799 = vrot.lane.b32.xlu0 %v16402_v28, %s16259_s7  ;;  %14925 = vmatmul.mubr.msk.bf16.vlgmr.msra.gmra.mrb[20].mxu1 %vm420_vm3, %v17330_v55  ;;  %v4383_v42 = vsel %vm21536_vm1, %v4333_v14, 0 }
 0x221   : > { %14928 = vmatprep.subr.msk.bf16.mxu1 %vm21536_vm1, %v4334_v48  ;;  %14987 = vmatmul.mubr.msk.bf16.vlgmr.msra.gmra.mrb[8].mxu0 %vm420_vm3, %v17943_v12  ;;  %v17963_v10 = vpop.permute.xlu1 %6302 }
 0x222   : > { %4682 = vmatpush1.bf16.msra.mxu1 %v4383_v42  ;;  %6483 = vmatpush1.bf16.msra.mxu0 %v6359_v29  ;;  %v6305_v61 = vpop.permute.xlu0 %6304 }
 0x223   : > { %7801 = vrot.lane.b32.xlu1 %v16409_v30, %s16259_s7  ;;  %4713 = vmatprep.mubr.bf16.mxu1 %v21548_v8  ;;  %v6333_v31 = vsel %vm6324_vm13, %v17963_v10, %v6305_v61 }
 0x224   : > { %6308 = vrot.lane.b32.xlu0 %v16331_v6, %s16256_s19  ;;  %6514 = vmatprep.mubr.bf16.mxu0 %v21548_v8  ;;  %v6371_v29 = vsel %vm21536_vm1, %v6333_v31, 0 }
 0x225   : > { %v17973_v32 = vpop.permute.xlu1 %6306 }
 0x226   : > { %v4790_v1 = vpop.permute.xlu0 %4789  ;;  %v6334_v49 = vsel %vm6324_vm13, %v6305_v61, %v17973_v32 }
 0x227   : > { %v4824_v14 = vsel %vm4821_vm10, %v17443_v53, %v4790_v1  ;;  %7805 = vrot.lane.b32.xlu1 %v16419_v34, %s16259_s7  ;;  %v4825_v48 = vsel %vm4821_vm10, %v4790_v1, %v17460_v62  ;;  %14994 = vmatprep.subr.msk.bf16.mxu0 %vm21536_vm1, %v6334_v49 }
 0x228   : > { %7807 = vrot.lane.b32.xlu0 %v16434_v36, %s16259_s7  ;;  %14929 = vmatmul.mubr.msk.bf16.vlgmr.msra.gmra.mrb[28].mxu1 %vm420_vm3, %v17330_v55  ;;  %v4850_v42 = vsel %vm21536_vm1, %v4824_v14, 0 }
 0x229   : > { %14934 = vmatprep.subr.msk.bf16.mxu1 %vm21536_vm1, %v4825_v48  ;;  %14991 = vmatmul.mubr.msk.bf16.vlgmr.msra.gmra.mrb[12].mxu0 %vm420_vm3, %v17943_v12  ;;  %v17993_v53 = vpop.permute.xlu1 %6310 }
 0x22a   : > { %4939 = vmatpush1.bf16.msra.mxu1 %v4850_v42  ;;  %6565 = vmatpush1.bf16.msra.mxu0 %v6371_v29  ;;  %v6313_v62 = vpop.permute.xlu0 %6312 }
 0x22b   : > { %v17995_v61 = vpop.f32.mrb[16].mxu1  ;;  %7809 = vrot.lane.b32.xlu1 %v16324_v4, %s16259_s7  ;;  %4970 = vmatprep.mubr.bf16.mxu1 %v21548_v8  ;;  %v6337_v55 = vsel %vm6324_vm13, %v17993_v53, %v6313_v62 }
 0x22c   : > { %21567 = vst [vmem:[#allocation10_spill] sm:$0xff] %v17995_v61  ;;  %6316 = vrot.lane.b32.xlu0 %v21552_v7, %s16256_s19  ;;  %v18004_v31 = vpop.f32.mrb[17].mxu1  ;;  %6596 = vmatprep.mubr.bf16.mxu0 %v21548_v8  ;;  %s16262_s19 = smov 120  }
 0x22d   : > { %21568 = vst [vmem:[#allocation11_spill] sm:$0xff] %v18004_v31  ;;  %v1590_v1 = vpop.f32.mrb[18].mxu1  ;;  %v18007_v49 = vpop.permute.xlu1 %6314 }
 0x22e   : > { %v4798_v14 = vpop.permute.xlu0 %4797  ;;  %v1591_v48 = vpop.f32.mrb[19].mxu1  ;;  %v6338_v29 = vsel %vm6324_vm13, %v6313_v62, %v18007_v49  ;;  %v6383_v1 = vsel %vm21536_vm1, %v6337_v55, 0 }
 0x22f   : > { %v4828_v42 = vsel %vm4821_vm10, %v17472_v9, %v4798_v14  ;;  %7813 = vrot.lane.b32.xlu1 %v16322_v3, %s16259_s7  ;;  %v4829_v61 = vsel %vm4821_vm10, %v4798_v14, %v17494_v44  ;;  %14998 = vmatprep.subr.msk.bf16.mxu0 %vm21536_vm1, %v6338_v29 }
 0x230   : > { %7815 = vrot.lane.b32.xlu0 %v16457_v38, %s16259_s7  ;;  %14935 = vmatmul.mubr.msk.bf16.vlgmr.msra.gmra.mrb[4].mxu1 %vm420_vm3, %v17480_v37  ;;  %v4862_v62 = vsel %vm21536_vm1, %v4828_v42, 0 }
 0x231   : > { %14938 = vmatprep.subr.msk.bf16.mxu1 %vm21536_vm1, %v4829_v61  ;;  %14995 = vmatmul.mubr.msk.bf16.vlgmr.msra.gmra.mrb[16].mxu0 %vm420_vm3, %v17943_v12  ;;  %v18027_v9 = vpop.permute.xlu1 %6318 }
 0x232   : > { %5021 = vmatpush1.bf16.msra.mxu1 %v4862_v62  ;;  %6647 = vmatpush1.bf16.msra.mxu0 %v6383_v1  ;;  %v6321_v44 = vpop.permute.xlu0 %6320 }
 0x233   : > { %7817 = vrot.lane.b32.xlu1 %v16358_v15, %s16259_s7  ;;  %5052 = vmatprep.mubr.bf16.mxu1 %v21548_v8  ;;  %v6341_v55 = vsel %vm6324_vm13, %v18027_v9, %v6321_v44 }
 0x234   : > { %6793 = vrot.lane.b32.xlu0 %v16389_v25, %s16257_s24  ;;  %6678 = vmatprep.mubr.bf16.mxu0 %v21548_v8  ;;  %v6395_v1 = vsel %vm21536_vm1, %v6341_v55, 0 }
 0x235   : > { %v6323_v61 = vpop.permute.xlu1 %6322 }
 0x236   : > { %v4806_v14 = vpop.permute.xlu0 %4805  ;;  %v6342_v48 = vsel %vm6324_vm13, %v6321_v44, %v6323_v61 }
 0x237   : > { %v4832_v29 = vsel %vm4821_vm10, %v17506_v59, %v4806_v14  ;;  %7821 = vrot.lane.b32.xlu1 %v16368_v19, %s16259_s7  ;;  %v4833_v42 = vsel %vm4821_vm10, %v4806_v14, %v17524_v2  ;;  %15002 = vmatprep.subr.msk.bf16.mxu0 %vm21536_vm1, %v6342_v48 }
 0x238   : > { %7823 = vrot.lane.b32.xlu0 %v17117_v52, %s16259_s7  ;;  %14939 = vmatmul.mubr.msk.bf16.vlgmr.msra.gmra.mrb[12].mxu1 %vm420_vm3, %v17480_v37  ;;  %v4874_v62 = vsel %vm21536_vm1, %v4832_v29, 0 }
 0x239   : > { %14942 = vmatprep.subr.msk.bf16.mxu1 %vm21536_vm1, %v4833_v42  ;;  %14999 = vmatmul.mubr.msk.bf16.vlgmr.msra.gmra.mrb[0].mxu0 %vm420_vm3, %v17943_v12  ;;  %v6788_v59 = vpop.permute.xlu1 %6787 }
 0x23a   : > { %5103 = vmatpush1.bf16.msra.mxu1 %v4874_v62  ;;  %6729 = vmatpush1.bf16.msra.mxu0 %v6395_v1  ;;  %v6790_v2 = vpop.permute.xlu0 %6789 }
 0x23b   : > { %7825 = vrot.lane.b32.xlu1 %v17125_v16, %s16259_s7  ;;  %5134 = vmatprep.mubr.bf16.mxu1 %v21548_v8  ;;  %v6826_v44 = vsel %vm6825_vm14, %v6788_v59, %v6790_v2 }
 0x23c   : > { %6801 = vrot.lane.b32.xlu0 %v16417_v33, %s16257_s24  ;;  %6760 = vmatprep.mubr.bf16.mxu0 %v21548_v8  ;;  %v6848_v48 = vsel %vm21536_vm1, %v6826_v44, 0  ;;  %v18096_v44 = vld [vmem:[%s21521_s2 + $0x34] sm:$0xf] }
 0x23d   : > { %v18061_v55 = vpop.permute.xlu1 %6791 }
 0x23e   : > { %v4814_v61 = vpop.permute.xlu0 %4813  ;;  %v6827_v14 = vsel %vm6825_vm14, %v6790_v2, %v18061_v55 }
 0x23f   : > { %v4836_v29 = vsel %vm4821_vm10, %v17536_v63, %v4814_v61  ;;  %8290 = vrot.lane.b32.xlu1 %v16343_v11, %s16260_s10  ;;  %v4837_v42 = vsel %vm4821_vm10, %v4814_v61, %v17554_v45  ;;  %15004 = vmatprep.subr.msk.bf16.mxu0 %vm21536_vm1, %v6827_v14  ;;  %vm11838_vm10 = vcmask 818176  }
 0x240   : > { %8292 = vrot.lane.b32.xlu0 %v16370_v20, %s16260_s10  ;;  %14943 = vmatmul.mubr.msk.bf16.vlgmr.msra.gmra.mrb[20].mxu1 %vm420_vm3, %v17480_v37  ;;  %v4886_v1 = vsel %vm21536_vm1, %v4836_v29, 0 }
 0x241   : > { %14946 = vmatprep.subr.msk.bf16.mxu1 %vm21536_vm1, %v4837_v42  ;;  %15003 = vmatmul.mubr.msk.bf16.vlgmr.msra.gmra.mrb[4].mxu0 %vm420_vm3, %v17943_v12  ;;  %v18081_v63 = vpop.permute.xlu1 %6795 }
 0x242   : > { %5185 = vmatpush1.bf16.msra.mxu1 %v4886_v1  ;;  %6902 = vmatpush1.bf16.msra.mxu0 %v6848_v48  ;;  %v6798_v45 = vpop.permute.xlu0 %6797 }
 0x243   : > { %8294 = vrot.lane.b32.xlu1 %v16377_v22, %s16260_s10  ;;  %5216 = vmatprep.mubr.bf16.mxu1 %v21548_v8  ;;  %v6830_v62 = vsel %vm6825_vm14, %v18081_v63, %v6798_v45 }
 0x244   : > { %6809 = vrot.lane.b32.xlu0 %v16331_v6, %s16257_s24  ;;  %6933 = vmatprep.mubr.bf16.mxu0 %v21548_v8  ;;  %v6860_v29 = vsel %vm21536_vm1, %v6830_v62, 0 }
 0x245   : > { %v18091_v59 = vpop.permute.xlu1 %6799 }
 0x246   : > { %v5291_v2 = vpop.permute.xlu0 %5290  ;;  %v6831_v61 = vsel %vm6825_vm14, %v6798_v45, %v18091_v59 }
 0x247   : > { %v5325_v14 = vsel %vm5322_vm11, %v17593_v18, %v5291_v2  ;;  %8298 = vrot.lane.b32.xlu1 %v16391_v26, %s16260_s10  ;;  %v5326_v48 = vsel %vm5322_vm11, %v5291_v2, %v17612_v51  ;;  %15008 = vmatprep.subr.msk.bf16.mxu0 %vm21536_vm1, %v6831_v61 }
 0x248   : > { %8300 = vrot.lane.b32.xlu0 %v16402_v28, %s16260_s10  ;;  %14947 = vmatmul.mubr.msk.bf16.vlgmr.msra.gmra.mrb[28].mxu1 %vm420_vm3, %v17480_v37  ;;  %v5351_v42 = vsel %vm21536_vm1, %v5325_v14, 0 }
 0x249   : > { %14952 = vmatprep.subr.msk.bf16.mxu1 %vm21536_vm1, %v5326_v48  ;;  %15005 = vmatmul.mubr.msk.bf16.vlgmr.msra.gmra.mrb[8].mxu0 %vm420_vm3, %v18096_v44  ;;  %v18116_v18 = vpop.permute.xlu1 %6803 }
 0x24a   : > { %5440 = vmatpush1.bf16.msra.mxu1 %v5351_v42  ;;  %6984 = vmatpush1.bf16.msra.mxu0 %v6860_v29  ;;  %v6806_v51 = vpop.permute.xlu0 %6805 }
 0x24b   : > { %8302 = vrot.lane.b32.xlu1 %v16409_v30, %s16260_s10  ;;  %5471 = vmatprep.mubr.bf16.mxu1 %v21548_v8  ;;  %v6834_v37 = vsel %vm6825_vm14, %v18116_v18, %v6806_v51 }
 0x24c   : > { %6817 = vrot.lane.b32.xlu0 %v21552_v7, %s16257_s24  ;;  %7015 = vmatprep.mubr.bf16.mxu0 %v21548_v8  ;;  %v6872_v14 = vsel %vm21536_vm1, %v6834_v37, 0  ;;  %s16264_s24 = smov 118  }
 0x24d   : > { %v18126_v1 = vpop.permute.xlu1 %6807 }
 0x24e   : > { %v5299_v45 = vpop.permute.xlu0 %5298  ;;  %v6835_v62 = vsel %vm6825_vm14, %v6806_v51, %v18126_v1 }
 0x24f   : > { %v5329_v2 = vsel %vm5322_vm11, %v17622_v58, %v5299_v45  ;;  %8306 = vrot.lane.b32.xlu1 %v16419_v34, %s16260_s10  ;;  %v5330_v61 = vsel %vm5322_vm11, %v5299_v45, %v17647_v54  ;;  %15012 = vmatprep.subr.msk.bf16.mxu0 %vm21536_vm1, %v6835_v62 }
 0x250   : > { %8308 = vrot.lane.b32.xlu0 %v16434_v36, %s16260_s10  ;;  %14953 = vmatmul.mubr.msk.bf16.vlgmr.msra.gmra.mrb[4].mxu1 %vm420_vm3, %v17627_v0  ;;  %v5363_v48 = vsel %vm21536_vm1, %v5329_v2, 0 }
 0x251   : > { %14956 = vmatprep.subr.msk.bf16.mxu1 %vm21536_vm1, %v5330_v61  ;;  %15009 = vmatmul.mubr.msk.bf16.vlgmr.msra.gmra.mrb[12].mxu0 %vm420_vm3, %v18096_v44  ;;  %v18146_v58 = vpop.permute.xlu1 %6811 }
 0x252   : > { %5522 = vmatpush1.bf16.msra.mxu1 %v5363_v48  ;;  %7066 = vmatpush1.bf16.msra.mxu0 %v6872_v14  ;;  %v6814_v54 = vpop.permute.xlu0 %6813 }
 0x253   : > { %8310 = vrot.lane.b32.xlu1 %v16324_v4, %s16260_s10  ;;  %5553 = vmatprep.mubr.bf16.mxu1 %v21548_v8  ;;  %v6838_v29 = vsel %vm6825_vm14, %v18146_v58, %v6814_v54 }
 0x254   : > { %7294 = vrot.lane.b32.xlu0 %v16389_v25, %s16258_s5  ;;  %7097 = vmatprep.mubr.bf16.mxu0 %v21548_v8  ;;  %v6884_v2 = vsel %vm21536_vm1, %v6838_v29, 0 }
 0x255   : > { %v18156_v42 = vpop.permute.xlu1 %6815 }
 0x256   : > { %v5307_v51 = vpop.permute.xlu0 %5306  ;;  %v6839_v37 = vsel %vm6825_vm14, %v6814_v54, %v18156_v42 }
 0x257   : > { %v5333_v45 = vsel %vm5322_vm11, %v17657_v41, %v5307_v51  ;;  %8314 = vrot.lane.b32.xlu1 %v16322_v3, %s16260_s10  ;;  %v5334_v62 = vsel %vm5322_vm11, %v5307_v51, %v17677_v43  ;;  %15016 = vmatprep.subr.msk.bf16.mxu0 %vm21536_vm1, %v6839_v37 }
 0x258   : > { %8316 = vrot.lane.b32.xlu0 %v16457_v38, %s16260_s10  ;;  %14957 = vmatmul.mubr.msk.bf16.vlgmr.msra.gmra.mrb[12].mxu1 %vm420_vm3, %v17627_v0  ;;  %v5375_v61 = vsel %vm21536_vm1, %v5333_v45, 0 }
 0x259   : > { %14960 = vmatprep.subr.msk.bf16.mxu1 %vm21536_vm1, %v5334_v62  ;;  %15013 = vmatmul.mubr.msk.bf16.vlgmr.msra.gmra.mrb[16].mxu0 %vm420_vm3, %v18096_v44  ;;  %v18176_v41 = vpop.permute.xlu1 %6819 }
 0x25a   : > { %5604 = vmatpush1.bf16.msra.mxu1 %v5375_v61  ;;  %7148 = vmatpush1.bf16.msra.mxu0 %v6884_v2  ;;  %v6822_v43 = vpop.permute.xlu0 %6821 }
 0x25b   : > { %8318 = vrot.lane.b32.xlu1 %v16358_v15, %s16260_s10  ;;  %5635 = vmatprep.mubr.bf16.mxu1 %v21548_v8  ;;  %v6842_v14 = vsel %vm6825_vm14, %v18176_v41, %v6822_v43 }
 0x25c   : > { %7302 = vrot.lane.b32.xlu0 %v16417_v33, %s16258_s5  ;;  %7179 = vmatprep.mubr.bf16.mxu0 %v21548_v8  ;;  %v6896_v45 = vsel %vm21536_vm1, %v6842_v14, 0 }
 0x25d   : > { %v6824_v48 = vpop.permute.xlu1 %6823 }
 0x25e   : > { %v5315_v54 = vpop.permute.xlu0 %5314  ;;  %v6843_v29 = vsel %vm6825_vm14, %v6822_v43, %v6824_v48 }
 0x25f   : > { %v5337_v51 = vsel %vm5322_vm11, %v17687_v5, %v5315_v54  ;;  %8322 = vrot.lane.b32.xlu1 %v16368_v19, %s16260_s10  ;;  %v5338_v37 = vsel %vm5322_vm11, %v5315_v54, %v17707_v56  ;;  %15020 = vmatprep.subr.msk.bf16.mxu0 %vm21536_vm1, %v6843_v29  ;;  %vm12339_vm11 = vcmask 687104  }
 0x260   : > { %8324 = vrot.lane.b32.xlu0 %v17117_v52, %s16260_s10  ;;  %14961 = vmatmul.mubr.msk.bf16.vlgmr.msra.gmra.mrb[20].mxu1 %vm420_vm3, %v17627_v0  ;;  %v5387_v62 = vsel %vm21536_vm1, %v5337_v51, 0 }
 0x261   : > { %14964 = vmatprep.subr.msk.bf16.mxu1 %vm21536_vm1, %v5338_v37  ;;  %15017 = vmatmul.mubr.msk.bf16.vlgmr.msra.gmra.mrb[0].mxu0 %vm420_vm3, %v18096_v44  ;;  %v7289_v5 = vpop.permute.xlu1 %7288  ;;  %v18245_v37 = vld [vmem:[%s21521_s2 + $0x38] sm:$0xf] }
 0x262   : > { %5686 = vmatpush1.bf16.msra.mxu1 %v5387_v62  ;;  %7230 = vmatpush1.bf16.msra.mxu0 %v6896_v45  ;;  %v7291_v56 = vpop.permute.xlu0 %7290 }
 0x263   : > { %8326 = vrot.lane.b32.xlu1 %v17125_v16, %s16260_s10  ;;  %5717 = vmatprep.mubr.bf16.mxu1 %v21548_v8  ;;  %v7327_v2 = vsel %vm7326_vm15, %v7289_v5, %v7291_v56 }
 0x264   : > { %7310 = vrot.lane.b32.xlu0 %v16331_v6, %s16258_s5  ;;  %7261 = vmatprep.mubr.bf16.mxu0 %v21548_v8  ;;  %v7349_v48 = vsel %vm21536_vm1, %v7327_v2, 0 }
 0x265   : > { %v18210_v61 = vpop.permute.xlu1 %7292 }
 0x266   : > { %v5792_v43 = vpop.permute.xlu0 %5791  ;;  %v7328_v14 = vsel %vm7326_vm15, %v7291_v56, %v18210_v61 }
 0x267   : > { %v5826_v54 = vsel %vm5823_vm12, %v17743_v35, %v5792_v43  ;;  %8791 = vrot.lane.b32.xlu1 %v16343_v11, %s16261_s13  ;;  %v5827_v29 = vsel %vm5823_vm12, %v5792_v43, %v17763_v60  ;;  %15022 = vmatprep.subr.msk.bf16.mxu0 %vm21536_vm1, %v7328_v14 }
 0x268   : > { %8793 = vrot.lane.b32.xlu0 %v16370_v20, %s16261_s13  ;;  %14965 = vmatmul.mubr.msk.bf16.vlgmr.msra.gmra.mrb[28].mxu1 %vm420_vm3, %v17627_v0  ;;  %v5852_v51 = vsel %vm21536_vm1, %v5826_v54, 0 }
 0x269   : > { %14970 = vmatprep.subr.msk.bf16.mxu1 %vm21536_vm1, %v5827_v29  ;;  %15021 = vmatmul.mubr.msk.bf16.vlgmr.msra.gmra.mrb[4].mxu0 %vm420_vm3, %v18096_v44  ;;  %v18230_v35 = vpop.permute.xlu1 %7296  ;;  %v21569_v29 = vld [vmem:[#allocation4_spill] sm:$0xff] }
 0x26a   : > { %5941 = vmatpush1.bf16.msra.mxu1 %v5852_v51  ;;  %7403 = vmatpush1.bf16.msra.mxu0 %v7349_v48  ;;  %v7299_v11 = vpop.permute.xlu0 %7298 }
 0x26b   : > { %8795 = vrot.lane.b32.xlu1 %v16377_v22, %s16261_s13  ;;  %5972 = vmatprep.mubr.bf16.mxu1 %v21548_v8  ;;  %v7331_v20 = vsel %vm7326_vm15, %v18230_v35, %v7299_v11 }
 0x26c   : > { %7318 = vrot.lane.b32.xlu0 %v21552_v7, %s16258_s5  ;;  %7434 = vmatprep.mubr.bf16.mxu0 %v21548_v8  ;;  %v7361_v5 = vsel %vm21536_vm1, %v7331_v20, 0  ;;  %s13824_s5 = sadd.s32 343, %s13823_s28 }
 0x26d   : > { %v18240_v0 = vpop.permute.xlu1 %7300 }
 0x26e   : > { %v5800_v60 = vpop.permute.xlu0 %5799  ;;  %v7332_v22 = vsel %vm7326_vm15, %v7299_v11, %v18240_v0 }
 0x26f   : > { %v5830_v45 = vsel %vm5823_vm12, %v17777_v21, %v5800_v60  ;;  %8799 = vrot.lane.b32.xlu1 %v16391_v26, %s16261_s13  ;;  %v5831_v62 = vsel %vm5823_vm12, %v5800_v60, %v17802_v50  ;;  %15026 = vmatprep.subr.msk.bf16.mxu0 %vm21536_vm1, %v7332_v22 }
 0x270   : > { %8801 = vrot.lane.b32.xlu0 %v16402_v28, %s16261_s13  ;;  %14971 = vmatmul.mubr.msk.bf16.vlgmr.msra.gmra.mrb[4].mxu1 %vm420_vm3, %v17782_v23  ;;  %v5864_v56 = vsel %vm21536_vm1, %v5830_v45, 0 }
 0x271   : > { %14974 = vmatprep.subr.msk.bf16.mxu1 %vm21536_vm1, %v5831_v62  ;;  %15023 = vmatmul.mubr.msk.bf16.vlgmr.msra.gmra.mrb[8].mxu0 %vm420_vm3, %v18245_v37  ;;  %v18265_v21 = vpop.permute.xlu1 %7304 }
 0x272   : > { %6023 = vmatpush1.bf16.msra.mxu1 %v5864_v56  ;;  %7485 = vmatpush1.bf16.msra.mxu0 %v7361_v5  ;;  %v7307_v50 = vpop.permute.xlu0 %7306 }
 0x273   : > { %8803 = vrot.lane.b32.xlu1 %v16409_v30, %s16261_s13  ;;  %6054 = vmatprep.mubr.bf16.mxu1 %v21548_v8  ;;  %v7335_v2 = vsel %vm7326_vm15, %v18265_v21, %v7307_v50 }
 0x274   : > { %7795 = vrot.lane.b32.xlu0 %v16389_v25, %s16259_s7  ;;  %7516 = vmatprep.mubr.bf16.mxu0 %v21548_v8  ;;  %v7373_v11 = vsel %vm21536_vm1, %v7335_v2, 0 }
 0x275   : > { %v18275_v43 = vpop.permute.xlu1 %7308 }
 0x276   : > { %v5808_v14 = vpop.permute.xlu0 %5807  ;;  %v7336_v48 = vsel %vm7326_vm15, %v7307_v50, %v18275_v43 }
 0x277   : > { %v5834_v54 = vsel %vm5823_vm12, %v17812_v17, %v5808_v14  ;;  %8807 = vrot.lane.b32.xlu1 %v16419_v34, %s16261_s13  ;;  %v5835_v51 = vsel %vm5823_vm12, %v5808_v14, %v21569_v29  ;;  %15030 = vmatprep.subr.msk.bf16.mxu0 %vm21536_vm1, %v7336_v48 }
 0x278   : > { %8809 = vrot.lane.b32.xlu0 %v16434_v36, %s16261_s13  ;;  %14975 = vmatmul.mubr.msk.bf16.vlgmr.msra.gmra.mrb[12].mxu1 %vm420_vm3, %v17782_v23  ;;  %v5876_v20 = vsel %vm21536_vm1, %v5834_v54, 0 }
 0x279   : > { %14978 = vmatprep.subr.msk.bf16.mxu1 %vm21536_vm1, %v5835_v51  ;;  %15027 = vmatmul.mubr.msk.bf16.vlgmr.msra.gmra.mrb[12].mxu0 %vm420_vm3, %v18245_v37  ;;  %v18295_v17 = vpop.permute.xlu1 %7312 }
 0x27a   : > { %6105 = vmatpush1.bf16.msra.mxu1 %v5876_v20  ;;  %7567 = vmatpush1.bf16.msra.mxu0 %v7373_v11  ;;  %v7315_v60 = vpop.permute.xlu0 %7314 }
 0x27b   : > { %8811 = vrot.lane.b32.xlu1 %v16324_v4, %s16261_s13  ;;  %6136 = vmatprep.mubr.bf16.mxu1 %v21548_v8  ;;  %v7339_v22 = vsel %vm7326_vm15, %v18295_v17, %v7315_v60 }
 0x27c   : > { %7803 = vrot.lane.b32.xlu0 %v16417_v33, %s16259_s7  ;;  %7598 = vmatprep.mubr.bf16.mxu0 %v21548_v8  ;;  %v7385_v2 = vsel %vm21536_vm1, %v7339_v22, 0 }
 0x27d   : > { %v18305_v45 = vpop.permute.xlu1 %7316 }
 0x27e   : > { %v5816_v62 = vpop.permute.xlu0 %5815  ;;  %v7340_v5 = vsel %vm7326_vm15, %v7315_v60, %v18305_v45 }
 0x27f   : > { %v5838_v56 = vsel %vm5823_vm12, %v17846_v57, %v5816_v62  ;;  %8815 = vrot.lane.b32.xlu1 %v16322_v3, %s16261_s13  ;;  %v5839_v50 = vsel %vm5823_vm12, %v5816_v62, %v17866_v24  ;;  %15034 = vmatprep.subr.msk.bf16.mxu0 %vm21536_vm1, %v7340_v5  ;;  %vm12840_vm12 = vcmask 678912  }
 0x280   : > { %8817 = vrot.lane.b32.xlu0 %v16457_v38, %s16261_s13  ;;  %14979 = vmatmul.mubr.msk.bf16.vlgmr.msra.gmra.mrb[20].mxu1 %vm420_vm3, %v17782_v23  ;;  %v5888_v14 = vsel %vm21536_vm1, %v5838_v56, 0 }
 0x281   : > { %14982 = vmatprep.subr.msk.bf16.mxu1 %vm21536_vm1, %v5839_v50  ;;  %15031 = vmatmul.mubr.msk.bf16.vlgmr.msra.gmra.mrb[16].mxu0 %vm420_vm3, %v18245_v37  ;;  %v18325_v57 = vpop.permute.xlu1 %7320 }
 0x282   : > { %6187 = vmatpush1.bf16.msra.mxu1 %v5888_v14  ;;  %7649 = vmatpush1.bf16.msra.mxu0 %v7385_v2  ;;  %v7323_v24 = vpop.permute.xlu0 %7322 }
 0x283   : > { %8819 = vrot.lane.b32.xlu1 %v16358_v15, %s16261_s13  ;;  %6218 = vmatprep.mubr.bf16.mxu1 %v21548_v8  ;;  %v7343_v48 = vsel %vm7326_vm15, %v18325_v57, %v7323_v24 }
 0x284   : > { %7811 = vrot.lane.b32.xlu0 %v16331_v6, %s16259_s7  ;;  %7680 = vmatprep.mubr.bf16.mxu0 %v21548_v8  ;;  %v7397_v60 = vsel %vm21536_vm1, %v7343_v48, 0 }
 0x285   : > { %v7325_v54 = vpop.permute.xlu1 %7324 }
 0x286   : > { %v6293_v29 = vpop.permute.xlu0 %6292  ;;  %v7344_v51 = vsel %vm7326_vm15, %v7323_v24, %v7325_v54 }
 0x287   : > { %v6327_v11 = vsel %vm6324_vm13, %v17904_v13, %v6293_v29  ;;  %8823 = vrot.lane.b32.xlu1 %v16368_v19, %s16261_s13  ;;  %v6328_v20 = vsel %vm6324_vm13, %v6293_v29, %v17924_v47  ;;  %15038 = vmatprep.subr.msk.bf16.mxu0 %vm21536_vm1, %v7344_v51  ;;  %v18394_v51 = vld [vmem:[%s21521_s2 + $0x3c] sm:$0xf] }
 0x288   : > { %8825 = vrot.lane.b32.xlu0 %v17117_v52, %s16261_s13  ;;  %14983 = vmatmul.mubr.msk.bf16.vlgmr.msra.gmra.mrb[28].mxu1 %vm420_vm3, %v17782_v23  ;;  %v6353_v22 = vsel %vm21536_vm1, %v6327_v11, 0 }
 0x289   : > { %14988 = vmatprep.subr.msk.bf16.mxu1 %vm21536_vm1, %v6328_v20  ;;  %15035 = vmatmul.mubr.msk.bf16.vlgmr.msra.gmra.mrb[0].mxu0 %vm420_vm3, %v18245_v37  ;;  %v7790_v13 = vpop.permute.xlu1 %7789 }
 0x28a   : > { %6442 = vmatpush1.bf16.msra.mxu1 %v6353_v22  ;;  %7731 = vmatpush1.bf16.msra.mxu0 %v7397_v60  ;;  %v7792_v47 = vpop.permute.xlu0 %7791 }
 0x28b   : > { %8827 = vrot.lane.b32.xlu1 %v17125_v16, %s16261_s13  ;;  %6473 = vmatprep.mubr.bf16.mxu1 %v21548_v8  ;;  %v7828_v62 = vsel %vm7827_vm0, %v7790_v13, %v7792_v47 }
 0x28c   : > { %7819 = vrot.lane.b32.xlu0 %v21552_v7, %s16259_s7  ;;  %7762 = vmatprep.mubr.bf16.mxu0 %v21548_v8  ;;  %v7850_v50 = vsel %vm21536_vm1, %v7828_v62, 0 }
 0x28d   : > { %v18359_v23 = vpop.permute.xlu1 %7793 }
 0x28e   : > { %v6301_v5 = vpop.permute.xlu0 %6300  ;;  %v7829_v56 = vsel %vm7827_vm0, %v7792_v47, %v18359_v23 }
 0x28f   : > { %v6331_v2 = vsel %vm6324_vm13, %v17938_v27, %v6301_v5  ;;  %9295 = vrot.lane.b32.xlu1 %v16389_v25, %s16262_s19  ;;  %v6332_v14 = vsel %vm6324_vm13, %v6301_v5, %v17963_v10  ;;  %15040 = vmatprep.subr.msk.bf16.mxu0 %vm21536_vm1, %v7829_v56 }
 0x290   : > { %9297 = vrot.lane.b32.xlu0 %v16391_v26, %s16262_s19  ;;  %14989 = vmatmul.mubr.msk.bf16.vlgmr.msra.gmra.mrb[4].mxu1 %vm420_vm3, %v17943_v12  ;;  %v6365_v24 = vsel %vm21536_vm1, %v6331_v2, 0 }
 0x291   : > { %14992 = vmatprep.subr.msk.bf16.mxu1 %vm21536_vm1, %v6332_v14  ;;  %15039 = vmatmul.mubr.msk.bf16.vlgmr.msra.gmra.mrb[4].mxu0 %vm420_vm3, %v18245_v37  ;;  %v18379_v27 = vpop.permute.xlu1 %7797 }
 0x292   : > { %6524 = vmatpush1.bf16.msra.mxu1 %v6365_v24  ;;  %7904 = vmatpush1.bf16.msra.mxu0 %v7850_v50  ;;  %v7800_v10 = vpop.permute.xlu0 %7799 }
 0x293   : > { %9299 = vrot.lane.b32.xlu1 %v16402_v28, %s16262_s19  ;;  %6555 = vmatprep.mubr.bf16.mxu1 %v21548_v8  ;;  %v7832_v48 = vsel %vm7827_vm0, %v18379_v27, %v7800_v10 }
 0x294   : > { %8296 = vrot.lane.b32.xlu0 %v16389_v25, %s16260_s10  ;;  %7935 = vmatprep.mubr.bf16.mxu0 %v21548_v8  ;;  %v7862_v22 = vsel %vm21536_vm1, %v7832_v48, 0 }
 0x295   : > { %v18389_v54 = vpop.permute.xlu1 %7801 }
 0x296   : > { %v6309_v29 = vpop.permute.xlu0 %6308  ;;  %v7833_v11 = vsel %vm7827_vm0, %v7800_v10, %v18389_v54 }
 0x297   : > { %v6335_v20 = vsel %vm6324_vm13, %v17973_v32, %v6309_v29  ;;  %9303 = vrot.lane.b32.xlu1 %v16417_v33, %s16262_s19  ;;  %v6336_v60 = vsel %vm6324_vm13, %v6309_v29, %v17993_v53  ;;  %15044 = vmatprep.subr.msk.bf16.mxu0 %vm21536_vm1, %v7833_v11 }
 0x298   : > { %9305 = vrot.lane.b32.xlu0 %v16419_v34, %s16262_s19  ;;  %14993 = vmatmul.mubr.msk.bf16.vlgmr.msra.gmra.mrb[12].mxu1 %vm420_vm3, %v17943_v12  ;;  %v6377_v13 = vsel %vm21536_vm1, %v6335_v20, 0 }
 0x299   : > { %14996 = vmatprep.subr.msk.bf16.mxu1 %vm21536_vm1, %v6336_v60  ;;  %15041 = vmatmul.mubr.msk.bf16.vlgmr.msra.gmra.mrb[8].mxu0 %vm420_vm3, %v18394_v51  ;;  %v18414_v32 = vpop.permute.xlu1 %7805 }
 0x29a   : > { %6606 = vmatpush1.bf16.msra.mxu1 %v6377_v13  ;;  %7986 = vmatpush1.bf16.msra.mxu0 %v7862_v22  ;;  %v7808_v53 = vpop.permute.xlu0 %7807 }
 0x29b   : > { %9307 = vrot.lane.b32.xlu1 %v16434_v36, %s16262_s19  ;;  %6637 = vmatprep.mubr.bf16.mxu1 %v21548_v8  ;;  %v7836_v47 = vsel %vm7827_vm0, %v18414_v32, %v7808_v53 }
 0x29c   : > { %8304 = vrot.lane.b32.xlu0 %v16417_v33, %s16260_s10  ;;  %8017 = vmatprep.mubr.bf16.mxu0 %v21548_v8  ;;  %v7874_v14 = vsel %vm21536_vm1, %v7836_v47, 0 }
 0x29d   : > { %v18424_v62 = vpop.permute.xlu1 %7809 }
 0x29e   : > { %v6317_v5 = vpop.permute.xlu0 %6316  ;;  %v7837_v56 = vsel %vm7827_vm0, %v7808_v53, %v18424_v62  ;;  %v291_v53 = vld [vmem:[%s16352_s30 + $0x20] sm:$0xff] }
 0x29f   : > { %v6339_v50 = vsel %vm6324_vm13, %v18007_v49, %v6317_v5  ;;  %9311 = vrot.lane.b32.xlu1 %v16331_v6, %s16262_s19  ;;  %v6340_v2 = vsel %vm6324_vm13, %v6317_v5, %v18027_v9  ;;  %15048 = vmatprep.subr.msk.bf16.mxu0 %vm21536_vm1, %v7837_v56  ;;  %v18488_v56 = vpack.c.bf16 %v291_v53, %v291_v53  ;;  %vm13341_vm13 = vcmask 670720  }
 0x2a0   : > { %9313 = vrot.lane.b32.xlu0 %v16322_v3, %s16262_s19  ;;  %14997 = vmatmul.mubr.msk.bf16.vlgmr.msra.gmra.mrb[20].mxu1 %vm420_vm3, %v17943_v12  ;;  %v6389_v24 = vsel %vm21536_vm1, %v6339_v50, 0  ;;  %v292_v50 = vld [vmem:[%s16352_s30 + $0x28] sm:$0xff] }
 0x2a1   : > { %15000 = vmatprep.subr.msk.bf16.mxu1 %vm21536_vm1, %v6340_v2  ;;  %15045 = vmatmul.mubr.msk.bf16.vlgmr.msra.gmra.mrb[12].mxu0 %vm420_vm3, %v18394_v51  ;;  %v18444_v49 = vpop.permute.xlu1 %7813 }
 0x2a2   : > { %6688 = vmatpush1.bf16.msra.mxu1 %v6389_v24  ;;  %8068 = vmatpush1.bf16.msra.mxu0 %v7874_v14  ;;  %v7816_v9 = vpop.permute.xlu0 %7815 }
 0x2a3   : > { %9315 = vrot.lane.b32.xlu1 %v16457_v38, %s16262_s19  ;;  %6719 = vmatprep.mubr.bf16.mxu1 %v21548_v8  ;;  %v7840_v10 = vsel %vm7827_vm0, %v18444_v49, %v7816_v9 }
 0x2a4   : > { %8312 = vrot.lane.b32.xlu0 %v16331_v6, %s16260_s10  ;;  %8099 = vmatprep.mubr.bf16.mxu0 %v21548_v8  ;;  %v7886_v22 = vsel %vm21536_vm1, %v7840_v10, 0 }
 0x2a5   : > { %v18454_v48 = vpop.permute.xlu1 %7817 }
 0x2a6   : > { %v6794_v29 = vpop.permute.xlu0 %6793  ;;  %v7841_v11 = vsel %vm7827_vm0, %v7816_v9, %v18454_v48 }
 0x2a7   : > { %v6828_v20 = vsel %vm6825_vm14, %v18061_v55, %v6794_v29  ;;  %9319 = vrot.lane.b32.xlu1 %v21552_v7, %s16262_s19  ;;  %v6829_v60 = vsel %vm6825_vm14, %v6794_v29, %v18081_v63  ;;  %15052 = vmatprep.subr.msk.bf16.mxu0 %vm21536_vm1, %v7841_v11  ;;  %v290_v55 = vld [vmem:[%s16352_s30 + $0x18] sm:$0xff]  ;;  %v18500_v11 = vpack.c.bf16 %v292_v50, %v292_v50  ;;  %s16263_s30 = smov 119  }
 0x2a8   : > { %9321 = vrot.lane.b32.xlu0 %v16368_v19, %s16262_s19  ;;  %15001 = vmatmul.mubr.msk.bf16.vlgmr.msra.gmra.mrb[28].mxu1 %vm420_vm3, %v17943_v12  ;;  %v6854_v13 = vsel %vm21536_vm1, %v6828_v20, 0  ;;  %v18481_v12 = vpack.c.bf16 %v290_v55, %v290_v55 }
 0x2a9   : > { %15006 = vmatprep.subr.msk.bf16.mxu1 %vm21536_vm1, %v6829_v60  ;;  %15049 = vmatmul.mubr.msk.bf16.vlgmr.msra.gmra.mrb[16].mxu0 %vm420_vm3, %v18394_v51  ;;  %v18475_v63 = vpop.permute.xlu1 %7821 }
 0x2aa   : > { %6943 = vmatpush1.bf16.msra.mxu1 %v6854_v13  ;;  %8150 = vmatpush1.bf16.msra.mxu0 %v7886_v22  ;;  %v7824_v47 = vpop.permute.xlu0 %7823 }
 0x2ab   : > { %9323 = vrot.lane.b32.xlu1 %v17117_v52, %s16262_s19  ;;  %6974 = vmatprep.mubr.bf16.mxu1 %v21548_v8  ;;  %v7844_v5 = vsel %vm7827_vm0, %v18475_v63, %v7824_v47 }
 0x2ac   : > { %8320 = vrot.lane.b32.xlu0 %v21552_v7, %s16260_s10  ;;  %8181 = vmatprep.mubr.bf16.mxu0 %v21548_v8  ;;  %v7898_v29 = vsel %vm21536_vm1, %v7844_v5, 0 }
 0x2ad   : > { %v7826_v2 = vpop.permute.xlu1 %7825 }
 0x2ae   : > { %v6802_v14 = vpop.permute.xlu0 %6801  ;;  %v7845_v24 = vsel %vm7827_vm0, %v7824_v47, %v7826_v2 }
 0x2af   : > { %v6832_v9 = vsel %vm6825_vm14, %v18091_v59, %v6802_v14  ;;  %9327 = vrot.lane.b32.xlu1 %v18481_v12, %s16262_s19  ;;  %v6833_v10 = vsel %vm6825_vm14, %v6802_v14, %v18116_v18  ;;  %15056 = vmatprep.subr.msk.bf16.mxu0 %vm21536_vm1, %v7845_v24 }
 0x2b0   : > { %9329 = vrot.lane.b32.xlu0 %v18488_v56, %s16262_s19  ;;  %15007 = vmatmul.mubr.msk.bf16.vlgmr.msra.gmra.mrb[4].mxu1 %vm420_vm3, %v18096_v44  ;;  %v6866_v59 = vsel %vm21536_vm1, %v6832_v9, 0  ;;  %v18552_v9 = vld [vmem:[%s21521_s2 + $0x40] sm:$0xf] }
 0x2b1   : > { %15010 = vmatprep.subr.msk.bf16.mxu1 %vm21536_vm1, %v6833_v10  ;;  %15053 = vmatmul.mubr.msk.bf16.vlgmr.msra.gmra.mrb[0].mxu0 %vm420_vm3, %v18394_v51  ;;  %v8291_v18 = vpop.permute.xlu1 %8290 }
 0x2b2   : > { %7025 = vmatpush1.bf16.msra.mxu1 %v6866_v59  ;;  %8232 = vmatpush1.bf16.msra.mxu0 %v7898_v29  ;;  %v8293_v20 = vpop.permute.xlu0 %8292 }
 0x2b3   : > { %9331 = vrot.lane.b32.xlu1 %v18500_v11, %s16262_s19  ;;  %7056 = vmatprep.mubr.bf16.mxu1 %v21548_v8  ;;  %v8329_v60 = vsel %vm8328_vm2, %v8291_v18, %v8293_v20 }
 0x2b4   : > { %8797 = vrot.lane.b32.xlu0 %v16389_v25, %s16261_s13  ;;  %8263 = vmatprep.mubr.bf16.mxu0 %v21548_v8  ;;  %v8351_v53 = vsel %vm21536_vm1, %v8329_v60, 0 }
 0x2b5   : > { %v18517_v22 = vpop.permute.xlu1 %8294 }
 0x2b6   : > { %v6810_v13 = vpop.permute.xlu0 %6809  ;;  %v8330_v55 = vsel %vm8328_vm2, %v8293_v20, %v18517_v22 }
 0x2b7   : > { %v6836_v47 = vsel %vm6825_vm14, %v18126_v1, %v6810_v13  ;;  %9796 = vrot.lane.b32.xlu1 %v16389_v25, %s16263_s30  ;;  %v6837_v5 = vsel %vm6825_vm14, %v6810_v13, %v18146_v58  ;;  %15058 = vmatprep.subr.msk.bf16.mxu0 %vm21536_vm1, %v8330_v55 }
 0x2b8   : > { %9798 = vrot.lane.b32.xlu0 %v16391_v26, %s16263_s30  ;;  %15011 = vmatmul.mubr.msk.bf16.vlgmr.msra.gmra.mrb[12].mxu1 %vm420_vm3, %v18096_v44  ;;  %v6878_v50 = vsel %vm21536_vm1, %v6836_v47, 0 }
 0x2b9   : > { %15014 = vmatprep.subr.msk.bf16.mxu1 %vm21536_vm1, %v6837_v5  ;;  %15057 = vmatmul.mubr.msk.bf16.vlgmr.msra.gmra.mrb[4].mxu0 %vm420_vm3, %v18394_v51  ;;  %v18537_v1 = vpop.permute.xlu1 %8298 }
 0x2ba   : > { %7107 = vmatpush1.bf16.msra.mxu1 %v6878_v50  ;;  %8405 = vmatpush1.bf16.msra.mxu0 %v8351_v53  ;;  %v8301_v58 = vpop.permute.xlu0 %8300 }
 0x2bb   : > { %9800 = vrot.lane.b32.xlu1 %v16402_v28, %s16263_s30  ;;  %7138 = vmatprep.mubr.bf16.mxu1 %v21548_v8  ;;  %v8333_v2 = vsel %vm8328_vm2, %v18537_v1, %v8301_v58 }
 0x2bc   : > { %8805 = vrot.lane.b32.xlu0 %v16417_v33, %s16261_s13  ;;  %8436 = vmatprep.mubr.bf16.mxu0 %v21548_v8  ;;  %v8363_v18 = vsel %vm21536_vm1, %v8333_v2, 0 }
 0x2bd   : > { %v18547_v14 = vpop.permute.xlu1 %8302 }
 0x2be   : > { %v6818_v24 = vpop.permute.xlu0 %6817  ;;  %v8334_v10 = vsel %vm8328_vm2, %v8301_v58, %v18547_v14 }
 0x2bf   : > { %v6840_v29 = vsel %vm6825_vm14, %v18156_v42, %v6818_v24  ;;  %9804 = vrot.lane.b32.xlu1 %v16417_v33, %s16263_s30  ;;  %v6841_v59 = vsel %vm6825_vm14, %v6818_v24, %v18176_v41  ;;  %15062 = vmatprep.subr.msk.bf16.mxu0 %vm21536_vm1, %v8334_v10 }
 0x2c0   : > { %9806 = vrot.lane.b32.xlu0 %v16419_v34, %s16263_s30  ;;  %15015 = vmatmul.mubr.msk.bf16.vlgmr.msra.gmra.mrb[20].mxu1 %vm420_vm3, %v18096_v44  ;;  %v6890_v20 = vsel %vm21536_vm1, %v6840_v29, 0 }
 0x2c1   : > { %15018 = vmatprep.subr.msk.bf16.mxu1 %vm21536_vm1, %v6841_v59  ;;  %15059 = vmatmul.mubr.msk.bf16.vlgmr.msra.gmra.mrb[8].mxu0 %vm420_vm3, %v18552_v9  ;;  %v18572_v42 = vpop.permute.xlu1 %8306 }
 0x2c2   : > { %7189 = vmatpush1.bf16.msra.mxu1 %v6890_v20  ;;  %8487 = vmatpush1.bf16.msra.mxu0 %v8363_v18  ;;  %v8309_v41 = vpop.permute.xlu0 %8308 }
 0x2c3   : > { %9808 = vrot.lane.b32.xlu1 %v16434_v36, %s16263_s30  ;;  %7220 = vmatprep.mubr.bf16.mxu1 %v21548_v8  ;;  %v8337_v60 = vsel %vm8328_vm2, %v18572_v42, %v8309_v41 }
 0x2c4   : > { %8813 = vrot.lane.b32.xlu0 %v16331_v6, %s16261_s13  ;;  %8518 = vmatprep.mubr.bf16.mxu0 %v21548_v8  ;;  %v8375_v50 = vsel %vm21536_vm1, %v8337_v60, 0 }
 0x2c5   : > { %v18582_v13 = vpop.permute.xlu1 %8310 }
 0x2c6   : > { %v7295_v55 = vpop.permute.xlu0 %7294  ;;  %v8338_v53 = vsel %vm8328_vm2, %v8309_v41, %v18582_v13 }
 0x2c7   : > { %v7329_v47 = vsel %vm7326_vm15, %v18210_v61, %v7295_v55  ;;  %9812 = vrot.lane.b32.xlu1 %v16331_v6, %s16263_s30  ;;  %v7330_v5 = vsel %vm7326_vm15, %v7295_v55, %v18230_v35  ;;  %15066 = vmatprep.subr.msk.bf16.mxu0 %vm21536_vm1, %v8338_v53 }
 0x2c8   : > { %9814 = vrot.lane.b32.xlu0 %v16322_v3, %s16263_s30  ;;  %15019 = vmatmul.mubr.msk.bf16.vlgmr.msra.gmra.mrb[28].mxu1 %vm420_vm3, %v18096_v44  ;;  %v7355_v58 = vsel %vm21536_vm1, %v7329_v47, 0 }
 0x2c9   : > { %15024 = vmatprep.subr.msk.bf16.mxu1 %vm21536_vm1, %v7330_v5  ;;  %15063 = vmatmul.mubr.msk.bf16.vlgmr.msra.gmra.mrb[12].mxu0 %vm420_vm3, %v18552_v9  ;;  %v18602_v61 = vpop.permute.xlu1 %8314 }
 0x2ca   : > { %7444 = vmatpush1.bf16.msra.mxu1 %v7355_v58  ;;  %8569 = vmatpush1.bf16.msra.mxu0 %v8375_v50  ;;  %v8317_v35 = vpop.permute.xlu0 %8316 }
 0x2cb   : > { %9816 = vrot.lane.b32.xlu1 %v16457_v38, %s16263_s30  ;;  %7475 = vmatprep.mubr.bf16.mxu1 %v21548_v8  ;;  %v8341_v44 = vsel %vm8328_vm2, %v18602_v61, %v8317_v35 }
 0x2cc   : > { %8821 = vrot.lane.b32.xlu0 %v21552_v7, %s16261_s13  ;;  %8600 = vmatprep.mubr.bf16.mxu0 %v21548_v8  ;;  %v8387_v18 = vsel %vm21536_vm1, %v8341_v44, 0 }
 0x2cd   : > { %v18612_v2 = vpop.permute.xlu1 %8318 }
 0x2ce   : > { %v7303_v24 = vpop.permute.xlu0 %7302  ;;  %v8342_v10 = vsel %vm8328_vm2, %v8317_v35, %v18612_v2 }
 0x2cf   : > { %v7333_v29 = vsel %vm7326_vm15, %v18240_v0, %v7303_v24  ;;  %9820 = vrot.lane.b32.xlu1 %v21552_v7, %s16263_s30  ;;  %v7334_v59 = vsel %vm7326_vm15, %v7303_v24, %v18265_v21  ;;  %15070 = vmatprep.subr.msk.bf16.mxu0 %vm21536_vm1, %v8342_v10 }
 0x2d0   : > { %9822 = vrot.lane.b32.xlu0 %v16368_v19, %s16263_s30  ;;  %15025 = vmatmul.mubr.msk.bf16.vlgmr.msra.gmra.mrb[4].mxu1 %vm420_vm3, %v18245_v37  ;;  %v7367_v20 = vsel %vm21536_vm1, %v7333_v29, 0 }
 0x2d1   : > { %15028 = vmatprep.subr.msk.bf16.mxu1 %vm21536_vm1, %v7334_v59  ;;  %15067 = vmatmul.mubr.msk.bf16.vlgmr.msra.gmra.mrb[16].mxu0 %vm420_vm3, %v18552_v9  ;;  %v18632_v0 = vpop.permute.xlu1 %8322 }
 0x2d2   : > { %7526 = vmatpush1.bf16.msra.mxu1 %v7367_v20  ;;  %8651 = vmatpush1.bf16.msra.mxu0 %v8387_v18  ;;  %v8325_v21 = vpop.permute.xlu0 %8324 }
 0x2d3   : > { %9824 = vrot.lane.b32.xlu1 %v17117_v52, %s16263_s30  ;;  %7557 = vmatprep.mubr.bf16.mxu1 %v21548_v8  ;;  %v8345_v41 = vsel %vm8328_vm2, %v18632_v0, %v8325_v21 }
 0x2d4   : > { %9301 = vrot.lane.b32.xlu0 %v16409_v30, %s16262_s19  ;;  %8682 = vmatprep.mubr.bf16.mxu0 %v21548_v8  ;;  %v8399_v50 = vsel %vm21536_vm1, %v8345_v41, 0 }
 0x2d5   : > { %v8327_v60 = vpop.permute.xlu1 %8326 }
 0x2d6   : > { %v7311_v55 = vpop.permute.xlu0 %7310  ;;  %v8346_v53 = vsel %vm8328_vm2, %v8325_v21, %v8327_v60 }
 0x2d7   : > { %v7337_v47 = vsel %vm7326_vm15, %v18275_v43, %v7311_v55  ;;  %9828 = vrot.lane.b32.xlu1 %v18481_v12, %s16263_s30  ;;  %v7338_v5 = vsel %vm7326_vm15, %v7311_v55, %v18295_v17  ;;  %15074 = vmatprep.subr.msk.bf16.mxu0 %vm21536_vm1, %v8346_v53  ;;  %v18701_v55 = vld [vmem:[%s21521_s2 + $0x44] sm:$0xf] }
 0x2d8   : > { %9830 = vrot.lane.b32.xlu0 %v18488_v56, %s16263_s30  ;;  %15029 = vmatmul.mubr.msk.bf16.vlgmr.msra.gmra.mrb[12].mxu1 %vm420_vm3, %v18245_v37  ;;  %v7379_v58 = vsel %vm21536_vm1, %v7337_v47, 0 }
 0x2d9   : > { %15032 = vmatprep.subr.msk.bf16.mxu1 %vm21536_vm1, %v7338_v5  ;;  %15071 = vmatmul.mubr.msk.bf16.vlgmr.msra.gmra.mrb[0].mxu0 %vm420_vm3, %v18552_v9  ;;  %v8792_v43 = vpop.permute.xlu1 %8791 }
 0x2da   : > { %7608 = vmatpush1.bf16.msra.mxu1 %v7379_v58  ;;  %8733 = vmatpush1.bf16.msra.mxu0 %v8399_v50  ;;  %v8794_v17 = vpop.permute.xlu0 %8793 }
 0x2db   : > { %9832 = vrot.lane.b32.xlu1 %v18500_v11, %s16263_s30  ;;  %7639 = vmatprep.mubr.bf16.mxu1 %v21548_v8  ;;  %v8830_v35 = vsel %vm8829_vm4, %v8792_v43, %v8794_v17 }
 0x2dc   : > { %9309 = vrot.lane.b32.xlu0 %v16324_v4, %s16262_s19  ;;  %8764 = vmatprep.mubr.bf16.mxu0 %v21548_v8  ;;  %v8852_v29 = vsel %vm21536_vm1, %v8830_v35, 0 }
 0x2dd   : > { %v18666_v44 = vpop.permute.xlu1 %8795 }
 0x2de   : > { %v7319_v24 = vpop.permute.xlu0 %7318  ;;  %v8831_v10 = vsel %vm8829_vm4, %v8794_v17, %v18666_v44 }
 0x2df   : > { %v7341_v59 = vsel %vm7326_vm15, %v18305_v45, %v7319_v24  ;;  %10297 = vrot.lane.b32.xlu1 %v16389_v25, %s16264_s24  ;;  %v7342_v18 = vsel %vm7326_vm15, %v7319_v24, %v18325_v57  ;;  %15076 = vmatprep.subr.msk.bf16.mxu0 %vm21536_vm1, %v8831_v10 }
 0x2e0   : > { %10299 = vrot.lane.b32.xlu0 %v16391_v26, %s16264_s24  ;;  %15033 = vmatmul.mubr.msk.bf16.vlgmr.msra.gmra.mrb[20].mxu1 %vm420_vm3, %v18245_v37  ;;  %v7391_v20 = vsel %vm21536_vm1, %v7341_v59, 0 }
 0x2e1   : > { %15036 = vmatprep.subr.msk.bf16.mxu1 %vm21536_vm1, %v7342_v18  ;;  %15075 = vmatmul.mubr.msk.bf16.vlgmr.msra.gmra.mrb[4].mxu0 %vm420_vm3, %v18552_v9  ;;  %v18686_v45 = vpop.permute.xlu1 %8799 }
 0x2e2   : > { %7690 = vmatpush1.bf16.msra.mxu1 %v7391_v20  ;;  %8906 = vmatpush1.bf16.msra.mxu0 %v8852_v29  ;;  %v8802_v57 = vpop.permute.xlu0 %8801 }
 0x2e3   : > { %10301 = vrot.lane.b32.xlu1 %v16402_v28, %s16264_s24  ;;  %7721 = vmatprep.mubr.bf16.mxu1 %v21548_v8  ;;  %v8834_v21 = vsel %vm8829_vm4, %v18686_v45, %v8802_v57 }
 0x2e4   : > { %9317 = vrot.lane.b32.xlu0 %v16358_v15, %s16262_s19  ;;  %8937 = vmatprep.mubr.bf16.mxu0 %v21548_v8  ;;  %v8864_v50 = vsel %vm21536_vm1, %v8834_v21, 0 }
 0x2e5   : > { %v18696_v41 = vpop.permute.xlu1 %8803 }
 0x2e6   : > { %v7796_v60 = vpop.permute.xlu0 %7795  ;;  %v8835_v53 = vsel %vm8829_vm4, %v8802_v57, %v18696_v41 }
 0x2e7   : > { %v7830_v47 = vsel %vm7827_vm0, %v18359_v23, %v7796_v60  ;;  %10305 = vrot.lane.b32.xlu1 %v16417_v33, %s16264_s24  ;;  %v7831_v5 = vsel %vm7827_vm0, %v7796_v60, %v18379_v27  ;;  %15080 = vmatprep.subr.msk.bf16.mxu0 %vm21536_vm1, %v8835_v53 }
 0x2e8   : > { %10307 = vrot.lane.b32.xlu0 %v16419_v34, %s16264_s24  ;;  %15037 = vmatmul.mubr.msk.bf16.vlgmr.msra.gmra.mrb[28].mxu1 %vm420_vm3, %v18245_v37  ;;  %v7856_v58 = vsel %vm21536_vm1, %v7830_v47, 0 }
 0x2e9   : > { %15042 = vmatprep.subr.msk.bf16.mxu1 %vm21536_vm1, %v7831_v5  ;;  %15077 = vmatmul.mubr.msk.bf16.vlgmr.msra.gmra.mrb[8].mxu0 %vm420_vm3, %v18701_v55  ;;  %v18721_v23 = vpop.permute.xlu1 %8807 }
 0x2ea   : > { %7945 = vmatpush1.bf16.msra.mxu1 %v7856_v58  ;;  %8988 = vmatpush1.bf16.msra.mxu0 %v8864_v50  ;;  %v8810_v27 = vpop.permute.xlu0 %8809 }
 0x2eb   : > { %10309 = vrot.lane.b32.xlu1 %v16434_v36, %s16264_s24  ;;  %7976 = vmatprep.mubr.bf16.mxu1 %v21548_v8  ;;  %v8838_v37 = vsel %vm8829_vm4, %v18721_v23, %v8810_v27 }
 0x2ec   : > { %9325 = vrot.lane.b32.xlu0 %v17125_v16, %s16262_s19  ;;  %9019 = vmatprep.mubr.bf16.mxu0 %v21548_v8  ;;  %v8876_v29 = vsel %vm21536_vm1, %v8838_v37, 0 }
 0x2ed   : > { %v18731_v43 = vpop.permute.xlu1 %8811 }
 0x2ee   : > { %v7804_v17 = vpop.permute.xlu0 %7803  ;;  %v8839_v35 = vsel %vm8829_vm4, %v8810_v27, %v18731_v43 }
 0x2ef   : > { %v7834_v24 = vsel %vm7827_vm0, %v18389_v54, %v7804_v17  ;;  %10313 = vrot.lane.b32.xlu1 %v16331_v6, %s16264_s24  ;;  %v7835_v10 = vsel %vm7827_vm0, %v7804_v17, %v18414_v32  ;;  %15084 = vmatprep.subr.msk.bf16.mxu0 %vm21536_vm1, %v8839_v35 }
 0x2f0   : > { %10315 = vrot.lane.b32.xlu0 %v16322_v3, %s16264_s24  ;;  %15043 = vmatmul.mubr.msk.bf16.vlgmr.msra.gmra.mrb[4].mxu1 %vm420_vm3, %v18394_v51  ;;  %v7868_v59 = vsel %vm21536_vm1, %v7834_v24, 0 }
 0x2f1   : > { %15046 = vmatprep.subr.msk.bf16.mxu1 %vm21536_vm1, %v7835_v10  ;;  %15081 = vmatmul.mubr.msk.bf16.vlgmr.msra.gmra.mrb[12].mxu0 %vm420_vm3, %v18701_v55  ;;  %v18751_v54 = vpop.permute.xlu1 %8815 }
 0x2f2   : > { %8027 = vmatpush1.bf16.msra.mxu1 %v7868_v59  ;;  %9070 = vmatpush1.bf16.msra.mxu0 %v8876_v29  ;;  %v8818_v32 = vpop.permute.xlu0 %8817 }
 0x2f3   : > { %10317 = vrot.lane.b32.xlu1 %v16457_v38, %s16264_s24  ;;  %8058 = vmatprep.mubr.bf16.mxu1 %v21548_v8  ;;  %v8842_v18 = vsel %vm8829_vm4, %v18751_v54, %v8818_v32 }
 0x2f4   : > { %9802 = vrot.lane.b32.xlu0 %v16409_v30, %s16263_s30  ;;  %9101 = vmatprep.mubr.bf16.mxu0 %v21548_v8  ;;  %v8888_v47 = vsel %vm21536_vm1, %v8842_v18, 0 }
 0x2f5   : > { %v18761_v20 = vpop.permute.xlu1 %8819 }
 0x2f6   : > { %v7812_v57 = vpop.permute.xlu0 %7811  ;;  %v8843_v21 = vsel %vm8829_vm4, %v8818_v32, %v18761_v20 }
 0x2f7   : > { %v7838_v60 = vsel %vm7827_vm0, %v18424_v62, %v7812_v57  ;;  %10321 = vrot.lane.b32.xlu1 %v21552_v7, %s16264_s24  ;;  %v7839_v53 = vsel %vm7827_vm0, %v7812_v57, %v18444_v49  ;;  %15088 = vmatprep.subr.msk.bf16.mxu0 %vm21536_vm1, %v8843_v21 }
 0x2f8   : > { %10323 = vrot.lane.b32.xlu0 %v16368_v19, %s16264_s24  ;;  %15047 = vmatmul.mubr.msk.bf16.vlgmr.msra.gmra.mrb[12].mxu1 %vm420_vm3, %v18394_v51  ;;  %v7880_v5 = vsel %vm21536_vm1, %v7838_v60, 0 }
 0x2f9   : > { %15050 = vmatprep.subr.msk.bf16.mxu1 %vm21536_vm1, %v7839_v53  ;;  %15085 = vmatmul.mubr.msk.bf16.vlgmr.msra.gmra.mrb[16].mxu0 %vm420_vm3, %v18701_v55  ;;  %v18781_v62 = vpop.permute.xlu1 %8823 }
 0x2fa   : > { %8109 = vmatpush1.bf16.msra.mxu1 %v7880_v5  ;;  %9152 = vmatpush1.bf16.msra.mxu0 %v8888_v47  ;;  %v8826_v49 = vpop.permute.xlu0 %8825 }
 0x2fb   : > { %10325 = vrot.lane.b32.xlu1 %v17117_v52, %s16264_s24  ;;  %8140 = vmatprep.mubr.bf16.mxu1 %v21548_v8  ;;  %v8846_v50 = vsel %vm8829_vm4, %v18781_v62, %v8826_v49 }
 0x2fc   : > { %9810 = vrot.lane.b32.xlu0 %v16324_v4, %s16263_s30  ;;  %9183 = vmatprep.mubr.bf16.mxu0 %v21548_v8  ;;  %v8900_v24 = vsel %vm21536_vm1, %v8846_v50, 0 }
 0x2fd   : > { %v8828_v58 = vpop.permute.xlu1 %8827 }
 0x2fe   : > { %v7820_v27 = vpop.permute.xlu0 %7819  ;;  %v8847_v37 = vsel %vm8829_vm4, %v8826_v49, %v8828_v58  ;;  %v18850_v49 = vld [vmem:[%s21521_s2 + $0x48] sm:$0xf] }
 0x2ff   : > { %v7842_v17 = vsel %vm7827_vm0, %v18454_v48, %v7820_v27  ;;  %10329 = vrot.lane.b32.xlu1 %v18481_v12, %s16264_s24  ;;  %v7843_v35 = vsel %vm7827_vm0, %v7820_v27, %v18475_v63  ;;  %15092 = vmatprep.subr.msk.bf16.mxu0 %vm21536_vm1, %v8847_v37 }
 0x300   : > { %10331 = vrot.lane.b32.xlu0 %v18488_v56, %s16264_s24  ;;  %15051 = vmatmul.mubr.msk.bf16.vlgmr.msra.gmra.mrb[20].mxu1 %vm420_vm3, %v18394_v51  ;;  %v7892_v10 = vsel %vm21536_vm1, %v7842_v17, 0 }
 0x301   : > { %15054 = vmatprep.subr.msk.bf16.mxu1 %vm21536_vm1, %v7843_v35  ;;  %15089 = vmatmul.mubr.msk.bf16.vlgmr.msra.gmra.mrb[0].mxu0 %vm420_vm3, %v18701_v55  ;;  %v9296_v48 = vpop.permute.xlu1 %9295 }
 0x302   : > { %8191 = vmatpush1.bf16.msra.mxu1 %v7892_v10  ;;  %9234 = vmatpush1.bf16.msra.mxu0 %v8900_v24  ;;  %v9298_v63 = vpop.permute.xlu0 %9297 }
 0x303   : > { %10333 = vrot.lane.b32.xlu1 %v18500_v11, %s16264_s24  ;;  %8222 = vmatprep.mubr.bf16.mxu1 %v21548_v8  ;;  %v9334_v29 = vsel %vm9333_vm5, %v9296_v48, %v9298_v63 }
 0x304   : > { %9818 = vrot.lane.b32.xlu0 %v16358_v15, %s16263_s30  ;;  %9265 = vmatprep.mubr.bf16.mxu0 %v21548_v8  ;;  %v9356_v57 = vsel %vm21536_vm1, %v9334_v29, 0 }
 0x305   : > { %v18815_v59 = vpop.permute.xlu1 %9299 }
 0x306   : > { %v8297_v32 = vpop.permute.xlu0 %8296  ;;  %v9335_v18 = vsel %vm9333_vm5, %v9298_v63, %v18815_v59 }
 0x307   : > { %v8331_v21 = vsel %vm8328_vm2, %v18517_v22, %v8297_v32  ;;  %10798 = vrot.lane.b32.xlu1 %v16389_v25, %s16265_s26  ;;  %v8332_v60 = vsel %vm8328_vm2, %v8297_v32, %v18537_v1  ;;  %15094 = vmatprep.subr.msk.bf16.mxu0 %vm21536_vm1, %v9335_v18 }
 0x308   : > { %10800 = vrot.lane.b32.xlu0 %v16391_v26, %s16265_s26  ;;  %15055 = vmatmul.mubr.msk.bf16.vlgmr.msra.gmra.mrb[28].mxu1 %vm420_vm3, %v18394_v51  ;;  %v8357_v53 = vsel %vm21536_vm1, %v8331_v21, 0 }
 0x309   : > { %15060 = vmatprep.subr.msk.bf16.mxu1 %vm21536_vm1, %v8332_v60  ;;  %15093 = vmatmul.mubr.msk.bf16.vlgmr.msra.gmra.mrb[4].mxu0 %vm420_vm3, %v18701_v55  ;;  %v18835_v22 = vpop.permute.xlu1 %9303 }
 0x30a   : > { %8446 = vmatpush1.bf16.msra.mxu1 %v8357_v53  ;;  %9410 = vmatpush1.bf16.msra.mxu0 %v9356_v57  ;;  %v9306_v1 = vpop.permute.xlu0 %9305 }
 0x30b   : > { %10802 = vrot.lane.b32.xlu1 %v16402_v28, %s16265_s26  ;;  %8477 = vmatprep.mubr.bf16.mxu1 %v21548_v8  ;;  %v9338_v51 = vsel %vm9333_vm5, %v18835_v22, %v9306_v1 }
 0x30c   : > { %9826 = vrot.lane.b32.xlu0 %v17125_v16, %s16263_s30  ;;  %9441 = vmatprep.mubr.bf16.mxu0 %v21548_v8  ;;  %v9368_v37 = vsel %vm21536_vm1, %v9338_v51, 0 }
 0x30d   : > { %v18845_v47 = vpop.permute.xlu1 %9307 }
 0x30e   : > { %v8305_v5 = vpop.permute.xlu0 %8304  ;;  %v9339_v50 = vsel %vm9333_vm5, %v9306_v1, %v18845_v47 }
 0x30f   : > { %v8335_v58 = vsel %vm8328_vm2, %v18547_v14, %v8305_v5  ;;  %10806 = vrot.lane.b32.xlu1 %v16417_v33, %s16265_s26  ;;  %v8336_v27 = vsel %vm8328_vm2, %v8305_v5, %v18572_v42  ;;  %15098 = vmatprep.subr.msk.bf16.mxu0 %vm21536_vm1, %v9339_v50 }
 0x310   : > { %10808 = vrot.lane.b32.xlu0 %v16419_v34, %s16265_s26  ;;  %15061 = vmatmul.mubr.msk.bf16.vlgmr.msra.gmra.mrb[4].mxu1 %vm420_vm3, %v18552_v9  ;;  %v8369_v17 = vsel %vm21536_vm1, %v8335_v58, 0 }
 0x311   : > { %15064 = vmatprep.subr.msk.bf16.mxu1 %vm21536_vm1, %v8336_v27  ;;  %15095 = vmatmul.mubr.msk.bf16.vlgmr.msra.gmra.mrb[8].mxu0 %vm420_vm3, %v18850_v49  ;;  %v18870_v14 = vpop.permute.xlu1 %9311 }
 0x312   : > { %8528 = vmatpush1.bf16.msra.mxu1 %v8369_v17  ;;  %9492 = vmatpush1.bf16.msra.mxu0 %v9368_v37  ;;  %v9314_v42 = vpop.permute.xlu0 %9313 }
 0x313   : > { %10810 = vrot.lane.b32.xlu1 %v16434_v36, %s16265_s26  ;;  %8559 = vmatprep.mubr.bf16.mxu1 %v21548_v8  ;;  %v9342_v35 = vsel %vm9333_vm5, %v18870_v14, %v9314_v42 }
 0x314   : > { %10303 = vrot.lane.b32.xlu0 %v16409_v30, %s16264_s24  ;;  %9523 = vmatprep.mubr.bf16.mxu0 %v21548_v8  ;;  %v9380_v32 = vsel %vm21536_vm1, %v9342_v35, 0 }
 0x315   : > { %v18880_v24 = vpop.permute.xlu1 %9315 }
 0x316   : > { %v8313_v10 = vpop.permute.xlu0 %8312  ;;  %v9343_v48 = vsel %vm9333_vm5, %v9314_v42, %v18880_v24 }
 0x317   : > { %v8339_v63 = vsel %vm8328_vm2, %v18582_v13, %v8313_v10  ;;  %10814 = vrot.lane.b32.xlu1 %v16331_v6, %s16265_s26  ;;  %v8340_v29 = vsel %vm8328_vm2, %v8313_v10, %v18602_v61  ;;  %15102 = vmatprep.subr.msk.bf16.mxu0 %vm21536_vm1, %v9343_v48 }
 0x318   : > { %10816 = vrot.lane.b32.xlu0 %v16322_v3, %s16265_s26  ;;  %15065 = vmatmul.mubr.msk.bf16.vlgmr.msra.gmra.mrb[12].mxu1 %vm420_vm3, %v18552_v9  ;;  %v8381_v18 = vsel %vm21536_vm1, %v8339_v63, 0 }
 0x319   : > { %15068 = vmatprep.subr.msk.bf16.mxu1 %vm21536_vm1, %v8340_v29  ;;  %15099 = vmatmul.mubr.msk.bf16.vlgmr.msra.gmra.mrb[12].mxu0 %vm420_vm3, %v18850_v49  ;;  %v18900_v13 = vpop.permute.xlu1 %9319 }
 0x31a   : > { %8610 = vmatpush1.bf16.msra.mxu1 %v8381_v18  ;;  %9574 = vmatpush1.bf16.msra.mxu0 %v9380_v32  ;;  %v9322_v61 = vpop.permute.xlu0 %9321 }
 0x31b   : > { %10818 = vrot.lane.b32.xlu1 %v16457_v38, %s16265_s26  ;;  %8641 = vmatprep.mubr.bf16.mxu1 %v21548_v8  ;;  %v9346_v57 = vsel %vm9333_vm5, %v18900_v13, %v9322_v61 }
 0x31c   : > { %10311 = vrot.lane.b32.xlu0 %v16324_v4, %s16264_s24  ;;  %9605 = vmatprep.mubr.bf16.mxu0 %v21548_v8  ;;  %v9392_v5 = vsel %vm21536_vm1, %v9346_v57, 0 }
 0x31d   : > { %v18910_v21 = vpop.permute.xlu1 %9323 }
 0x31e   : > { %v8321_v60 = vpop.permute.xlu0 %8320  ;;  %v9347_v53 = vsel %vm9333_vm5, %v9322_v61, %v18910_v21 }
 0x31f   : > { %v8343_v1 = vsel %vm8328_vm2, %v18612_v2, %v8321_v60  ;;  %10822 = vrot.lane.b32.xlu1 %v21552_v7, %s16265_s26  ;;  %v8344_v51 = vsel %vm8328_vm2, %v8321_v60, %v18632_v0  ;;  %15106 = vmatprep.subr.msk.bf16.mxu0 %vm21536_vm1, %v9347_v53 }
 0x320   : > { %10824 = vrot.lane.b32.xlu0 %v16368_v19, %s16265_s26  ;;  %15069 = vmatmul.mubr.msk.bf16.vlgmr.msra.gmra.mrb[20].mxu1 %vm420_vm3, %v18552_v9  ;;  %v8393_v50 = vsel %vm21536_vm1, %v8343_v1, 0 }
 0x321   : > { %15072 = vmatprep.subr.msk.bf16.mxu1 %vm21536_vm1, %v8344_v51  ;;  %15103 = vmatmul.mubr.msk.bf16.vlgmr.msra.gmra.mrb[16].mxu0 %vm420_vm3, %v18850_v49  ;;  %v18930_v2 = vpop.permute.xlu1 %9327 }
 0x322   : > { %8692 = vmatpush1.bf16.msra.mxu1 %v8393_v50  ;;  %9656 = vmatpush1.bf16.msra.mxu0 %v9392_v5  ;;  %v9330_v0 = vpop.permute.xlu0 %9329  ;;  %v18999_v5 = vld [vmem:[%s21521_s2 + $0x4c] sm:$0xf] }
 0x323   : > { %10826 = vrot.lane.b32.xlu1 %v17117_v52, %s16265_s26  ;;  %8723 = vmatprep.mubr.bf16.mxu1 %v21548_v8  ;;  %v9350_v58 = vsel %vm9333_vm5, %v18930_v2, %v9330_v0 }
 0x324   : > { %10319 = vrot.lane.b32.xlu0 %v16358_v15, %s16264_s24  ;;  %9687 = vmatprep.mubr.bf16.mxu0 %v21548_v8  ;;  %v9404_v10 = vsel %vm21536_vm1, %v9350_v58, 0 }
 0x325   : > { %v9332_v27 = vpop.permute.xlu1 %9331 }
 0x326   : > { %v8798_v37 = vpop.permute.xlu0 %8797  ;;  %v9351_v17 = vsel %vm9333_vm5, %v9330_v0, %v9332_v27 }
 0x327   : > { %v8832_v42 = vsel %vm8829_vm4, %v18666_v44, %v8798_v37  ;;  %10830 = vrot.lane.b32.xlu1 %v18481_v12, %s16265_s26  ;;  %v8833_v35 = vsel %vm8829_vm4, %v8798_v37, %v18686_v45  ;;  %15110 = vmatprep.subr.msk.bf16.mxu0 %vm21536_vm1, %v9351_v17 }
 0x328   : > { %10832 = vrot.lane.b32.xlu0 %v18488_v56, %s16265_s26  ;;  %15073 = vmatmul.mubr.msk.bf16.vlgmr.msra.gmra.mrb[28].mxu1 %vm420_vm3, %v18552_v9  ;;  %v8858_v48 = vsel %vm21536_vm1, %v8832_v42, 0 }
 0x329   : > { %15078 = vmatprep.subr.msk.bf16.mxu1 %vm21536_vm1, %v8833_v35  ;;  %15107 = vmatmul.mubr.msk.bf16.vlgmr.msra.gmra.mrb[0].mxu0 %vm420_vm3, %v18850_v49  ;;  %v9797_v44 = vpop.permute.xlu1 %9796 }
 0x32a   : > { %8947 = vmatpush1.bf16.msra.mxu1 %v8858_v48  ;;  %9738 = vmatpush1.bf16.msra.mxu0 %v9404_v10  ;;  %v9799_v45 = vpop.permute.xlu0 %9798 }
 0x32b   : > { %10834 = vrot.lane.b32.xlu1 %v18500_v11, %s16265_s26  ;;  %8978 = vmatprep.mubr.bf16.mxu1 %v21548_v8  ;;  %v9835_v63 = vsel %vm9834_vm6, %v9797_v44, %v9799_v45 }
 0x32c   : > { %10327 = vrot.lane.b32.xlu0 %v17125_v16, %s16264_s24  ;;  %9769 = vmatprep.mubr.bf16.mxu0 %v21548_v8  ;;  %v9857_v18 = vsel %vm21536_vm1, %v9835_v63, 0 }
 0x32d   : > { %v18964_v9 = vpop.permute.xlu1 %9800 }
 0x32e   : > { %v8806_v29 = vpop.permute.xlu0 %8805  ;;  %v9836_v32 = vsel %vm9834_vm6, %v9799_v45, %v18964_v9 }
 0x32f   : > { %v8836_v61 = vsel %vm8829_vm4, %v18696_v41, %v8806_v29  ;;  %11299 = vrot.lane.b32.xlu1 %v16389_v25, %s16266_s29  ;;  %v8837_v57 = vsel %vm8829_vm4, %v8806_v29, %v18721_v23  ;;  %15112 = vmatprep.subr.msk.bf16.mxu0 %vm21536_vm1, %v9836_v32 }
 0x330   : > { %11301 = vrot.lane.b32.xlu0 %v16391_v26, %s16266_s29  ;;  %15079 = vmatmul.mubr.msk.bf16.vlgmr.msra.gmra.mrb[4].mxu1 %vm420_vm3, %v18701_v55  ;;  %v8870_v60 = vsel %vm21536_vm1, %v8836_v61, 0 }
 0x331   : > { %15082 = vmatprep.subr.msk.bf16.mxu1 %vm21536_vm1, %v8837_v57  ;;  %15111 = vmatmul.mubr.msk.bf16.vlgmr.msra.gmra.mrb[4].mxu0 %vm420_vm3, %v18850_v49  ;;  %v18984_v41 = vpop.permute.xlu1 %9804 }
 0x332   : > { %9029 = vmatpush1.bf16.msra.mxu1 %v8870_v60  ;;  %9911 = vmatpush1.bf16.msra.mxu0 %v9857_v18  ;;  %v9807_v23 = vpop.permute.xlu0 %9806 }
 0x333   : > { %11303 = vrot.lane.b32.xlu1 %v16402_v28, %s16266_s29  ;;  %9060 = vmatprep.mubr.bf16.mxu1 %v21548_v8  ;;  %v9839_v53 = vsel %vm9834_vm6, %v18984_v41, %v9807_v23 }
 0x334   : > { %10804 = vrot.lane.b32.xlu0 %v16409_v30, %s16265_s26  ;;  %9942 = vmatprep.mubr.bf16.mxu0 %v21548_v8  ;;  %v9869_v27 = vsel %vm21536_vm1, %v9839_v53, 0 }
 0x335   : > { %v18994_v1 = vpop.permute.xlu1 %9808 }
 0x336   : > { %v8814_v51 = vpop.permute.xlu0 %8813  ;;  %v9840_v50 = vsel %vm9834_vm6, %v9807_v23, %v18994_v1 }
 0x337   : > { %v8840_v0 = vsel %vm8829_vm4, %v18731_v43, %v8814_v51  ;;  %11307 = vrot.lane.b32.xlu1 %v16417_v33, %s16266_s29  ;;  %v8841_v58 = vsel %vm8829_vm4, %v8814_v51, %v18751_v54  ;;  %15116 = vmatprep.subr.msk.bf16.mxu0 %vm21536_vm1, %v9840_v50 }
 0x338   : > { %11309 = vrot.lane.b32.xlu0 %v16419_v34, %s16266_s29  ;;  %15083 = vmatmul.mubr.msk.bf16.vlgmr.msra.gmra.mrb[12].mxu1 %vm420_vm3, %v18701_v55  ;;  %v8882_v37 = vsel %vm21536_vm1, %v8840_v0, 0 }
 0x339   : > { %15086 = vmatprep.subr.msk.bf16.mxu1 %vm21536_vm1, %v8841_v58  ;;  %15113 = vmatmul.mubr.msk.bf16.vlgmr.msra.gmra.mrb[8].mxu0 %vm420_vm3, %v18999_v5  ;;  %v19019_v43 = vpop.permute.xlu1 %9812 }
 0x33a   : > { %9111 = vmatpush1.bf16.msra.mxu1 %v8882_v37  ;;  %9993 = vmatpush1.bf16.msra.mxu0 %v9869_v27  ;;  %v9815_v54 = vpop.permute.xlu0 %9814 }
 0x33b   : > { %11311 = vrot.lane.b32.xlu1 %v16434_v36, %s16266_s29  ;;  %9142 = vmatprep.mubr.bf16.mxu1 %v21548_v8  ;;  %v9843_v17 = vsel %vm9834_vm6, %v19019_v43, %v9815_v54 }
 0x33c   : > { %10812 = vrot.lane.b32.xlu0 %v16324_v4, %s16265_s26  ;;  %10024 = vmatprep.mubr.bf16.mxu0 %v21548_v8  ;;  %v9881_v45 = vsel %vm21536_vm1, %v9843_v17, 0 }
 0x33d   : > { %v19029_v42 = vpop.permute.xlu1 %9816 }
 0x33e   : > { %v8822_v35 = vpop.permute.xlu0 %8821  ;;  %v9844_v10 = vsel %vm9834_vm6, %v9815_v54, %v19029_v42 }
 0x33f   : > { %v8844_v48 = vsel %vm8829_vm4, %v18761_v20, %v8822_v35  ;;  %11315 = vrot.lane.b32.xlu1 %v16331_v6, %s16266_s29  ;;  %v8845_v44 = vsel %vm8829_vm4, %v8822_v35, %v18781_v62  ;;  %15120 = vmatprep.subr.msk.bf16.mxu0 %vm21536_vm1, %v9844_v10 }
 0x340   : > { %11317 = vrot.lane.b32.xlu0 %v16322_v3, %s16266_s29  ;;  %15087 = vmatmul.mubr.msk.bf16.vlgmr.msra.gmra.mrb[20].mxu1 %vm420_vm3, %v18701_v55  ;;  %v8894_v63 = vsel %vm21536_vm1, %v8844_v48, 0 }
 0x341   : > { %15090 = vmatprep.subr.msk.bf16.mxu1 %vm21536_vm1, %v8845_v44  ;;  %15117 = vmatmul.mubr.msk.bf16.vlgmr.msra.gmra.mrb[12].mxu0 %vm420_vm3, %v18999_v5  ;;  %v19049_v20 = vpop.permute.xlu1 %9820 }
 0x342   : > { %9193 = vmatpush1.bf16.msra.mxu1 %v8894_v63  ;;  %10075 = vmatpush1.bf16.msra.mxu0 %v9881_v45  ;;  %v9823_v62 = vpop.permute.xlu0 %9822 }
 0x343   : > { %11319 = vrot.lane.b32.xlu1 %v16457_v38, %s16266_s29  ;;  %9224 = vmatprep.mubr.bf16.mxu1 %v21548_v8  ;;  %v9847_v29 = vsel %vm9834_vm6, %v19049_v20, %v9823_v62 }
 0x344   : > { %10820 = vrot.lane.b32.xlu0 %v16358_v15, %s16265_s26  ;;  %10106 = vmatprep.mubr.bf16.mxu0 %v21548_v8  ;;  %v9893_v23 = vsel %vm21536_vm1, %v9847_v29, 0 }
 0x345   : > { %v19059_v32 = vpop.permute.xlu1 %9824 }
 0x346   : > { %v9302_v18 = vpop.permute.xlu0 %9301  ;;  %v9848_v61 = vsel %vm9834_vm6, %v9823_v62, %v19059_v32 }
 0x347   : > { %v9336_v57 = vsel %vm9333_vm5, %v18815_v59, %v9302_v18  ;;  %11323 = vrot.lane.b32.xlu1 %v21552_v7, %s16266_s29  ;;  %v9337_v60 = vsel %vm9333_vm5, %v9302_v18, %v18835_v22  ;;  %15124 = vmatprep.subr.msk.bf16.mxu0 %vm21536_vm1, %v9848_v61 }
 0x348   : > { %11325 = vrot.lane.b32.xlu0 %v16368_v19, %s16266_s29  ;;  %15091 = vmatmul.mubr.msk.bf16.vlgmr.msra.gmra.mrb[28].mxu1 %vm420_vm3, %v18701_v55  ;;  %v9362_v53 = vsel %vm21536_vm1, %v9336_v57, 0  ;;  %v19148_v57 = vld [vmem:[%s21521_s2 + $0x50] sm:$0xf] }
 0x349   : > { %15096 = vmatprep.subr.msk.bf16.mxu1 %vm21536_vm1, %v9337_v60  ;;  %15121 = vmatmul.mubr.msk.bf16.vlgmr.msra.gmra.mrb[16].mxu0 %vm420_vm3, %v18999_v5  ;;  %v19079_v59 = vpop.permute.xlu1 %9828 }
 0x34a   : > { %9451 = vmatpush1.bf16.msra.mxu1 %v9362_v53  ;;  %10157 = vmatpush1.bf16.msra.mxu0 %v9893_v23  ;;  %v9831_v22 = vpop.permute.xlu0 %9830 }
 0x34b   : > { %11327 = vrot.lane.b32.xlu1 %v17117_v52, %s16266_s29  ;;  %9482 = vmatprep.mubr.bf16.mxu1 %v21548_v8  ;;  %v9851_v55 = vsel %vm9834_vm6, %v19079_v59, %v9831_v22 }
 0x34c   : > { %10828 = vrot.lane.b32.xlu0 %v17125_v16, %s16265_s26  ;;  %10188 = vmatprep.mubr.bf16.mxu0 %v21548_v8  ;;  %v9905_v37 = vsel %vm21536_vm1, %v9851_v55, 0 }
 0x34d   : > { %v9833_v51 = vpop.permute.xlu1 %9832 }
 0x34e   : > { %v9310_v50 = vpop.permute.xlu0 %9309  ;;  %v9852_v0 = vsel %vm9834_vm6, %v9831_v22, %v9833_v51 }
 0x34f   : > { %v9340_v58 = vsel %vm9333_vm5, %v18845_v47, %v9310_v50  ;;  %11331 = vrot.lane.b32.xlu1 %v18481_v12, %s16266_s29  ;;  %v9341_v27 = vsel %vm9333_vm5, %v9310_v50, %v18870_v14  ;;  %15128 = vmatprep.subr.msk.bf16.mxu0 %vm21536_vm1, %v9852_v0 }
 0x350   : > { %11333 = vrot.lane.b32.xlu0 %v18488_v56, %s16266_s29  ;;  %15097 = vmatmul.mubr.msk.bf16.vlgmr.msra.gmra.mrb[4].mxu1 %vm420_vm3, %v18850_v49  ;;  %v9374_v54 = vsel %vm21536_vm1, %v9340_v58, 0 }
 0x351   : > { %15100 = vmatprep.subr.msk.bf16.mxu1 %vm21536_vm1, %v9341_v27  ;;  %15125 = vmatmul.mubr.msk.bf16.vlgmr.msra.gmra.mrb[0].mxu0 %vm420_vm3, %v18999_v5  ;;  %v10298_v47 = vpop.permute.xlu1 %10297 }
 0x352   : > { %9533 = vmatpush1.bf16.msra.mxu1 %v9374_v54  ;;  %10239 = vmatpush1.bf16.msra.mxu0 %v9905_v37  ;;  %v10300_v14 = vpop.permute.xlu0 %10299 }
 0x353   : > { %11335 = vrot.lane.b32.xlu1 %v18500_v11, %s16266_s29  ;;  %9564 = vmatprep.mubr.bf16.mxu1 %v21548_v8  ;;  %v10336_v17 = vsel %vm10335_vm7, %v10298_v47, %v10300_v14 }
 0x354   : > { %11305 = vrot.lane.b32.xlu0 %v16409_v30, %s16266_s29  ;;  %10270 = vmatprep.mubr.bf16.mxu0 %v21548_v8  ;;  %v10358_v44 = vsel %vm21536_vm1, %v10336_v17, 0 }
 0x355   : > { %v19113_v35 = vpop.permute.xlu1 %10301 }
 0x356   : > { %v9318_v10 = vpop.permute.xlu0 %9317  ;;  %v10337_v48 = vsel %vm10335_vm7, %v10300_v14, %v19113_v35 }
 0x357   : > { %v9344_v45 = vsel %vm9333_vm5, %v18880_v24, %v9318_v10  ;;  %11800 = vrot.lane.b32.xlu1 %v16389_v25, %s16267_s8  ;;  %v9345_v63 = vsel %vm9333_vm5, %v9318_v10, %v18900_v13  ;;  %15130 = vmatprep.subr.msk.bf16.mxu0 %vm21536_vm1, %v10337_v48 }
 0x358   : > { %11802 = vrot.lane.b32.xlu0 %v16391_v26, %s16267_s8  ;;  %15101 = vmatmul.mubr.msk.bf16.vlgmr.msra.gmra.mrb[12].mxu1 %vm420_vm3, %v18850_v49  ;;  %v9386_v62 = vsel %vm21536_vm1, %v9344_v45, 0 }
 0x359   : > { %15104 = vmatprep.subr.msk.bf16.mxu1 %vm21536_vm1, %v9345_v63  ;;  %15129 = vmatmul.mubr.msk.bf16.vlgmr.msra.gmra.mrb[4].mxu0 %vm420_vm3, %v18999_v5  ;;  %v19133_v24 = vpop.permute.xlu1 %10305 }
 0x35a   : > { %9615 = vmatpush1.bf16.msra.mxu1 %v9386_v62  ;;  %10412 = vmatpush1.bf16.msra.mxu0 %v10358_v44  ;;  %v10308_v13 = vpop.permute.xlu0 %10307 }
 0x35b   : > { %11804 = vrot.lane.b32.xlu1 %v16402_v28, %s16267_s8  ;;  %9646 = vmatprep.mubr.bf16.mxu1 %v21548_v8  ;;  %v10340_v29 = vsel %vm10335_vm7, %v19133_v24, %v10308_v13 }
 0x35c   : > { %11313 = vrot.lane.b32.xlu0 %v16324_v4, %s16266_s29  ;;  %10443 = vmatprep.mubr.bf16.mxu0 %v21548_v8  ;;  %v10370_v22 = vsel %vm21536_vm1, %v10340_v29, 0 }
 0x35d   : > { %v19143_v18 = vpop.permute.xlu1 %10309 }
 0x35e   : > { %v9326_v61 = vpop.permute.xlu0 %9325  ;;  %v10341_v60 = vsel %vm10335_vm7, %v10308_v13, %v19143_v18 }
 0x35f   : > { %v9348_v23 = vsel %vm9333_vm5, %v18910_v21, %v9326_v61  ;;  %11808 = vrot.lane.b32.xlu1 %v16417_v33, %s16267_s8  ;;  %v9349_v53 = vsel %vm9333_vm5, %v9326_v61, %v18930_v2  ;;  %15134 = vmatprep.subr.msk.bf16.mxu0 %vm21536_vm1, %v10341_v60 }
 0x360   : > { %11810 = vrot.lane.b32.xlu0 %v16419_v34, %s16267_s8  ;;  %15105 = vmatmul.mubr.msk.bf16.vlgmr.msra.gmra.mrb[20].mxu1 %vm420_vm3, %v18850_v49  ;;  %v9398_v55 = vsel %vm21536_vm1, %v9348_v23, 0 }
 0x361   : > { %15108 = vmatprep.subr.msk.bf16.mxu1 %vm21536_vm1, %v9349_v53  ;;  %15131 = vmatmul.mubr.msk.bf16.vlgmr.msra.gmra.mrb[8].mxu0 %vm420_vm3, %v19148_v57  ;;  %v19168_v21 = vpop.permute.xlu1 %10313 }
 0x362   : > { %9697 = vmatpush1.bf16.msra.mxu1 %v9398_v55  ;;  %10494 = vmatpush1.bf16.msra.mxu0 %v10370_v22  ;;  %v10316_v2 = vpop.permute.xlu0 %10315 }
 0x363   : > { %11812 = vrot.lane.b32.xlu1 %v16434_v36, %s16267_s8  ;;  %9728 = vmatprep.mubr.bf16.mxu1 %v21548_v8  ;;  %v10344_v51 = vsel %vm10335_vm7, %v19168_v21, %v10316_v2 }
 0x364   : > { %11321 = vrot.lane.b32.xlu0 %v16358_v15, %s16266_s29  ;;  %10525 = vmatprep.mubr.bf16.mxu0 %v21548_v8  ;;  %v10382_v54 = vsel %vm21536_vm1, %v10344_v51, 0 }
 0x365   : > { %v19178_v50 = vpop.permute.xlu1 %10317 }
 0x366   : > { %v9803_v0 = vpop.permute.xlu0 %9802  ;;  %v10345_v58 = vsel %vm10335_vm7, %v10316_v2, %v19178_v50 }
 0x367   : > { %v9837_v27 = vsel %vm9834_vm6, %v18964_v9, %v9803_v0  ;;  %11816 = vrot.lane.b32.xlu1 %v16331_v6, %s16267_s8  ;;  %v9838_v37 = vsel %vm9834_vm6, %v9803_v0, %v18984_v41  ;;  %15138 = vmatprep.subr.msk.bf16.mxu0 %vm21536_vm1, %v10345_v58 }
 0x368   : > { %11818 = vrot.lane.b32.xlu0 %v16322_v3, %s16267_s8  ;;  %15109 = vmatmul.mubr.msk.bf16.vlgmr.msra.gmra.mrb[28].mxu1 %vm420_vm3, %v18850_v49  ;;  %v9863_v47 = vsel %vm21536_vm1, %v9837_v27, 0 }
 0x369   : > { %15114 = vmatprep.subr.msk.bf16.mxu1 %vm21536_vm1, %v9838_v37  ;;  %15135 = vmatmul.mubr.msk.bf16.vlgmr.msra.gmra.mrb[12].mxu0 %vm420_vm3, %v19148_v57  ;;  %v19198_v9 = vpop.permute.xlu1 %10321 }
 0x36a   : > { %9952 = vmatpush1.bf16.msra.mxu1 %v9863_v47  ;;  %10576 = vmatpush1.bf16.msra.mxu0 %v10382_v54  ;;  %v10324_v41 = vpop.permute.xlu0 %10323 }
 0x36b   : > { %11820 = vrot.lane.b32.xlu1 %v16457_v38, %s16267_s8  ;;  %9983 = vmatprep.mubr.bf16.mxu1 %v21548_v8  ;;  %v10348_v49 = vsel %vm10335_vm7, %v19198_v9, %v10324_v41 }
 0x36c   : > { %11329 = vrot.lane.b32.xlu0 %v17125_v16, %s16266_s29  ;;  %10607 = vmatprep.mubr.bf16.mxu0 %v21548_v8  ;;  %v10394_v45 = vsel %vm21536_vm1, %v10348_v49, 0  ;;  %s14768_s29 = sshll.u32 %s21929_s17, 1 }
 0x36d   : > { %v19208_v14 = vpop.permute.xlu1 %10325  ;;  %s21288_s7 = scalar_lea.vmem %s21522_s3, %s14768_s29 }
 0x36e   : > { %v9811_v17 = vpop.permute.xlu0 %9810  ;;  %v10349_v10 = vsel %vm10335_vm7, %v10324_v41, %v19208_v14 }
 0x36f   : > { %v9841_v48 = vsel %vm9834_vm6, %v18994_v1, %v9811_v17  ;;  %11824 = vrot.lane.b32.xlu1 %v21552_v7, %s16267_s8  ;;  %v9842_v44 = vsel %vm9834_vm6, %v9811_v17, %v19019_v43  ;;  %15142 = vmatprep.subr.msk.bf16.mxu0 %vm21536_vm1, %v10349_v10  ;;  %v19297_v17 = vld [vmem:[%s21521_s2 + $0x54] sm:$0xf] }
 0x370   : > { %11826 = vrot.lane.b32.xlu0 %v16368_v19, %s16267_s8  ;;  %15115 = vmatmul.mubr.msk.bf16.vlgmr.msra.gmra.mrb[4].mxu1 %vm420_vm3, %v18999_v5  ;;  %v9875_v63 = vsel %vm21536_vm1, %v9841_v48, 0 }
 0x371   : > { %15118 = vmatprep.subr.msk.bf16.mxu1 %vm21536_vm1, %v9842_v44  ;;  %15139 = vmatmul.mubr.msk.bf16.vlgmr.msra.gmra.mrb[16].mxu0 %vm420_vm3, %v19148_v57  ;;  %v19228_v1 = vpop.permute.xlu1 %10329 }
 0x372   : > { %10034 = vmatpush1.bf16.msra.mxu1 %v9875_v63  ;;  %10658 = vmatpush1.bf16.msra.mxu0 %v10394_v45  ;;  %v10332_v43 = vpop.permute.xlu0 %10331 }
 0x373   : > { %11828 = vrot.lane.b32.xlu1 %v17117_v52, %s16267_s8  ;;  %10065 = vmatprep.mubr.bf16.mxu1 %v21548_v8  ;;  %v10352_v62 = vsel %vm10335_vm7, %v19228_v1, %v10332_v43 }
 0x374   : > { %11806 = vrot.lane.b32.xlu0 %v16409_v30, %s16267_s8  ;;  %10689 = vmatprep.mubr.bf16.mxu0 %v21548_v8  ;;  %v10406_v53 = vsel %vm21536_vm1, %v10352_v62, 0 }
 0x375   : > { %v10334_v13 = vpop.permute.xlu1 %10333 }
 0x376   : > { %v9819_v29 = vpop.permute.xlu0 %9818  ;;  %v10353_v61 = vsel %vm10335_vm7, %v10332_v43, %v10334_v13 }
 0x377   : > { %v9845_v60 = vsel %vm9834_vm6, %v19029_v42, %v9819_v29  ;;  %11832 = vrot.lane.b32.xlu1 %v18481_v12, %s16267_s8  ;;  %v9846_v23 = vsel %vm9834_vm6, %v9819_v29, %v19049_v20  ;;  %15146 = vmatprep.subr.msk.bf16.mxu0 %vm21536_vm1, %v10353_v61 }
 0x378   : > { %11834 = vrot.lane.b32.xlu0 %v18488_v56, %s16267_s8  ;;  %15119 = vmatmul.mubr.msk.bf16.vlgmr.msra.gmra.mrb[12].mxu1 %vm420_vm3, %v18999_v5  ;;  %v9887_v22 = vsel %vm21536_vm1, %v9845_v60, 0 }
 0x379   : > { %15122 = vmatprep.subr.msk.bf16.mxu1 %vm21536_vm1, %v9846_v23  ;;  %15143 = vmatmul.mubr.msk.bf16.vlgmr.msra.gmra.mrb[0].mxu0 %vm420_vm3, %v19148_v57  ;;  %v10799_v42 = vpop.permute.xlu1 %10798 }
 0x37a   : > { %10116 = vmatpush1.bf16.msra.mxu1 %v9887_v22  ;;  %10740 = vmatpush1.bf16.msra.mxu0 %v10406_v53  ;;  %v10801_v20 = vpop.permute.xlu0 %10800 }
 0x37b   : > { %11836 = vrot.lane.b32.xlu1 %v18500_v11, %s16267_s8  ;;  %10147 = vmatprep.mubr.bf16.mxu1 %v21548_v8  ;;  %v10837_v55 = vsel %vm10836_vm8, %v10799_v42, %v10801_v20 }
 0x37c   : > { %11814 = vrot.lane.b32.xlu0 %v16324_v4, %s16267_s8  ;;  %10771 = vmatprep.mubr.bf16.mxu0 %v21548_v8  ;;  %v10859_v58 = vsel %vm21536_vm1, %v10837_v55, 0 }
 0x37d   : > { %v19262_v2 = vpop.permute.xlu1 %10802 }
 0x37e   : > { %v9827_v51 = vpop.permute.xlu0 %9826  ;;  %v10838_v0 = vsel %vm10836_vm8, %v10801_v20, %v19262_v2 }
 0x37f   : > { %v9849_v27 = vsel %vm9834_vm6, %v19059_v32, %v9827_v51  ;;  %12301 = vrot.lane.b32.xlu1 %v16389_v25, %s16268_s11  ;;  %v9850_v37 = vsel %vm9834_vm6, %v9827_v51, %v19079_v59  ;;  %15148 = vmatprep.subr.msk.bf16.mxu0 %vm21536_vm1, %v10838_v0 }
 0x380   : > { %12303 = vrot.lane.b32.xlu0 %v16391_v26, %s16268_s11  ;;  %15123 = vmatmul.mubr.msk.bf16.vlgmr.msra.gmra.mrb[20].mxu1 %vm420_vm3, %v18999_v5  ;;  %v9899_v54 = vsel %vm21536_vm1, %v9849_v27, 0 }
 0x381   : > { %15126 = vmatprep.subr.msk.bf16.mxu1 %vm21536_vm1, %v9850_v37  ;;  %15147 = vmatmul.mubr.msk.bf16.vlgmr.msra.gmra.mrb[4].mxu0 %vm420_vm3, %v19148_v57  ;;  %v19282_v32 = vpop.permute.xlu1 %10806 }
 0x382   : > { %10198 = vmatpush1.bf16.msra.mxu1 %v9899_v54  ;;  %10913 = vmatpush1.bf16.msra.mxu0 %v10859_v58  ;;  %v10809_v59 = vpop.permute.xlu0 %10808 }
 0x383   : > { %12305 = vrot.lane.b32.xlu1 %v16402_v28, %s16268_s11  ;;  %10229 = vmatprep.mubr.bf16.mxu1 %v21548_v8  ;;  %v10841_v47 = vsel %vm10836_vm8, %v19282_v32, %v10809_v59 }
 0x384   : > { %11822 = vrot.lane.b32.xlu0 %v16358_v15, %s16267_s8  ;;  %10944 = vmatprep.mubr.bf16.mxu0 %v21548_v8  ;;  %v10871_v45 = vsel %vm21536_vm1, %v10841_v47, 0 }
 0x385   : > { %v19292_v41 = vpop.permute.xlu1 %10810 }
 0x386   : > { %v10304_v49 = vpop.permute.xlu0 %10303  ;;  %v10842_v10 = vsel %vm10836_vm8, %v10809_v59, %v19292_v41 }
 0x387   : > { %v10338_v48 = vsel %vm10335_vm7, %v19113_v35, %v10304_v49  ;;  %12309 = vrot.lane.b32.xlu1 %v16417_v33, %s16268_s11  ;;  %v10339_v44 = vsel %vm10335_vm7, %v10304_v49, %v19133_v24  ;;  %15152 = vmatprep.subr.msk.bf16.mxu0 %vm21536_vm1, %v10842_v10 }
 0x388   : > { %12311 = vrot.lane.b32.xlu0 %v16419_v34, %s16268_s11  ;;  %15127 = vmatmul.mubr.msk.bf16.vlgmr.msra.gmra.mrb[28].mxu1 %vm420_vm3, %v18999_v5  ;;  %v10364_v63 = vsel %vm21536_vm1, %v10338_v48, 0 }
 0x389   : > { %15132 = vmatprep.subr.msk.bf16.mxu1 %vm21536_vm1, %v10339_v44  ;;  %15149 = vmatmul.mubr.msk.bf16.vlgmr.msra.gmra.mrb[8].mxu0 %vm420_vm3, %v19297_v17  ;;  %v19317_v35 = vpop.permute.xlu1 %10814 }
 0x38a   : > { %10453 = vmatpush1.bf16.msra.mxu1 %v10364_v63  ;;  %10995 = vmatpush1.bf16.msra.mxu0 %v10871_v45  ;;  %v10817_v24 = vpop.permute.xlu0 %10816 }
 0x38b   : > { %12313 = vrot.lane.b32.xlu1 %v16434_v36, %s16268_s11  ;;  %10484 = vmatprep.mubr.bf16.mxu1 %v21548_v8  ;;  %v10845_v5 = vsel %vm10836_vm8, %v19317_v35, %v10817_v24 }
 0x38c   : > { %11830 = vrot.lane.b32.xlu0 %v17125_v16, %s16267_s8  ;;  %11026 = vmatprep.mubr.bf16.mxu0 %v21548_v8  ;;  %v10883_v60 = vsel %vm21536_vm1, %v10845_v5, 0  ;;  %s14769_s8 = sshll.u32 %s21931_s16, 3 }
 0x38d   : > { %v19327_v43 = vpop.permute.xlu1 %10818 }
 0x38e   : > { %v10312_v62 = vpop.permute.xlu0 %10311  ;;  %v10846_v13 = vsel %vm10836_vm8, %v10817_v24, %v19327_v43 }
 0x38f   : > { %v10342_v29 = vsel %vm10335_vm7, %v19143_v18, %v10312_v62  ;;  %12317 = vrot.lane.b32.xlu1 %v16331_v6, %s16268_s11  ;;  %v10343_v61 = vsel %vm10335_vm7, %v10312_v62, %v19168_v21  ;;  %15156 = vmatprep.subr.msk.bf16.mxu0 %vm21536_vm1, %v10846_v13 }
 0x390   : > { %12319 = vrot.lane.b32.xlu0 %v16322_v3, %s16268_s11  ;;  %15133 = vmatmul.mubr.msk.bf16.vlgmr.msra.gmra.mrb[4].mxu1 %vm420_vm3, %v19148_v57  ;;  %v10376_v23 = vsel %vm21536_vm1, %v10342_v29, 0 }
 0x391   : > { %15136 = vmatprep.subr.msk.bf16.mxu1 %vm21536_vm1, %v10343_v61  ;;  %15153 = vmatmul.mubr.msk.bf16.vlgmr.msra.gmra.mrb[12].mxu0 %vm420_vm3, %v19297_v17  ;;  %v19347_v18 = vpop.permute.xlu1 %10822 }
 0x392   : > { %10535 = vmatpush1.bf16.msra.mxu1 %v10376_v23  ;;  %11077 = vmatpush1.bf16.msra.mxu0 %v10883_v60  ;;  %v10825_v21 = vpop.permute.xlu0 %10824 }
 0x393   : > { %12321 = vrot.lane.b32.xlu1 %v16457_v38, %s16268_s11  ;;  %10566 = vmatprep.mubr.bf16.mxu1 %v21548_v8  ;;  %v10849_v53 = vsel %vm10836_vm8, %v19347_v18, %v10825_v21 }
 0x394   : > { %12307 = vrot.lane.b32.xlu0 %v16409_v30, %s16268_s11  ;;  %11108 = vmatprep.mubr.bf16.mxu0 %v21548_v8  ;;  %v10895_v0 = vsel %vm21536_vm1, %v10849_v53, 0 }
 0x395   : > { %v19357_v22 = vpop.permute.xlu1 %10826 }
 0x396   : > { %v10320_v42 = vpop.permute.xlu0 %10319  ;;  %v10850_v20 = vsel %vm10836_vm8, %v10825_v21, %v19357_v22  ;;  %v19448_v21 = vld [vmem:[%s21521_s2 + $0x58] sm:$0xf] }
 0x397   : > { %v10346_v55 = vsel %vm10335_vm7, %v19178_v50, %v10320_v42  ;;  %12325 = vrot.lane.b32.xlu1 %v21552_v7, %s16268_s11  ;;  %v10347_v51 = vsel %vm10335_vm7, %v10320_v42, %v19198_v9  ;;  %15160 = vmatprep.subr.msk.bf16.mxu0 %vm21536_vm1, %v10850_v20 }
 0x398   : > { %12327 = vrot.lane.b32.xlu0 %v16368_v19, %s16268_s11  ;;  %15137 = vmatmul.mubr.msk.bf16.vlgmr.msra.gmra.mrb[12].mxu1 %vm420_vm3, %v19148_v57  ;;  %v10388_v58 = vsel %vm21536_vm1, %v10346_v55, 0 }
 0x399   : > { %15140 = vmatprep.subr.msk.bf16.mxu1 %vm21536_vm1, %v10347_v51  ;;  %15157 = vmatmul.mubr.msk.bf16.vlgmr.msra.gmra.mrb[16].mxu0 %vm420_vm3, %v19297_v17  ;;  %v19377_v50 = vpop.permute.xlu1 %10830 }
 0x39a   : > { %10617 = vmatpush1.bf16.msra.mxu1 %v10388_v58  ;;  %11159 = vmatpush1.bf16.msra.mxu0 %v10895_v0  ;;  %v10833_v9 = vpop.permute.xlu0 %10832 }
 0x39b   : > { %12329 = vrot.lane.b32.xlu1 %v17117_v52, %s16268_s11  ;;  %10648 = vmatprep.mubr.bf16.mxu1 %v21548_v8  ;;  %v10853_v27 = vsel %vm10836_vm8, %v19377_v50, %v10833_v9 }
 0x39c   : > { %12315 = vrot.lane.b32.xlu0 %v16324_v4, %s16268_s11  ;;  %11190 = vmatprep.mubr.bf16.mxu0 %v21548_v8  ;;  %v10907_v10 = vsel %vm21536_vm1, %v10853_v27, 0 }
 0x39d   : > { %v10835_v37 = vpop.permute.xlu1 %10834 }
 0x39e   : > { %v10328_v54 = vpop.permute.xlu0 %10327  ;;  %v10854_v59 = vsel %vm10836_vm8, %v10833_v9, %v10835_v37 }
 0x39f   : > { %v10350_v47 = vsel %vm10335_vm7, %v19208_v14, %v10328_v54  ;;  %12333 = vrot.lane.b32.xlu1 %v18481_v12, %s16268_s11  ;;  %v10351_v49 = vsel %vm10335_vm7, %v10328_v54, %v19228_v1  ;;  %15164 = vmatprep.subr.msk.bf16.mxu0 %vm21536_vm1, %v10854_v59 }
 0x3a0   : > { %12335 = vrot.lane.b32.xlu0 %v18488_v56, %s16268_s11  ;;  %15141 = vmatmul.mubr.msk.bf16.vlgmr.msra.gmra.mrb[20].mxu1 %vm420_vm3, %v19148_v57  ;;  %v10400_v48 = vsel %vm21536_vm1, %v10350_v47, 0 }
 0x3a1   : > { %15144 = vmatprep.subr.msk.bf16.mxu1 %vm21536_vm1, %v10351_v49  ;;  %15161 = vmatmul.mubr.msk.bf16.vlgmr.msra.gmra.mrb[0].mxu0 %vm420_vm3, %v19297_v17  ;;  %v11300_v14 = vpop.permute.xlu1 %11299 }
 0x3a2   : > { %10699 = vmatpush1.bf16.msra.mxu1 %v10400_v48  ;;  %11241 = vmatpush1.bf16.msra.mxu0 %v10907_v10  ;;  %v11302_v1 = vpop.permute.xlu0 %11301 }
 0x3a3   : > { %12337 = vrot.lane.b32.xlu1 %v18500_v11, %s16268_s11  ;;  %10730 = vmatprep.mubr.bf16.mxu1 %v21548_v8  ;;  %v11338_v44 = vsel %vm11337_vm9, %v11300_v14, %v11302_v1 }
 0x3a4   : > { %12323 = vrot.lane.b32.xlu0 %v16358_v15, %s16268_s11  ;;  %11272 = vmatprep.mubr.bf16.mxu0 %v21548_v8  ;;  %v11360_v5 = vsel %vm21536_vm1, %v11338_v44, 0 }
 0x3a5   : > { %v19411_v45 = vpop.permute.xlu1 %11303 }
 0x3a6   : > { %v10805_v63 = vpop.permute.xlu0 %10804  ;;  %v11339_v24 = vsel %vm11337_vm9, %v11302_v1, %v19411_v45 }
 0x3a7   : > { %v10839_v62 = vsel %vm10836_vm8, %v19262_v2, %v10805_v63  ;;  %v10840_v13 = vsel %vm10836_vm8, %v10805_v63, %v19282_v32  ;;  %12802 = vrot.lane.b32.xlu1 %v16389_v25, %s16269_s14  ;;  %15166 = vmatprep.subr.msk.bf16.mxu0 %vm21536_vm1, %v11339_v24 }
 0x3a8   : > { %v10865_v29 = vsel %vm21536_vm1, %v10839_v62, 0  ;;  %12804 = vrot.lane.b32.xlu0 %v16391_v26, %s16269_s14  ;;  %15145 = vmatmul.mubr.msk.bf16.vlgmr.msra.gmra.mrb[28].mxu1 %vm420_vm3, %v19148_v57 }
 0x3a9   : > { %15150 = vmatprep.subr.msk.bf16.mxu1 %vm21536_vm1, %v10840_v13  ;;  %15165 = vmatmul.mubr.msk.bf16.vlgmr.msra.gmra.mrb[4].mxu0 %vm420_vm3, %v19297_v17  ;;  %v19431_v2 = vpop.permute.xlu1 %11307 }
 0x3aa   : > { %10954 = vmatpush1.bf16.msra.mxu1 %v10865_v29  ;;  %11414 = vmatpush1.bf16.msra.mxu0 %v11360_v5  ;;  %v11310_v32 = vpop.permute.xlu0 %11309 }
 0x3ab   : > { %12806 = vrot.lane.b32.xlu1 %v16402_v28, %s16269_s14  ;;  %10985 = vmatprep.mubr.bf16.mxu1 %v21548_v8  ;;  %v11342_v61 = vsel %vm11337_vm9, %v19431_v2, %v11310_v32 }
 0x3ac   : > { %12331 = vrot.lane.b32.xlu0 %v17125_v16, %s16268_s11  ;;  %11445 = vmatprep.mubr.bf16.mxu0 %v21548_v8  ;;  %v11372_v53 = vsel %vm21536_vm1, %v11342_v61, 0  ;;  %s267_s11 = scalar_lea.vmem %s21523_s4, %s14769_s8 }
 0x3ad   : > { %v19441_v57 = vpop.permute.xlu1 %11311 }
 0x3ae   : > { %v10813_v60 = vpop.permute.xlu0 %10812  ;;  %v11343_v23 = vsel %vm11337_vm9, %v11310_v32, %v19441_v57 }
 0x3af   : > { %v10843_v42 = vsel %vm10836_vm8, %v19292_v41, %v10813_v60  ;;  %v10844_v20 = vsel %vm10836_vm8, %v10813_v60, %v19317_v35  ;;  %12810 = vrot.lane.b32.xlu1 %v16417_v33, %s16269_s14  ;;  %15170 = vmatprep.subr.msk.bf16.mxu0 %vm21536_vm1, %v11343_v23 }
 0x3b0   : > { %v10877_v55 = vsel %vm21536_vm1, %v10843_v42, 0  ;;  %12812 = vrot.lane.b32.xlu0 %v16419_v34, %s16269_s14  ;;  %15151 = vmatmul.mubr.msk.bf16.vlgmr.msra.gmra.mrb[4].mxu1 %vm420_vm3, %v19297_v17 }
 0x3b1   : > { %15154 = vmatprep.subr.msk.bf16.mxu1 %vm21536_vm1, %v10844_v20  ;;  %15167 = vmatmul.mubr.msk.bf16.vlgmr.msra.gmra.mrb[8].mxu0 %vm420_vm3, %v19448_v21  ;;  %v19466_v41 = vpop.permute.xlu1 %11315 }
 0x3b2   : > { %11036 = vmatpush1.bf16.msra.mxu1 %v10877_v55  ;;  %11496 = vmatpush1.bf16.msra.mxu0 %v11372_v53  ;;  %v11318_v35 = vpop.permute.xlu0 %11317 }
 0x3b3   : > { %12814 = vrot.lane.b32.xlu1 %v16434_v36, %s16269_s14  ;;  %11067 = vmatprep.mubr.bf16.mxu1 %v21548_v8  ;;  %v11346_v51 = vsel %vm11337_vm9, %v19466_v41, %v11318_v35 }
 0x3b4   : > { %12808 = vrot.lane.b32.xlu0 %v16409_v30, %s16269_s14  ;;  %11527 = vmatprep.mubr.bf16.mxu0 %v21548_v8  ;;  %v11384_v27 = vsel %vm21536_vm1, %v11346_v51, 0 }
 0x3b5   : > { %v19476_v0 = vpop.permute.xlu1 %11319 }
 0x3b6   : > { %v10821_v58 = vpop.permute.xlu0 %10820  ;;  %v11347_v9 = vsel %vm11337_vm9, %v11318_v35, %v19476_v0 }
 0x3b7   : > { %v10847_v37 = vsel %vm10836_vm8, %v19327_v43, %v10821_v58  ;;  %v10848_v54 = vsel %vm10836_vm8, %v10821_v58, %v19347_v18  ;;  %12818 = vrot.lane.b32.xlu1 %v16331_v6, %s16269_s14  ;;  %15174 = vmatprep.subr.msk.bf16.mxu0 %vm21536_vm1, %v11347_v9 }
 0x3b8   : > { %v10889_v59 = vsel %vm21536_vm1, %v10847_v37, 0  ;;  %12820 = vrot.lane.b32.xlu0 %v16322_v3, %s16269_s14  ;;  %15155 = vmatmul.mubr.msk.bf16.vlgmr.msra.gmra.mrb[12].mxu1 %vm420_vm3, %v19297_v17 }
 0x3b9   : > { %15158 = vmatprep.subr.msk.bf16.mxu1 %vm21536_vm1, %v10848_v54  ;;  %15171 = vmatmul.mubr.msk.bf16.vlgmr.msra.gmra.mrb[12].mxu0 %vm420_vm3, %v19448_v21  ;;  %v19496_v43 = vpop.permute.xlu1 %11323 }
 0x3ba   : > { %11118 = vmatpush1.bf16.msra.mxu1 %v10889_v59  ;;  %11578 = vmatpush1.bf16.msra.mxu0 %v11384_v27  ;;  %v11326_v18 = vpop.permute.xlu0 %11325 }
 0x3bb   : > { %12822 = vrot.lane.b32.xlu1 %v16457_v38, %s16269_s14  ;;  %11149 = vmatprep.mubr.bf16.mxu1 %v21548_v8  ;;  %v11350_v47 = vsel %vm11337_vm9, %v19496_v43, %v11326_v18 }
 0x3bc   : > { %12816 = vrot.lane.b32.xlu0 %v16324_v4, %s16269_s14  ;;  %11609 = vmatprep.mubr.bf16.mxu0 %v21548_v8  ;;  %v11396_v14 = vsel %vm21536_vm1, %v11350_v47, 0 }
 0x3bd   : > { %v19506_v49 = vpop.permute.xlu1 %11327 }
 0x3be   : > { %v10829_v10 = vpop.permute.xlu0 %10828  ;;  %v11351_v48 = vsel %vm11337_vm9, %v11326_v18, %v19506_v49 }
 0x3bf   : > { %v10851_v1 = vsel %vm10836_vm8, %v19357_v22, %v10829_v10  ;;  %v10852_v44 = vsel %vm10836_vm8, %v10829_v10, %v19377_v50  ;;  %12826 = vrot.lane.b32.xlu1 %v21552_v7, %s16269_s14  ;;  %15178 = vmatprep.subr.msk.bf16.mxu0 %vm21536_vm1, %v11351_v48 }
 0x3c0   : > { %v10901_v63 = vsel %vm21536_vm1, %v10851_v1, 0  ;;  %12828 = vrot.lane.b32.xlu0 %v16368_v19, %s16269_s14  ;;  %15159 = vmatmul.mubr.msk.bf16.vlgmr.msra.gmra.mrb[20].mxu1 %vm420_vm3, %v19297_v17 }
 0x3c1   : > { %15162 = vmatprep.subr.msk.bf16.mxu1 %vm21536_vm1, %v10852_v44  ;;  %15175 = vmatmul.mubr.msk.bf16.vlgmr.msra.gmra.mrb[16].mxu0 %vm420_vm3, %v19448_v21  ;;  %v19526_v22 = vpop.permute.xlu1 %11331 }
 0x3c2   : > { %11200 = vmatpush1.bf16.msra.mxu1 %v10901_v63  ;;  %11660 = vmatpush1.bf16.msra.mxu0 %v11396_v14  ;;  %v11334_v50 = vpop.permute.xlu0 %11333 }
 0x3c3   : > { %12830 = vrot.lane.b32.xlu1 %v17117_v52, %s16269_s14  ;;  %11231 = vmatprep.mubr.bf16.mxu1 %v21548_v8  ;;  %v11354_v24 = vsel %vm11337_vm9, %v19526_v22, %v11334_v50 }
 0x3c4   : > { %12824 = vrot.lane.b32.xlu0 %v16358_v15, %s16269_s14  ;;  %11691 = vmatprep.mubr.bf16.mxu0 %v21548_v8  ;;  %v11408_v29 = vsel %vm21536_vm1, %v11354_v24, 0 }
 0x3c5   : > { %v11336_v5 = vpop.permute.xlu1 %11335 }
 0x3c6   : > { %v11306_v62 = vpop.permute.xlu0 %11305  ;;  %v11355_v13 = vsel %vm11337_vm9, %v11334_v50, %v11336_v5 }
 0x3c7   : > { %v11340_v32 = vsel %vm11337_vm9, %v19411_v45, %v11306_v62  ;;  %v11341_v61 = vsel %vm11337_vm9, %v11306_v62, %v19431_v2  ;;  %12834 = vrot.lane.b32.xlu1 %v18481_v12, %s16269_s14  ;;  %15182 = vmatprep.subr.msk.bf16.mxu0 %vm21536_vm1, %v11355_v13 }
 0x3c8   : > { %v11366_v60 = vsel %vm21536_vm1, %v11340_v32, 0  ;;  %12836 = vrot.lane.b32.xlu0 %v18488_v56, %s16269_s14  ;;  %15163 = vmatmul.mubr.msk.bf16.vlgmr.msra.gmra.mrb[28].mxu1 %vm420_vm3, %v19297_v17 }
 0x3c9   : > { %15168 = vmatprep.subr.msk.bf16.mxu1 %vm21536_vm1, %v11341_v61  ;;  %15179 = vmatmul.mubr.msk.bf16.vlgmr.msra.gmra.mrb[0].mxu0 %vm420_vm3, %v19448_v21  ;;  %v11801_v45 = vpop.permute.xlu1 %11800 }
 0x3ca   : > { %11455 = vmatpush1.bf16.msra.mxu1 %v11366_v60  ;;  %11742 = vmatpush1.bf16.msra.mxu0 %v11408_v29  ;;  %v11803_v2 = vpop.permute.xlu0 %11802 }
 0x3cb   : > { %12838 = vrot.lane.b32.xlu1 %v18500_v11, %s16269_s14  ;;  %11486 = vmatprep.mubr.bf16.mxu1 %v21548_v8  ;;  %v11839_v23 = vsel %vm11838_vm10, %v11801_v45, %v11803_v2 }
 0x3cc   : > { %12832 = vrot.lane.b32.xlu0 %v17125_v16, %s16269_s14  ;;  %11773 = vmatprep.mubr.bf16.mxu0 %v21548_v8  ;;  %v11861_v20 = vsel %vm21536_vm1, %v11839_v23, 0 }
 0x3cd   : > { %v19560_v17 = vpop.permute.xlu1 %11804 }
 0x3ce   : > { %v11314_v53 = vpop.permute.xlu0 %11313  ;;  %v11840_v42 = vsel %vm11838_vm10, %v11803_v2, %v19560_v17 }
 0x3cf   : > { %v11344_v55 = vsel %vm11337_vm9, %v19441_v57, %v11314_v53  ;;  %v11345_v35 = vsel %vm11337_vm9, %v11314_v53, %v19466_v41  ;;  %13303 = vrot.lane.b32.xlu1 %v16389_v25, %s16270_s20  ;;  %15184 = vmatprep.subr.msk.bf16.mxu0 %vm21536_vm1, %v11840_v42 }
 0x3d0   : > { %v11378_v51 = vsel %vm21536_vm1, %v11344_v55, 0  ;;  %15169 = vmatmul.mubr.msk.bf16.vlgmr.msra.gmra.mrb[4].mxu1 %vm420_vm3, %v19448_v21  ;;  %15172 = vmatprep.subr.msk.bf16.mxu1 %vm21536_vm1, %v11345_v35  ;;  %v19712_v35 = vld [vmem:[%s21521_s2 + $0x60] sm:$0xf] }
 0x3d1   : > { %15183 = vmatmul.mubr.msk.bf16.vlgmr.msra.gmra.mrb[4].mxu0 %vm420_vm3, %v19448_v21  ;;  %11537 = vmatpush1.bf16.msra.mxu1 %v11378_v51  ;;  %v11809_v57 = vpop.permute.xlu1 %11808 }
 0x3d2   : > { %11915 = vmatpush1.bf16.msra.mxu0 %v11861_v20  ;;  %v11811_v41 = vpop.permute.xlu0 %11810  ;;  %13305 = vrot.lane.b32.xlu0 %v16391_v26, %s16270_s20  ;;  %v19594_v26 = vld [vmem:[%s21521_s2 + $0x5c] sm:$0xf] }
 0x3d3   : > { %13307 = vrot.lane.b32.xlu1 %v16402_v28, %s16270_s20  ;;  %11568 = vmatprep.mubr.bf16.mxu1 %v21548_v8  ;;  %v11843_v25 = vsel %vm11838_vm10, %v11809_v57, %v11811_v41 }
 0x3d4   : > { %11946 = vmatprep.mubr.bf16.mxu0 %v21548_v8  ;;  %v11873_v28 = vsel %vm21536_vm1, %v11843_v25, 0 }
 0x3d5   : > { %v19585_v58 = vpop.permute.xlu1 %11812 }
 0x3d6   : > { %v11322_v9 = vpop.permute.xlu0 %11321  ;;  %v11844_v27 = vsel %vm11838_vm10, %v11811_v41, %v19585_v58  ;;  %13309 = vrot.lane.b32.xlu0 %v16409_v30, %s16270_s20 }
 0x3d7   : > { %v11348_v37 = vsel %vm11337_vm9, %v19476_v0, %v11322_v9  ;;  %v11349_v54 = vsel %vm11337_vm9, %v11322_v9, %v19496_v43  ;;  %13311 = vrot.lane.b32.xlu1 %v16417_v33, %s16270_s20  ;;  %15188 = vmatprep.subr.msk.bf16.mxu0 %vm21536_vm1, %v11844_v27 }
 0x3d8   : > { %v11390_v30 = vsel %vm21536_vm1, %v11348_v37, 0  ;;  %15173 = vmatmul.mubr.msk.bf16.vlgmr.msra.gmra.mrb[12].mxu1 %vm420_vm3, %v19448_v21  ;;  %15176 = vmatprep.subr.msk.bf16.mxu1 %vm21536_vm1, %v11349_v54 }
 0x3d9   : > { %15185 = vmatmul.mubr.msk.bf16.vlgmr.msra.gmra.mrb[8].mxu0 %vm420_vm3, %v19594_v26  ;;  %11619 = vmatpush1.bf16.msra.mxu1 %v11390_v30  ;;  %v11817_v0 = vpop.permute.xlu1 %11816 }
 0x3da   : > { %11997 = vmatpush1.bf16.msra.mxu0 %v11873_v28  ;;  %v11819_v59 = vpop.permute.xlu0 %11818  ;;  %13313 = vrot.lane.b32.xlu0 %v16419_v34, %s16270_s20 }
 0x3db   : > { %13315 = vrot.lane.b32.xlu1 %v16434_v36, %s16270_s20  ;;  %11650 = vmatprep.mubr.bf16.mxu1 %v21548_v8  ;;  %v11847_v33 = vsel %vm11838_vm10, %v11817_v0, %v11819_v59 }
 0x3dc   : > { %12028 = vmatprep.mubr.bf16.mxu0 %v21548_v8  ;;  %v11885_v34 = vsel %vm21536_vm1, %v11847_v33, 0 }
 0x3dd   : > { %v19617_v43 = vpop.permute.xlu1 %11820 }
 0x3de   : > { %v11330_v18 = vpop.permute.xlu0 %11329  ;;  %v11848_v47 = vsel %vm11838_vm10, %v11819_v59, %v19617_v43  ;;  %13317 = vrot.lane.b32.xlu0 %v16324_v4, %s16270_s20 }
 0x3df   : > { %v11352_v36 = vsel %vm11337_vm9, %v19506_v49, %v11330_v18  ;;  %v11353_v10 = vsel %vm11337_vm9, %v11330_v18, %v19526_v22  ;;  %13319 = vrot.lane.b32.xlu1 %v16331_v6, %s16270_s20  ;;  %15192 = vmatprep.subr.msk.bf16.mxu0 %vm21536_vm1, %v11848_v47 }
 0x3e0   : > { %v11402_v48 = vsel %vm21536_vm1, %v11352_v36, 0  ;;  %15177 = vmatmul.mubr.msk.bf16.vlgmr.msra.gmra.mrb[20].mxu1 %vm420_vm3, %v19448_v21  ;;  %15180 = vmatprep.subr.msk.bf16.mxu1 %vm21536_vm1, %v11353_v10 }
 0x3e1   : > { %15189 = vmatmul.mubr.msk.bf16.vlgmr.msra.gmra.mrb[12].mxu0 %vm420_vm3, %v19594_v26  ;;  %11701 = vmatpush1.bf16.msra.mxu1 %v11402_v48  ;;  %v11825_v4 = vpop.permute.xlu1 %11824 }
 0x3e2   : > { %12079 = vmatpush1.bf16.msra.mxu0 %v11885_v34  ;;  %v11827_v49 = vpop.permute.xlu0 %11826  ;;  %13321 = vrot.lane.b32.xlu0 %v16322_v3, %s16270_s20 }
 0x3e3   : > { %13323 = vrot.lane.b32.xlu1 %v16457_v38, %s16270_s20  ;;  %11732 = vmatprep.mubr.bf16.mxu1 %v21548_v8  ;;  %v11851_v6 = vsel %vm11838_vm10, %v11825_v4, %v11827_v49 }
 0x3e4   : > { %12110 = vmatprep.mubr.bf16.mxu0 %v21548_v8  ;;  %v11897_v3 = vsel %vm21536_vm1, %v11851_v6, 0 }
 0x3e5   : > { %v19644_v14 = vpop.permute.xlu1 %11828 }
 0x3e6   : > { %v11807_v1 = vpop.permute.xlu0 %11806  ;;  %v11852_v44 = vsel %vm11838_vm10, %v11827_v49, %v19644_v14  ;;  %13325 = vrot.lane.b32.xlu0 %v16358_v15, %s16270_s20 }
 0x3e7   : > { %v11841_v38 = vsel %vm11838_vm10, %v19560_v17, %v11807_v1  ;;  %v11842_v63 = vsel %vm11838_vm10, %v11807_v1, %v11809_v57  ;;  %13327 = vrot.lane.b32.xlu1 %v21552_v7, %s16270_s20  ;;  %15196 = vmatprep.subr.msk.bf16.mxu0 %vm21536_vm1, %v11852_v44 }
 0x3e8   : > { %v11867_v22 = vsel %vm21536_vm1, %v11841_v38, 0  ;;  %15181 = vmatmul.mubr.msk.bf16.vlgmr.msra.gmra.mrb[28].mxu1 %vm420_vm3, %v19448_v21  ;;  %15186 = vmatprep.subr.msk.bf16.mxu1 %vm21536_vm1, %v11842_v63 }
 0x3e9   : > { %15193 = vmatmul.mubr.msk.bf16.vlgmr.msra.gmra.mrb[16].mxu0 %vm420_vm3, %v19594_v26  ;;  %11956 = vmatpush1.bf16.msra.mxu1 %v11867_v22  ;;  %v11833_v15 = vpop.permute.xlu1 %11832 }
 0x3ea   : > { %12161 = vmatpush1.bf16.msra.mxu0 %v11897_v3  ;;  %v11835_v50 = vpop.permute.xlu0 %11834  ;;  %13329 = vrot.lane.b32.xlu0 %v16368_v19, %s16270_s20 }
 0x3eb   : > { %13331 = vrot.lane.b32.xlu1 %v17117_v52, %s16270_s20  ;;  %11987 = vmatprep.mubr.bf16.mxu1 %v21548_v8  ;;  %v11855_v7 = vsel %vm11838_vm10, %v11833_v15, %v11835_v50 }
 0x3ec   : > { %12192 = vmatprep.mubr.bf16.mxu0 %v21548_v8  ;;  %v11909_v62 = vsel %vm21536_vm1, %v11855_v7, 0 }
 0x3ed   : > { %v11837_v21 = vpop.permute.xlu1 %11836 }
 0x3ee   : > { %v11815_v24 = vpop.permute.xlu0 %11814  ;;  %v11856_v5 = vsel %vm11838_vm10, %v11835_v50, %v11837_v21  ;;  %13333 = vrot.lane.b32.xlu0 %v17125_v16, %s16270_s20 }
 0x3ef   : > { %v11845_v19 = vsel %vm11838_vm10, %v19585_v58, %v11815_v24  ;;  %v11846_v52 = vsel %vm11838_vm10, %v11815_v24, %v11817_v0  ;;  %13335 = vrot.lane.b32.xlu1 %v18481_v12, %s16270_s20  ;;  %15200 = vmatprep.subr.msk.bf16.mxu0 %vm21536_vm1, %v11856_v5 }
 0x3f0   : > { %v11879_v13 = vsel %vm21536_vm1, %v11845_v19, 0  ;;  %15187 = vmatmul.mubr.msk.bf16.vlgmr.msra.gmra.mrb[4].mxu1 %vm420_vm3, %v19594_v26  ;;  %15190 = vmatprep.subr.msk.bf16.mxu1 %vm21536_vm1, %v11846_v52 }
 0x3f1   : > { %15197 = vmatmul.mubr.msk.bf16.vlgmr.msra.gmra.mrb[0].mxu0 %vm420_vm3, %v19594_v26  ;;  %12038 = vmatpush1.bf16.msra.mxu1 %v11879_v13  ;;  %v12302_v16 = vpop.permute.xlu1 %12301 }
 0x3f2   : > { %12243 = vmatpush1.bf16.msra.mxu0 %v11909_v62  ;;  %v12304_v29 = vpop.permute.xlu0 %12303  ;;  %13337 = vrot.lane.b32.xlu0 %v18488_v56, %s16270_s20 }
 0x3f3   : > { %13339 = vrot.lane.b32.xlu1 %v18500_v11, %s16270_s20  ;;  %12069 = vmatprep.mubr.bf16.mxu1 %v21548_v8  ;;  %v12340_v12 = vsel %vm12339_vm11, %v12302_v16, %v12304_v29 }
 0x3f4   : > { %12274 = vmatprep.mubr.bf16.mxu0 %v21548_v8  ;;  %v12362_v45 = vsel %vm21536_vm1, %v12340_v12, 0 }
 0x3f5   : > { %v12306_v32 = vpop.permute.xlu1 %12305 }
 0x3f6   : > { %v11823_v61 = vpop.permute.xlu0 %11822  ;;  %v12341_v60 = vsel %vm12339_vm11, %v12304_v29, %v12306_v32 }
 0x3f7   : > { %v11849_v2 = vsel %vm11838_vm10, %v19617_v43, %v11823_v61  ;;  %v11850_v56 = vsel %vm11838_vm10, %v11823_v61, %v11825_v4  ;;  %15202 = vmatprep.subr.msk.bf16.mxu0 %vm21536_vm1, %v12341_v60 }
 0x3f8   : > { %v11891_v11 = vsel %vm21536_vm1, %v11849_v2, 0  ;;  %15191 = vmatmul.mubr.msk.bf16.vlgmr.msra.gmra.mrb[12].mxu1 %vm420_vm3, %v19594_v26  ;;  %15194 = vmatprep.subr.msk.bf16.mxu1 %vm21536_vm1, %v11850_v56  ;;  %v19788_v56 = vld [vmem:[%s21521_s2 + $0x64] sm:$0xf] }
 0x3f9   : > { %15201 = vmatmul.mubr.msk.bf16.vlgmr.msra.gmra.mrb[4].mxu0 %vm420_vm3, %v19594_v26  ;;  %12120 = vmatpush1.bf16.msra.mxu1 %v11891_v11  ;;  %v12310_v23 = vpop.permute.xlu1 %12309 }
 0x3fa   : > { %12416 = vmatpush1.bf16.msra.mxu0 %v12362_v45  ;;  %v12312_v17 = vpop.permute.xlu0 %12311  ;;  %12151 = vmatprep.mubr.bf16.mxu1 %v21548_v8 }
 0x3fb   : > { %12447 = vmatprep.mubr.bf16.mxu0 %v21548_v8  ;;  %v12344_v53 = vsel %vm12339_vm11, %v12310_v23, %v12312_v17 }
 0x3fc   : > { %v12374_v51 = vsel %vm21536_vm1, %v12344_v53, 0 }
 0x3fd   : > { %v12314_v42 = vpop.permute.xlu1 %12313 }
 0x3fe   : > { %v11831_v20 = vpop.permute.xlu0 %11830  ;;  %v12345_v55 = vsel %vm12339_vm11, %v12312_v17, %v12314_v42 }
 0x3ff   : > { %v11853_v57 = vsel %vm11838_vm10, %v19644_v14, %v11831_v20  ;;  %v11854_v41 = vsel %vm11838_vm10, %v11831_v20, %v11833_v15  ;;  %15206 = vmatprep.subr.msk.bf16.mxu0 %vm21536_vm1, %v12345_v55 }
 0x400   : > { %v11903_v25 = vsel %vm21536_vm1, %v11853_v57, 0  ;;  %15195 = vmatmul.mubr.msk.bf16.vlgmr.msra.gmra.mrb[20].mxu1 %vm420_vm3, %v19594_v26  ;;  %15198 = vmatprep.subr.msk.bf16.mxu1 %vm21536_vm1, %v11854_v41 }
 0x401   : > { %15203 = vmatmul.mubr.msk.bf16.vlgmr.msra.gmra.mrb[8].mxu0 %vm420_vm3, %v19712_v35  ;;  %12202 = vmatpush1.bf16.msra.mxu1 %v11903_v25  ;;  %v12318_v58 = vpop.permute.xlu1 %12317 }
 0x402   : > { %12498 = vmatpush1.bf16.msra.mxu0 %v12374_v51  ;;  %v12320_v9 = vpop.permute.xlu0 %12319  ;;  %12233 = vmatprep.mubr.bf16.mxu1 %v21548_v8 }
 0x403   : > { %12529 = vmatprep.mubr.bf16.mxu0 %v21548_v8  ;;  %v12348_v27 = vsel %vm12339_vm11, %v12318_v58, %v12320_v9 }
 0x404   : > { %v12386_v30 = vsel %vm21536_vm1, %v12348_v27, 0 }
 0x405   : > { %v12322_v28 = vpop.permute.xlu1 %12321 }
 0x406   : > { %v12308_v37 = vpop.permute.xlu0 %12307  ;;  %v12349_v54 = vsel %vm12339_vm11, %v12320_v9, %v12322_v28 }
 0x407   : > { %v12342_v0 = vsel %vm12339_vm11, %v12306_v32, %v12308_v37  ;;  %v12343_v59 = vsel %vm12339_vm11, %v12308_v37, %v12310_v23  ;;  %15210 = vmatprep.subr.msk.bf16.mxu0 %vm21536_vm1, %v12349_v54 }
 0x408   : > { %v12368_v33 = vsel %vm21536_vm1, %v12342_v0, 0  ;;  %15199 = vmatmul.mubr.msk.bf16.vlgmr.msra.gmra.mrb[28].mxu1 %vm420_vm3, %v19594_v26  ;;  %15204 = vmatprep.subr.msk.bf16.mxu1 %vm21536_vm1, %v12343_v59 }
 0x409   : > { %15207 = vmatmul.mubr.msk.bf16.vlgmr.msra.gmra.mrb[12].mxu0 %vm420_vm3, %v19712_v35  ;;  %12457 = vmatpush1.bf16.msra.mxu1 %v12368_v33  ;;  %v12326_v43 = vpop.permute.xlu1 %12325 }
 0x40a   : > { %12580 = vmatpush1.bf16.msra.mxu0 %v12386_v30  ;;  %v12328_v18 = vpop.permute.xlu0 %12327  ;;  %12488 = vmatprep.mubr.bf16.mxu1 %v21548_v8 }
 0x40b   : > { %12611 = vmatprep.mubr.bf16.mxu0 %v21548_v8  ;;  %v12352_v47 = vsel %vm12339_vm11, %v12326_v43, %v12328_v18 }
 0x40c   : > { %v12398_v26 = vsel %vm21536_vm1, %v12352_v47, 0 }
 0x40d   : > { %v12330_v34 = vpop.permute.xlu1 %12329 }
 0x40e   : > { %v12316_v36 = vpop.permute.xlu0 %12315  ;;  %v12353_v10 = vsel %vm12339_vm11, %v12328_v18, %v12330_v34 }
 0x40f   : > { %v12346_v48 = vsel %vm12339_vm11, %v12314_v42, %v12316_v36  ;;  %v12347_v4 = vsel %vm12339_vm11, %v12316_v36, %v12318_v58  ;;  %15214 = vmatprep.subr.msk.bf16.mxu0 %vm21536_vm1, %v12353_v10 }
 0x410   : > { %v12380_v49 = vsel %vm21536_vm1, %v12346_v48, 0  ;;  %15205 = vmatmul.mubr.msk.bf16.vlgmr.msra.gmra.mrb[4].mxu1 %vm420_vm3, %v19712_v35  ;;  %15208 = vmatprep.subr.msk.bf16.mxu1 %vm21536_vm1, %v12347_v4 }
 0x411   : > { %15211 = vmatmul.mubr.msk.bf16.vlgmr.msra.gmra.mrb[16].mxu0 %vm420_vm3, %v19712_v35  ;;  %12539 = vmatpush1.bf16.msra.mxu1 %v12380_v49  ;;  %v12334_v6 = vpop.permute.xlu1 %12333 }
 0x412   : > { %12662 = vmatpush1.bf16.msra.mxu0 %v12398_v26  ;;  %v12336_v14 = vpop.permute.xlu0 %12335  ;;  %12570 = vmatprep.mubr.bf16.mxu1 %v21548_v8 }
 0x413   : > { %12693 = vmatprep.mubr.bf16.mxu0 %v21548_v8  ;;  %v12356_v1 = vsel %vm12339_vm11, %v12334_v6, %v12336_v14 }
 0x414   : > { %v12410_v63 = vsel %vm21536_vm1, %v12356_v1, 0 }
 0x415   : > { %v12338_v44 = vpop.permute.xlu1 %12337 }
 0x416   : > { %v12324_v3 = vpop.permute.xlu0 %12323  ;;  %v12357_v38 = vsel %vm12339_vm11, %v12336_v14, %v12338_v44 }
 0x417   : > { %v12350_v22 = vsel %vm12339_vm11, %v12322_v28, %v12324_v3  ;;  %v12351_v15 = vsel %vm12339_vm11, %v12324_v3, %v12326_v43  ;;  %15218 = vmatprep.subr.msk.bf16.mxu0 %vm21536_vm1, %v12357_v38 }
 0x418   : > { %v12392_v50 = vsel %vm21536_vm1, %v12350_v22, 0  ;;  %15209 = vmatmul.mubr.msk.bf16.vlgmr.msra.gmra.mrb[12].mxu1 %vm420_vm3, %v19712_v35  ;;  %15212 = vmatprep.subr.msk.bf16.mxu1 %vm21536_vm1, %v12351_v15 }
 0x419   : > { %15215 = vmatmul.mubr.msk.bf16.vlgmr.msra.gmra.mrb[0].mxu0 %vm420_vm3, %v19712_v35  ;;  %12621 = vmatpush1.bf16.msra.mxu1 %v12392_v50  ;;  %v12803_v7 = vpop.permute.xlu1 %12802 }
 0x41a   : > { %12744 = vmatpush1.bf16.msra.mxu0 %v12410_v63  ;;  %v12805_v21 = vpop.permute.xlu0 %12804  ;;  %12652 = vmatprep.mubr.bf16.mxu1 %v21548_v8 }
 0x41b   : > { %12775 = vmatprep.mubr.bf16.mxu0 %v21548_v8  ;;  %v12841_v24 = vsel %vm12840_vm12, %v12803_v7, %v12805_v21 }
 0x41c   : > { %v12863_v52 = vsel %vm21536_vm1, %v12841_v24, 0 }
 0x41d   : > { %v12807_v5 = vpop.permute.xlu1 %12806 }
 0x41e   : > { %v12332_v62 = vpop.permute.xlu0 %12331  ;;  %v12842_v19 = vsel %vm12840_vm12, %v12805_v21, %v12807_v5 }
 0x41f   : > { %v12354_v13 = vsel %vm12339_vm11, %v12330_v34, %v12332_v62  ;;  %v12355_v16 = vsel %vm12339_vm11, %v12332_v62, %v12334_v6  ;;  %15220 = vmatprep.subr.msk.bf16.mxu0 %vm21536_vm1, %v12842_v19 }
 0x420   : > { %v12404_v29 = vsel %vm21536_vm1, %v12354_v13, 0  ;;  %15213 = vmatmul.mubr.msk.bf16.vlgmr.msra.gmra.mrb[20].mxu1 %vm420_vm3, %v19712_v35  ;;  %15216 = vmatprep.subr.msk.bf16.mxu1 %vm21536_vm1, %v12355_v16 }
 0x421   : > { %15219 = vmatmul.mubr.msk.bf16.vlgmr.msra.gmra.mrb[4].mxu0 %vm420_vm3, %v19712_v35  ;;  %12703 = vmatpush1.bf16.msra.mxu1 %v12404_v29  ;;  %v12811_v12 = vpop.permute.xlu1 %12810 }
 0x422   : > { %12917 = vmatpush1.bf16.msra.mxu0 %v12863_v52  ;;  %v12813_v32 = vpop.permute.xlu0 %12812  ;;  %12734 = vmatprep.mubr.bf16.mxu1 %v21548_v8  ;;  %v343_v52 = vld [vmem:[%s21521_s2 + $0x68] sm:$0xf] }
 0x423   : > { %12948 = vmatprep.mubr.bf16.mxu0 %v21548_v8  ;;  %v12845_v61 = vsel %vm12840_vm12, %v12811_v12, %v12813_v32 }
 0x424   : > { %v12875_v11 = vsel %vm21536_vm1, %v12845_v61, 0 }
 0x425   : > { %v12815_v60 = vpop.permute.xlu1 %12814 }
 0x426   : > { %v12809_v45 = vpop.permute.xlu0 %12808  ;;  %v12846_v2 = vsel %vm12840_vm12, %v12813_v32, %v12815_v60 }
 0x427   : > { %v12843_v23 = vsel %vm12840_vm12, %v12807_v5, %v12809_v45  ;;  %v12844_v17 = vsel %vm12840_vm12, %v12809_v45, %v12811_v12  ;;  %15224 = vmatprep.subr.msk.bf16.mxu0 %vm21536_vm1, %v12846_v2 }
 0x428   : > { %v12869_v53 = vsel %vm21536_vm1, %v12843_v23, 0  ;;  %15217 = vmatmul.mubr.msk.bf16.vlgmr.msra.gmra.mrb[28].mxu1 %vm420_vm3, %v19712_v35  ;;  %15222 = vmatprep.subr.msk.bf16.mxu1 %vm21536_vm1, %v12844_v17 }
 0x429   : > { %15221 = vmatmul.mubr.msk.bf16.vlgmr.msra.gmra.mrb[8].mxu0 %vm420_vm3, %v19788_v56  ;;  %12958 = vmatpush1.bf16.msra.mxu1 %v12869_v53  ;;  %v12819_v42 = vpop.permute.xlu1 %12818 }
 0x42a   : > { %12999 = vmatpush1.bf16.msra.mxu0 %v12875_v11  ;;  %v12821_v20 = vpop.permute.xlu0 %12820  ;;  %12989 = vmatprep.mubr.bf16.mxu1 %v21548_v8 }
 0x42b   : > { %13030 = vmatprep.mubr.bf16.mxu0 %v21548_v8  ;;  %v12849_v55 = vsel %vm12840_vm12, %v12819_v42, %v12821_v20 }
 0x42c   : > { %v12887_v35 = vsel %vm21536_vm1, %v12849_v55, 0 }
 0x42d   : > { %v12823_v51 = vpop.permute.xlu1 %12822 }
 0x42e   : > { %v12817_v57 = vpop.permute.xlu0 %12816  ;;  %v12850_v41 = vsel %vm12840_vm12, %v12821_v20, %v12823_v51 }
 0x42f   : > { %v12847_v25 = vsel %vm12840_vm12, %v12815_v60, %v12817_v57  ;;  %v12848_v58 = vsel %vm12840_vm12, %v12817_v57, %v12819_v42  ;;  %15228 = vmatprep.subr.msk.bf16.mxu0 %vm21536_vm1, %v12850_v41 }
 0x430   : > { %v12881_v9 = vsel %vm21536_vm1, %v12847_v25, 0  ;;  %15223 = vmatmul.mubr.msk.bf16.vlgmr.msra.gmra.mrb[4].mxu1 %vm420_vm3, %v19788_v56  ;;  %15226 = vmatprep.subr.msk.bf16.mxu1 %vm21536_vm1, %v12848_v58 }
 0x431   : > { %15225 = vmatmul.mubr.msk.bf16.vlgmr.msra.gmra.mrb[12].mxu0 %vm420_vm3, %v19788_v56  ;;  %13040 = vmatpush1.bf16.msra.mxu1 %v12881_v9  ;;  %v12827_v27 = vpop.permute.xlu1 %12826 }
 0x432   : > { %13081 = vmatpush1.bf16.msra.mxu0 %v12887_v35  ;;  %v12829_v28 = vpop.permute.xlu0 %12828  ;;  %13071 = vmatprep.mubr.bf16.mxu1 %v21548_v8 }
 0x433   : > { %13112 = vmatprep.mubr.bf16.mxu0 %v21548_v8  ;;  %v12853_v37 = vsel %vm12840_vm12, %v12827_v27, %v12829_v28 }
 0x434   : > { %v12899_v59 = vsel %vm21536_vm1, %v12853_v37, 0 }
 0x435   : > { %v12831_v54 = vpop.permute.xlu1 %12830 }
 0x436   : > { %v12825_v30 = vpop.permute.xlu0 %12824  ;;  %v12854_v0 = vsel %vm12840_vm12, %v12829_v28, %v12831_v54 }
 0x437   : > { %v12851_v33 = vsel %vm12840_vm12, %v12823_v51, %v12825_v30  ;;  %v12852_v43 = vsel %vm12840_vm12, %v12825_v30, %v12827_v27  ;;  %15232 = vmatprep.subr.msk.bf16.mxu0 %vm21536_vm1, %v12854_v0 }
 0x438   : > { %v12893_v18 = vsel %vm21536_vm1, %v12851_v33, 0  ;;  %15227 = vmatmul.mubr.msk.bf16.vlgmr.msra.gmra.mrb[12].mxu1 %vm420_vm3, %v19788_v56  ;;  %15230 = vmatprep.subr.msk.bf16.mxu1 %vm21536_vm1, %v12852_v43  ;;  %v21537_v43 = vlaneseq }
 0x439   : > { %15229 = vmatmul.mubr.msk.bf16.vlgmr.msra.gmra.mrb[16].mxu0 %vm420_vm3, %v19788_v56  ;;  %13122 = vmatpush1.bf16.msra.mxu1 %v12893_v18  ;;  %v12835_v47 = vpop.permute.xlu1 %12834 }
 0x43a   : > { %13163 = vmatpush1.bf16.msra.mxu0 %v12899_v59  ;;  %v12837_v34 = vpop.permute.xlu0 %12836  ;;  %13153 = vmatprep.mubr.bf16.mxu1 %v21548_v8  ;;  %v19907_v18 = vand.u32 127, %v21537_v43 }
 0x43b   : > { %13194 = vmatprep.mubr.bf16.mxu0 %v21548_v8  ;;  %v12857_v36 = vsel %vm12840_vm12, %v12835_v47, %v12837_v34 }
 0x43c   : > { %v12911_v4 = vsel %vm21536_vm1, %v12857_v36, 0  ;;  %v13806_v36 = vadd.s32 128, %v19907_v18 }
 0x43d   : > { %v12839_v10 = vpop.permute.xlu1 %12838 }
 0x43e   : > { %v12833_v26 = vpop.permute.xlu0 %12832  ;;  %v12858_v48 = vsel %vm12840_vm12, %v12837_v34, %v12839_v10  ;;  %v19910_v34 = vstv %s13824_s5 }
 0x43f   : > { %v12855_v49 = vsel %vm12840_vm12, %v12831_v54, %v12833_v26  ;;  %v12856_v6 = vsel %vm12840_vm12, %v12833_v26, %v12835_v47  ;;  %15236 = vmatprep.subr.msk.bf16.mxu0 %vm21536_vm1, %v12858_v48  ;;  %v13807_v47 = vadd.s32 256, %v19907_v18  ;;  %v13826_v26 = vadd.s32 %v19910_v34, %v19907_v18 }
 0x440   : > { %v12905_v14 = vsel %vm21536_vm1, %v12855_v49, 0  ;;  %15231 = vmatmul.mubr.msk.bf16.vlgmr.msra.gmra.mrb[20].mxu1 %vm420_vm3, %v19788_v56  ;;  %15234 = vmatprep.subr.msk.bf16.mxu1 %vm21536_vm1, %v12856_v6  ;;  %v13827_v48 = vadd.s32 %v19910_v34, %v13806_v36 }
 0x441   : > { %15233 = vmatmul.mubr.msk.bf16.vlgmr.msra.gmra.mrb[0].mxu0 %vm420_vm3, %v19788_v56  ;;  %13204 = vmatpush1.bf16.msra.mxu1 %v12905_v14  ;;  %v13304_v1 = vpop.permute.xlu1 %13303  ;;  %v13828_v10 = vadd.s32 %v19910_v34, %v13807_v47  ;;  %v13844_v49 = vcvt.s32.f32 %v13826_v26 }
 0x442   : > { %13245 = vmatpush1.bf16.msra.mxu0 %v12911_v4  ;;  %13235 = vmatprep.mubr.bf16.mxu1 %v21548_v8  ;;  %v13845_v14 = vcvt.s32.f32 %v13827_v48 }
 0x443   : > { %13276 = vmatprep.mubr.bf16.mxu0 %v21548_v8  ;;  %v13846_v4 = vcvt.s32.f32 %v13828_v10  ;;  %v13813_v10 = vadd.s32 1024, %v19907_v18 }
 0x444   : > { %v13306_v44 = vpop.permute.xlu0 %13305 }
 0x445   : > { %v13342_v3 = vsel %vm13341_vm13, %v13304_v1, %v13306_v44  ;;  %v13308_v38 = vpop.permute.xlu1 %13307  ;;  %v13864_v1 = vadd.f32 0.5, %v13846_v4 }
 0x446   : > { %v13343_v63 = vsel %vm13341_vm13, %v13306_v44, %v13308_v38  ;;  %v13364_v22 = vsel %vm21536_vm1, %v13342_v3, 0  ;;  %v13862_v44 = vadd.f32 0.5, %v13844_v49 }
 0x447   : > { %15238 = vmatprep.subr.msk.bf16.mxu0 %vm21536_vm1, %v13343_v63  ;;  %v13883_v63 = vmul.f32 0.000308642, %v13864_v1 }
 0x448   : > { %15235 = vmatmul.mubr.msk.bf16.vlgmr.msra.gmra.mrb[28].mxu1 %vm420_vm3, %v19788_v56  ;;  %v13310_v15 = vpop.permute.xlu0 %13309 }
 0x449   : > { %15237 = vmatmul.mubr.msk.bf16.vlgmr.msra.gmra.mrb[4].mxu0 %vm420_vm3, %v19788_v56  ;;  %v13344_v50 = vsel %vm13341_vm13, %v13308_v38, %v13310_v15  ;;  %v13312_v7 = vpop.permute.xlu1 %13311  ;;  %13490 = vmatprep.mubr.bf16.mxu1 %v21548_v8  ;;  %v13863_v38 = vadd.f32 0.5, %v13845_v14 }
 0x44a   : > { %13418 = vmatpush1.bf16.msra.mxu0 %v13364_v22  ;;  %v13370_v21 = vsel %vm21536_vm1, %v13344_v50, 0  ;;  %v13345_v24 = vsel %vm13341_vm13, %v13310_v15, %v13312_v7  ;;  %13449 = vmatprep.mubr.bf16.mxu0 %v21548_v8  ;;  %v13881_v22 = vmul.f32 0.000308642, %v13862_v44  ;;  %v13815_v44 = vadd.s32 1280, %v19907_v18 }
 0x44b   : > { %15240 = vmatprep.subr.msk.bf16.mxu1 %vm21536_vm1, %v13345_v24  ;;  %v13882_v50 = vmul.f32 0.000308642, %v13863_v38  ;;  %v13814_v38 = vadd.s32 1152, %v19907_v18 }
 0x44c   : > { %13459 = vmatpush1.bf16.msra.mxu1 %v13370_v21  ;;  %v13314_v5 = vpop.permute.xlu0 %13313  ;;  %v13811_v21 = vadd.s32 768, %v19907_v18  ;;  %v19922_v24 = vfloor.f32 %v13881_v22 }
 0x44d   : > { %v13346_v62 = vsel %vm13341_vm13, %v13312_v7, %v13314_v5  ;;  %v13316_v19 = vpop.permute.xlu1 %13315  ;;  %v19919_v7 = vfloor.f32 %v13883_v63 }
 0x44e   : > { %v13347_v13 = vsel %vm13341_vm13, %v13314_v5, %v13316_v19  ;;  %v13376_v16 = vsel %vm21536_vm1, %v13346_v62, 0  ;;  %v19924_v62 = vfloor.f32 %v13882_v50  ;;  %vm14135_vm15 = vcmp.ge.f32.partialorder %v19922_v24, 1.0 }
 0x44f   : > { %15242 = vmatprep.subr.msk.bf16.mxu0 %vm21536_vm1, %v13347_v13  ;;  %v13919_v13 = vmul.f32 3240.0, %v19919_v7  ;;  %vm14155_vm14 = vcmp.le.f32.partialorder %v19919_v7, 2.0  ;;  %vm14153_vm0 = vcmp.le.f32.partialorder %v19922_v24, 2.0 }
 0x450   : > { %15241 = vmatmul.mubr.msk.bf16.vlgmr.msra.gmra.mrb[4].mxu1 %vm420_vm3, %v343_v52  ;;  %v13318_v29 = vpop.permute.xlu0 %13317  ;;  %vm14136_vm6 = vcmp.ge.f32.partialorder %v19924_v62, 1.0  ;;  %vm14154_vm8 = vcmp.le.f32.partialorder %v19924_v62, 2.0  ;;  %vm20104_vm12 = vmand %vm14135_vm15, %vm14153_vm0 }
 0x451   : > { %15239 = vmatmul.mubr.msk.bf16.vlgmr.msra.gmra.mrb[8].mxu0 %vm420_vm3, %v343_v52  ;;  %v13348_v12 = vsel %vm13341_vm13, %v13316_v19, %v13318_v29  ;;  %v13320_v32 = vpop.permute.xlu1 %13319  ;;  %13572 = vmatprep.mubr.bf16.mxu1 %v21548_v8  ;;  %v13809_v19 = vadd.s32 512, %v19907_v18 }
 0x452   : > { %13500 = vmatpush1.bf16.msra.mxu0 %v13376_v16  ;;  %v13382_v61 = vsel %vm21536_vm1, %v13348_v12, 0  ;;  %v13349_v60 = vsel %vm13341_vm13, %v13318_v29, %v13320_v32  ;;  %13531 = vmatprep.mubr.bf16.mxu0 %v21548_v8  ;;  %v13832_v16 = vadd.s32 %v19910_v34, %v13811_v21  ;;  %v13917_v29 = vmul.f32 3240.0, %v19922_v24 }
 0x453   : > { %15244 = vmatprep.subr.msk.bf16.mxu1 %vm21536_vm1, %v13349_v60  ;;  %v13830_v60 = vadd.s32 %v19910_v34, %v13809_v19 }
 0x454   : > { %13541 = vmatpush1.bf16.msra.mxu1 %v13382_v61  ;;  %v13322_v45 = vpop.permute.xlu0 %13321  ;;  %v13918_v61 = vmul.f32 3240.0, %v19924_v62 }
 0x455   : > { %v13350_v2 = vsel %vm13341_vm13, %v13320_v32, %v13322_v45  ;;  %v13324_v56 = vpop.permute.xlu1 %13323  ;;  %v13810_v32 = vadd.s32 640, %v19907_v18 }
 0x456   : > { %v13351_v11 = vsel %vm13341_vm13, %v13322_v45, %v13324_v56  ;;  %v13388_v23 = vsel %vm21536_vm1, %v13350_v2, 0  ;;  %v13937_v2 = vsub.f32 %v13846_v4, %v13919_v13  ;;  %v19972_v13 = vadd.s32 %v19910_v34, %v13815_v44 }
 0x457   : > { %15246 = vmatprep.subr.msk.bf16.mxu0 %vm21536_vm1, %v13351_v11  ;;  %v13935_v11 = vsub.f32 %v13844_v49, %v13917_v29  ;;  %v19976_v29 = vadd.s32 %v19910_v34, %v13814_v38 }
 0x458   : > { %15245 = vmatmul.mubr.msk.bf16.vlgmr.msra.gmra.mrb[12].mxu1 %vm420_vm3, %v343_v52  ;;  %v13326_v17 = vpop.permute.xlu0 %13325 }
 0x459   : > { %15243 = vmatmul.mubr.msk.bf16.vlgmr.msra.gmra.mrb[12].mxu0 %vm420_vm3, %v343_v52  ;;  %v13352_v53 = vsel %vm13341_vm13, %v13324_v56, %v13326_v17  ;;  %v13328_v42 = vpop.permute.xlu1 %13327  ;;  %13654 = vmatprep.mubr.bf16.mxu1 %v21548_v8  ;;  %v13850_v56 = vcvt.s32.f32 %v13832_v16 }
 0x45a   : > { %13582 = vmatpush1.bf16.msra.mxu0 %v13388_v23  ;;  %v13394_v20 = vsel %vm21536_vm1, %v13352_v53, 0  ;;  %v13353_v55 = vsel %vm13341_vm13, %v13326_v17, %v13328_v42  ;;  %13613 = vmatprep.mubr.bf16.mxu0 %v21548_v8  ;;  %v13831_v17 = vadd.s32 %v19910_v34, %v13810_v32  ;;  %v13936_v53 = vsub.f32 %v13845_v14, %v13918_v61 }
 0x45b   : > { %15248 = vmatprep.subr.msk.bf16.mxu1 %vm21536_vm1, %v13353_v55  ;;  %v13955_v55 = vadd.f32 0.5, %v13937_v2 }
 0x45c   : > { %13623 = vmatpush1.bf16.msra.mxu1 %v13394_v20  ;;  %v13330_v51 = vpop.permute.xlu0 %13329 }
 0x45d   : > { %v13354_v57 = vsel %vm13341_vm13, %v13328_v42, %v13330_v51  ;;  %v13332_v41 = vpop.permute.xlu1 %13331  ;;  %v13848_v42 = vcvt.s32.f32 %v13830_v60 }
 0x45e   : > { %v13355_v35 = vsel %vm13341_vm13, %v13330_v51, %v13332_v41  ;;  %v13400_v25 = vsel %vm21536_vm1, %v13354_v57, 0  ;;  %v13868_v51 = vadd.f32 0.5, %v13850_v56  ;;  %v13953_v57 = vadd.f32 0.5, %v13935_v11 }
 0x45f   : > { %15250 = vmatprep.subr.msk.bf16.mxu0 %vm21536_vm1, %v13355_v35  ;;  %v13849_v35 = vcvt.s32.f32 %v13831_v17 }
 0x460   : > { %15249 = vmatmul.mubr.msk.bf16.vlgmr.msra.gmra.mrb[20].mxu1 %vm420_vm3, %v343_v52  ;;  %v13334_v58 = vpop.permute.xlu0 %13333 }
 0x461   : > { %15247 = vmatmul.mubr.msk.bf16.vlgmr.msra.gmra.mrb[16].mxu0 %vm420_vm3, %v343_v52  ;;  %v13356_v9 = vsel %vm13341_vm13, %v13332_v41, %v13334_v58  ;;  %v13336_v27 = vpop.permute.xlu1 %13335  ;;  %13736 = vmatprep.mubr.bf16.mxu1 %v21548_v8 }
 0x462   : > { %13664 = vmatpush1.bf16.msra.mxu0 %v13400_v25  ;;  %v13406_v28 = vsel %vm21536_vm1, %v13356_v9, 0  ;;  %v13357_v37 = vsel %vm13341_vm13, %v13334_v58, %v13336_v27  ;;  %13695 = vmatprep.mubr.bf16.mxu0 %v21548_v8  ;;  %v13954_v25 = vadd.f32 0.5, %v13936_v53  ;;  %v13866_v58 = vadd.f32 0.5, %v13848_v42 }
 0x463   : > { %15252 = vmatprep.subr.msk.bf16.mxu1 %vm21536_vm1, %v13357_v37  ;;  %v13972_v37 = vmul.f32 0.0030864198, %v13953_v57  ;;  %v13853_v57 = vcvt.s32.f32 %v19976_v29 }
 0x464   : > { %13705 = vmatpush1.bf16.msra.mxu1 %v13406_v28  ;;  %v13338_v54 = vpop.permute.xlu0 %13337  ;;  %v13887_v28 = vmul.f32 0.000308642, %v13868_v51  ;;  %v13816_v51 = vadd.s32 1408, %v19907_v18 }
 0x465   : > { %v13358_v30 = vsel %vm13341_vm13, %v13336_v27, %v13338_v54  ;;  %v13340_v0 = vpop.permute.xlu1 %13339  ;;  %v13974_v27 = vmul.f32 0.0030864198, %v13955_v55  ;;  %v19944_v26 = vfloor.f32 %v13972_v37  ;;  %v13854_v55 = vcvt.s32.f32 %v19972_v13 }
 0x466   : > { %v13359_v59 = vsel %vm13341_vm13, %v13338_v54, %v13340_v0  ;;  %v13412_v33 = vsel %vm21536_vm1, %v13358_v30, 0  ;;  %v13867_v30 = vadd.f32 0.5, %v13849_v35  ;;  %v13973_v0 = vmul.f32 0.0030864198, %v13954_v25 }
 0x467   : > { %15254 = vmatprep.subr.msk.bf16.mxu0 %vm21536_vm1, %v13359_v59  ;;  %v13885_v59 = vmul.f32 0.000308642, %v13866_v58  ;;  %v19939_v47 = vfloor.f32 %v13974_v27  ;;  %v19941_v36 = vfloor.f32 %v13887_v28  ;;  %v14008_v63 = vmul.f32 324.0, %v19944_v26  ;;  %vm20133_vm1 = vmand %vm14136_vm6, %vm14154_vm8 }
 0x468   : > { %15253 = vmatmul.mubr.msk.bf16.vlgmr.msra.gmra.mrb[28].mxu1 %vm420_vm3, %v343_v52  ;;  %v13886_v48 = vmul.f32 0.000308642, %v13867_v30  ;;  %v19946_v4 = vfloor.f32 %v13973_v0  ;;  %v13872_v37 = vadd.f32 0.5, %v13854_v55  ;;  %vm14189_vm2 = vcmp.ge.f32.partialorder %v19944_v26, 1.0 }
 0x469   : > { %15251 = vmatmul.mubr.msk.bf16.vlgmr.msra.gmra.mrb[0].mxu0 %vm420_vm3, %v343_v52  ;;  %v19948_v49 = vfloor.f32 %v13885_v59  ;;  %v14010_v14 = vmul.f32 324.0, %v19939_v47  ;;  %v13923_v1 = vmul.f32 3240.0, %v19941_v36  ;;  %v19978_v32 = vsub.f32 %v13935_v11, %v14008_v63 }
 0x46a   : > { %13746 = vmatpush1.bf16.msra.mxu0 %v13412_v33  ;;  %13777 = vmatprep.mubr.bf16.mxu0 %v21548_v8  ;;  %v13808_v8 = vadd.s32 384, %v19907_v18  ;;  %v14009_v50 = vmul.f32 324.0, %v19946_v4  ;;  %vm14191_vm4 = vcmp.ge.f32.partialorder %v19939_v47, 1.0  ;;  %vm14225_vm5 = vcmp.le.f32.partialorder %v19944_v26, 8.0 }
 0x46b   : > { %v13921_v21 = vmul.f32 3240.0, %v19948_v49  ;;  %v19967_v19 = vsub.f32 %v13937_v2, %v14010_v14  ;;  %vm14227_vm7 = vcmp.le.f32.partialorder %v19939_v47, 8.0  ;;  %vm14190_vm9 = vcmp.ge.f32.partialorder %v19946_v4, 1.0 }
 0x46c   : > { %v13829_v6 = vadd.s32 %v19910_v34, %v13808_v8  ;;  %vm14226_vm10 = vcmp.le.f32.partialorder %v19946_v4, 8.0  ;;  %vm14141_vm8 = vcmp.ge.f32.partialorder %v19941_v36, 1.0  ;;  %vm20171_vm0 = vmand %vm20133_vm1, %vm14190_vm9 }
 0x46d   : > { %v19984_v2 = vsub.f32 %v13848_v42, %v13921_v21 }
 0x46e   : > { %v13847_v3 = vcvt.s32.f32 %v13829_v6 }
 0x46f   : > { %v13957_v58 = vadd.f32 0.5, %v19984_v2 }
 0x470   : > { %v13865_v15 = vadd.f32 0.5, %v13847_v3 }
 0x471   : > { %15255 = vmatmul.mubr.msk.bf16.vlgmr.msra.gmra.mrb[4].mxu0 %vm420_vm3, %v343_v52  ;;  %v13812_v52 = vadd.s32 896, %v19907_v18  ;;  %vm14137_vm3 = vcmp.ge.f32.partialorder %v19919_v7, 1.0 }
 0x472   : > { %v13884_v5 = vmul.f32 0.000308642, %v13865_v15  ;;  %v19962_v15 = vfloor.f32 %v13886_v48  ;;  %vm20119_vm11 = vmand %vm14137_vm3, %vm14155_vm14 }
 0x473   : > { %v13833_v45 = vadd.s32 %v19910_v34, %v13812_v52  ;;  %v19969_v52 = vsub.f32 %v13850_v56, %v13923_v1  ;;  %v13891_v1 = vmul.f32 0.000308642, %v13872_v37  ;;  %vm20145_vm14 = vmand %vm20104_vm12, %vm14189_vm2  ;;  %vm14159_vm12 = vcmp.le.f32.partialorder %v19941_v36, 2.0 }
 0x474   : > { %v19931_v12 = vfloor.f32 %v13884_v5  ;;  %v13922_v60 = vmul.f32 3240.0, %v19962_v15  ;;  %vm20158_vm6 = vmand %vm20119_vm11, %vm14191_vm4 }
 0x475   : > { %v13851_v20 = vcvt.s32.f32 %v13833_v45  ;;  %v19982_v45 = vsub.f32 %v13936_v53, %v14009_v50  ;;  %v13959_v17 = vadd.f32 0.5, %v19969_v52  ;;  %v14044_v53 = vadd.f32 0.5, %v19978_v32  ;;  %vm20187_vm11 = vmand %vm20145_vm14, %vm14225_vm5 }
 0x476   : > { %v13920_v23 = vmul.f32 3240.0, %v19931_v12  ;;  %v19998_v42 = vsub.f32 %v13849_v35, %v13922_v60  ;;  %vm14156_vm13 = vcmp.le.f32.partialorder %v19931_v12, 2.0  ;;  %vm20202_vm5 = vmand %vm20158_vm6, %vm14227_vm7  ;;  %vm21588_vm9 = vcmp.ge.f32.partialorder %v19931_v12, 1.0 }
 0x477   : > { %v13869_v9 = vadd.f32 0.5, %v13851_v20  ;;  %v13978_v28 = vmul.f32 0.0030864198, %v13959_v17  ;;  %v14063_v35 = vmul.f32 0.055555556, %v14044_v53  ;;  %vm20216_vm7 = vmand %vm20171_vm0, %vm14226_vm10  ;;  %vm21591_vm10 = vcmp.le.f32.partialorder %v19948_v49, 2.0 }
 0x478   : > { %v13938_v41 = vsub.f32 %v13847_v3, %v13920_v23  ;;  %v19956_v3 = vadd.s32 %v19910_v34, %v13813_v10  ;;  %v14046_v23 = vadd.f32 0.5, %v19967_v19  ;;  %v13958_v59 = vadd.f32 0.5, %v19998_v42  ;;  %vm20229_vm14 = vmand %vm21588_vm9, %vm14156_vm13 }
 0x479   : > { %v13888_v33 = vmul.f32 0.000308642, %v13869_v9  ;;  %v13976_v10 = vmul.f32 0.0030864198, %v13957_v58  ;;  %v20014_v14 = vfloor.f32 %v13978_v28  ;;  %v20019_v50 = vfloor.f32 %v14063_v35  ;;  %vm20263_vm9 = vmand %vm14141_vm8, %vm14159_vm12 }
 0x47a   : > { %v13956_v54 = vadd.f32 0.5, %v13938_v41  ;;  %v13852_v16 = vcvt.s32.f32 %v19956_v3  ;;  %v14065_v27 = vmul.f32 0.055555556, %v14046_v23  ;;  %vm21592_vm0 = vcmp.ge.f32.partialorder %v19948_v49, 1.0 }
 0x47b   : > { %v19950_v6 = vfloor.f32 %v13888_v33  ;;  %v20024_v23 = vfloor.f32 %v13976_v10  ;;  %v14014_v53 = vmul.f32 324.0, %v20014_v14  ;;  %v14099_v28 = vmul.f32 18.0, %v20019_v50  ;;  %vm20246_vm1 = vmand %vm21592_vm0, %vm21591_vm10 }
 0x47c   : > { %v13975_v8 = vmul.f32 0.0030864198, %v13956_v54  ;;  %v13870_v11 = vadd.f32 0.5, %v13852_v16  ;;  %v20006_v54 = vadd.s32 %v19910_v34, %v13816_v51  ;;  %v20012_v48 = vfloor.f32 %v14065_v27 }
 0x47d   : > { %v13924_v5 = vmul.f32 3240.0, %v19950_v6  ;;  %v13819_v51 = vadd.s32 1792, %v19907_v18  ;;  %vm14195_vm3 = vcmp.ge.f32.partialorder %v20014_v14, 1.0  ;;  %vm14261_vm15 = vcmp.ge.f32.partialorder %v20019_v50, 1.0 }
 0x47e   : > { %v19960_v22 = vfloor.f32 %v13975_v8  ;;  %v13889_v30 = vmul.f32 0.000308642, %v13870_v11  ;;  %v13855_v44 = vcvt.s32.f32 %v20006_v54  ;;  %v14101_v11 = vmul.f32 18.0, %v20012_v48 }
 0x47f   : > { %v19986_v56 = vsub.f32 %v13851_v20, %v13924_v5  ;;  %v14045_v20 = vadd.f32 0.5, %v19982_v45  ;;  %v13977_v5 = vmul.f32 0.0030864198, %v13958_v59  ;;  %v20052_v35 = vadd.s32 %v19910_v34, %v13819_v51 }
 0x480   : > { %v14011_v61 = vmul.f32 324.0, %v19960_v22  ;;  %v20017_v38 = vfloor.f32 %v13889_v30  ;;  %v13873_v58 = vadd.f32 0.5, %v13855_v44  ;;  %v14012_v59 = vmul.f32 324.0, %v20024_v23 }
 0x481   : > { %v13960_v9 = vadd.f32 0.5, %v19986_v56  ;;  %v14064_v33 = vmul.f32 0.055555556, %v14045_v20  ;;  %v20031_v20 = vfloor.f32 %v13891_v1  ;;  %v20077_v3 = vfloor.f32 %v13977_v5 }
 0x482   : > { %v19996_v25 = vsub.f32 %v13938_v41, %v14011_v61  ;;  %v13871_v41 = vadd.f32 0.5, %v13853_v57  ;;  %v13817_v61 = vadd.s32 1536, %v19907_v18  ;;  %v13892_v10 = vmul.f32 0.000308642, %v13873_v58 }
 0x483   : > { %v13979_v8 = vmul.f32 0.0030864198, %v13960_v9  ;;  %v20022_v60 = vfloor.f32 %v14064_v33  ;;  %v13925_v9 = vmul.f32 3240.0, %v20017_v38  ;;  %v13927_v33 = vmul.f32 3240.0, %v20031_v20 }
 0x484   : > { %v14047_v0 = vadd.f32 0.5, %v19996_v25  ;;  %v13890_v63 = vmul.f32 0.000308642, %v13871_v41  ;;  %v20045_v30 = vadd.s32 %v19910_v34, %v13817_v61  ;;  %v14013_v29 = vmul.f32 324.0, %v20077_v3 }
 0x485   : > { %v20026_v17 = vfloor.f32 %v13979_v8  ;;  %v14100_v41 = vmul.f32 18.0, %v20022_v60  ;;  %v20063_v8 = vsub.f32 %v13852_v16, %v13925_v9  ;;  %v21539_v16 = vcvt.s32.f32 %v20052_v35 }
 0x486   : > { %v14066_v21 = vmul.f32 0.055555556, %v14047_v0  ;;  %v20038_v27 = vfloor.f32 %v13890_v63  ;;  %v20055_v0 = vsub.f32 %v19967_v19, %v14101_v11  ;;  %v20067_v63 = vsub.f32 %v19978_v32, %v14099_v28 }
 0x487   : > { %v20074_v61 = vsub.f32 %v19982_v45, %v14100_v41  ;;  %v20083_v32 = vsub.f32 %v19984_v2, %v14012_v59  ;;  %v20087_v51 = vsub.f32 %v13854_v55, %v13927_v33  ;;  %v20089_v11 = vfloor.f32 %v13892_v10 }
 0x488   : > { %v20042_v37 = vfloor.f32 %v14066_v21  ;;  %v13926_v1 = vmul.f32 3240.0, %v20038_v27  ;;  %v21540_v21 = vcvt.s32.f32 %v20045_v30  ;;  %v20092_v45 = vsub.f32 %v19969_v52, %v14014_v53 }
 0x489   : > { %v13961_v5 = vadd.f32 0.5, %v20063_v8  ;;  %v13818_v9 = vadd.s32 1664, %v19907_v18  ;;  %v13876_v55 = vadd.f32 0.5, %v21539_v16  ;;  %v13963_v53 = vadd.f32 0.5, %v20087_v51 }
 0x48a   : > { %v14102_v19 = vmul.f32 18.0, %v20042_v37  ;;  %v20097_v58 = vsub.f32 %v13853_v57, %v13926_v1  ;;  %v13874_v52 = vadd.f32 0.5, %v21540_v21  ;;  %v13820_v57 = vadd.s32 1920, %v19907_v18 }
 0x48b   : > { %v13928_v28 = vmul.f32 3240.0, %v20089_v11  ;;  %v14050_v62 = vadd.f32 0.5, %v20092_v45  ;;  %v13980_v59 = vmul.f32 0.0030864198, %v13961_v5  ;;  %v20152_v10 = vadd.s32 %v19910_v34, %v13818_v9 }
 0x48c   : > { %v20109_v2 = vsub.f32 %v19996_v25, %v14102_v19  ;;  %v14048_v25 = vadd.f32 0.5, %v20083_v32  ;;  %v13962_v33 = vadd.f32 0.5, %v20097_v58  ;;  %vm14228_vm2 = vcmp.le.f32.partialorder %v19960_v22, 8.0 }
 0x48d   : > { %v13893_v19 = vmul.f32 0.000308642, %v13874_v52  ;;  %vm14229_vm4 = vcmp.le.f32.partialorder %v20024_v23, 8.0  ;;  %v20177_v9 = vsub.f32 %v19998_v42, %v14013_v29  ;;  %v14015_v13 = vmul.f32 324.0, %v20026_v17 }
 0x48e   : > { %v13895_v24 = vmul.f32 0.000308642, %v13876_v55  ;;  %v20181_v52 = vadd.s32 %v19910_v34, %v13820_v57  ;;  %v14067_v43 = vmul.f32 0.055555556, %v14048_v25  ;;  %v13982_v42 = vmul.f32 0.0030864198, %v13963_v53 }
 0x48f   : > { %v20195_v29 = vsub.f32 %v13855_v44, %v13928_v28  ;;  %v13821_v55 = vadd.s32 2048, %v19907_v18  ;;  %v14069_v57 = vmul.f32 0.055555556, %v14050_v62  ;;  %v20209_v54 = vfloor.f32 %v13980_v59 }
 0x490   : > { %v13981_v44 = vmul.f32 0.0030864198, %v13962_v33  ;;  %v21538_v25 = vcvt.s32.f32 %v20152_v10  ;;  %v20222_v53 = vfloor.f32 %v13893_v19  ;;  %v13822_v28 = vadd.s32 2176, %v19907_v18 }
 0x491   : > { %v14049_v41 = vadd.f32 0.5, %v20177_v9  ;;  %v20235_v62 = vsub.f32 %v19986_v56, %v14015_v13  ;;  %v20237_v59 = vfloor.f32 %v13895_v24  ;;  %v21541_v33 = vcvt.s32.f32 %v20181_v52 }
 0x492   : > { %v20240_v1 = vfloor.f32 %v14067_v43  ;;  %v20251_v12 = vfloor.f32 %v13982_v42  ;;  %v13964_v56 = vadd.f32 0.5, %v20195_v29  ;;  %v20255_v19 = vadd.s32 %v19910_v34, %v13821_v55 }
 0x493   : > { %v20257_v5 = vfloor.f32 %v14069_v57  ;;  %v14016_v49 = vmul.f32 324.0, %v20209_v54  ;;  %v20268_v13 = vfloor.f32 %v13981_v44  ;;  %v13875_v24 = vadd.f32 0.5, %v21538_v25 }
 0x494   : > { %vm21597_vm10 = vcmp.ge.f32.partialorder %v19960_v22, 1.0  ;;  %vm14160_vm8 = vcmp.le.f32.partialorder %v19950_v6, 2.0  ;;  %v13929_v36 = vmul.f32 3240.0, %v20222_v53  ;;  %v20284_v55 = vadd.s32 %v19910_v34, %v13822_v28 }
 0x495   : > { %vm20276_vm0 = vmand %vm20229_vm14, %vm21597_vm10  ;;  %vm21600_vm13 = vcmp.ge.f32.partialorder %v20024_v23, 1.0  ;;  %v14068_v44 = vmul.f32 0.055555556, %v14049_v41  ;;  %v14051_v4 = vadd.f32 0.5, %v20235_v62  ;;  %v13931_v25 = vmul.f32 3240.0, %v20237_v59 }
 0x496   : > { %vm20290_vm6 = vmand %vm20246_vm1, %vm21600_vm13  ;;  %v13877_v16 = vadd.f32 0.5, %v21541_v33  ;;  %v14103_v34 = vmul.f32 18.0, %v20240_v1  ;;  %v14018_v41 = vmul.f32 324.0, %v20251_v12  ;;  %v13983_v18 = vmul.f32 0.0030864198, %v13964_v56 }
 0x497   : > { %vm20304_vm1 = vmand %vm20263_vm9, %vm14195_vm3  ;;  %v13860_v21 = vcvt.s32.f32 %v20255_v19  ;;  %v14105_v43 = vmul.f32 18.0, %v20257_v5  ;;  %v20321_v31 = vsub.f32 %v20063_v8, %v14016_v49  ;;  %v14017_v40 = vmul.f32 324.0, %v20268_v13 }
 0x498   : > { %vm20315_vm10 = vmand %vm20276_vm0, %vm14228_vm2  ;;  %v13894_v39 = vmul.f32 0.000308642, %v13875_v24  ;;  %vm14265_vm0 = vcmp.ge.f32.partialorder %v20240_v1, 1.0  ;;  %vm14267_vm13 = vcmp.ge.f32.partialorder %v20257_v5, 1.0  ;;  %v21611_v7 = vcvt.s32.f32 %v20045_v30 }
 0x499   : > { %vm20328_vm3 = vmand %vm20187_vm11, %vm14261_vm15  ;;  %v13861_v49 = vcvt.s32.f32 %v20284_v55  ;;  %vm21612_vm15 = vcmp.ge.f32.partialorder %v20012_v48, 1.0  ;;  %v20365_v24 = vfloor.f32 %v14068_v44  ;;  %v14070_v42 = vmul.f32 0.055555556, %v14051_v4 }
 0x49a   : > { %vm20337_vm9 = vmand %vm20290_vm6, %vm14229_vm4  ;;  %v20345_v56 = vsub.f32 %v21611_v7, %v13929_v36  ;;  %vm21615_vm6 = vcmp.le.f32.partialorder %v20014_v14, 8.0  ;;  %v21618_v36 = vcvt.s32.f32 %v20052_v35  ;;  %v13896_v57 = vmul.f32 0.000308642, %v13877_v16 }
 0x49b   : > { %vm20352_vm11 = vmand %vm20202_vm5, %vm21612_vm15  ;;  %vm21619_vm5 = vcmp.ge.f32.partialorder %v20022_v60, 1.0  ;;  %v20390_v35 = vsub.f32 %v20083_v32, %v14103_v34  ;;  %v20403_v47 = vfloor.f32 %v13983_v18  ;;  %v13878_v33 = vadd.f32 0.5, %v13860_v21 }
 0x49c   : > { %vm20361_vm2 = vmand %vm20304_vm1, %vm21615_vm6  ;;  %v20369_v26 = vsub.f32 %v21618_v36, %v13931_v25  ;;  %vm21622_vm6 = vcmp.ge.f32.partialorder %v20042_v37, 1.0  ;;  %v20401_v25 = vsub.f32 %v20087_v51, %v14018_v41  ;;  %v14052_v4 = vadd.f32 0.5, %v20321_v31 }
 0x49d   : > { %vm20375_vm15 = vmand %vm20216_vm7, %vm21619_vm5  ;;  %vm21625_vm7 = vcmp.le.f32.partialorder %v19962_v15, 2.0  ;;  %vm21626_vm5 = vcmp.ge.f32.partialorder %v19962_v15, 1.0  ;;  %v20417_v15 = vsub.f32 %v20092_v45, %v14105_v43  ;;  %v20430_v34 = vsub.f32 %v20097_v58, %v14017_v40 }
 0x49e   : > { %vm20384_vm4 = vmand %vm20315_vm10, %vm21622_vm6  ;;  %v20432_v28 = vfloor.f32 %v13894_v39  ;;  %v21634_v45 = vmov 0  ;;  %v13879_v40 = vadd.f32 0.5, %v13861_v49  ;;  %v14104_v39 = vmul.f32 18.0, %v20365_v24 }
 0x49f   : > { %vm20396_vm12 = vmand %vm21626_vm5, %vm21625_vm7  ;;  %vm21631_vm5 = vcmp.ge.f32.partialorder %v19950_v6, 1.0  ;;  %v13965_v6 = vadd.f32 0.5, %v20345_v56  ;;  %v14088_v58 = vfloor.f32 %v14070_v42  ;;  %v13967_v41 = vadd.f32 0.5, %v20369_v26 }
 0x4a0   : > { %vm20411_vm10 = vmand %vm20337_vm9, %vm14265_vm0  ;;  %vm14161_vm0 = vcmp.le.f32.partialorder %v20017_v38, 2.0  ;;  %v20453_v18 = vfloor.f32 %v13896_v57  ;;  %v14054_v43 = vadd.f32 0.5, %v20401_v25  ;;  %v14019_v8 = vmul.f32 324.0, %v20403_v47 }
 0x4a1   : > { %vm20424_vm14 = vmand %vm21631_vm5, %vm14160_vm8  ;;  %vm14143_vm8 = vcmp.ge.f32.partialorder %v20017_v38, 1.0  ;;  %vm21636_vm5 = vcmp.ge.f32.partialorder %v20077_v3, 1.0  ;;  %v13897_v7 = vmul.f32 0.000308642, %v13878_v33  ;;  %v14071_v30 = vmul.f32 0.055555556, %v14052_v4 }
 0x4a2   : > { %vm20438_vm9 = vmand %vm20361_vm2, %vm14267_vm13  ;;  %vm21637_vm2 = vcmp.ge.f32.partialorder %v20026_v17, 1.0  ;;  %v14053_v42 = vadd.f32 0.5, %v20430_v34  ;;  %v13930_v36 = vmul.f32 3240.0, %v20432_v28  ;;  %vm21638_vm1 = vcmp.le.f32.partialorder %v20077_v3, 8.0 }
 0x4a3   : > { %v21635_v45 = vsel %vm20438_vm9, 4294967295, %v21634_v45  ;;  %vm14212_vm7 = vmand %vm20396_vm12, %vm21636_vm5  ;;  %vm14197_vm5 = vcmp.ge.f32.partialorder %v20209_v54, 1.0  ;;  %v13984_v16 = vmul.f32 0.0030864198, %v13965_v6  ;;  %v13898_v33 = vmul.f32 0.000308642, %v13879_v40 }
 0x4a4   : > { %vm14214_vm6 = vmand %vm20424_vm14, %vm21637_vm2  ;;  %vm14268_vm2 = vcmp.ge.f32.partialorder %v14088_v58, 1.0  ;;  %vm21641_vm9 = vcmp.le.f32.partialorder %v20026_v17, 8.0  ;;  %v13986_v51 = vmul.f32 0.0030864198, %v13967_v41  ;;  %v13932_v3 = vmul.f32 3240.0, %v20453_v18 }
 0x4a5   : > { %vm14179_vm12 = vmand %vm14143_vm8, %vm14161_vm0  ;;  %v14073_v6 = vmul.f32 0.055555556, %v14054_v43  ;;  %v20488_v40 = vsub.f32 %v20195_v29, %v14019_v8  ;;  %v20490_v17 = vfloor.f32 %v13897_v7  ;;  %v14089_v29 = vfloor.f32 %v14071_v30 }
 0x4a6   : > { %vm20469_vm13 = vmand %vm14212_vm7, %vm21638_vm1  ;;  %vm14233_vm7 = vcmp.le.f32.partialorder %v20209_v54, 8.0  ;;  %vm14163_vm14 = vcmp.le.f32.partialorder %v20031_v20, 2.0  ;;  %v21652_v22 = vcvt.s32.f32 %v20152_v10  ;;  %v20534_v10 = vfloor.f32 %v13898_v33 }
 0x4a7   : > { %vm20476_vm8 = vmand %vm14214_vm6, %vm21641_vm9  ;;  %vm21646_vm6 = vcmp.le.f32.partialorder %v20019_v50, 16.0  ;;  %v14072_v50 = vmul.f32 0.055555556, %v14053_v42  ;;  %v20562_v14 = vfloor.f32 %v13986_v51  ;;  %v21669_v57 = vmov 0 }
 0x4a8   : > { %vm20482_vm1 = vmand %vm14179_vm12, %vm14197_vm5  ;;  %vm21649_vm5 = vcmp.ge.f32.partialorder %v20365_v24, 1.0  ;;  %v20512_v8 = vsub.f32 %v21652_v22, %v13930_v36  ;;  %v14106_v36 = vmul.f32 18.0, %v14088_v58  ;;  %v21673_v54 = vmov 0 }
 0x4a9   : > { %vm20496_vm9 = vmand %vm20328_vm3, %vm21646_vm6  ;;  %vm21653_vm3 = vcmp.le.f32.partialorder %v20012_v48, 16.0  ;;  %v20532_v48 = vfloor.f32 %v13984_v16  ;;  %v13933_v32 = vmul.f32 3240.0, %v20490_v17  ;;  %v20617_v33 = vfloor.f32 %v14072_v50 }
 0x4aa   : > { %vm20505_vm0 = vmand %vm20469_vm13, %vm21649_vm5  ;;  %v20631_v38 = vsub.f32 %v20235_v62, %v14106_v36  ;;  %v14022_v51 = vmul.f32 324.0, %v20562_v14  ;;  %v21699_v55 = vmov 0 }
 0x4ab   : > { %vm20518_vm6 = vmand %vm20352_vm11, %vm21653_vm3  ;;  %vm21658_vm11 = vcmp.le.f32.partialorder %v20022_v60, 16.0  ;;  %v20652_v43 = vsub.f32 %v13860_v21, %v13933_v32  ;;  %v21725_v32 = vmov 0 }
 0x4ac   : > { %vm20526_vm5 = vmand %vm20476_vm8, %vm14268_vm2  ;;  %vm21661_vm8 = vcmp.le.f32.partialorder %v20042_v37, 16.0  ;;  %v21666_v37 = vcvt.s32.f32 %v20181_v52  ;;  %vm21672_vm2 = vnez %v21635_v45  ;;  %v20586_v52 = vfloor.f32 %v14073_v6 }
 0x4ad   : > { %vm20540_vm3 = vmand %vm20375_vm15, %vm21658_vm11  ;;  %v20600_v45 = vsub.f32 %v20177_v9, %v14104_v39  ;;  %v13966_v9 = vadd.f32 0.5, %v20512_v8  ;;  %v14020_v39 = vmul.f32 324.0, %v20532_v48  ;;  %v20687_v30 = vsub.f32 %v20369_v26, %v14022_v51 }
 0x4ae   : > { %vm20549_vm13 = vmand %vm20384_vm4, %vm21661_vm8  ;;  %v20566_v44 = vsub.f32 %v21666_v37, %v13932_v3  ;;  %vm21667_vm4 = vcmp.le.f32.partialorder %v20240_v1, 16.0  ;;  %v14109_v4 = vmul.f32 18.0, %v20586_v52  ;;  %v13969_v41 = vadd.f32 0.5, %v20652_v43 }
 0x4af   : > { %vm20558_vm15 = vmand %vm20482_vm1, %vm14233_vm7  ;;  %vm21671_vm7 = vcmp.le.f32.partialorder %v20257_v5, 16.0  ;;  %v14055_v5 = vadd.f32 0.5, %v20488_v40  ;;  %vm21685_vm1 = vcmp.ge.f32.partialorder %v20038_v27, 1.0  ;;  %v13985_v50 = vmul.f32 0.0030864198, %v13966_v9 }
 0x4b0   : > { %vm21668_vm8 = vmmov %vm20411_vm10  ;;  %vm21684_vm10 = vcmp.le.f32.partialorder %v20038_v27, 2.0  ;;  %v13968_v3 = vadd.f32 0.5, %v20566_v44  ;;  %v20672_v21 = vsub.f32 %v20345_v56, %v14020_v39  ;;  %v20698_v56 = vsub.f32 %v20401_v25, %v14109_v4 }
 0x4b1   : > { %vm20572_vm12 = vmand %vm21668_vm8, %vm21667_vm4  ;;  %vm21675_vm4 = vcmp.ge.f32.partialorder %v20031_v20, 1.0  ;;  %v14074_v62 = vmul.f32 0.055555556, %v14055_v5  ;;  %v20733_v7 = vfloor.f32 %v13985_v50  ;;  %v21714_v1 = vmov 0 }
 0x4b2   : > { %v21670_v57 = vsel %vm20572_vm12, 4294967295, %v21669_v57  ;;  %vm20581_vm11 = vmand %vm21672_vm2, %vm21671_vm7  ;;  %vm21678_vm2 = vcmp.le.f32.partialorder %v20365_v24, 16.0  ;;  %vm14198_vm12 = vcmp.ge.f32.partialorder %v20268_v13, 1.0  ;;  %v14107_v24 = vmul.f32 18.0, %v14089_v29 }
 0x4b3   : > { %v21674_v54 = vsel %vm20581_vm11, 4294967295, %v21673_v54  ;;  %vm20592_vm8 = vmand %vm21675_vm4, %vm14163_vm14  ;;  %vm21681_vm14 = vcmp.le.f32.partialorder %v14088_v58, 16.0  ;;  %v13934_v58 = vmul.f32 3240.0, %v20534_v10  ;;  %v13987_v36 = vmul.f32 0.0030864198, %v13968_v3 }
 0x4b4   : > { %vm20606_vm7 = vmand %vm20505_vm0, %vm21678_vm2  ;;  %vm21686_vm0 = vcmp.ge.f32.partialorder %v14089_v29, 1.0  ;;  %v20662_v22 = vsub.f32 %v20321_v31, %v14107_v24  ;;  %v14056_v23 = vadd.f32 0.5, %v20672_v21  ;;  %v21734_v39 = vmov 0 }
 0x4b5   : > { %vm20613_vm4 = vmand %vm20526_vm5, %vm21681_vm14  ;;  %vm14305_vm5 = vcmp.le.f32.partialorder %v14089_v29, 16.0  ;;  %vm21687_vm14 = vcmp.ge.f32.partialorder %v20251_v12, 1.0  ;;  %v20789_v24 = vfloor.f32 %v13987_v36  ;;  %v21776_v26 = vmov 0 }
 0x4b6   : > { %vm14180_vm11 = vmand %vm21685_vm1, %vm21684_vm10  ;;  %vm14235_vm1 = vcmp.le.f32.partialorder %v20251_v12, 8.0  ;;  %v14108_v12 = vmul.f32 18.0, %v20617_v33  ;;  %v21803_v5 = vlaneseq }
 0x4b7   : > { %vm14287_vm2 = vmand %vm20558_vm15, %vm21686_vm0  ;;  %vm14234_vm0 = vcmp.le.f32.partialorder %v20268_v13, 8.0  ;;  %v20676_v13 = vsub.f32 %v13861_v49, %v13934_v58  ;;  %v20700_v49 = vfloor.f32 %v14074_v62  ;;  %v13988_v58 = vmul.f32 0.0030864198, %v13969_v41 }
 0x4b8   : > { %vm20637_vm10 = vmand %vm20592_vm8, %vm21687_vm14  ;;  %v20731_v60 = vsub.f32 %v20430_v34, %v14108_v12  ;;  %v21780_v41 = vmov 0  ;;  %v21791_v34 = vmov 0 }
 0x4b9   : > { %vm20645_vm15 = vmand %vm14180_vm11, %vm14198_vm12  ;;  %vm14164_vm12 = vcmp.le.f32.partialorder %v20089_v11, 2.0  ;;  %v13970_v42 = vadd.f32 0.5, %v20676_v13  ;;  %v14110_v16 = vmul.f32 18.0, %v20700_v49  ;;  %v20854_v29 = vfloor.f32 %v13988_v58 }
 0x4ba   : > { %vm20654_vm8 = vmand %vm14287_vm2, %vm14305_vm5 }
 0x4bb   : > { %vm20666_vm11 = vmand %vm20637_vm10, %vm14235_vm1  ;;  %vm21698_vm1 = vcmp.ge.f32.partialorder %v20067_v63, 1.0  ;;  %vm21716_vm10 = vcmp.ge.f32.partialorder %v20617_v33, 1.0  ;;  %v13989_v51 = vmul.f32 0.0030864198, %v13970_v42  ;;  %v20850_v62 = vsub.f32 %v20488_v40, %v14110_v16 }
 0x4bc   : > { %vm20681_vm14 = vmand %vm20645_vm15, %vm14234_vm0  ;;  %vm21701_vm15 = vcmp.ge.f32.partialorder %v20089_v11, 1.0  ;;  %v16271_v11 = vmov 1983009808   ;;  %v21797_v42 = vmov 0 }
 0x4bd   : > { %vm20693_vm2 = vmand %vm20496_vm9, %vm21698_vm1  ;;  %vm21704_vm9 = vcmp.ge.f32.partialorder %v20055_v0, 1.0  ;;  %v20882_v31 = vfloor.f32 %v13989_v51  ;;  %v14578_v37 = vunpack.c.l.s4 %v16271_v11 }
 0x4be   : > { %v21700_v55 = vsel %vm20693_vm2, 4294967295, %v21699_v55  ;;  %vm20706_vm0 = vmand %vm21701_vm15, %vm14164_vm12  ;;  %vm21707_vm2 = vcmp.ge.f32.partialorder %v20586_v52, 1.0  ;;  %vm21723_vm15 = vcmp.ge.f32.partialorder %v20417_v15, 1.0 }
 0x4bf   : > { %vm20716_vm1 = vmand %vm20518_vm6, %vm21704_vm9  ;;  %vm21710_vm6 = vcmp.ge.f32.partialorder %v20074_v61, 1.0 }
 0x4c0   : > { %vm20725_vm12 = vmand %vm20666_vm11, %vm21707_vm2  ;;  %vm21713_vm11 = vcmp.ge.f32.partialorder %v20109_v2, 1.0 }
 0x4c1   : > { %vm20739_vm9 = vmand %vm20540_vm3, %vm21710_vm6  ;;  %vm21720_vm6 = vnez %v21670_v57  ;;  %vm21727_vm3 = vcmp.ge.f32.partialorder %v20403_v47, 1.0  ;;  %v14058_v57 = vadd.f32 0.5, %v20687_v30 }
 0x4c2   : > { %vm20747_vm2 = vmand %vm20549_vm13, %vm21713_vm11  ;;  %vm21719_vm13 = vcmp.ge.f32.partialorder %v20390_v35, 1.0 }
 0x4c3   : > { %v21715_v1 = vsel %vm20747_vm2, 4294967295, %v21714_v1  ;;  %vm20756_vm5 = vmand %vm20681_vm14, %vm21716_vm10  ;;  %vm21724_vm14 = vnez %v21674_v54  ;;  %v21731_v54 = vmov 0  ;;  %v14077_v4 = vmul.f32 0.055555556, %v14058_v57 }
 0x4c4   : > { %vm20767_vm11 = vmand %vm21720_vm6, %vm21719_vm13  ;;  %vm21730_vm6 = vcmp.ge.f32.partialorder %v20600_v45, 1.0 }
 0x4c5   : > { %vm20775_vm10 = vmand %vm21724_vm14, %vm21723_vm15  ;;  %vm21733_vm14 = vcmp.ge.f32.partialorder %v20631_v38, 1.0  ;;  %v20893_v36 = vfloor.f32 %v14077_v4 }
 0x4c6   : > { %v21726_v32 = vsel %vm20775_vm10, 4294967295, %v21725_v32  ;;  %vm20783_vm2 = vmand %vm20706_vm0, %vm21727_vm3  ;;  %vm21736_vm3 = vcmp.le.f32.partialorder %v20586_v52, 16.0  ;;  %vm14343_vm10 = vcmp.ge.f32.partialorder %v20698_v56, 1.0  ;;  %v14021_v52 = vmul.f32 324.0, %v20733_v7 }
 0x4c7   : > { %vm20795_vm15 = vmand %vm20606_vm7, %vm21730_vm6  ;;  %vm21737_vm6 = vcmp.ge.f32.partialorder %v20662_v22, 1.0  ;;  %vm21741_vm7 = vcmp.le.f32.partialorder %v20403_v47, 8.0  ;;  %v14023_v47 = vmul.f32 324.0, %v20789_v24 }
 0x4c8   : > { %v21732_v54 = vsel %vm20795_vm15, 4294967295, %v21731_v54  ;;  %vm20803_vm0 = vmand %vm20613_vm4, %vm21733_vm14  ;;  %vm21740_vm14 = vcmp.le.f32.partialorder %v20617_v33, 16.0  ;;  %v14075_v33 = vmul.f32 0.055555556, %v14056_v23  ;;  %v20868_v40 = vsub.f32 %v20512_v8, %v14021_v52 }
 0x4c9   : > { %v21735_v39 = vsel %vm20803_vm0, 4294967295, %v21734_v39  ;;  %vm14325_vm13 = vmand %vm20725_vm12, %vm21736_vm3  ;;  %vm14342_vm3 = vcmp.ge.f32.partialorder %v20731_v60, 1.0  ;;  %v21754_v8 = vmov 0  ;;  %v14113_v23 = vmul.f32 18.0, %v20893_v36 }
 0x4ca   : > { %vm20818_vm4 = vmand %vm20654_vm8, %vm21737_vm6  ;;  %vm14272_vm8 = vcmp.ge.f32.partialorder %v20700_v49, 1.0  ;;  %v20871_v50 = vfloor.f32 %v14075_v33 }
 0x4cb   : > { %vm14324_vm12 = vmand %vm20756_vm5, %vm21740_vm14  ;;  %vm14147_vm5 = vcmp.ge.f32.partialorder %v20222_v53, 1.0  ;;  %vm14165_vm14 = vcmp.le.f32.partialorder %v20222_v53, 2.0 }
 0x4cc   : > { %vm20833_vm15 = vmand %vm20783_vm2, %vm21741_vm7  ;;  %vm21769_vm2 = vnez %v21715_v1  ;;  %v14111_v25 = vmul.f32 18.0, %v20871_v50  ;;  %v21787_v1 = vmov 0 }
 0x4cd   : > { %vm20838_vm6 = vmand %vm14325_vm13, %vm14343_vm10  ;;  %vm14167_vm10 = vcmp.le.f32.partialorder %v20237_v59, 2.0  ;;  %vm21753_vm13 = vnez %v21700_v55  ;;  %v21760_v55 = vmov 0 }
 0x4ce   : > { %vm20845_vm0 = vmand %vm14324_vm12, %vm14342_vm3  ;;  %v14129_v9 = vsub.f32 %v20672_v21, %v14111_v25 }
 0x4cf   : > { %vm20862_vm12 = vmand %vm20833_vm15, %vm14272_vm8  ;;  %vm21752_vm8 = vcmp.le.f32.partialorder %v20067_v63, 16.0  ;;  %v20905_v63 = vsub.f32 %v20566_v44, %v14023_v47 }
 0x4d0   : > { %vm20877_vm7 = vmand %vm14147_vm5, %vm14165_vm14  ;;  %vm21756_vm5 = vcmp.ge.f32.partialorder %v20237_v59, 1.0 }
 0x4d1   : > { %vm20888_vm3 = vmand %vm21753_vm13, %vm21752_vm8  ;;  %vm21759_vm13 = vcmp.le.f32.partialorder %v20055_v0, 16.0  ;;  %v14024_v0 = vmul.f32 324.0, %v20854_v29 }
 0x4d2   : > { %v21755_v8 = vsel %vm20888_vm3, 4294967295, %v21754_v8  ;;  %vm20899_vm14 = vmand %vm21756_vm5, %vm14167_vm10  ;;  %vm21762_vm5 = vcmp.le.f32.partialorder %v20700_v49, 16.0  ;;  %vm21768_vm10 = vcmp.le.f32.partialorder %v20109_v2, 16.0  ;;  %v21770_v49 = vmov 0 }
 0x4d3   : > { %vm20911_vm8 = vmand %vm20716_vm1, %vm21759_vm13  ;;  %vm21765_vm1 = vcmp.le.f32.partialorder %v20074_v61, 16.0  ;;  %v14057_v2 = vadd.f32 0.5, %v20868_v40  ;;  %vm21778_vm3 = vcmp.le.f32.partialorder %v20417_v15, 16.0  ;;  %v14025_v15 = vmul.f32 324.0, %v20882_v31 }
 0x4d4   : > { %v21761_v55 = vsel %vm20911_vm8, 4294967295, %v21760_v55  ;;  %vm20921_vm15 = vmand %vm20862_vm12, %vm21762_vm5  ;;  %vm21772_vm8 = vcmp.ge.f32.partialorder %v20532_v48, 1.0  ;;  %vm21779_vm5 = vnez %v21726_v32 }
 0x4d5   : > { %vm20931_vm13 = vmand %vm20739_vm9, %vm21765_vm1  ;;  %v14076_v32 = vmul.f32 0.055555556, %v14057_v2 }
 0x4d6   : > { %vm20939_vm12 = vmand %vm21769_vm2, %vm21768_vm10  ;;  %vm21775_vm2 = vcmp.le.f32.partialorder %v20390_v35, 16.0 }
 0x4d7   : > { %v21771_v49 = vsel %vm20939_vm12, 4294967295, %v21770_v49  ;;  %vm20949_vm9 = vmand %vm20877_vm7, %vm21772_vm8  ;;  %vm21782_vm8 = vcmp.ge.f32.partialorder %v20562_v14, 1.0 }
 0x4d8   : > { %vm20959_vm10 = vmand %vm20767_vm11, %vm21775_vm2  ;;  %vm14378_vm11 = vcmp.le.f32.partialorder %v20731_v60, 16.0  ;;  %v21800_v60 = vmov 0 }
 0x4d9   : > { %v21777_v26 = vsel %vm20959_vm10, 4294967295, %v21776_v26  ;;  %vm20967_vm7 = vmand %vm21779_vm5, %vm21778_vm3  ;;  %vm21785_vm3 = vcmp.le.f32.partialorder %v20600_v45, 16.0  ;;  %vm21786_vm5 = vnez %v21732_v54  ;;  %vm21793_vm10 = vcmp.ge.f32.partialorder %v20850_v62, 1.0 }
 0x4da   : > { %v21781_v41 = vsel %vm20967_vm7, 4294967295, %v21780_v41  ;;  %vm20976_vm1 = vmand %vm20899_vm14, %vm21782_vm8  ;;  %vm21789_vm7 = vcmp.le.f32.partialorder %v20631_v38, 16.0  ;;  %vm21790_vm14 = vnez %v21735_v39  ;;  %v14059_v38 = vadd.f32 0.5, %v20905_v63 }
 0x4db   : > { %vm20986_vm2 = vmand %vm21786_vm5, %vm21785_vm3  ;;  %vm21796_vm3 = vcmp.le.f32.partialorder %v20662_v22, 16.0  ;;  %vm21799_vm5 = vcmp.le.f32.partialorder %v20698_v56, 16.0  ;;  %v21032_v22 = vsub.f32 %v20652_v43, %v14024_v0  ;;  %v14581_v56 = vshrl.u32 %v21803_v5, 7 }
 0x4dc   : > { %v21788_v1 = vsel %vm20986_vm2, 4294967295, %v21787_v1  ;;  %vm20994_vm8 = vmand %vm21790_vm14, %vm21789_vm7  ;;  %vm21802_vm14 = vcmp.le.f32.partialorder %v20532_v48, 8.0  ;;  %v21805_v48 = vmov 0  ;;  %v14579_v43 = vunpack.c.0.s8 %v14578_v37 }
 0x4dd   : > { %v21792_v34 = vsel %vm20994_vm8, 4294967295, %v21791_v34  ;;  %vm21003_vm12 = vmand %vm20921_vm15, %vm21793_vm10  ;;  %vm14380_vm10 = vcmp.le.f32.partialorder %v20850_v62, 16.0  ;;  %v14131_v54 = vsub.f32 %v20687_v30, %v14113_v23  ;;  %v14078_v21 = vmul.f32 0.055555556, %v14059_v38 }
 0x4de   : > { %vm21013_vm7 = vmand %vm20818_vm4, %vm21796_vm3  ;;  %vm14273_vm4 = vcmp.ge.f32.partialorder %v20871_v50, 1.0  ;;  %vm21804_vm3 = vcmp.le.f32.partialorder %v20562_v14, 8.0  ;;  %v21050_v14 = vsub.f32 %v20676_v13, %v14025_v15  ;;  %v21062_v13 = vfloor.f32 %v14076_v32 }
 0x4df   : > { %v21798_v42 = vsel %vm21013_vm7, 4294967295, %v21797_v42  ;;  %vm21021_vm15 = vmand %vm20838_vm6, %vm21799_vm5  ;;  %vm14275_vm5 = vcmp.ge.f32.partialorder %v20893_v36, 1.0  ;;  %vm14202_vm2 = vcmp.ge.f32.partialorder %v20733_v7, 1.0  ;;  %v16272_v39 = vmov 0.0  }
 0x4e0   : > { %v21801_v60 = vsel %vm21021_vm15, 4294967295, %v21800_v60  ;;  %vm14255_vm8 = vmand %vm20949_vm9, %vm21802_vm14  ;;  %vm14148_vm9 = vcmp.ge.f32.partialorder %v20432_v28, 1.0  ;;  %vm14166_vm14 = vcmp.le.f32.partialorder %v20432_v28, 2.0  ;;  %v14060_v28 = vadd.f32 0.5, %v21032_v22 }
 0x4e1   : > { %vm14257_vm6 = vmand %vm20976_vm1, %vm21804_vm3  ;;  %v14061_v30 = vadd.f32 0.5, %v21050_v14  ;;  %v21078_v52 = vsub.s32 %v14579_v43, %v14581_v56  ;;  %v21084_v33 = vfloor.f32 %v14078_v21  ;;  %v21089_v51 = vsel %vm20931_vm13, 1.0, %v16272_v39 }
 0x4e2   : > { %vm21042_vm15 = vmand %vm20845_vm0, %vm14378_vm11  ;;  %vm14309_vm11 = vcmp.le.f32.partialorder %v20871_v50, 16.0  ;;  %v14079_v47 = vmul.f32 0.055555556, %v14060_v28  ;;  %vm21819_vm13 = vnez %v21781_v41  ;;  %v14112_v50 = vmul.f32 18.0, %v21062_v13 }
 0x4e3   : > { %v21806_v48 = vsel %vm21042_vm15, 4294967295, %v21805_v48  ;;  %vm21054_vm1 = vmand %vm21003_vm12, %vm14380_vm10  ;;  %vm14311_vm15 = vcmp.le.f32.partialorder %v20893_v36, 16.0  ;;  %vm21809_vm12 = vnez %v21755_v8  ;;  %vm14345_vm10 = vcmp.ge.f32.partialorder %v14129_v9, 1.0 }
 0x4e4   : > { %vm14291_vm0 = vmand %vm14255_vm8, %vm14273_vm4  ;;  %v21068_v16 = vsel %vm21809_vm12, 1.0, %v16272_v39  ;;  %vm21812_vm4 = vnez %v21761_v55  ;;  %v21109_v62 = vsel %vm21819_vm13, 1.0, %v16272_v39  ;;  %v14080_v36 = vmul.f32 0.055555556, %v14061_v30 }
 0x4e5   : > { %vm14293_vm3 = vmand %vm14257_vm6, %vm14275_vm5  ;;  %v14407_v20 = vsel %vm21812_vm4, 1.0, %v16272_v39  ;;  %vm14347_vm5 = vcmp.ge.f32.partialorder %v14131_v54, 1.0  ;;  %vm21825_vm4 = vnez %v21801_v60  ;;  %v14114_v0 = vmul.f32 18.0, %v21084_v33 }
 0x4e6   : > { %vm14184_vm7 = vmand %vm14148_vm9, %vm14166_vm14  ;;  %vm21815_vm9 = vnez %v21771_v49  ;;  %v21139_v55 = vsel %vm21825_vm4, 1.0, %v16272_v39  ;;  %v21171_v2 = vsub.f32 %v20868_v40, %v14112_v50  ;;  %v21179_v41 = vsel %vm21054_vm1, 1.0, %v16272_v39 }
 0x4e7   : > { %vm21070_vm8 = vmand %vm14291_vm0, %vm14309_vm11  ;;  %v21094_v3 = vsel %vm21815_vm9, 1.0, %v16272_v39  ;;  %vm21818_vm0 = vnez %v21777_v26  ;;  %v21189_v40 = vfloor.f32 %v14080_v36  ;;  %v21202_v37 = vsub.f32 %v20905_v63, %v14114_v0 }
 0x4e8   : > { %vm21080_vm6 = vmand %vm14293_vm3, %vm14311_vm15  ;;  %vm14238_vm15 = vcmp.le.f32.partialorder %v20733_v7, 8.0  ;;  %v21104_v6 = vsel %vm21818_vm0, 1.0, %v16272_v39  ;;  %vm21823_vm3 = vnez %v21792_v34  ;;  %v21164_v7 = vfloor.f32 %v14079_v47 }
 0x4e9   : > { %vm21096_vm14 = vmand %vm14184_vm7, %vm14202_vm2  ;;  %vm14381_vm2 = vcmp.le.f32.partialorder %v14129_v9, 16.0  ;;  %vm21822_vm7 = vnez %v21788_v1  ;;  %v21126_v8 = vsel %vm21823_vm3, 1.0, %v16272_v39  ;;  %vm14241_vm4 = vcmp.le.f32.partialorder %v20854_v29, 8.0 }
 0x4ea   : > { %vm21113_vm11 = vmand %vm21070_vm8, %vm14345_vm10  ;;  %v21121_v19 = vsel %vm21822_vm7, 1.0, %v16272_v39  ;;  %vm14383_vm8 = vcmp.le.f32.partialorder %v14131_v54, 16.0  ;;  %vm21824_vm10 = vnez %v21798_v42  ;;  %vm14169_vm7 = vcmp.le.f32.partialorder %v20490_v17, 2.0  ;;  %v21837_v42 = vld [vmem:[#allocation7_spill] sm:$0xff] }
 0x4eb   : > { %vm14365_vm12 = vmand %vm21080_vm6, %vm14347_vm5  ;;  %v21134_v53 = vsel %vm21824_vm10, 1.0, %v16272_v39  ;;  %vm14274_vm6 = vcmp.ge.f32.partialorder %v21062_v13, 1.0  ;;  %vm21828_vm5 = vnez %v21806_v48  ;;  %vm14205_vm10 = vcmp.ge.f32.partialorder %v20854_v29, 1.0 }
 0x4ec   : > { %vm21145_vm9 = vmand %vm21096_vm14, %vm14238_vm15  ;;  %v21154_v44 = vsel %vm21828_vm5, 1.0, %v16272_v39  ;;  %vm14150_vm14 = vcmp.ge.f32.partialorder %v20453_v18, 1.0  ;;  %vm14168_vm15 = vcmp.le.f32.partialorder %v20453_v18, 2.0  ;;  %v14115_v18 = vmul.f32 18.0, %v21164_v7 }
 0x4ed   : > { %vm21158_vm0 = vmand %vm21113_vm11, %vm14381_vm2  ;;  %vm14204_vm11 = vcmp.ge.f32.partialorder %v20789_v24, 1.0  ;;  %vm14151_vm2 = vcmp.ge.f32.partialorder %v20490_v17, 1.0  ;;  %v14116_v57 = vmul.f32 18.0, %v21189_v40 }
 0x4ee   : > { %vm21166_vm13 = vmand %vm14365_vm12, %vm14383_vm8  ;;  %vm14310_vm12 = vcmp.le.f32.partialorder %v21062_v13, 16.0  ;;  %vm14240_vm8 = vcmp.le.f32.partialorder %v20789_v24, 8.0  ;;  %v21199_v11 = vsel %vm21158_vm0, 1.0, %v16272_v39  ;;  %vm14346_vm0 = vcmp.ge.f32.partialorder %v21171_v2, 1.0 }
 0x4ef   : > { %vm21183_vm3 = vmand %vm21145_vm9, %vm14274_vm6  ;;  %vm14170_vm6 = vcmp.le.f32.partialorder %v20534_v10, 2.0  ;;  %v21234_v9 = vsel %vm21166_vm13, 1.0, %v16272_v39  ;;  %vm14348_vm13 = vcmp.ge.f32.partialorder %v21202_v37, 1.0  ;;  %v21270_v17 = vsub.f32 %v21032_v22, %v14115_v18  ;;  %v21860_v18 = vld [vmem:[#allocation9_spill] sm:$0xff] }
 0x4f0   : > { %vm21208_vm1 = vmand %vm14150_vm14, %vm14168_vm15  ;;  %vm14382_vm14 = vcmp.le.f32.partialorder %v21171_v2, 16.0  ;;  %vm14276_vm15 = vcmp.ge.f32.partialorder %v21084_v33, 1.0  ;;  %v21301_v36 = vsub.f32 %v21050_v14, %v14116_v57 }
 0x4f1   : > { %vm21223_vm5 = vmand %vm21183_vm3, %vm14310_vm12  ;;  %vm21844_vm12 = vcmask 1043456  }
 0x4f2   : > { %vm21240_vm3 = vmand %vm21208_vm1, %vm14204_vm11  ;;  %vm14277_vm1 = vcmp.ge.f32.partialorder %v21164_v7, 1.0 }
 0x4f3   : > { %vm21255_vm11 = vmand %vm14151_vm2, %vm14169_vm7 }
 0x4f4   : > { %vm21265_vm9 = vmand %vm21223_vm5, %vm14346_vm0  ;;  %vm14242_vm5 = vcmp.le.f32.partialorder %v20882_v31, 8.0 }
 0x4f5   : > { %vm21847_vm2 = vmmov %vm21844_vm12 }
 0x4f6   : > { %vm21279_vm7 = vmand %vm21240_vm3, %vm14240_vm8  ;;  %vm14313_vm3 = vcmp.le.f32.partialorder %v21164_v7, 16.0 }
 0x4f7   : > { %vm21850_vm0 = vmmov %vm21847_vm2 }
 0x4f8   : > { %vm21295_vm8 = vmand %vm21255_vm11, %vm14205_vm10 }
 0x4f9   : > { %vm21309_vm10 = vmand %vm21265_vm9, %vm14382_vm14  ;;  %vm14278_vm9 = vcmp.ge.f32.partialorder %v21189_v40, 1.0 }
 0x4fa   : > { %vm21318_vm11 = vmand %vm21279_vm7, %vm14276_vm15 }
 0x4fb   : > { %vm21859_vm14 = vmmov %vm21850_vm0 }
 0x4fc   : > { %vm21332_vm15 = vmand %vm21295_vm8, %vm14241_vm4  ;;  %vm21866_vm4 = vcmask 1043456   ;;  %vm21867_vm8 = vcmp.le.f32.partialorder %v21084_v33, 16.0 }
 0x4fd   : > { %vm21354_vm7 = vmand %vm21318_vm11, %vm21867_vm8  ;;  %vm21874_vm8 = vcmp.ge.f32.partialorder %v20882_v31, 1.0 }
 0x523   : > { %v13492_v26 = vpop.f32.mrb[4].mxu1 }
 0x524   : > { %v13451_v35 = vpop.f32.mrb[8].mxu0  ;;  %v13494_v15 = vpop.f32.mrb[5].mxu1  ;;  %v14425_v63 = vmul.f32 %v14407_v20, %v13492_v26 }
 0x525   : > { %v15268_v34 = vadd.f32 %v13451_v35, %v17868_v46  ;;  %v13453_v45 = vpop.f32.mrb[9].mxu0  ;;  %v15257_v23 = vpack.c.bf16 %v13494_v15, %v13492_v26  ;;  %v13496_v38 = vpop.f32.mrb[6].mxu1  ;;  %v14426_v28 = vmul.f32 %v21094_v3, %v13494_v15 }
 0x526   : > { %v15269_v60 = vadd.f32 %v13453_v45, %v21837_v42  ;;  %v13455_v5 = vpop.f32.mrb[10].mxu0  ;;  %v13497_v56 = vpop.f32.mrb[7].mxu1  ;;  %v14480_v30 = vmul.f32 %v14425_v63, %v13492_v26 }
 0x527   : > { %v14423_v46 = vmul.f32 %v15268_v34, %v21068_v16  ;;  %v13456_v48 = vpop.f32.mrb[11].mxu0  ;;  %v14590_v4 = vrot.slane %v15257_v23, %v21078_v52  ;;  %v14481_v49 = vmul.f32 %v14426_v28, %v13494_v15  ;;  %v14446_v38 = vsel %vm21850_vm0, %v14426_v28, 0.0 }
 0x528   : > { %v14424_v54 = vmul.f32 %v15269_v60, %v21089_v51  ;;  %v15256_v21 = vpack.c.bf16 %v15269_v60, %v15268_v34  ;;  %v14499_v2 = vsel %vm21859_vm14, %v14480_v30, 0.0  ;;  %vm21863_vm14 = vcmp.ge.f32.partialorder %v20534_v10, 1.0 }
 0x529   : > { %v14441_v16 = vsel %vm21844_vm12, %v14423_v46, 0.0  ;;  %v14478_v58 = vmul.f32 %v15268_v34, %v14423_v46  ;;  %vm14384_vm12 = vcmp.le.f32.partialorder %v21202_v37, 16.0  ;;  %v21856_v34 = vld [vmem:[#allocation8_spill] sm:$0xff] }
 0x52a   : > { %v14442_v27 = vsel %vm21847_vm2, %v14424_v54, 0.0  ;;  %v14479_v51 = vmul.f32 %v15269_v60, %v14424_v54  ;;  %v14583_v3 = vrot.slane %v15256_v21, %v21078_v52  ;;  %vm21853_vm2 = vmmov %vm21850_vm0  ;;  %v14501_v21 = vsel %vm21866_vm4, %v14481_v49, 0.0 }
 0x52b   : > { %v14496_v22 = vsel %vm21850_vm0, %v14478_v58, 0.0  ;;  %v14443_v12 = vadd.f32 %v14442_v27, %v14441_v16  ;;  %v13574_v50 = vpop.f32.mrb[12].mxu1  ;;  %v14444_v59 = vsel %vm21853_vm2, %v14425_v63, 0.0  ;;  %vm14349_vm2 = vcmp.ge.f32.partialorder %v21270_v17, 1.0 }
 0x52c   : > { %v14497_v0 = vsel %vm21850_vm0, %v14479_v51, 0.0  ;;  %v14591_v61 = vcombine.low %v14583_v3, %v14590_v4  ;;  %v13533_v26 = vpop.f32.mrb[12].mxu0  ;;  %v13576_v25 = vpop.f32.mrb[13].mxu1  ;;  %v14429_v57 = vmul.f32 %v21109_v62, %v13574_v50  ;;  %vm21343_vm0 = vmand %vm21863_vm14, %vm14170_vm6  ;;  %v21918_v62 = vld [vmem:[#allocation6_spill] sm:$0xff] }
 0x52d   : > { %v14498_v1 = vadd.f32 %v14497_v0, %v14496_v22  ;;  %v14445_v14 = vadd.f32 %v14444_v59, %v14443_v12  ;;  %v15270_v45 = vadd.f32 %v13533_v26, %v21856_v34  ;;  %v13535_v63 = vpop.f32.mrb[13].mxu0  ;;  %v13578_v23 = vpop.f32.mrb[14].mxu1  ;;  %v15259_v60 = vpack.c.bf16 %v13576_v25, %v13574_v50  ;;  %vm21870_vm14 = vmmov %vm21866_vm4  ;;  %v21905_v12 = vld [vmem:[#allocation3_spill] sm:$0xff] }
 0x52e   : > { %14656 = vst [vmem:[%s21288_s7] sm:$0xff] %v14591_v61  ;;  %v15271_v42 = vadd.f32 %v13535_v63, %v21860_v18  ;;  %v13537_v5 = vpop.f32.mrb[14].mxu0  ;;  %v13579_v56 = vpop.f32.mrb[15].mxu1  ;;  %vm21365_vm4 = vmand %vm21332_vm15, %vm14277_vm1  ;;  %v14484_v4 = vmul.f32 %v14429_v57, %v13574_v50  ;;  %v21383_v22 = vsel %vm21309_vm10, 1.0, %v16272_v39  ;;  %vm14350_vm15 = vcmp.ge.f32.partialorder %v21301_v36, 1.0  ;;  %v21888_v18 = vld [vmem:[#allocation11_spill] sm:$0xff] }
 0x52f   : > { %v14447_v46 = vadd.f32 %v14446_v38, %v14445_v14  ;;  %v14500_v48 = vadd.f32 %v14499_v2, %v14498_v1  ;;  %v14427_v43 = vmul.f32 %v15270_v45, %v21104_v6  ;;  %v13538_v54 = vpop.f32.mrb[15].mxu0  ;;  %v14430_v6 = vmul.f32 %v21126_v8, %v13576_v25  ;;  %vm21873_vm11 = vmmov %vm21870_vm14  ;;  %v21884_v14 = vld [vmem:[#allocation10_spill] sm:$0xff] }
 0x530   : > { %v14428_v28 = vmul.f32 %v15271_v42, %v21121_v19  ;;  %v15258_v13 = vpack.c.bf16 %v15271_v42, %v15270_v45  ;;  %v14607_v30 = vrot.slane %v15259_v60, %v21078_v52  ;;  %vm21877_vm6 = vmmov %vm21873_vm11 }
 0x531   : > { %v14502_v10 = vadd.f32 %v14501_v21, %v14500_v48  ;;  %v14448_v16 = vsel %vm21870_vm14, %v14427_v43, 0.0  ;;  %v14482_v58 = vmul.f32 %v15270_v45, %v14427_v43  ;;  %vm21375_vm14 = vmand %vm21343_vm0, %vm21874_vm8  ;;  %v14485_v1 = vmul.f32 %v14430_v6, %v13576_v25 }
 0x532   : > { %v14449_v19 = vadd.f32 %v14448_v16, %v14447_v46  ;;  %v14450_v8 = vsel %vm21873_vm11, %v14428_v28, 0.0  ;;  %v14483_v20 = vmul.f32 %v15271_v42, %v14428_v28  ;;  %v14600_v27 = vrot.slane %v15258_v13, %v21078_v52  ;;  %vm21389_vm1 = vmand %vm21354_vm7, %vm14348_vm13 }
 0x533   : > { %v14503_v3 = vsel %vm21877_vm6, %v14482_v58, 0.0  ;;  %v13656_v47 = vpop.f32.mrb[20].mxu1  ;;  %vm21880_vm0 = vmmov %vm21877_vm6 }
 0x534   : > { %v14504_v24 = vadd.f32 %v14503_v3, %v14502_v10  ;;  %v14451_v59 = vadd.f32 %v14450_v8, %v14449_v19  ;;  %v14505_v50 = vsel %vm21880_vm0, %v14483_v20, 0.0  ;;  %v14608_v0 = vcombine.low %v14600_v27, %v14607_v30  ;;  %v13615_v49 = vpop.f32.mrb[16].mxu0  ;;  %v13658_v61 = vpop.f32.mrb[21].mxu1  ;;  %vm21399_vm10 = vmand %vm21365_vm4, %vm14313_vm3 }
 0x535   : > { %vm21883_vm13 = vmmov %vm21880_vm0  ;;  %v15272_v34 = vadd.f32 %v13615_v49, %v21884_v14  ;;  %v13617_v45 = vpop.f32.mrb[17].mxu0  ;;  %v15261_v63 = vpack.c.bf16 %v13658_v61, %v13656_v47  ;;  %v13660_v23 = vpop.f32.mrb[22].mxu1  ;;  %v14433_v32 = vmul.f32 %v21139_v55, %v13656_v47  ;;  %v14434_v46 = vmul.f32 %v21179_v41, %v13658_v61 }
 0x536   : > { %v14452_v35 = vsel %vm21883_vm13, %v14429_v57, 0.0  ;;  %vm21409_vm7 = vmand %vm21375_vm14, %vm14242_vm5  ;;  %v14506_v15 = vadd.f32 %v14505_v50, %v14504_v24  ;;  %14657 = vst [vmem:[%s21288_s7 + $0x8] sm:$0xff] %v14608_v0  ;;  %v15273_v25 = vadd.f32 %v13617_v45, %v21888_v18  ;;  %v13619_v42 = vpop.f32.mrb[18].mxu0  ;;  %v13661_v60 = vpop.f32.mrb[23].mxu1  ;;  %vm14386_vm5 = vcmp.le.f32.partialorder %v21301_v36, 16.0 }
 0x537   : > { %v14453_v2 = vadd.f32 %v14452_v35, %v14451_v59  ;;  %vm21887_vm3 = vmmov %vm21880_vm0  ;;  %v14431_v56 = vmul.f32 %v15272_v34, %v21134_v53  ;;  %v13620_v48 = vpop.f32.mrb[19].mxu0  ;;  %v14488_v16 = vmul.f32 %v14433_v32, %v13656_v47  ;;  %v14624_v30 = vrot.slane %v15261_v63, %v21078_v52  ;;  %v21910_v63 = vld [vmem:[#allocation2_spill] sm:$0xff] }
 0x538   : > { %v14454_v38 = vsel %vm21887_vm3, %v14430_v6, 0.0  ;;  %vm21420_vm6 = vmand %vm21389_vm1, %vm14384_vm12  ;;  %v14432_v57 = vmul.f32 %v15273_v25, %v21154_v44  ;;  %v15260_v54 = vpack.c.bf16 %v15273_v25, %v15272_v34  ;;  %vm21897_vm1 = vcmp.le.f32.partialorder %v21270_v17, 16.0 }
 0x539   : > { %vm21891_vm4 = vmmov %vm21880_vm0  ;;  %v14455_v37 = vadd.f32 %v14454_v38, %v14453_v2  ;;  %v14486_v29 = vmul.f32 %v15272_v34, %v14431_v56  ;;  %v14420_v21 = vsel %vm21420_vm6, 1.0, %v16272_v39  ;;  %v14489_v27 = vmul.f32 %v14434_v46, %v13658_v61 }
 0x53a   : > { %v14507_v5 = vsel %vm21891_vm4, %v14484_v4, 0.0  ;;  %vm14367_vm11 = vmand %vm21399_vm10, %vm14349_vm2  ;;  %v14487_v6 = vmul.f32 %v15273_v25, %v14432_v57  ;;  %v14617_v58 = vrot.slane %v15260_v54, %v21078_v52  ;;  %vm21900_vm10 = vcmp.le.f32.partialorder %v21189_v40, 16.0 }
 0x53b   : > { %v14508_v43 = vadd.f32 %v14507_v5, %v14506_v15  ;;  %vm21438_vm12 = vmand %vm21409_vm7, %vm14278_vm9  ;;  %v14511_v10 = vsel %vm21880_vm0, %v14486_v29, 0.0  ;;  %v13738_v33 = vpop.f32.mrb[28].mxu1 }
 0x53c   : > { %vm21894_vm8 = vmmov %vm21880_vm0  ;;  %v13697_v51 = vpop.f32.mrb[0].mxu0  ;;  %v13740_v3 = vpop.f32.mrb[29].mxu1  ;;  %v14625_v47 = vcombine.low %v14617_v58, %v14624_v30  ;;  %v14437_v26 = vmul.f32 %v21234_v9, %v13738_v33 }
 0x53d   : > { %v14509_v55 = vsel %vm21894_vm8, %v14485_v1, 0.0  ;;  %vm21895_vm14 = vmmov %vm21880_vm0  ;;  %v15274_v24 = vadd.f32 %v13697_v51, %v21905_v12  ;;  %v13699_v40 = vpop.f32.mrb[1].mxu0  ;;  %v15263_v59 = vpack.c.bf16 %v13740_v3, %v13738_v33  ;;  %v13742_v50 = vpop.f32.mrb[30].mxu1  ;;  %v14438_v18 = vmul.f32 %v14420_v21, %v13740_v3  ;;  %v21917_v21 = vld [vmem:[#allocation5_spill] sm:$0xff] }
 0x53e   : > { %v14456_v41 = vsel %vm21895_vm14, %v14431_v56, 0.0  ;;  %v14510_v28 = vadd.f32 %v14509_v55, %v14508_v43  ;;  %vm21896_vm2 = vmmov %vm21880_vm0  ;;  %v13701_v35 = vpop.f32.mrb[2].mxu0  ;;  %v13743_v1 = vpop.f32.mrb[31].mxu1  ;;  %14658 = vst [vmem:[%s21288_s7 + $0x10] sm:$0xff] %v14625_v47  ;;  %v15275_v23 = vadd.f32 %v13699_v40, %v21910_v63  ;;  %v14492_v56 = vmul.f32 %v14437_v26, %v13738_v33 }
 0x53f   : > { %v14457_v44 = vadd.f32 %v14456_v41, %v14455_v37  ;;  %v14458_v13 = vsel %vm21896_vm2, %v14432_v57, 0.0  ;;  %vm21450_vm9 = vmand %vm14367_vm11, %vm21897_vm1  ;;  %v14435_v9 = vmul.f32 %v15274_v24, %v21199_v11  ;;  %v13702_v7 = vpop.f32.mrb[3].mxu0  ;;  %v14493_v41 = vmul.f32 %v14438_v18, %v13740_v3 }
 0x540   : > { %vm21461_vm13 = vmand %vm21438_vm12, %vm21900_vm10  ;;  %v14512_v17 = vadd.f32 %v14511_v10, %v14510_v28  ;;  %v14421_v61 = vsel %vm21450_vm9, 1.0, %v16272_v39  ;;  %v14436_v60 = vmul.f32 %v15275_v23, %v21383_v22  ;;  %v15262_v31 = vpack.c.bf16 %v15275_v23, %v15274_v24 }
 0x541   : > { %v14459_v8 = vadd.f32 %v14458_v13, %v14457_v44  ;;  %vm21903_vm7 = vmmov %vm21880_vm0  ;;  %v14490_v42 = vmul.f32 %v15274_v24, %v14435_v9  ;;  %v14470_v58 = vsel %vm21880_vm0, %v14438_v18, 0.0 }
 0x542   : > { %v14513_v20 = vsel %vm21903_vm7, %v14487_v6, 0.0  ;;  %vm21904_vm3 = vmmov %vm21880_vm0  ;;  %v14491_v37 = vmul.f32 %v15275_v23, %v14436_v60  ;;  %v14634_v43 = vrot.slane %v15262_v31, %v21078_v52 }
 0x543   : > { %v14460_v4 = vsel %vm21904_vm3, %v14433_v32, 0.0  ;;  %v14514_v0 = vadd.f32 %v14513_v20, %v14512_v17  ;;  %vm21476_vm6 = vmand %vm21461_vm13, %vm14350_vm15  ;;  %v14641_v32 = vrot.slane %v15263_v59, %v21078_v52 }
 0x544   : > { %v14461_v49 = vadd.f32 %v14460_v4, %v14459_v8  ;;  %vm21908_vm4 = vmmov %vm21880_vm0  ;;  %v13779_v54 = vpop.f32.mrb[4].mxu0 }
 0x545   : > { %v14515_v34 = vsel %vm21908_vm4, %v14488_v16, 0.0  ;;  %vm21909_vm11 = vmmov %vm21880_vm0  ;;  %v14642_v29 = vcombine.low %v14634_v43, %v14641_v32  ;;  %v15276_v28 = vadd.f32 %v13779_v54, %v21917_v21  ;;  %v13781_v44 = vpop.f32.mrb[5].mxu0  ;;  %vm14537_vm4 = vcmask 7168  }
 0x546   : > { %v14462_v45 = vsel %vm21909_vm11, %v14434_v46, 0.0  ;;  %v14516_v2 = vadd.f32 %v14515_v34, %v14514_v0  ;;  %vm21911_vm12 = vmmov %vm21880_vm0  ;;  %v15277_v10 = vadd.f32 %v13781_v44, %v21918_v62  ;;  %v13783_v52 = vpop.f32.mrb[6].mxu0 }
 0x547   : > { %v14463_v15 = vadd.f32 %v14462_v45, %v14461_v49  ;;  %v14517_v38 = vsel %vm21911_vm12, %v14489_v27, 0.0  ;;  %vm21912_vm8 = vmmov %vm21880_vm0  ;;  %14659 = vst [vmem:[%s21288_s7 + $0x18] sm:$0xff] %v14642_v29  ;;  %v14439_v30 = vmul.f32 %v15276_v28, %v14421_v61 }
 0x548   : > { %v14464_v25 = vsel %vm21912_vm8, %v14435_v9, 0.0  ;;  %vm14404_vm15 = vmand %vm21476_vm6, %vm14386_vm5  ;;  %v14518_v11 = vadd.f32 %v14517_v38, %v14516_v2  ;;  %v15264_v8 = vpack.c.bf16 %v15277_v10, %v15276_v28 }
 0x549   : > { %v14465_v5 = vadd.f32 %v14464_v25, %v14463_v15  ;;  %vm21913_vm14 = vmmov %vm21880_vm0  ;;  %v14422_v53 = vsel %vm14404_vm15, 1.0, %v16272_v39  ;;  %v13784_v39 = vpop.f32.mrb[7].mxu0  ;;  %v14494_v27 = vmul.f32 %v15276_v28, %v14439_v30 }
 0x54a   : > { %v14519_v46 = vsel %vm21913_vm14, %v14490_v42, 0.0  ;;  %vm21914_vm2 = vmmov %vm21880_vm0  ;;  %v14440_v17 = vmul.f32 %v15277_v10, %v14422_v53  ;;  %15265 = vst.sshfl [vmem:[%s21288_s7 + $0x20] sm:$0x33 pattern:$0x76325410] %v15264_v8 }
 0x54b   : > { %v14466_v48 = vsel %vm21914_vm2, %v14436_v60, 0.0  ;;  %v14520_v57 = vadd.f32 %v14519_v46, %v14518_v11  ;;  %vm21915_vm1 = vmmov %vm21880_vm0 }
 0x54c   : > { %v14468_v22 = vsel %vm21915_vm1, %v14437_v26, 0.0  ;;  %v14467_v36 = vadd.f32 %v14466_v48, %v14465_v5  ;;  %vm21916_vm5 = vmmov %vm21880_vm0  ;;  %v14495_v4 = vmul.f32 %v15277_v10, %v14440_v17 }
 0x54d   : > { %v14521_v55 = vsel %vm21916_vm5, %v14491_v37, 0.0  ;;  %vm21919_vm9 = vmmov %vm21880_vm0 }
 0x54e   : > { %v14522_v13 = vadd.f32 %v14521_v55, %v14520_v57  ;;  %v14469_v6 = vadd.f32 %v14468_v22, %v14467_v36  ;;  %v14523_v16 = vsel %vm21919_vm9, %v14492_v56, 0.0  ;;  %vm21920_vm10 = vmmov %vm21880_vm0 }
 0x54f   : > { %v14525_v20 = vsel %vm21920_vm10, %v14493_v41, 0.0  ;;  %vm21921_vm13 = vmmov %vm21880_vm0 }
 0x550   : > { %v14471_v33 = vadd.f32 %v14470_v58, %v14469_v6  ;;  %v14524_v19 = vadd.f32 %v14523_v16, %v14522_v13  ;;  %v14472_v51 = vsel %vm21921_vm13, %v14439_v30, 0.0  ;;  %vm21922_vm7 = vmmov %vm21880_vm0 }
 0x551   : > { %v14474_v12 = vsel %vm21922_vm7, %v14440_v17, 0.0  ;;  %vm21923_vm3 = vmmov %vm21880_vm0 }
 0x552   : > { %v14526_v3 = vadd.f32 %v14525_v20, %v14524_v19  ;;  %v14473_v47 = vadd.f32 %v14472_v51, %v14471_v33  ;;  %v14527_v24 = vsel %vm21923_vm3, %v14494_v27, 0.0  ;;  %vm21924_vm6 = vmmov %vm21880_vm0 }
 0x553   : > { %v14529_v50 = vsel %vm21924_vm6, %v14495_v4, 0.0  ;;  %vm21925_vm11 = vmmov %vm21880_vm0 }
 0x554   : > { %v14475_v40 = vadd.f32 %v14474_v12, %v14473_v47  ;;  %v14528_v59 = vadd.f32 %v14527_v24, %v14526_v3 }
 0x556   : > { %14476 = vadd.xlane.f32.xlu1 %v14475_v40  ;;  %v14530_v0 = vadd.f32 %v14529_v50, %v14528_v59 }
 0x558   : > { %14531 = vadd.xlane.f32.xlu0 %v14530_v0 }
 0x5e3   : > { %v14477_v35 = vpop.xlane.xlu1 %14476 }
 0x5e5   : > { %v14532_v49 = vpop.xlane.xlu0 %14531 }
 0x5e6   : > { %v14534_v26 = vrot.slane %v14532_v49, 4 }
 0x5e8   : > { %v14536_v1 = vsel %vm21925_vm11, %v14477_v35, %v14534_v26 }
 0x5e9   : > { %14538 = vst.msk [vmem:[%s267_s11] sm:$0xff] %vm14537_vm4, %v14536_v1 }
 0x5ea PF: > { %s15_s15 = sadd.s32 1, %s16242_s15  }
 0x5eb   : > { %p12_p7 = scmp.ge.s32.totalorder %s15_s15, 7  }
 0x5ed   :  { %14 = sbr.rel (!%p12_p7) target bundleno = 1 (0x1), region = 77 }

</bundles_post_ra>
